<compile_context>
chip_gen: v7x
topology: tpu7x:2x2x1
jax: 0.10.0
libtpu: 0.0.40
codegen_flags: <defaults>
</compile_context>

<pallas_src>
import functools
import math

import jax
import jax.numpy as jnp
import numpy as np
from jax.experimental import pallas as pl
from jax.experimental.pallas import tpu as pltpu

K = 3  # kernel size (fixed at 3; 'same' padding = 1, stride = 1)


def _conv3d_kernel(x_ref, w_ref, o_ref, p0, p1, p2, *, plane, wp, ci, fvc, nfc):
    """One batch element per grid step.

    x_ref: (1, Ci, SV)     flat zero-padded volume (lanes = flattened D,H,W)
    w_ref: (3, Co, 9*Ci)   weights grouped by kd; rows ordered (kh, kw, ci)
    o_ref: (1, Co, FV)     flat output volume (lane-dense, FV % 128 == 0)
    p0/p1/p2: (9*Ci, FVc)  per-kd im2col patch scratch (one lane chunk)
    """
    bufs = (p0, p1, p2)

    def build(kd, c0):
        buf = bufs[kd]
        t = 0
        for kh in range(K):
            for kw in range(K):
                # Fully static lane offset for this tap / chunk.
                off = c0 + kd * plane + kh * wp + kw
                buf[t * ci:(t + 1) * ci, :] = x_ref[0, :, pl.ds(off, fvc)]
                t += 1
        # TODO(synk): pltpu.roll-based kw taps + paired (8-row) patch stores
        # would further cut vld/vst pressure; copies are not the bottleneck
        # at these channel counts.

    # Static unroll over lane chunks; within a chunk the per-kd groups are
    # straight-lined so patch copies of group g+1 overlap the matmul of g.
    for c in range(nfc):
        c0 = c * fvc
        build(0, c0)
        acc = jnp.dot(w_ref[0], p0[...], preferred_element_type=jnp.float32)
        build(1, c0)
        acc = acc + jnp.dot(w_ref[1], p1[...], preferred_element_type=jnp.float32)
        build(2, c0)
        acc = acc + jnp.dot(w_ref[2], p2[...], preferred_element_type=jnp.float32)
        o_ref[0, :, c0:c0 + fvc] = acc.astype(o_ref.dtype)


def _pick_padded_plane(D, H, W):
    """Smallest Hp >= H+2, Wp >= W+2 such that D*Hp*Wp is a multiple of 128."""
    best = None
    for hp in range(H + 2, H + 2 + 17):
        for wp in range(W + 2, W + 2 + 129):
            if (D * hp * wp) % 128 == 0:
                if best is None or hp * wp < best[0] * best[1]:
                    best = (hp, wp)
                break  # smallest wp for this hp; larger only adds junk
    return best


def _pick_lane_chunk(FV, target_lanes=1024, min_lanes=512):
    """128-multiple divisor chunk of FV, as large as possible but <= target."""
    units = FV // 128
    chunks = sorted({FV // d for d in range(1, units + 1) if units % d == 0},
                    reverse=True)
    for c in chunks:                      # largest first
        if c <= target_lanes and c >= min_lanes:
            return c
    for c in reversed(chunks):            # smallest first: anything >= min
        if c >= min_lanes:
            return c
    return FV


def conv3d_same(x_ncdhw, weight_oidhw):
    """Forward pass of Conv: 3D conv, k=3, stride=1, 'same' padding, no bias.

    x_ncdhw:      (N, Cin, D, H, W)    float32
    weight_oidhw: (Cout, Cin, 3, 3, 3) float32
    returns:      (N, Cout, D, H, W)   float32
    """
    N, Ci, D, H, W = x_ncdhw.shape
    Co = weight_oidhw.shape[0]

    Hp, Wp = _pick_padded_plane(D, H, W)
    P = Hp * Wp                # flat padded plane size (lanes per depth row)
    Dp = D + 3                 # 1 front pad + 2 back (junk-read slack)
    SV = Dp * P                # flat padded volume length
    FV = D * P                 # flat output length (junk rows/cols, 128-mult)
    K9 = K * K * Ci            # contraction rows per kd group
    K3C = K * K9               # full contraction length (27*Ci)
    assert FV % 128 == 0

    FVc = _pick_lane_chunk(FV)
    nfc = FV // FVc
    assert FVc % 128 == 0 and nfc * FVc == FV

    # Zero-pad ('same' for k=3, plus junk-read slack) and flatten the volume.
    # No transposes: channel-major NCDHW order is kept end to end.
    x = jnp.pad(x_ncdhw,
                ((0, 0), (0, 0), (1, 2), (1, Hp - H - 1), (1, Wp - W - 1)))
    x = x.reshape(N, Ci, SV)

    # (Cout, Cin, kd, kh, kw) -> (kd, Cout, (kh, kw, ci)) to match patch rows.
    w = jnp.transpose(weight_oidhw, (2, 0, 3, 4, 1)).reshape(K, Co, K9)

    kernel = functools.partial(
        _conv3d_kernel, plane=P, wp=Wp, ci=Ci, fvc=FVc, nfc=nfc)

    out_flat = pl.pallas_call(
        kernel,
        out_shape=jax.ShapeDtypeStruct((N, Co, FV), jnp.float32),
        grid_spec=pltpu.PrefetchScalarGridSpec(
            num_scalar_prefetch=0,
            grid=(N,),
            in_specs=[
                # One halo-free fetch of the whole flat volume per batch elem.
                pl.BlockSpec((1, Ci, SV), lambda n: (n, 0, 0)),
                # Weights: tiny block, DMA'd once (constant index map).
                pl.BlockSpec((K, Co, K9), lambda n: (0, 0, 0)),
            ],
            out_specs=pl.BlockSpec((1, Co, FV), lambda n: (n, 0, 0)),
            scratch_shapes=[pltpu.VMEM((K9, FVc), jnp.float32)] * 3,
        ),
        compiler_params=pltpu.CompilerParams(
            dimension_semantics=("parallel",),
            # Per-step footprint is a few hundred KiB at these sizes; 32 MiB
            # leaves headroom and stays inside v7x's 64 MiB physical VMEM.
            vmem_limit_bytes=32 * 1024 * 1024,
        ),
        cost_estimate=pl.CostEstimate(
            flops=2 * N * FV * K3C * Co,
            transcendentals=0,
            bytes_accessed=4 * (N * Ci * SV + Co * K3C + N * Co * FV),
        ),
    )(x, w)

    # (N, Co, D*Hp*Wp) -> drop junk rows/cols; already NCDHW-ordered.
    return out_flat.reshape(N, Co, D, Hp, Wp)[:, :, :, :H, :W]


def kaiming_normal_weight(key, out_channels, in_channels, k):
    # nn.init.kaiming_normal_(w, nonlinearity='relu'): std = sqrt(2 / fan_in),
    # fan_in = in_channels * k^3.
    fan_in = in_channels * k * k * k
    std = math.sqrt(2.0 / fan_in)
    return std * jax.random.normal(
        key, (out_channels, in_channels, k, k, k), dtype=jnp.float32)


if __name__ == "__main__":
    N, Ci, Co, D, H, W = 2, 4, 8, 8, 16, 16

    key = jax.random.PRNGKey(0)
    kx, kw = jax.random.split(key)
    x = jax.random.normal(kx, (N, Ci, D, H, W), dtype=jnp.float32)
    weight = kaiming_normal_weight(kw, Co, Ci, K)

    conv = jax.jit(conv3d_same)
    out = jax.block_until_ready(conv(x, weight))
    assert out.shape == (N, Co, D, H, W), out.shape

    # Reference check against XLA's conv (same semantics as nn.Conv3d forward).
    ref = jax.lax.conv_general_dilated(
        x, weight,
        window_strides=(1, 1, 1),
        padding=[(1, 1), (1, 1), (1, 1)],
        dimension_numbers=("NCDHW", "OIDHW", "NCDHW"),
        precision=jax.lax.Precision.HIGHEST,
    )
    np.testing.assert_allclose(np.asarray(out), np.asarray(ref),
                               rtol=2e-4, atol=2e-4)

    print("KERNEL_OK")
</pallas_src>

<mosaic_0001>
module attributes {stable_mosaic.version = 11 : i64} {
  func.func @_conv3d_kernel(%arg0: i32, %arg1: memref<1x4x4400xf32, #tpu.memory_space<vmem>>, %arg2: memref<3x8x36xf32, #tpu.memory_space<vmem>>, %arg3: memref<1x8x3200xf32, #tpu.memory_space<vmem>>, %arg4: memref<36x640xf32, #tpu.memory_space<vmem>>, %arg5: memref<36x640xf32, #tpu.memory_space<vmem>>, %arg6: memref<36x640xf32, #tpu.memory_space<vmem>>) attributes {dimension_semantics = [#tpu.dimension_semantics<parallel>], iteration_bounds = array<i64: 2>, scalar_prefetch = 0 : i64, scratch_operands = 3 : i64, tpu.core_type = #tpu.core_type<tc>, window_params = [{transform_indices = @transform_0, window_bounds = array<i64: 1, 4, 4400>}, {pipeline_mode = #tpu.pipeline_mode<synchronous>, transform_indices = @transform_1, window_bounds = array<i64: 3, 8, 36>}, {transform_indices = @transform_2, window_bounds = array<i64: 1, 8, 3200>}]} {
    %c0 = arith.constant 0 : index
    %c0_0 = arith.constant 0 : index
    %c0_1 = arith.constant 0 : index
    %0 = vector.load %arg1[%c0, %c0_0, %c0_1] : memref<1x4x4400xf32, #tpu.memory_space<vmem>>, vector<1x4x640xf32>
    %1 = vector.shape_cast %0 : vector<1x4x640xf32> to vector<4x640xf32>
    %c0_2 = arith.constant 0 : index
    %c0_3 = arith.constant 0 : index
    %2 = vector.load %arg4[%c0_2, %c0_3] : memref<36x640xf32, #tpu.memory_space<vmem>>, vector<4x640xf32>
    tpu.vector_store %arg4[%c0_2, %c0_3], %1 {strides = array<i32>} : memref<36x640xf32, #tpu.memory_space<vmem>>, vector<4x640xf32>,
    %c0_4 = arith.constant 0 : index
    %c0_5 = arith.constant 0 : index
    %c1 = arith.constant 1 : index
    %3 = vector.load %arg1[%c0_4, %c0_5, %c1] : memref<1x4x4400xf32, #tpu.memory_space<vmem>>, vector<1x4x640xf32>
    %4 = vector.shape_cast %3 : vector<1x4x640xf32> to vector<4x640xf32>
    %c4 = arith.constant 4 : index
    %c0_6 = arith.constant 0 : index
    %5 = vector.load %arg4[%c4, %c0_6] : memref<36x640xf32, #tpu.memory_space<vmem>>, vector<4x640xf32>
    tpu.vector_store %arg4[%c4, %c0_6], %4 {strides = array<i32>} : memref<36x640xf32, #tpu.memory_space<vmem>>, vector<4x640xf32>,
    %c0_7 = arith.constant 0 : index
    %c0_8 = arith.constant 0 : index
    %c2 = arith.constant 2 : index
    %6 = vector.load %arg1[%c0_7, %c0_8, %c2] : memref<1x4x4400xf32, #tpu.memory_space<vmem>>, vector<1x4x640xf32>
    %7 = vector.shape_cast %6 : vector<1x4x640xf32> to vector<4x640xf32>
    %c8 = arith.constant 8 : index
    %c0_9 = arith.constant 0 : index
    %8 = vector.load %arg4[%c8, %c0_9] : memref<36x640xf32, #tpu.memory_space<vmem>>, vector<4x640xf32>
    tpu.vector_store %arg4[%c8, %c0_9], %7 {strides = array<i32>} : memref<36x640xf32, #tpu.memory_space<vmem>>, vector<4x640xf32>,
    %c0_10 = arith.constant 0 : index
    %c0_11 = arith.constant 0 : index
    %c20 = arith.constant 20 : index
    %9 = vector.load %arg1[%c0_10, %c0_11, %c20] : memref<1x4x4400xf32, #tpu.memory_space<vmem>>, vector<1x4x640xf32>
    %10 = vector.shape_cast %9 : vector<1x4x640xf32> to vector<4x640xf32>
    %c12 = arith.constant 12 : index
    %c0_12 = arith.constant 0 : index
    %11 = vector.load %arg4[%c12, %c0_12] : memref<36x640xf32, #tpu.memory_space<vmem>>, vector<4x640xf32>
    tpu.vector_store %arg4[%c12, %c0_12], %10 {strides = array<i32>} : memref<36x640xf32, #tpu.memory_space<vmem>>, vector<4x640xf32>,
    %c0_13 = arith.constant 0 : index
    %c0_14 = arith.constant 0 : index
    %c21 = arith.constant 21 : index
    %12 = vector.load %arg1[%c0_13, %c0_14, %c21] : memref<1x4x4400xf32, #tpu.memory_space<vmem>>, vector<1x4x640xf32>
    %13 = vector.shape_cast %12 : vector<1x4x640xf32> to vector<4x640xf32>
    %c16 = arith.constant 16 : index
    %c0_15 = arith.constant 0 : index
    %14 = vector.load %arg4[%c16, %c0_15] : memref<36x640xf32, #tpu.memory_space<vmem>>, vector<4x640xf32>
    tpu.vector_store %arg4[%c16, %c0_15], %13 {strides = array<i32>} : memref<36x640xf32, #tpu.memory_space<vmem>>, vector<4x640xf32>,
    %c0_16 = arith.constant 0 : index
    %c0_17 = arith.constant 0 : index
    %c22 = arith.constant 22 : index
    %15 = vector.load %arg1[%c0_16, %c0_17, %c22] : memref<1x4x4400xf32, #tpu.memory_space<vmem>>, vector<1x4x640xf32>
    %16 = vector.shape_cast %15 : vector<1x4x640xf32> to vector<4x640xf32>
    %c20_18 = arith.constant 20 : index
    %c0_19 = arith.constant 0 : index
    %17 = vector.load %arg4[%c20_18, %c0_19] : memref<36x640xf32, #tpu.memory_space<vmem>>, vector<4x640xf32>
    tpu.vector_store %arg4[%c20_18, %c0_19], %16 {strides = array<i32>} : memref<36x640xf32, #tpu.memory_space<vmem>>, vector<4x640xf32>,
    %c0_20 = arith.constant 0 : index
    %c0_21 = arith.constant 0 : index
    %c40 = arith.constant 40 : index
    %18 = vector.load %arg1[%c0_20, %c0_21, %c40] : memref<1x4x4400xf32, #tpu.memory_space<vmem>>, vector<1x4x640xf32>
    %19 = vector.shape_cast %18 : vector<1x4x640xf32> to vector<4x640xf32>
    %c24 = arith.constant 24 : index
    %c0_22 = arith.constant 0 : index
    %20 = vector.load %arg4[%c24, %c0_22] : memref<36x640xf32, #tpu.memory_space<vmem>>, vector<4x640xf32>
    tpu.vector_store %arg4[%c24, %c0_22], %19 {strides = array<i32>} : memref<36x640xf32, #tpu.memory_space<vmem>>, vector<4x640xf32>,
    %c0_23 = arith.constant 0 : index
    %c0_24 = arith.constant 0 : index
    %c41 = arith.constant 41 : index
    %21 = vector.load %arg1[%c0_23, %c0_24, %c41] : memref<1x4x4400xf32, #tpu.memory_space<vmem>>, vector<1x4x640xf32>
    %22 = vector.shape_cast %21 : vector<1x4x640xf32> to vector<4x640xf32>
    %c28 = arith.constant 28 : index
    %c0_25 = arith.constant 0 : index
    %23 = vector.load %arg4[%c28, %c0_25] : memref<36x640xf32, #tpu.memory_space<vmem>>, vector<4x640xf32>
    tpu.vector_store %arg4[%c28, %c0_25], %22 {strides = array<i32>} : memref<36x640xf32, #tpu.memory_space<vmem>>, vector<4x640xf32>,
    %c0_26 = arith.constant 0 : index
    %c0_27 = arith.constant 0 : index
    %c42 = arith.constant 42 : index
    %24 = vector.load %arg1[%c0_26, %c0_27, %c42] : memref<1x4x4400xf32, #tpu.memory_space<vmem>>, vector<1x4x640xf32>
    %25 = vector.shape_cast %24 : vector<1x4x640xf32> to vector<4x640xf32>
    %c32 = arith.constant 32 : index
    %c0_28 = arith.constant 0 : index
    %26 = vector.load %arg4[%c32, %c0_28] : memref<36x640xf32, #tpu.memory_space<vmem>>, vector<4x640xf32>
    tpu.vector_store %arg4[%c32, %c0_28], %25 {strides = array<i32>} : memref<36x640xf32, #tpu.memory_space<vmem>>, vector<4x640xf32>,
    %c0_29 = arith.constant 0 : index
    %c0_30 = arith.constant 0 : index
    %c0_31 = arith.constant 0 : index
    %27 = vector.load %arg2[%c0_29, %c0_30, %c0_31] : memref<3x8x36xf32, #tpu.memory_space<vmem>>, vector<1x8x36xf32>
    %28 = vector.shape_cast %27 : vector<1x8x36xf32> to vector<8x36xf32>
    %c0_32 = arith.constant 0 : index
    %c0_33 = arith.constant 0 : index
    %29 = vector.load %arg4[%c0_32, %c0_33] : memref<36x640xf32, #tpu.memory_space<vmem>>, vector<36x640xf32>
    %cst = arith.constant dense<0.000000e+00> : vector<8x640xf32>
    %30 = tpu.matmul %28, %29, %cst {dimension_numbers = #tpu.dot_dimension_numbers<[1], [0], [0], [1], [0, 0, 1, 1], [], []>} : vector<8x36xf32>, vector<36x640xf32>, vector<8x640xf32> -> vector<8x640xf32>
    %c0_34 = arith.constant 0 : index
    %c0_35 = arith.constant 0 : index
    %c400 = arith.constant 400 : index
    %31 = vector.load %arg1[%c0_34, %c0_35, %c400] : memref<1x4x4400xf32, #tpu.memory_space<vmem>>, vector<1x4x640xf32>
    %32 = vector.shape_cast %31 : vector<1x4x640xf32> to vector<4x640xf32>
    %c0_36 = arith.constant 0 : index
    %c0_37 = arith.constant 0 : index
    %33 = vector.load %arg5[%c0_36, %c0_37] : memref<36x640xf32, #tpu.memory_space<vmem>>, vector<4x640xf32>
    tpu.vector_store %arg5[%c0_36, %c0_37], %32 {strides = array<i32>} : memref<36x640xf32, #tpu.memory_space<vmem>>, vector<4x640xf32>,
    %c0_38 = arith.constant 0 : index
    %c0_39 = arith.constant 0 : index
    %c401 = arith.constant 401 : index
    %34 = vector.load %arg1[%c0_38, %c0_39, %c401] : memref<1x4x4400xf32, #tpu.memory_space<vmem>>, vector<1x4x640xf32>
    %35 = vector.shape_cast %34 : vector<1x4x640xf32> to vector<4x640xf32>
    %c4_40 = arith.constant 4 : index
    %c0_41 = arith.constant 0 : index
    %36 = vector.load %arg5[%c4_40, %c0_41] : memref<36x640xf32, #tpu.memory_space<vmem>>, vector<4x640xf32>
    tpu.vector_store %arg5[%c4_40, %c0_41], %35 {strides = array<i32>} : memref<36x640xf32, #tpu.memory_space<vmem>>, vector<4x640xf32>,
    %c0_42 = arith.constant 0 : index
    %c0_43 = arith.constant 0 : index
    %c402 = arith.constant 402 : index
    %37 = vector.load %arg1[%c0_42, %c0_43, %c402] : memref<1x4x4400xf32, #tpu.memory_space<vmem>>, vector<1x4x640xf32>
    %38 = vector.shape_cast %37 : vector<1x4x640xf32> to vector<4x640xf32>
    %c8_44 = arith.constant 8 : index
    %c0_45 = arith.constant 0 : index
    %39 = vector.load %arg5[%c8_44, %c0_45] : memref<36x640xf32, #tpu.memory_space<vmem>>, vector<4x640xf32>
    tpu.vector_store %arg5[%c8_44, %c0_45], %38 {strides = array<i32>} : memref<36x640xf32, #tpu.memory_space<vmem>>, vector<4x640xf32>,
    %c0_46 = arith.constant 0 : index
    %c0_47 = arith.constant 0 : index
    %c420 = arith.constant 420 : index
    %40 = vector.load %arg1[%c0_46, %c0_47, %c420] : memref<1x4x4400xf32, #tpu.memory_space<vmem>>, vector<1x4x640xf32>
    %41 = vector.shape_cast %40 : vector<1x4x640xf32> to vector<4x640xf32>
    %c12_48 = arith.constant 12 : index
    %c0_49 = arith.constant 0 : index
    %42 = vector.load %arg5[%c12_48, %c0_49] : memref<36x640xf32, #tpu.memory_space<vmem>>, vector<4x640xf32>
    tpu.vector_store %arg5[%c12_48, %c0_49], %41 {strides = array<i32>} : memref<36x640xf32, #tpu.memory_space<vmem>>, vector<4x640xf32>,
    %c0_50 = arith.constant 0 : index
    %c0_51 = arith.constant 0 : index
    %c421 = arith.constant 421 : index
    %43 = vector.load %arg1[%c0_50, %c0_51, %c421] : memref<1x4x4400xf32, #tpu.memory_space<vmem>>, vector<1x4x640xf32>
    %44 = vector.shape_cast %43 : vector<1x4x640xf32> to vector<4x640xf32>
    %c16_52 = arith.constant 16 : index
    %c0_53 = arith.constant 0 : index
    %45 = vector.load %arg5[%c16_52, %c0_53] : memref<36x640xf32, #tpu.memory_space<vmem>>, vector<4x640xf32>
    tpu.vector_store %arg5[%c16_52, %c0_53], %44 {strides = array<i32>} : memref<36x640xf32, #tpu.memory_space<vmem>>, vector<4x640xf32>,
    %c0_54 = arith.constant 0 : index
    %c0_55 = arith.constant 0 : index
    %c422 = arith.constant 422 : index
    %46 = vector.load %arg1[%c0_54, %c0_55, %c422] : memref<1x4x4400xf32, #tpu.memory_space<vmem>>, vector<1x4x640xf32>
    %47 = vector.shape_cast %46 : vector<1x4x640xf32> to vector<4x640xf32>
    %c20_56 = arith.constant 20 : index
    %c0_57 = arith.constant 0 : index
    %48 = vector.load %arg5[%c20_56, %c0_57] : memref<36x640xf32, #tpu.memory_space<vmem>>, vector<4x640xf32>
    tpu.vector_store %arg5[%c20_56, %c0_57], %47 {strides = array<i32>} : memref<36x640xf32, #tpu.memory_space<vmem>>, vector<4x640xf32>,
    %c0_58 = arith.constant 0 : index
    %c0_59 = arith.constant 0 : index
    %c440 = arith.constant 440 : index
    %49 = vector.load %arg1[%c0_58, %c0_59, %c440] : memref<1x4x4400xf32, #tpu.memory_space<vmem>>, vector<1x4x640xf32>
    %50 = vector.shape_cast %49 : vector<1x4x640xf32> to vector<4x640xf32>
    %c24_60 = arith.constant 24 : index
    %c0_61 = arith.constant 0 : index
    %51 = vector.load %arg5[%c24_60, %c0_61] : memref<36x640xf32, #tpu.memory_space<vmem>>, vector<4x640xf32>
    tpu.vector_store %arg5[%c24_60, %c0_61], %50 {strides = array<i32>} : memref<36x640xf32, #tpu.memory_space<vmem>>, vector<4x640xf32>,
    %c0_62 = arith.constant 0 : index
    %c0_63 = arith.constant 0 : index
    %c441 = arith.constant 441 : index
    %52 = vector.load %arg1[%c0_62, %c0_63, %c441] : memref<1x4x4400xf32, #tpu.memory_space<vmem>>, vector<1x4x640xf32>
    %53 = vector.shape_cast %52 : vector<1x4x640xf32> to vector<4x640xf32>
    %c28_64 = arith.constant 28 : index
    %c0_65 = arith.constant 0 : index
    %54 = vector.load %arg5[%c28_64, %c0_65] : memref<36x640xf32, #tpu.memory_space<vmem>>, vector<4x640xf32>
    tpu.vector_store %arg5[%c28_64, %c0_65], %53 {strides = array<i32>} : memref<36x640xf32, #tpu.memory_space<vmem>>, vector<4x640xf32>,
    %c0_66 = arith.constant 0 : index
    %c0_67 = arith.constant 0 : index
    %c442 = arith.constant 442 : index
    %55 = vector.load %arg1[%c0_66, %c0_67, %c442] : memref<1x4x4400xf32, #tpu.memory_space<vmem>>, vector<1x4x640xf32>
    %56 = vector.shape_cast %55 : vector<1x4x640xf32> to vector<4x640xf32>
    %c32_68 = arith.constant 32 : index
    %c0_69 = arith.constant 0 : index
    %57 = vector.load %arg5[%c32_68, %c0_69] : memref<36x640xf32, #tpu.memory_space<vmem>>, vector<4x640xf32>
    tpu.vector_store %arg5[%c32_68, %c0_69], %56 {strides = array<i32>} : memref<36x640xf32, #tpu.memory_space<vmem>>, vector<4x640xf32>,
    %c1_70 = arith.constant 1 : index
    %c0_71 = arith.constant 0 : index
    %c0_72 = arith.constant 0 : index
    %58 = vector.load %arg2[%c1_70, %c0_71, %c0_72] : memref<3x8x36xf32, #tpu.memory_space<vmem>>, vector<1x8x36xf32>
    %59 = vector.shape_cast %58 : vector<1x8x36xf32> to vector<8x36xf32>
    %c0_73 = arith.constant 0 : index
    %c0_74 = arith.constant 0 : index
    %60 = vector.load %arg5[%c0_73, %c0_74] : memref<36x640xf32, #tpu.memory_space<vmem>>, vector<36x640xf32>
    %cst_75 = arith.constant dense<0.000000e+00> : vector<8x640xf32>
    %61 = tpu.matmul %59, %60, %cst_75 {dimension_numbers = #tpu.dot_dimension_numbers<[1], [0], [0], [1], [0, 0, 1, 1], [], []>} : vector<8x36xf32>, vector<36x640xf32>, vector<8x640xf32> -> vector<8x640xf32>
    %62 = arith.addf %30, %61 : vector<8x640xf32>
    %c0_76 = arith.constant 0 : index
    %c0_77 = arith.constant 0 : index
    %c800 = arith.constant 800 : index
    %63 = vector.load %arg1[%c0_76, %c0_77, %c800] : memref<1x4x4400xf32, #tpu.memory_space<vmem>>, vector<1x4x640xf32>
    %64 = vector.shape_cast %63 : vector<1x4x640xf32> to vector<4x640xf32>
    %c0_78 = arith.constant 0 : index
    %c0_79 = arith.constant 0 : index
    %65 = vector.load %arg6[%c0_78, %c0_79] : memref<36x640xf32, #tpu.memory_space<vmem>>, vector<4x640xf32>
    tpu.vector_store %arg6[%c0_78, %c0_79], %64 {strides = array<i32>} : memref<36x640xf32, #tpu.memory_space<vmem>>, vector<4x640xf32>,
    %c0_80 = arith.constant 0 : index
    %c0_81 = arith.constant 0 : index
    %c801 = arith.constant 801 : index
    %66 = vector.load %arg1[%c0_80, %c0_81, %c801] : memref<1x4x4400xf32, #tpu.memory_space<vmem>>, vector<1x4x640xf32>
    %67 = vector.shape_cast %66 : vector<1x4x640xf32> to vector<4x640xf32>
    %c4_82 = arith.constant 4 : index
    %c0_83 = arith.constant 0 : index
    %68 = vector.load %arg6[%c4_82, %c0_83] : memref<36x640xf32, #tpu.memory_space<vmem>>, vector<4x640xf32>
    tpu.vector_store %arg6[%c4_82, %c0_83], %67 {strides = array<i32>} : memref<36x640xf32, #tpu.memory_space<vmem>>, vector<4x640xf32>,
    %c0_84 = arith.constant 0 : index
    %c0_85 = arith.constant 0 : index
    %c802 = arith.constant 802 : index
    %69 = vector.load %arg1[%c0_84, %c0_85, %c802] : memref<1x4x4400xf32, #tpu.memory_space<vmem>>, vector<1x4x640xf32>
    %70 = vector.shape_cast %69 : vector<1x4x640xf32> to vector<4x640xf32>
    %c8_86 = arith.constant 8 : index
    %c0_87 = arith.constant 0 : index
    %71 = vector.load %arg6[%c8_86, %c0_87] : memref<36x640xf32, #tpu.memory_space<vmem>>, vector<4x640xf32>
    tpu.vector_store %arg6[%c8_86, %c0_87], %70 {strides = array<i32>} : memref<36x640xf32, #tpu.memory_space<vmem>>, vector<4x640xf32>,
    %c0_88 = arith.constant 0 : index
    %c0_89 = arith.constant 0 : index
    %c820 = arith.constant 820 : index
    %72 = vector.load %arg1[%c0_88, %c0_89, %c820] : memref<1x4x4400xf32, #tpu.memory_space<vmem>>, vector<1x4x640xf32>
    %73 = vector.shape_cast %72 : vector<1x4x640xf32> to vector<4x640xf32>
    %c12_90 = arith.constant 12 : index
    %c0_91 = arith.constant 0 : index
    %74 = vector.load %arg6[%c12_90, %c0_91] : memref<36x640xf32, #tpu.memory_space<vmem>>, vector<4x640xf32>
    tpu.vector_store %arg6[%c12_90, %c0_91], %73 {strides = array<i32>} : memref<36x640xf32, #tpu.memory_space<vmem>>, vector<4x640xf32>,
    %c0_92 = arith.constant 0 : index
    %c0_93 = arith.constant 0 : index
    %c821 = arith.constant 821 : index
    %75 = vector.load %arg1[%c0_92, %c0_93, %c821] : memref<1x4x4400xf32, #tpu.memory_space<vmem>>, vector<1x4x640xf32>
    %76 = vector.shape_cast %75 : vector<1x4x640xf32> to vector<4x640xf32>
    %c16_94 = arith.constant 16 : index
    %c0_95 = arith.constant 0 : index
    %77 = vector.load %arg6[%c16_94, %c0_95] : memref<36x640xf32, #tpu.memory_space<vmem>>, vector<4x640xf32>
    tpu.vector_store %arg6[%c16_94, %c0_95], %76 {strides = array<i32>} : memref<36x640xf32, #tpu.memory_space<vmem>>, vector<4x640xf32>,
    %c0_96 = arith.constant 0 : index
    %c0_97 = arith.constant 0 : index
    %c822 = arith.constant 822 : index
    %78 = vector.load %arg1[%c0_96, %c0_97, %c822] : memref<1x4x4400xf32, #tpu.memory_space<vmem>>, vector<1x4x640xf32>
    %79 = vector.shape_cast %78 : vector<1x4x640xf32> to vector<4x640xf32>
    %c20_98 = arith.constant 20 : index
    %c0_99 = arith.constant 0 : index
    %80 = vector.load %arg6[%c20_98, %c0_99] : memref<36x640xf32, #tpu.memory_space<vmem>>, vector<4x640xf32>
    tpu.vector_store %arg6[%c20_98, %c0_99], %79 {strides = array<i32>} : memref<36x640xf32, #tpu.memory_space<vmem>>, vector<4x640xf32>,
    %c0_100 = arith.constant 0 : index
    %c0_101 = arith.constant 0 : index
    %c840 = arith.constant 840 : index
    %81 = vector.load %arg1[%c0_100, %c0_101, %c840] : memref<1x4x4400xf32, #tpu.memory_space<vmem>>, vector<1x4x640xf32>
    %82 = vector.shape_cast %81 : vector<1x4x640xf32> to vector<4x640xf32>
    %c24_102 = arith.constant 24 : index
    %c0_103 = arith.constant 0 : index
    %83 = vector.load %arg6[%c24_102, %c0_103] : memref<36x640xf32, #tpu.memory_space<vmem>>, vector<4x640xf32>
    tpu.vector_store %arg6[%c24_102, %c0_103], %82 {strides = array<i32>} : memref<36x640xf32, #tpu.memory_space<vmem>>, vector<4x640xf32>,
    %c0_104 = arith.constant 0 : index
    %c0_105 = arith.constant 0 : index
    %c841 = arith.constant 841 : index
    %84 = vector.load %arg1[%c0_104, %c0_105, %c841] : memref<1x4x4400xf32, #tpu.memory_space<vmem>>, vector<1x4x640xf32>
    %85 = vector.shape_cast %84 : vector<1x4x640xf32> to vector<4x640xf32>
    %c28_106 = arith.constant 28 : index
    %c0_107 = arith.constant 0 : index
    %86 = vector.load %arg6[%c28_106, %c0_107] : memref<36x640xf32, #tpu.memory_space<vmem>>, vector<4x640xf32>
    tpu.vector_store %arg6[%c28_106, %c0_107], %85 {strides = array<i32>} : memref<36x640xf32, #tpu.memory_space<vmem>>, vector<4x640xf32>,
    %c0_108 = arith.constant 0 : index
    %c0_109 = arith.constant 0 : index
    %c842 = arith.constant 842 : index
    %87 = vector.load %arg1[%c0_108, %c0_109, %c842] : memref<1x4x4400xf32, #tpu.memory_space<vmem>>, vector<1x4x640xf32>
    %88 = vector.shape_cast %87 : vector<1x4x640xf32> to vector<4x640xf32>
    %c32_110 = arith.constant 32 : index
    %c0_111 = arith.constant 0 : index
    %89 = vector.load %arg6[%c32_110, %c0_111] : memref<36x640xf32, #tpu.memory_space<vmem>>, vector<4x640xf32>
    tpu.vector_store %arg6[%c32_110, %c0_111], %88 {strides = array<i32>} : memref<36x640xf32, #tpu.memory_space<vmem>>, vector<4x640xf32>,
    %c2_112 = arith.constant 2 : index
    %c0_113 = arith.constant 0 : index
    %c0_114 = arith.constant 0 : index
    %90 = vector.load %arg2[%c2_112, %c0_113, %c0_114] : memref<3x8x36xf32, #tpu.memory_space<vmem>>, vector<1x8x36xf32>
    %91 = vector.shape_cast %90 : vector<1x8x36xf32> to vector<8x36xf32>
    %c0_115 = arith.constant 0 : index
    %c0_116 = arith.constant 0 : index
    %92 = vector.load %arg6[%c0_115, %c0_116] : memref<36x640xf32, #tpu.memory_space<vmem>>, vector<36x640xf32>
    %cst_117 = arith.constant dense<0.000000e+00> : vector<8x640xf32>
    %93 = tpu.matmul %91, %92, %cst_117 {dimension_numbers = #tpu.dot_dimension_numbers<[1], [0], [0], [1], [0, 0, 1, 1], [], []>} : vector<8x36xf32>, vector<36x640xf32>, vector<8x640xf32> -> vector<8x640xf32>
    %94 = arith.addf %62, %93 : vector<8x640xf32>
    %c0_118 = arith.constant 0 : index
    %c0_119 = arith.constant 0 : index
    %c0_120 = arith.constant 0 : index
    %95 = vector.load %arg3[%c0_118, %c0_119, %c0_120] : memref<1x8x3200xf32, #tpu.memory_space<vmem>>, vector<1x8x640xf32>
    %96 = vector.shape_cast %95 : vector<1x8x640xf32> to vector<8x640xf32>
    %97 = vector.shape_cast %94 : vector<8x640xf32> to vector<1x8x640xf32>
    tpu.vector_store %arg3[%c0_118, %c0_119, %c0_120], %97 {strides = array<i32>} : memref<1x8x3200xf32, #tpu.memory_space<vmem>>, vector<1x8x640xf32>,
    %c0_121 = arith.constant 0 : index
    %c0_122 = arith.constant 0 : index
    %c640 = arith.constant 640 : index
    %98 = vector.load %arg1[%c0_121, %c0_122, %c640] : memref<1x4x4400xf32, #tpu.memory_space<vmem>>, vector<1x4x640xf32>
    %99 = vector.shape_cast %98 : vector<1x4x640xf32> to vector<4x640xf32>
    %c0_123 = arith.constant 0 : index
    %c0_124 = arith.constant 0 : index
    %100 = vector.load %arg4[%c0_123, %c0_124] : memref<36x640xf32, #tpu.memory_space<vmem>>, vector<4x640xf32>
    tpu.vector_store %arg4[%c0_123, %c0_124], %99 {strides = array<i32>} : memref<36x640xf32, #tpu.memory_space<vmem>>, vector<4x640xf32>,
    %c0_125 = arith.constant 0 : index
    %c0_126 = arith.constant 0 : index
    %c641 = arith.constant 641 : index
    %101 = vector.load %arg1[%c0_125, %c0_126, %c641] : memref<1x4x4400xf32, #tpu.memory_space<vmem>>, vector<1x4x640xf32>
    %102 = vector.shape_cast %101 : vector<1x4x640xf32> to vector<4x640xf32>
    %c4_127 = arith.constant 4 : index
    %c0_128 = arith.constant 0 : index
    %103 = vector.load %arg4[%c4_127, %c0_128] : memref<36x640xf32, #tpu.memory_space<vmem>>, vector<4x640xf32>
    tpu.vector_store %arg4[%c4_127, %c0_128], %102 {strides = array<i32>} : memref<36x640xf32, #tpu.memory_space<vmem>>, vector<4x640xf32>,
    %c0_129 = arith.constant 0 : index
    %c0_130 = arith.constant 0 : index
    %c642 = arith.constant 642 : index
    %104 = vector.load %arg1[%c0_129, %c0_130, %c642] : memref<1x4x4400xf32, #tpu.memory_space<vmem>>, vector<1x4x640xf32>
    %105 = vector.shape_cast %104 : vector<1x4x640xf32> to vector<4x640xf32>
    %c8_131 = arith.constant 8 : index
    %c0_132 = arith.constant 0 : index
    %106 = vector.load %arg4[%c8_131, %c0_132] : memref<36x640xf32, #tpu.memory_space<vmem>>, vector<4x640xf32>
    tpu.vector_store %arg4[%c8_131, %c0_132], %105 {strides = array<i32>} : memref<36x640xf32, #tpu.memory_space<vmem>>, vector<4x640xf32>,
    %c0_133 = arith.constant 0 : index
    %c0_134 = arith.constant 0 : index
    %c660 = arith.constant 660 : index
    %107 = vector.load %arg1[%c0_133, %c0_134, %c660] : memref<1x4x4400xf32, #tpu.memory_space<vmem>>, vector<1x4x640xf32>
    %108 = vector.shape_cast %107 : vector<1x4x640xf32> to vector<4x640xf32>
    %c12_135 = arith.constant 12 : index
    %c0_136 = arith.constant 0 : index
    %109 = vector.load %arg4[%c12_135, %c0_136] : memref<36x640xf32, #tpu.memory_space<vmem>>, vector<4x640xf32>
    tpu.vector_store %arg4[%c12_135, %c0_136], %108 {strides = array<i32>} : memref<36x640xf32, #tpu.memory_space<vmem>>, vector<4x640xf32>,
    %c0_137 = arith.constant 0 : index
    %c0_138 = arith.constant 0 : index
    %c661 = arith.constant 661 : index
    %110 = vector.load %arg1[%c0_137, %c0_138, %c661] : memref<1x4x4400xf32, #tpu.memory_space<vmem>>, vector<1x4x640xf32>
    %111 = vector.shape_cast %110 : vector<1x4x640xf32> to vector<4x640xf32>
    %c16_139 = arith.constant 16 : index
    %c0_140 = arith.constant 0 : index
    %112 = vector.load %arg4[%c16_139, %c0_140] : memref<36x640xf32, #tpu.memory_space<vmem>>, vector<4x640xf32>
    tpu.vector_store %arg4[%c16_139, %c0_140], %111 {strides = array<i32>} : memref<36x640xf32, #tpu.memory_space<vmem>>, vector<4x640xf32>,
    %c0_141 = arith.constant 0 : index
    %c0_142 = arith.constant 0 : index
    %c662 = arith.constant 662 : index
    %113 = vector.load %arg1[%c0_141, %c0_142, %c662] : memref<1x4x4400xf32, #tpu.memory_space<vmem>>, vector<1x4x640xf32>
    %114 = vector.shape_cast %113 : vector<1x4x640xf32> to vector<4x640xf32>
    %c20_143 = arith.constant 20 : index
    %c0_144 = arith.constant 0 : index
    %115 = vector.load %arg4[%c20_143, %c0_144] : memref<36x640xf32, #tpu.memory_space<vmem>>, vector<4x640xf32>
    tpu.vector_store %arg4[%c20_143, %c0_144], %114 {strides = array<i32>} : memref<36x640xf32, #tpu.memory_space<vmem>>, vector<4x640xf32>,
    %c0_145 = arith.constant 0 : index
    %c0_146 = arith.constant 0 : index
    %c680 = arith.constant 680 : index
    %116 = vector.load %arg1[%c0_145, %c0_146, %c680] : memref<1x4x4400xf32, #tpu.memory_space<vmem>>, vector<1x4x640xf32>
    %117 = vector.shape_cast %116 : vector<1x4x640xf32> to vector<4x640xf32>
    %c24_147 = arith.constant 24 : index
    %c0_148 = arith.constant 0 : index
    %118 = vector.load %arg4[%c24_147, %c0_148] : memref<36x640xf32, #tpu.memory_space<vmem>>, vector<4x640xf32>
    tpu.vector_store %arg4[%c24_147, %c0_148], %117 {strides = array<i32>} : memref<36x640xf32, #tpu.memory_space<vmem>>, vector<4x640xf32>,
    %c0_149 = arith.constant 0 : index
    %c0_150 = arith.constant 0 : index
    %c681 = arith.constant 681 : index
    %119 = vector.load %arg1[%c0_149, %c0_150, %c681] : memref<1x4x4400xf32, #tpu.memory_space<vmem>>, vector<1x4x640xf32>
    %120 = vector.shape_cast %119 : vector<1x4x640xf32> to vector<4x640xf32>
    %c28_151 = arith.constant 28 : index
    %c0_152 = arith.constant 0 : index
    %121 = vector.load %arg4[%c28_151, %c0_152] : memref<36x640xf32, #tpu.memory_space<vmem>>, vector<4x640xf32>
    tpu.vector_store %arg4[%c28_151, %c0_152], %120 {strides = array<i32>} : memref<36x640xf32, #tpu.memory_space<vmem>>, vector<4x640xf32>,
    %c0_153 = arith.constant 0 : index
    %c0_154 = arith.constant 0 : index
    %c682 = arith.constant 682 : index
    %122 = vector.load %arg1[%c0_153, %c0_154, %c682] : memref<1x4x4400xf32, #tpu.memory_space<vmem>>, vector<1x4x640xf32>
    %123 = vector.shape_cast %122 : vector<1x4x640xf32> to vector<4x640xf32>
    %c32_155 = arith.constant 32 : index
    %c0_156 = arith.constant 0 : index
    %124 = vector.load %arg4[%c32_155, %c0_156] : memref<36x640xf32, #tpu.memory_space<vmem>>, vector<4x640xf32>
    tpu.vector_store %arg4[%c32_155, %c0_156], %123 {strides = array<i32>} : memref<36x640xf32, #tpu.memory_space<vmem>>, vector<4x640xf32>,
    %c0_157 = arith.constant 0 : index
    %c0_158 = arith.constant 0 : index
    %c0_159 = arith.constant 0 : index
    %125 = vector.load %arg2[%c0_157, %c0_158, %c0_159] : memref<3x8x36xf32, #tpu.memory_space<vmem>>, vector<1x8x36xf32>
    %126 = vector.shape_cast %125 : vector<1x8x36xf32> to vector<8x36xf32>
    %c0_160 = arith.constant 0 : index
    %c0_161 = arith.constant 0 : index
    %127 = vector.load %arg4[%c0_160, %c0_161] : memref<36x640xf32, #tpu.memory_space<vmem>>, vector<36x640xf32>
    %cst_162 = arith.constant dense<0.000000e+00> : vector<8x640xf32>
    %128 = tpu.matmul %126, %127, %cst_162 {dimension_numbers = #tpu.dot_dimension_numbers<[1], [0], [0], [1], [0, 0, 1, 1], [], []>} : vector<8x36xf32>, vector<36x640xf32>, vector<8x640xf32> -> vector<8x640xf32>
    %c0_163 = arith.constant 0 : index
    %c0_164 = arith.constant 0 : index
    %c1040 = arith.constant 1040 : index
    %129 = vector.load %arg1[%c0_163, %c0_164, %c1040] : memref<1x4x4400xf32, #tpu.memory_space<vmem>>, vector<1x4x640xf32>
    %130 = vector.shape_cast %129 : vector<1x4x640xf32> to vector<4x640xf32>
    %c0_165 = arith.constant 0 : index
    %c0_166 = arith.constant 0 : index
    %131 = vector.load %arg5[%c0_165, %c0_166] : memref<36x640xf32, #tpu.memory_space<vmem>>, vector<4x640xf32>
    tpu.vector_store %arg5[%c0_165, %c0_166], %130 {strides = array<i32>} : memref<36x640xf32, #tpu.memory_space<vmem>>, vector<4x640xf32>,
    %c0_167 = arith.constant 0 : index
    %c0_168 = arith.constant 0 : index
    %c1041 = arith.constant 1041 : index
    %132 = vector.load %arg1[%c0_167, %c0_168, %c1041] : memref<1x4x4400xf32, #tpu.memory_space<vmem>>, vector<1x4x640xf32>
    %133 = vector.shape_cast %132 : vector<1x4x640xf32> to vector<4x640xf32>
    %c4_169 = arith.constant 4 : index
    %c0_170 = arith.constant 0 : index
    %134 = vector.load %arg5[%c4_169, %c0_170] : memref<36x640xf32, #tpu.memory_space<vmem>>, vector<4x640xf32>
    tpu.vector_store %arg5[%c4_169, %c0_170], %133 {strides = array<i32>} : memref<36x640xf32, #tpu.memory_space<vmem>>, vector<4x640xf32>,
    %c0_171 = arith.constant 0 : index
    %c0_172 = arith.constant 0 : index
    %c1042 = arith.constant 1042 : index
    %135 = vector.load %arg1[%c0_171, %c0_172, %c1042] : memref<1x4x4400xf32, #tpu.memory_space<vmem>>, vector<1x4x640xf32>
    %136 = vector.shape_cast %135 : vector<1x4x640xf32> to vector<4x640xf32>
    %c8_173 = arith.constant 8 : index
    %c0_174 = arith.constant 0 : index
    %137 = vector.load %arg5[%c8_173, %c0_174] : memref<36x640xf32, #tpu.memory_space<vmem>>, vector<4x640xf32>
    tpu.vector_store %arg5[%c8_173, %c0_174], %136 {strides = array<i32>} : memref<36x640xf32, #tpu.memory_space<vmem>>, vector<4x640xf32>,
    %c0_175 = arith.constant 0 : index
    %c0_176 = arith.constant 0 : index
    %c1060 = arith.constant 1060 : index
    %138 = vector.load %arg1[%c0_175, %c0_176, %c1060] : memref<1x4x4400xf32, #tpu.memory_space<vmem>>, vector<1x4x640xf32>
    %139 = vector.shape_cast %138 : vector<1x4x640xf32> to vector<4x640xf32>
    %c12_177 = arith.constant 12 : index
    %c0_178 = arith.constant 0 : index
    %140 = vector.load %arg5[%c12_177, %c0_178] : memref<36x640xf32, #tpu.memory_space<vmem>>, vector<4x640xf32>
    tpu.vector_store %arg5[%c12_177, %c0_178], %139 {strides = array<i32>} : memref<36x640xf32, #tpu.memory_space<vmem>>, vector<4x640xf32>,
    %c0_179 = arith.constant 0 : index
    %c0_180 = arith.constant 0 : index
    %c1061 = arith.constant 1061 : index
    %141 = vector.load %arg1[%c0_179, %c0_180, %c1061] : memref<1x4x4400xf32, #tpu.memory_space<vmem>>, vector<1x4x640xf32>
    %142 = vector.shape_cast %141 : vector<1x4x640xf32> to vector<4x640xf32>
    %c16_181 = arith.constant 16 : index
    %c0_182 = arith.constant 0 : index
    %143 = vector.load %arg5[%c16_181, %c0_182] : memref<36x640xf32, #tpu.memory_space<vmem>>, vector<4x640xf32>
    tpu.vector_store %arg5[%c16_181, %c0_182], %142 {strides = array<i32>} : memref<36x640xf32, #tpu.memory_space<vmem>>, vector<4x640xf32>,
    %c0_183 = arith.constant 0 : index
    %c0_184 = arith.constant 0 : index
    %c1062 = arith.constant 1062 : index
    %144 = vector.load %arg1[%c0_183, %c0_184, %c1062] : memref<1x4x4400xf32, #tpu.memory_space<vmem>>, vector<1x4x640xf32>
    %145 = vector.shape_cast %144 : vector<1x4x640xf32> to vector<4x640xf32>
    %c20_185 = arith.constant 20 : index
    %c0_186 = arith.constant 0 : index
    %146 = vector.load %arg5[%c20_185, %c0_186] : memref<36x640xf32, #tpu.memory_space<vmem>>, vector<4x640xf32>
    tpu.vector_store %arg5[%c20_185, %c0_186], %145 {strides = array<i32>} : memref<36x640xf32, #tpu.memory_space<vmem>>, vector<4x640xf32>,
    %c0_187 = arith.constant 0 : index
    %c0_188 = arith.constant 0 : index
    %c1080 = arith.constant 1080 : index
    %147 = vector.load %arg1[%c0_187, %c0_188, %c1080] : memref<1x4x4400xf32, #tpu.memory_space<vmem>>, vector<1x4x640xf32>
    %148 = vector.shape_cast %147 : vector<1x4x640xf32> to vector<4x640xf32>
    %c24_189 = arith.constant 24 : index
    %c0_190 = arith.constant 0 : index
    %149 = vector.load %arg5[%c24_189, %c0_190] : memref<36x640xf32, #tpu.memory_space<vmem>>, vector<4x640xf32>
    tpu.vector_store %arg5[%c24_189, %c0_190], %148 {strides = array<i32>} : memref<36x640xf32, #tpu.memory_space<vmem>>, vector<4x640xf32>,
    %c0_191 = arith.constant 0 : index
    %c0_192 = arith.constant 0 : index
    %c1081 = arith.constant 1081 : index
    %150 = vector.load %arg1[%c0_191, %c0_192, %c1081] : memref<1x4x4400xf32, #tpu.memory_space<vmem>>, vector<1x4x640xf32>
    %151 = vector.shape_cast %150 : vector<1x4x640xf32> to vector<4x640xf32>
    %c28_193 = arith.constant 28 : index
    %c0_194 = arith.constant 0 : index
    %152 = vector.load %arg5[%c28_193, %c0_194] : memref<36x640xf32, #tpu.memory_space<vmem>>, vector<4x640xf32>
    tpu.vector_store %arg5[%c28_193, %c0_194], %151 {strides = array<i32>} : memref<36x640xf32, #tpu.memory_space<vmem>>, vector<4x640xf32>,
    %c0_195 = arith.constant 0 : index
    %c0_196 = arith.constant 0 : index
    %c1082 = arith.constant 1082 : index
    %153 = vector.load %arg1[%c0_195, %c0_196, %c1082] : memref<1x4x4400xf32, #tpu.memory_space<vmem>>, vector<1x4x640xf32>
    %154 = vector.shape_cast %153 : vector<1x4x640xf32> to vector<4x640xf32>
    %c32_197 = arith.constant 32 : index
    %c0_198 = arith.constant 0 : index
    %155 = vector.load %arg5[%c32_197, %c0_198] : memref<36x640xf32, #tpu.memory_space<vmem>>, vector<4x640xf32>
    tpu.vector_store %arg5[%c32_197, %c0_198], %154 {strides = array<i32>} : memref<36x640xf32, #tpu.memory_space<vmem>>, vector<4x640xf32>,
    %c1_199 = arith.constant 1 : index
    %c0_200 = arith.constant 0 : index
    %c0_201 = arith.constant 0 : index
    %156 = vector.load %arg2[%c1_199, %c0_200, %c0_201] : memref<3x8x36xf32, #tpu.memory_space<vmem>>, vector<1x8x36xf32>
    %157 = vector.shape_cast %156 : vector<1x8x36xf32> to vector<8x36xf32>
    %c0_202 = arith.constant 0 : index
    %c0_203 = arith.constant 0 : index
    %158 = vector.load %arg5[%c0_202, %c0_203] : memref<36x640xf32, #tpu.memory_space<vmem>>, vector<36x640xf32>
    %cst_204 = arith.constant dense<0.000000e+00> : vector<8x640xf32>
    %159 = tpu.matmul %157, %158, %cst_204 {dimension_numbers = #tpu.dot_dimension_numbers<[1], [0], [0], [1], [0, 0, 1, 1], [], []>} : vector<8x36xf32>, vector<36x640xf32>, vector<8x640xf32> -> vector<8x640xf32>
    %160 = arith.addf %128, %159 : vector<8x640xf32>
    %c0_205 = arith.constant 0 : index
    %c0_206 = arith.constant 0 : index
    %c1440 = arith.constant 1440 : index
    %161 = vector.load %arg1[%c0_205, %c0_206, %c1440] : memref<1x4x4400xf32, #tpu.memory_space<vmem>>, vector<1x4x640xf32>
    %162 = vector.shape_cast %161 : vector<1x4x640xf32> to vector<4x640xf32>
    %c0_207 = arith.constant 0 : index
    %c0_208 = arith.constant 0 : index
    %163 = vector.load %arg6[%c0_207, %c0_208] : memref<36x640xf32, #tpu.memory_space<vmem>>, vector<4x640xf32>
    tpu.vector_store %arg6[%c0_207, %c0_208], %162 {strides = array<i32>} : memref<36x640xf32, #tpu.memory_space<vmem>>, vector<4x640xf32>,
    %c0_209 = arith.constant 0 : index
    %c0_210 = arith.constant 0 : index
    %c1441 = arith.constant 1441 : index
    %164 = vector.load %arg1[%c0_209, %c0_210, %c1441] : memref<1x4x4400xf32, #tpu.memory_space<vmem>>, vector<1x4x640xf32>
    %165 = vector.shape_cast %164 : vector<1x4x640xf32> to vector<4x640xf32>
    %c4_211 = arith.constant 4 : index
    %c0_212 = arith.constant 0 : index
    %166 = vector.load %arg6[%c4_211, %c0_212] : memref<36x640xf32, #tpu.memory_space<vmem>>, vector<4x640xf32>
    tpu.vector_store %arg6[%c4_211, %c0_212], %165 {strides = array<i32>} : memref<36x640xf32, #tpu.memory_space<vmem>>, vector<4x640xf32>,
    %c0_213 = arith.constant 0 : index
    %c0_214 = arith.constant 0 : index
    %c1442 = arith.constant 1442 : index
    %167 = vector.load %arg1[%c0_213, %c0_214, %c1442] : memref<1x4x4400xf32, #tpu.memory_space<vmem>>, vector<1x4x640xf32>
    %168 = vector.shape_cast %167 : vector<1x4x640xf32> to vector<4x640xf32>
    %c8_215 = arith.constant 8 : index
    %c0_216 = arith.constant 0 : index
    %169 = vector.load %arg6[%c8_215, %c0_216] : memref<36x640xf32, #tpu.memory_space<vmem>>, vector<4x640xf32>
    tpu.vector_store %arg6[%c8_215, %c0_216], %168 {strides = array<i32>} : memref<36x640xf32, #tpu.memory_space<vmem>>, vector<4x640xf32>,
    %c0_217 = arith.constant 0 : index
    %c0_218 = arith.constant 0 : index
    %c1460 = arith.constant 1460 : index
    %170 = vector.load %arg1[%c0_217, %c0_218, %c1460] : memref<1x4x4400xf32, #tpu.memory_space<vmem>>, vector<1x4x640xf32>
    %171 = vector.shape_cast %170 : vector<1x4x640xf32> to vector<4x640xf32>
    %c12_219 = arith.constant 12 : index
    %c0_220 = arith.constant 0 : index
    %172 = vector.load %arg6[%c12_219, %c0_220] : memref<36x640xf32, #tpu.memory_space<vmem>>, vector<4x640xf32>
    tpu.vector_store %arg6[%c12_219, %c0_220], %171 {strides = array<i32>} : memref<36x640xf32, #tpu.memory_space<vmem>>, vector<4x640xf32>,
    %c0_221 = arith.constant 0 : index
    %c0_222 = arith.constant 0 : index
    %c1461 = arith.constant 1461 : index
    %173 = vector.load %arg1[%c0_221, %c0_222, %c1461] : memref<1x4x4400xf32, #tpu.memory_space<vmem>>, vector<1x4x640xf32>
    %174 = vector.shape_cast %173 : vector<1x4x640xf32> to vector<4x640xf32>
    %c16_223 = arith.constant 16 : index
    %c0_224 = arith.constant 0 : index
    %175 = vector.load %arg6[%c16_223, %c0_224] : memref<36x640xf32, #tpu.memory_space<vmem>>, vector<4x640xf32>
    tpu.vector_store %arg6[%c16_223, %c0_224], %174 {strides = array<i32>} : memref<36x640xf32, #tpu.memory_space<vmem>>, vector<4x640xf32>,
    %c0_225 = arith.constant 0 : index
    %c0_226 = arith.constant 0 : index
    %c1462 = arith.constant 1462 : index
    %176 = vector.load %arg1[%c0_225, %c0_226, %c1462] : memref<1x4x4400xf32, #tpu.memory_space<vmem>>, vector<1x4x640xf32>
    %177 = vector.shape_cast %176 : vector<1x4x640xf32> to vector<4x640xf32>
    %c20_227 = arith.constant 20 : index
    %c0_228 = arith.constant 0 : index
    %178 = vector.load %arg6[%c20_227, %c0_228] : memref<36x640xf32, #tpu.memory_space<vmem>>, vector<4x640xf32>
    tpu.vector_store %arg6[%c20_227, %c0_228], %177 {strides = array<i32>} : memref<36x640xf32, #tpu.memory_space<vmem>>, vector<4x640xf32>,
    %c0_229 = arith.constant 0 : index
    %c0_230 = arith.constant 0 : index
    %c1480 = arith.constant 1480 : index
    %179 = vector.load %arg1[%c0_229, %c0_230, %c1480] : memref<1x4x4400xf32, #tpu.memory_space<vmem>>, vector<1x4x640xf32>
    %180 = vector.shape_cast %179 : vector<1x4x640xf32> to vector<4x640xf32>
    %c24_231 = arith.constant 24 : index
    %c0_232 = arith.constant 0 : index
    %181 = vector.load %arg6[%c24_231, %c0_232] : memref<36x640xf32, #tpu.memory_space<vmem>>, vector<4x640xf32>
    tpu.vector_store %arg6[%c24_231, %c0_232], %180 {strides = array<i32>} : memref<36x640xf32, #tpu.memory_space<vmem>>, vector<4x640xf32>,
    %c0_233 = arith.constant 0 : index
    %c0_234 = arith.constant 0 : index
    %c1481 = arith.constant 1481 : index
    %182 = vector.load %arg1[%c0_233, %c0_234, %c1481] : memref<1x4x4400xf32, #tpu.memory_space<vmem>>, vector<1x4x640xf32>
    %183 = vector.shape_cast %182 : vector<1x4x640xf32> to vector<4x640xf32>
    %c28_235 = arith.constant 28 : index
    %c0_236 = arith.constant 0 : index
    %184 = vector.load %arg6[%c28_235, %c0_236] : memref<36x640xf32, #tpu.memory_space<vmem>>, vector<4x640xf32>
    tpu.vector_store %arg6[%c28_235, %c0_236], %183 {strides = array<i32>} : memref<36x640xf32, #tpu.memory_space<vmem>>, vector<4x640xf32>,
    %c0_237 = arith.constant 0 : index
    %c0_238 = arith.constant 0 : index
    %c1482 = arith.constant 1482 : index
    %185 = vector.load %arg1[%c0_237, %c0_238, %c1482] : memref<1x4x4400xf32, #tpu.memory_space<vmem>>, vector<1x4x640xf32>
    %186 = vector.shape_cast %185 : vector<1x4x640xf32> to vector<4x640xf32>
    %c32_239 = arith.constant 32 : index
    %c0_240 = arith.constant 0 : index
    %187 = vector.load %arg6[%c32_239, %c0_240] : memref<36x640xf32, #tpu.memory_space<vmem>>, vector<4x640xf32>
    tpu.vector_store %arg6[%c32_239, %c0_240], %186 {strides = array<i32>} : memref<36x640xf32, #tpu.memory_space<vmem>>, vector<4x640xf32>,
    %c2_241 = arith.constant 2 : index
    %c0_242 = arith.constant 0 : index
    %c0_243 = arith.constant 0 : index
    %188 = vector.load %arg2[%c2_241, %c0_242, %c0_243] : memref<3x8x36xf32, #tpu.memory_space<vmem>>, vector<1x8x36xf32>
    %189 = vector.shape_cast %188 : vector<1x8x36xf32> to vector<8x36xf32>
    %c0_244 = arith.constant 0 : index
    %c0_245 = arith.constant 0 : index
    %190 = vector.load %arg6[%c0_244, %c0_245] : memref<36x640xf32, #tpu.memory_space<vmem>>, vector<36x640xf32>
    %cst_246 = arith.constant dense<0.000000e+00> : vector<8x640xf32>
    %191 = tpu.matmul %189, %190, %cst_246 {dimension_numbers = #tpu.dot_dimension_numbers<[1], [0], [0], [1], [0, 0, 1, 1], [], []>} : vector<8x36xf32>, vector<36x640xf32>, vector<8x640xf32> -> vector<8x640xf32>
    %192 = arith.addf %160, %191 : vector<8x640xf32>
    %c0_247 = arith.constant 0 : index
    %c0_248 = arith.constant 0 : index
    %c640_249 = arith.constant 640 : index
    %193 = vector.load %arg3[%c0_247, %c0_248, %c640_249] : memref<1x8x3200xf32, #tpu.memory_space<vmem>>, vector<1x8x640xf32>
    %194 = vector.shape_cast %193 : vector<1x8x640xf32> to vector<8x640xf32>
    %195 = vector.shape_cast %192 : vector<8x640xf32> to vector<1x8x640xf32>
    tpu.vector_store %arg3[%c0_247, %c0_248, %c640_249], %195 {strides = array<i32>} : memref<1x8x3200xf32, #tpu.memory_space<vmem>>, vector<1x8x640xf32>,
    %c0_250 = arith.constant 0 : index
    %c0_251 = arith.constant 0 : index
    %c1280 = arith.constant 1280 : index
    %196 = vector.load %arg1[%c0_250, %c0_251, %c1280] : memref<1x4x4400xf32, #tpu.memory_space<vmem>>, vector<1x4x640xf32>
    %197 = vector.shape_cast %196 : vector<1x4x640xf32> to vector<4x640xf32>
    %c0_252 = arith.constant 0 : index
    %c0_253 = arith.constant 0 : index
    %198 = vector.load %arg4[%c0_252, %c0_253] : memref<36x640xf32, #tpu.memory_space<vmem>>, vector<4x640xf32>
    tpu.vector_store %arg4[%c0_252, %c0_253], %197 {strides = array<i32>} : memref<36x640xf32, #tpu.memory_space<vmem>>, vector<4x640xf32>,
    %c0_254 = arith.constant 0 : index
    %c0_255 = arith.constant 0 : index
    %c1281 = arith.constant 1281 : index
    %199 = vector.load %arg1[%c0_254, %c0_255, %c1281] : memref<1x4x4400xf32, #tpu.memory_space<vmem>>, vector<1x4x640xf32>
    %200 = vector.shape_cast %199 : vector<1x4x640xf32> to vector<4x640xf32>
    %c4_256 = arith.constant 4 : index
    %c0_257 = arith.constant 0 : index
    %201 = vector.load %arg4[%c4_256, %c0_257] : memref<36x640xf32, #tpu.memory_space<vmem>>, vector<4x640xf32>
    tpu.vector_store %arg4[%c4_256, %c0_257], %200 {strides = array<i32>} : memref<36x640xf32, #tpu.memory_space<vmem>>, vector<4x640xf32>,
    %c0_258 = arith.constant 0 : index
    %c0_259 = arith.constant 0 : index
    %c1282 = arith.constant 1282 : index
    %202 = vector.load %arg1[%c0_258, %c0_259, %c1282] : memref<1x4x4400xf32, #tpu.memory_space<vmem>>, vector<1x4x640xf32>
    %203 = vector.shape_cast %202 : vector<1x4x640xf32> to vector<4x640xf32>
    %c8_260 = arith.constant 8 : index
    %c0_261 = arith.constant 0 : index
    %204 = vector.load %arg4[%c8_260, %c0_261] : memref<36x640xf32, #tpu.memory_space<vmem>>, vector<4x640xf32>
    tpu.vector_store %arg4[%c8_260, %c0_261], %203 {strides = array<i32>} : memref<36x640xf32, #tpu.memory_space<vmem>>, vector<4x640xf32>,
    %c0_262 = arith.constant 0 : index
    %c0_263 = arith.constant 0 : index
    %c1300 = arith.constant 1300 : index
    %205 = vector.load %arg1[%c0_262, %c0_263, %c1300] : memref<1x4x4400xf32, #tpu.memory_space<vmem>>, vector<1x4x640xf32>
    %206 = vector.shape_cast %205 : vector<1x4x640xf32> to vector<4x640xf32>
    %c12_264 = arith.constant 12 : index
    %c0_265 = arith.constant 0 : index
    %207 = vector.load %arg4[%c12_264, %c0_265] : memref<36x640xf32, #tpu.memory_space<vmem>>, vector<4x640xf32>
    tpu.vector_store %arg4[%c12_264, %c0_265], %206 {strides = array<i32>} : memref<36x640xf32, #tpu.memory_space<vmem>>, vector<4x640xf32>,
    %c0_266 = arith.constant 0 : index
    %c0_267 = arith.constant 0 : index
    %c1301 = arith.constant 1301 : index
    %208 = vector.load %arg1[%c0_266, %c0_267, %c1301] : memref<1x4x4400xf32, #tpu.memory_space<vmem>>, vector<1x4x640xf32>
    %209 = vector.shape_cast %208 : vector<1x4x640xf32> to vector<4x640xf32>
    %c16_268 = arith.constant 16 : index
    %c0_269 = arith.constant 0 : index
    %210 = vector.load %arg4[%c16_268, %c0_269] : memref<36x640xf32, #tpu.memory_space<vmem>>, vector<4x640xf32>
    tpu.vector_store %arg4[%c16_268, %c0_269], %209 {strides = array<i32>} : memref<36x640xf32, #tpu.memory_space<vmem>>, vector<4x640xf32>,
    %c0_270 = arith.constant 0 : index
    %c0_271 = arith.constant 0 : index
    %c1302 = arith.constant 1302 : index
    %211 = vector.load %arg1[%c0_270, %c0_271, %c1302] : memref<1x4x4400xf32, #tpu.memory_space<vmem>>, vector<1x4x640xf32>
    %212 = vector.shape_cast %211 : vector<1x4x640xf32> to vector<4x640xf32>
    %c20_272 = arith.constant 20 : index
    %c0_273 = arith.constant 0 : index
    %213 = vector.load %arg4[%c20_272, %c0_273] : memref<36x640xf32, #tpu.memory_space<vmem>>, vector<4x640xf32>
    tpu.vector_store %arg4[%c20_272, %c0_273], %212 {strides = array<i32>} : memref<36x640xf32, #tpu.memory_space<vmem>>, vector<4x640xf32>,
    %c0_274 = arith.constant 0 : index
    %c0_275 = arith.constant 0 : index
    %c1320 = arith.constant 1320 : index
    %214 = vector.load %arg1[%c0_274, %c0_275, %c1320] : memref<1x4x4400xf32, #tpu.memory_space<vmem>>, vector<1x4x640xf32>
    %215 = vector.shape_cast %214 : vector<1x4x640xf32> to vector<4x640xf32>
    %c24_276 = arith.constant 24 : index
    %c0_277 = arith.constant 0 : index
    %216 = vector.load %arg4[%c24_276, %c0_277] : memref<36x640xf32, #tpu.memory_space<vmem>>, vector<4x640xf32>
    tpu.vector_store %arg4[%c24_276, %c0_277], %215 {strides = array<i32>} : memref<36x640xf32, #tpu.memory_space<vmem>>, vector<4x640xf32>,
    %c0_278 = arith.constant 0 : index
    %c0_279 = arith.constant 0 : index
    %c1321 = arith.constant 1321 : index
    %217 = vector.load %arg1[%c0_278, %c0_279, %c1321] : memref<1x4x4400xf32, #tpu.memory_space<vmem>>, vector<1x4x640xf32>
    %218 = vector.shape_cast %217 : vector<1x4x640xf32> to vector<4x640xf32>
    %c28_280 = arith.constant 28 : index
    %c0_281 = arith.constant 0 : index
    %219 = vector.load %arg4[%c28_280, %c0_281] : memref<36x640xf32, #tpu.memory_space<vmem>>, vector<4x640xf32>
    tpu.vector_store %arg4[%c28_280, %c0_281], %218 {strides = array<i32>} : memref<36x640xf32, #tpu.memory_space<vmem>>, vector<4x640xf32>,
    %c0_282 = arith.constant 0 : index
    %c0_283 = arith.constant 0 : index
    %c1322 = arith.constant 1322 : index
    %220 = vector.load %arg1[%c0_282, %c0_283, %c1322] : memref<1x4x4400xf32, #tpu.memory_space<vmem>>, vector<1x4x640xf32>
    %221 = vector.shape_cast %220 : vector<1x4x640xf32> to vector<4x640xf32>
    %c32_284 = arith.constant 32 : index
    %c0_285 = arith.constant 0 : index
    %222 = vector.load %arg4[%c32_284, %c0_285] : memref<36x640xf32, #tpu.memory_space<vmem>>, vector<4x640xf32>
    tpu.vector_store %arg4[%c32_284, %c0_285], %221 {strides = array<i32>} : memref<36x640xf32, #tpu.memory_space<vmem>>, vector<4x640xf32>,
    %c0_286 = arith.constant 0 : index
    %c0_287 = arith.constant 0 : index
    %c0_288 = arith.constant 0 : index
    %223 = vector.load %arg2[%c0_286, %c0_287, %c0_288] : memref<3x8x36xf32, #tpu.memory_space<vmem>>, vector<1x8x36xf32>
    %224 = vector.shape_cast %223 : vector<1x8x36xf32> to vector<8x36xf32>
    %c0_289 = arith.constant 0 : index
    %c0_290 = arith.constant 0 : index
    %225 = vector.load %arg4[%c0_289, %c0_290] : memref<36x640xf32, #tpu.memory_space<vmem>>, vector<36x640xf32>
    %cst_291 = arith.constant dense<0.000000e+00> : vector<8x640xf32>
    %226 = tpu.matmul %224, %225, %cst_291 {dimension_numbers = #tpu.dot_dimension_numbers<[1], [0], [0], [1], [0, 0, 1, 1], [], []>} : vector<8x36xf32>, vector<36x640xf32>, vector<8x640xf32> -> vector<8x640xf32>
    %c0_292 = arith.constant 0 : index
    %c0_293 = arith.constant 0 : index
    %c1680 = arith.constant 1680 : index
    %227 = vector.load %arg1[%c0_292, %c0_293, %c1680] : memref<1x4x4400xf32, #tpu.memory_space<vmem>>, vector<1x4x640xf32>
    %228 = vector.shape_cast %227 : vector<1x4x640xf32> to vector<4x640xf32>
    %c0_294 = arith.constant 0 : index
    %c0_295 = arith.constant 0 : index
    %229 = vector.load %arg5[%c0_294, %c0_295] : memref<36x640xf32, #tpu.memory_space<vmem>>, vector<4x640xf32>
    tpu.vector_store %arg5[%c0_294, %c0_295], %228 {strides = array<i32>} : memref<36x640xf32, #tpu.memory_space<vmem>>, vector<4x640xf32>,
    %c0_296 = arith.constant 0 : index
    %c0_297 = arith.constant 0 : index
    %c1681 = arith.constant 1681 : index
    %230 = vector.load %arg1[%c0_296, %c0_297, %c1681] : memref<1x4x4400xf32, #tpu.memory_space<vmem>>, vector<1x4x640xf32>
    %231 = vector.shape_cast %230 : vector<1x4x640xf32> to vector<4x640xf32>
    %c4_298 = arith.constant 4 : index
    %c0_299 = arith.constant 0 : index
    %232 = vector.load %arg5[%c4_298, %c0_299] : memref<36x640xf32, #tpu.memory_space<vmem>>, vector<4x640xf32>
    tpu.vector_store %arg5[%c4_298, %c0_299], %231 {strides = array<i32>} : memref<36x640xf32, #tpu.memory_space<vmem>>, vector<4x640xf32>,
    %c0_300 = arith.constant 0 : index
    %c0_301 = arith.constant 0 : index
    %c1682 = arith.constant 1682 : index
    %233 = vector.load %arg1[%c0_300, %c0_301, %c1682] : memref<1x4x4400xf32, #tpu.memory_space<vmem>>, vector<1x4x640xf32>
    %234 = vector.shape_cast %233 : vector<1x4x640xf32> to vector<4x640xf32>
    %c8_302 = arith.constant 8 : index
    %c0_303 = arith.constant 0 : index
    %235 = vector.load %arg5[%c8_302, %c0_303] : memref<36x640xf32, #tpu.memory_space<vmem>>, vector<4x640xf32>
    tpu.vector_store %arg5[%c8_302, %c0_303], %234 {strides = array<i32>} : memref<36x640xf32, #tpu.memory_space<vmem>>, vector<4x640xf32>,
    %c0_304 = arith.constant 0 : index
    %c0_305 = arith.constant 0 : index
    %c1700 = arith.constant 1700 : index
    %236 = vector.load %arg1[%c0_304, %c0_305, %c1700] : memref<1x4x4400xf32, #tpu.memory_space<vmem>>, vector<1x4x640xf32>
    %237 = vector.shape_cast %236 : vector<1x4x640xf32> to vector<4x640xf32>
    %c12_306 = arith.constant 12 : index
    %c0_307 = arith.constant 0 : index
    %238 = vector.load %arg5[%c12_306, %c0_307] : memref<36x640xf32, #tpu.memory_space<vmem>>, vector<4x640xf32>
    tpu.vector_store %arg5[%c12_306, %c0_307], %237 {strides = array<i32>} : memref<36x640xf32, #tpu.memory_space<vmem>>, vector<4x640xf32>,
    %c0_308 = arith.constant 0 : index
    %c0_309 = arith.constant 0 : index
    %c1701 = arith.constant 1701 : index
    %239 = vector.load %arg1[%c0_308, %c0_309, %c1701] : memref<1x4x4400xf32, #tpu.memory_space<vmem>>, vector<1x4x640xf32>
    %240 = vector.shape_cast %239 : vector<1x4x640xf32> to vector<4x640xf32>
    %c16_310 = arith.constant 16 : index
    %c0_311 = arith.constant 0 : index
    %241 = vector.load %arg5[%c16_310, %c0_311] : memref<36x640xf32, #tpu.memory_space<vmem>>, vector<4x640xf32>
    tpu.vector_store %arg5[%c16_310, %c0_311], %240 {strides = array<i32>} : memref<36x640xf32, #tpu.memory_space<vmem>>, vector<4x640xf32>,
    %c0_312 = arith.constant 0 : index
    %c0_313 = arith.constant 0 : index
    %c1702 = arith.constant 1702 : index
    %242 = vector.load %arg1[%c0_312, %c0_313, %c1702] : memref<1x4x4400xf32, #tpu.memory_space<vmem>>, vector<1x4x640xf32>
    %243 = vector.shape_cast %242 : vector<1x4x640xf32> to vector<4x640xf32>
    %c20_314 = arith.constant 20 : index
    %c0_315 = arith.constant 0 : index
    %244 = vector.load %arg5[%c20_314, %c0_315] : memref<36x640xf32, #tpu.memory_space<vmem>>, vector<4x640xf32>
    tpu.vector_store %arg5[%c20_314, %c0_315], %243 {strides = array<i32>} : memref<36x640xf32, #tpu.memory_space<vmem>>, vector<4x640xf32>,
    %c0_316 = arith.constant 0 : index
    %c0_317 = arith.constant 0 : index
    %c1720 = arith.constant 1720 : index
    %245 = vector.load %arg1[%c0_316, %c0_317, %c1720] : memref<1x4x4400xf32, #tpu.memory_space<vmem>>, vector<1x4x640xf32>
    %246 = vector.shape_cast %245 : vector<1x4x640xf32> to vector<4x640xf32>
    %c24_318 = arith.constant 24 : index
    %c0_319 = arith.constant 0 : index
    %247 = vector.load %arg5[%c24_318, %c0_319] : memref<36x640xf32, #tpu.memory_space<vmem>>, vector<4x640xf32>
    tpu.vector_store %arg5[%c24_318, %c0_319], %246 {strides = array<i32>} : memref<36x640xf32, #tpu.memory_space<vmem>>, vector<4x640xf32>,
    %c0_320 = arith.constant 0 : index
    %c0_321 = arith.constant 0 : index
    %c1721 = arith.constant 1721 : index
    %248 = vector.load %arg1[%c0_320, %c0_321, %c1721] : memref<1x4x4400xf32, #tpu.memory_space<vmem>>, vector<1x4x640xf32>
    %249 = vector.shape_cast %248 : vector<1x4x640xf32> to vector<4x640xf32>
    %c28_322 = arith.constant 28 : index
    %c0_323 = arith.constant 0 : index
    %250 = vector.load %arg5[%c28_322, %c0_323] : memref<36x640xf32, #tpu.memory_space<vmem>>, vector<4x640xf32>
    tpu.vector_store %arg5[%c28_322, %c0_323], %249 {strides = array<i32>} : memref<36x640xf32, #tpu.memory_space<vmem>>, vector<4x640xf32>,
    %c0_324 = arith.constant 0 : index
    %c0_325 = arith.constant 0 : index
    %c1722 = arith.constant 1722 : index
    %251 = vector.load %arg1[%c0_324, %c0_325, %c1722] : memref<1x4x4400xf32, #tpu.memory_space<vmem>>, vector<1x4x640xf32>
    %252 = vector.shape_cast %251 : vector<1x4x640xf32> to vector<4x640xf32>
    %c32_326 = arith.constant 32 : index
    %c0_327 = arith.constant 0 : index
    %253 = vector.load %arg5[%c32_326, %c0_327] : memref<36x640xf32, #tpu.memory_space<vmem>>, vector<4x640xf32>
    tpu.vector_store %arg5[%c32_326, %c0_327], %252 {strides = array<i32>} : memref<36x640xf32, #tpu.memory_space<vmem>>, vector<4x640xf32>,
    %c1_328 = arith.constant 1 : index
    %c0_329 = arith.constant 0 : index
    %c0_330 = arith.constant 0 : index
    %254 = vector.load %arg2[%c1_328, %c0_329, %c0_330] : memref<3x8x36xf32, #tpu.memory_space<vmem>>, vector<1x8x36xf32>
    %255 = vector.shape_cast %254 : vector<1x8x36xf32> to vector<8x36xf32>
    %c0_331 = arith.constant 0 : index
    %c0_332 = arith.constant 0 : index
    %256 = vector.load %arg5[%c0_331, %c0_332] : memref<36x640xf32, #tpu.memory_space<vmem>>, vector<36x640xf32>
    %cst_333 = arith.constant dense<0.000000e+00> : vector<8x640xf32>
    %257 = tpu.matmul %255, %256, %cst_333 {dimension_numbers = #tpu.dot_dimension_numbers<[1], [0], [0], [1], [0, 0, 1, 1], [], []>} : vector<8x36xf32>, vector<36x640xf32>, vector<8x640xf32> -> vector<8x640xf32>
    %258 = arith.addf %226, %257 : vector<8x640xf32>
    %c0_334 = arith.constant 0 : index
    %c0_335 = arith.constant 0 : index
    %c2080 = arith.constant 2080 : index
    %259 = vector.load %arg1[%c0_334, %c0_335, %c2080] : memref<1x4x4400xf32, #tpu.memory_space<vmem>>, vector<1x4x640xf32>
    %260 = vector.shape_cast %259 : vector<1x4x640xf32> to vector<4x640xf32>
    %c0_336 = arith.constant 0 : index
    %c0_337 = arith.constant 0 : index
    %261 = vector.load %arg6[%c0_336, %c0_337] : memref<36x640xf32, #tpu.memory_space<vmem>>, vector<4x640xf32>
    tpu.vector_store %arg6[%c0_336, %c0_337], %260 {strides = array<i32>} : memref<36x640xf32, #tpu.memory_space<vmem>>, vector<4x640xf32>,
    %c0_338 = arith.constant 0 : index
    %c0_339 = arith.constant 0 : index
    %c2081 = arith.constant 2081 : index
    %262 = vector.load %arg1[%c0_338, %c0_339, %c2081] : memref<1x4x4400xf32, #tpu.memory_space<vmem>>, vector<1x4x640xf32>
    %263 = vector.shape_cast %262 : vector<1x4x640xf32> to vector<4x640xf32>
    %c4_340 = arith.constant 4 : index
    %c0_341 = arith.constant 0 : index
    %264 = vector.load %arg6[%c4_340, %c0_341] : memref<36x640xf32, #tpu.memory_space<vmem>>, vector<4x640xf32>
    tpu.vector_store %arg6[%c4_340, %c0_341], %263 {strides = array<i32>} : memref<36x640xf32, #tpu.memory_space<vmem>>, vector<4x640xf32>,
    %c0_342 = arith.constant 0 : index
    %c0_343 = arith.constant 0 : index
    %c2082 = arith.constant 2082 : index
    %265 = vector.load %arg1[%c0_342, %c0_343, %c2082] : memref<1x4x4400xf32, #tpu.memory_space<vmem>>, vector<1x4x640xf32>
    %266 = vector.shape_cast %265 : vector<1x4x640xf32> to vector<4x640xf32>
    %c8_344 = arith.constant 8 : index
    %c0_345 = arith.constant 0 : index
    %267 = vector.load %arg6[%c8_344, %c0_345] : memref<36x640xf32, #tpu.memory_space<vmem>>, vector<4x640xf32>
    tpu.vector_store %arg6[%c8_344, %c0_345], %266 {strides = array<i32>} : memref<36x640xf32, #tpu.memory_space<vmem>>, vector<4x640xf32>,
    %c0_346 = arith.constant 0 : index
    %c0_347 = arith.constant 0 : index
    %c2100 = arith.constant 2100 : index
    %268 = vector.load %arg1[%c0_346, %c0_347, %c2100] : memref<1x4x4400xf32, #tpu.memory_space<vmem>>, vector<1x4x640xf32>
    %269 = vector.shape_cast %268 : vector<1x4x640xf32> to vector<4x640xf32>
    %c12_348 = arith.constant 12 : index
    %c0_349 = arith.constant 0 : index
    %270 = vector.load %arg6[%c12_348, %c0_349] : memref<36x640xf32, #tpu.memory_space<vmem>>, vector<4x640xf32>
    tpu.vector_store %arg6[%c12_348, %c0_349], %269 {strides = array<i32>} : memref<36x640xf32, #tpu.memory_space<vmem>>, vector<4x640xf32>,
    %c0_350 = arith.constant 0 : index
    %c0_351 = arith.constant 0 : index
    %c2101 = arith.constant 2101 : index
    %271 = vector.load %arg1[%c0_350, %c0_351, %c2101] : memref<1x4x4400xf32, #tpu.memory_space<vmem>>, vector<1x4x640xf32>
    %272 = vector.shape_cast %271 : vector<1x4x640xf32> to vector<4x640xf32>
    %c16_352 = arith.constant 16 : index
    %c0_353 = arith.constant 0 : index
    %273 = vector.load %arg6[%c16_352, %c0_353] : memref<36x640xf32, #tpu.memory_space<vmem>>, vector<4x640xf32>
    tpu.vector_store %arg6[%c16_352, %c0_353], %272 {strides = array<i32>} : memref<36x640xf32, #tpu.memory_space<vmem>>, vector<4x640xf32>,
    %c0_354 = arith.constant 0 : index
    %c0_355 = arith.constant 0 : index
    %c2102 = arith.constant 2102 : index
    %274 = vector.load %arg1[%c0_354, %c0_355, %c2102] : memref<1x4x4400xf32, #tpu.memory_space<vmem>>, vector<1x4x640xf32>
    %275 = vector.shape_cast %274 : vector<1x4x640xf32> to vector<4x640xf32>
    %c20_356 = arith.constant 20 : index
    %c0_357 = arith.constant 0 : index
    %276 = vector.load %arg6[%c20_356, %c0_357] : memref<36x640xf32, #tpu.memory_space<vmem>>, vector<4x640xf32>
    tpu.vector_store %arg6[%c20_356, %c0_357], %275 {strides = array<i32>} : memref<36x640xf32, #tpu.memory_space<vmem>>, vector<4x640xf32>,
    %c0_358 = arith.constant 0 : index
    %c0_359 = arith.constant 0 : index
    %c2120 = arith.constant 2120 : index
    %277 = vector.load %arg1[%c0_358, %c0_359, %c2120] : memref<1x4x4400xf32, #tpu.memory_space<vmem>>, vector<1x4x640xf32>
    %278 = vector.shape_cast %277 : vector<1x4x640xf32> to vector<4x640xf32>
    %c24_360 = arith.constant 24 : index
    %c0_361 = arith.constant 0 : index
    %279 = vector.load %arg6[%c24_360, %c0_361] : memref<36x640xf32, #tpu.memory_space<vmem>>, vector<4x640xf32>
    tpu.vector_store %arg6[%c24_360, %c0_361], %278 {strides = array<i32>} : memref<36x640xf32, #tpu.memory_space<vmem>>, vector<4x640xf32>,
    %c0_362 = arith.constant 0 : index
    %c0_363 = arith.constant 0 : index
    %c2121 = arith.constant 2121 : index
    %280 = vector.load %arg1[%c0_362, %c0_363, %c2121] : memref<1x4x4400xf32, #tpu.memory_space<vmem>>, vector<1x4x640xf32>
    %281 = vector.shape_cast %280 : vector<1x4x640xf32> to vector<4x640xf32>
    %c28_364 = arith.constant 28 : index
    %c0_365 = arith.constant 0 : index
    %282 = vector.load %arg6[%c28_364, %c0_365] : memref<36x640xf32, #tpu.memory_space<vmem>>, vector<4x640xf32>
    tpu.vector_store %arg6[%c28_364, %c0_365], %281 {strides = array<i32>} : memref<36x640xf32, #tpu.memory_space<vmem>>, vector<4x640xf32>,
    %c0_366 = arith.constant 0 : index
    %c0_367 = arith.constant 0 : index
    %c2122 = arith.constant 2122 : index
    %283 = vector.load %arg1[%c0_366, %c0_367, %c2122] : memref<1x4x4400xf32, #tpu.memory_space<vmem>>, vector<1x4x640xf32>
    %284 = vector.shape_cast %283 : vector<1x4x640xf32> to vector<4x640xf32>
    %c32_368 = arith.constant 32 : index
    %c0_369 = arith.constant 0 : index
    %285 = vector.load %arg6[%c32_368, %c0_369] : memref<36x640xf32, #tpu.memory_space<vmem>>, vector<4x640xf32>
    tpu.vector_store %arg6[%c32_368, %c0_369], %284 {strides = array<i32>} : memref<36x640xf32, #tpu.memory_space<vmem>>, vector<4x640xf32>,
    %c2_370 = arith.constant 2 : index
    %c0_371 = arith.constant 0 : index
    %c0_372 = arith.constant 0 : index
    %286 = vector.load %arg2[%c2_370, %c0_371, %c0_372] : memref<3x8x36xf32, #tpu.memory_space<vmem>>, vector<1x8x36xf32>
    %287 = vector.shape_cast %286 : vector<1x8x36xf32> to vector<8x36xf32>
    %c0_373 = arith.constant 0 : index
    %c0_374 = arith.constant 0 : index
    %288 = vector.load %arg6[%c0_373, %c0_374] : memref<36x640xf32, #tpu.memory_space<vmem>>, vector<36x640xf32>
    %cst_375 = arith.constant dense<0.000000e+00> : vector<8x640xf32>
    %289 = tpu.matmul %287, %288, %cst_375 {dimension_numbers = #tpu.dot_dimension_numbers<[1], [0], [0], [1], [0, 0, 1, 1], [], []>} : vector<8x36xf32>, vector<36x640xf32>, vector<8x640xf32> -> vector<8x640xf32>
    %290 = arith.addf %258, %289 : vector<8x640xf32>
    %c0_376 = arith.constant 0 : index
    %c0_377 = arith.constant 0 : index
    %c1280_378 = arith.constant 1280 : index
    %291 = vector.load %arg3[%c0_376, %c0_377, %c1280_378] : memref<1x8x3200xf32, #tpu.memory_space<vmem>>, vector<1x8x640xf32>
    %292 = vector.shape_cast %291 : vector<1x8x640xf32> to vector<8x640xf32>
    %293 = vector.shape_cast %290 : vector<8x640xf32> to vector<1x8x640xf32>
    tpu.vector_store %arg3[%c0_376, %c0_377, %c1280_378], %293 {strides = array<i32>} : memref<1x8x3200xf32, #tpu.memory_space<vmem>>, vector<1x8x640xf32>,
    %c0_379 = arith.constant 0 : index
    %c0_380 = arith.constant 0 : index
    %c1920 = arith.constant 1920 : index
    %294 = vector.load %arg1[%c0_379, %c0_380, %c1920] : memref<1x4x4400xf32, #tpu.memory_space<vmem>>, vector<1x4x640xf32>
    %295 = vector.shape_cast %294 : vector<1x4x640xf32> to vector<4x640xf32>
    %c0_381 = arith.constant 0 : index
    %c0_382 = arith.constant 0 : index
    %296 = vector.load %arg4[%c0_381, %c0_382] : memref<36x640xf32, #tpu.memory_space<vmem>>, vector<4x640xf32>
    tpu.vector_store %arg4[%c0_381, %c0_382], %295 {strides = array<i32>} : memref<36x640xf32, #tpu.memory_space<vmem>>, vector<4x640xf32>,
    %c0_383 = arith.constant 0 : index
    %c0_384 = arith.constant 0 : index
    %c1921 = arith.constant 1921 : index
    %297 = vector.load %arg1[%c0_383, %c0_384, %c1921] : memref<1x4x4400xf32, #tpu.memory_space<vmem>>, vector<1x4x640xf32>
    %298 = vector.shape_cast %297 : vector<1x4x640xf32> to vector<4x640xf32>
    %c4_385 = arith.constant 4 : index
    %c0_386 = arith.constant 0 : index
    %299 = vector.load %arg4[%c4_385, %c0_386] : memref<36x640xf32, #tpu.memory_space<vmem>>, vector<4x640xf32>
    tpu.vector_store %arg4[%c4_385, %c0_386], %298 {strides = array<i32>} : memref<36x640xf32, #tpu.memory_space<vmem>>, vector<4x640xf32>,
    %c0_387 = arith.constant 0 : index
    %c0_388 = arith.constant 0 : index
    %c1922 = arith.constant 1922 : index
    %300 = vector.load %arg1[%c0_387, %c0_388, %c1922] : memref<1x4x4400xf32, #tpu.memory_space<vmem>>, vector<1x4x640xf32>
    %301 = vector.shape_cast %300 : vector<1x4x640xf32> to vector<4x640xf32>
    %c8_389 = arith.constant 8 : index
    %c0_390 = arith.constant 0 : index
    %302 = vector.load %arg4[%c8_389, %c0_390] : memref<36x640xf32, #tpu.memory_space<vmem>>, vector<4x640xf32>
    tpu.vector_store %arg4[%c8_389, %c0_390], %301 {strides = array<i32>} : memref<36x640xf32, #tpu.memory_space<vmem>>, vector<4x640xf32>,
    %c0_391 = arith.constant 0 : index
    %c0_392 = arith.constant 0 : index
    %c1940 = arith.constant 1940 : index
    %303 = vector.load %arg1[%c0_391, %c0_392, %c1940] : memref<1x4x4400xf32, #tpu.memory_space<vmem>>, vector<1x4x640xf32>
    %304 = vector.shape_cast %303 : vector<1x4x640xf32> to vector<4x640xf32>
    %c12_393 = arith.constant 12 : index
    %c0_394 = arith.constant 0 : index
    %305 = vector.load %arg4[%c12_393, %c0_394] : memref<36x640xf32, #tpu.memory_space<vmem>>, vector<4x640xf32>
    tpu.vector_store %arg4[%c12_393, %c0_394], %304 {strides = array<i32>} : memref<36x640xf32, #tpu.memory_space<vmem>>, vector<4x640xf32>,
    %c0_395 = arith.constant 0 : index
    %c0_396 = arith.constant 0 : index
    %c1941 = arith.constant 1941 : index
    %306 = vector.load %arg1[%c0_395, %c0_396, %c1941] : memref<1x4x4400xf32, #tpu.memory_space<vmem>>, vector<1x4x640xf32>
    %307 = vector.shape_cast %306 : vector<1x4x640xf32> to vector<4x640xf32>
    %c16_397 = arith.constant 16 : index
    %c0_398 = arith.constant 0 : index
    %308 = vector.load %arg4[%c16_397, %c0_398] : memref<36x640xf32, #tpu.memory_space<vmem>>, vector<4x640xf32>
    tpu.vector_store %arg4[%c16_397, %c0_398], %307 {strides = array<i32>} : memref<36x640xf32, #tpu.memory_space<vmem>>, vector<4x640xf32>,
    %c0_399 = arith.constant 0 : index
    %c0_400 = arith.constant 0 : index
    %c1942 = arith.constant 1942 : index
    %309 = vector.load %arg1[%c0_399, %c0_400, %c1942] : memref<1x4x4400xf32, #tpu.memory_space<vmem>>, vector<1x4x640xf32>
    %310 = vector.shape_cast %309 : vector<1x4x640xf32> to vector<4x640xf32>
    %c20_401 = arith.constant 20 : index
    %c0_402 = arith.constant 0 : index
    %311 = vector.load %arg4[%c20_401, %c0_402] : memref<36x640xf32, #tpu.memory_space<vmem>>, vector<4x640xf32>
    tpu.vector_store %arg4[%c20_401, %c0_402], %310 {strides = array<i32>} : memref<36x640xf32, #tpu.memory_space<vmem>>, vector<4x640xf32>,
    %c0_403 = arith.constant 0 : index
    %c0_404 = arith.constant 0 : index
    %c1960 = arith.constant 1960 : index
    %312 = vector.load %arg1[%c0_403, %c0_404, %c1960] : memref<1x4x4400xf32, #tpu.memory_space<vmem>>, vector<1x4x640xf32>
    %313 = vector.shape_cast %312 : vector<1x4x640xf32> to vector<4x640xf32>
    %c24_405 = arith.constant 24 : index
    %c0_406 = arith.constant 0 : index
    %314 = vector.load %arg4[%c24_405, %c0_406] : memref<36x640xf32, #tpu.memory_space<vmem>>, vector<4x640xf32>
    tpu.vector_store %arg4[%c24_405, %c0_406], %313 {strides = array<i32>} : memref<36x640xf32, #tpu.memory_space<vmem>>, vector<4x640xf32>,
    %c0_407 = arith.constant 0 : index
    %c0_408 = arith.constant 0 : index
    %c1961 = arith.constant 1961 : index
    %315 = vector.load %arg1[%c0_407, %c0_408, %c1961] : memref<1x4x4400xf32, #tpu.memory_space<vmem>>, vector<1x4x640xf32>
    %316 = vector.shape_cast %315 : vector<1x4x640xf32> to vector<4x640xf32>
    %c28_409 = arith.constant 28 : index
    %c0_410 = arith.constant 0 : index
    %317 = vector.load %arg4[%c28_409, %c0_410] : memref<36x640xf32, #tpu.memory_space<vmem>>, vector<4x640xf32>
    tpu.vector_store %arg4[%c28_409, %c0_410], %316 {strides = array<i32>} : memref<36x640xf32, #tpu.memory_space<vmem>>, vector<4x640xf32>,
    %c0_411 = arith.constant 0 : index
    %c0_412 = arith.constant 0 : index
    %c1962 = arith.constant 1962 : index
    %318 = vector.load %arg1[%c0_411, %c0_412, %c1962] : memref<1x4x4400xf32, #tpu.memory_space<vmem>>, vector<1x4x640xf32>
    %319 = vector.shape_cast %318 : vector<1x4x640xf32> to vector<4x640xf32>
    %c32_413 = arith.constant 32 : index
    %c0_414 = arith.constant 0 : index
    %320 = vector.load %arg4[%c32_413, %c0_414] : memref<36x640xf32, #tpu.memory_space<vmem>>, vector<4x640xf32>
    tpu.vector_store %arg4[%c32_413, %c0_414], %319 {strides = array<i32>} : memref<36x640xf32, #tpu.memory_space<vmem>>, vector<4x640xf32>,
    %c0_415 = arith.constant 0 : index
    %c0_416 = arith.constant 0 : index
    %c0_417 = arith.constant 0 : index
    %321 = vector.load %arg2[%c0_415, %c0_416, %c0_417] : memref<3x8x36xf32, #tpu.memory_space<vmem>>, vector<1x8x36xf32>
    %322 = vector.shape_cast %321 : vector<1x8x36xf32> to vector<8x36xf32>
    %c0_418 = arith.constant 0 : index
    %c0_419 = arith.constant 0 : index
    %323 = vector.load %arg4[%c0_418, %c0_419] : memref<36x640xf32, #tpu.memory_space<vmem>>, vector<36x640xf32>
    %cst_420 = arith.constant dense<0.000000e+00> : vector<8x640xf32>
    %324 = tpu.matmul %322, %323, %cst_420 {dimension_numbers = #tpu.dot_dimension_numbers<[1], [0], [0], [1], [0, 0, 1, 1], [], []>} : vector<8x36xf32>, vector<36x640xf32>, vector<8x640xf32> -> vector<8x640xf32>
    %c0_421 = arith.constant 0 : index
    %c0_422 = arith.constant 0 : index
    %c2320 = arith.constant 2320 : index
    %325 = vector.load %arg1[%c0_421, %c0_422, %c2320] : memref<1x4x4400xf32, #tpu.memory_space<vmem>>, vector<1x4x640xf32>
    %326 = vector.shape_cast %325 : vector<1x4x640xf32> to vector<4x640xf32>
    %c0_423 = arith.constant 0 : index
    %c0_424 = arith.constant 0 : index
    %327 = vector.load %arg5[%c0_423, %c0_424] : memref<36x640xf32, #tpu.memory_space<vmem>>, vector<4x640xf32>
    tpu.vector_store %arg5[%c0_423, %c0_424], %326 {strides = array<i32>} : memref<36x640xf32, #tpu.memory_space<vmem>>, vector<4x640xf32>,
    %c0_425 = arith.constant 0 : index
    %c0_426 = arith.constant 0 : index
    %c2321 = arith.constant 2321 : index
    %328 = vector.load %arg1[%c0_425, %c0_426, %c2321] : memref<1x4x4400xf32, #tpu.memory_space<vmem>>, vector<1x4x640xf32>
    %329 = vector.shape_cast %328 : vector<1x4x640xf32> to vector<4x640xf32>
    %c4_427 = arith.constant 4 : index
    %c0_428 = arith.constant 0 : index
    %330 = vector.load %arg5[%c4_427, %c0_428] : memref<36x640xf32, #tpu.memory_space<vmem>>, vector<4x640xf32>
    tpu.vector_store %arg5[%c4_427, %c0_428], %329 {strides = array<i32>} : memref<36x640xf32, #tpu.memory_space<vmem>>, vector<4x640xf32>,
    %c0_429 = arith.constant 0 : index
    %c0_430 = arith.constant 0 : index
    %c2322 = arith.constant 2322 : index
    %331 = vector.load %arg1[%c0_429, %c0_430, %c2322] : memref<1x4x4400xf32, #tpu.memory_space<vmem>>, vector<1x4x640xf32>
    %332 = vector.shape_cast %331 : vector<1x4x640xf32> to vector<4x640xf32>
    %c8_431 = arith.constant 8 : index
    %c0_432 = arith.constant 0 : index
    %333 = vector.load %arg5[%c8_431, %c0_432] : memref<36x640xf32, #tpu.memory_space<vmem>>, vector<4x640xf32>
    tpu.vector_store %arg5[%c8_431, %c0_432], %332 {strides = array<i32>} : memref<36x640xf32, #tpu.memory_space<vmem>>, vector<4x640xf32>,
    %c0_433 = arith.constant 0 : index
    %c0_434 = arith.constant 0 : index
    %c2340 = arith.constant 2340 : index
    %334 = vector.load %arg1[%c0_433, %c0_434, %c2340] : memref<1x4x4400xf32, #tpu.memory_space<vmem>>, vector<1x4x640xf32>
    %335 = vector.shape_cast %334 : vector<1x4x640xf32> to vector<4x640xf32>
    %c12_435 = arith.constant 12 : index
    %c0_436 = arith.constant 0 : index
    %336 = vector.load %arg5[%c12_435, %c0_436] : memref<36x640xf32, #tpu.memory_space<vmem>>, vector<4x640xf32>
    tpu.vector_store %arg5[%c12_435, %c0_436], %335 {strides = array<i32>} : memref<36x640xf32, #tpu.memory_space<vmem>>, vector<4x640xf32>,
    %c0_437 = arith.constant 0 : index
    %c0_438 = arith.constant 0 : index
    %c2341 = arith.constant 2341 : index
    %337 = vector.load %arg1[%c0_437, %c0_438, %c2341] : memref<1x4x4400xf32, #tpu.memory_space<vmem>>, vector<1x4x640xf32>
    %338 = vector.shape_cast %337 : vector<1x4x640xf32> to vector<4x640xf32>
    %c16_439 = arith.constant 16 : index
    %c0_440 = arith.constant 0 : index
    %339 = vector.load %arg5[%c16_439, %c0_440] : memref<36x640xf32, #tpu.memory_space<vmem>>, vector<4x640xf32>
    tpu.vector_store %arg5[%c16_439, %c0_440], %338 {strides = array<i32>} : memref<36x640xf32, #tpu.memory_space<vmem>>, vector<4x640xf32>,
    %c0_441 = arith.constant 0 : index
    %c0_442 = arith.constant 0 : index
    %c2342 = arith.constant 2342 : index
    %340 = vector.load %arg1[%c0_441, %c0_442, %c2342] : memref<1x4x4400xf32, #tpu.memory_space<vmem>>, vector<1x4x640xf32>
    %341 = vector.shape_cast %340 : vector<1x4x640xf32> to vector<4x640xf32>
    %c20_443 = arith.constant 20 : index
    %c0_444 = arith.constant 0 : index
    %342 = vector.load %arg5[%c20_443, %c0_444] : memref<36x640xf32, #tpu.memory_space<vmem>>, vector<4x640xf32>
    tpu.vector_store %arg5[%c20_443, %c0_444], %341 {strides = array<i32>} : memref<36x640xf32, #tpu.memory_space<vmem>>, vector<4x640xf32>,
    %c0_445 = arith.constant 0 : index
    %c0_446 = arith.constant 0 : index
    %c2360 = arith.constant 2360 : index
    %343 = vector.load %arg1[%c0_445, %c0_446, %c2360] : memref<1x4x4400xf32, #tpu.memory_space<vmem>>, vector<1x4x640xf32>
    %344 = vector.shape_cast %343 : vector<1x4x640xf32> to vector<4x640xf32>
    %c24_447 = arith.constant 24 : index
    %c0_448 = arith.constant 0 : index
    %345 = vector.load %arg5[%c24_447, %c0_448] : memref<36x640xf32, #tpu.memory_space<vmem>>, vector<4x640xf32>
    tpu.vector_store %arg5[%c24_447, %c0_448], %344 {strides = array<i32>} : memref<36x640xf32, #tpu.memory_space<vmem>>, vector<4x640xf32>,
    %c0_449 = arith.constant 0 : index
    %c0_450 = arith.constant 0 : index
    %c2361 = arith.constant 2361 : index
    %346 = vector.load %arg1[%c0_449, %c0_450, %c2361] : memref<1x4x4400xf32, #tpu.memory_space<vmem>>, vector<1x4x640xf32>
    %347 = vector.shape_cast %346 : vector<1x4x640xf32> to vector<4x640xf32>
    %c28_451 = arith.constant 28 : index
    %c0_452 = arith.constant 0 : index
    %348 = vector.load %arg5[%c28_451, %c0_452] : memref<36x640xf32, #tpu.memory_space<vmem>>, vector<4x640xf32>
    tpu.vector_store %arg5[%c28_451, %c0_452], %347 {strides = array<i32>} : memref<36x640xf32, #tpu.memory_space<vmem>>, vector<4x640xf32>,
    %c0_453 = arith.constant 0 : index
    %c0_454 = arith.constant 0 : index
    %c2362 = arith.constant 2362 : index
    %349 = vector.load %arg1[%c0_453, %c0_454, %c2362] : memref<1x4x4400xf32, #tpu.memory_space<vmem>>, vector<1x4x640xf32>
    %350 = vector.shape_cast %349 : vector<1x4x640xf32> to vector<4x640xf32>
    %c32_455 = arith.constant 32 : index
    %c0_456 = arith.constant 0 : index
    %351 = vector.load %arg5[%c32_455, %c0_456] : memref<36x640xf32, #tpu.memory_space<vmem>>, vector<4x640xf32>
    tpu.vector_store %arg5[%c32_455, %c0_456], %350 {strides = array<i32>} : memref<36x640xf32, #tpu.memory_space<vmem>>, vector<4x640xf32>,
    %c1_457 = arith.constant 1 : index
    %c0_458 = arith.constant 0 : index
    %c0_459 = arith.constant 0 : index
    %352 = vector.load %arg2[%c1_457, %c0_458, %c0_459] : memref<3x8x36xf32, #tpu.memory_space<vmem>>, vector<1x8x36xf32>
    %353 = vector.shape_cast %352 : vector<1x8x36xf32> to vector<8x36xf32>
    %c0_460 = arith.constant 0 : index
    %c0_461 = arith.constant 0 : index
    %354 = vector.load %arg5[%c0_460, %c0_461] : memref<36x640xf32, #tpu.memory_space<vmem>>, vector<36x640xf32>
    %cst_462 = arith.constant dense<0.000000e+00> : vector<8x640xf32>
    %355 = tpu.matmul %353, %354, %cst_462 {dimension_numbers = #tpu.dot_dimension_numbers<[1], [0], [0], [1], [0, 0, 1, 1], [], []>} : vector<8x36xf32>, vector<36x640xf32>, vector<8x640xf32> -> vector<8x640xf32>
    %356 = arith.addf %324, %355 : vector<8x640xf32>
    %c0_463 = arith.constant 0 : index
    %c0_464 = arith.constant 0 : index
    %c2720 = arith.constant 2720 : index
    %357 = vector.load %arg1[%c0_463, %c0_464, %c2720] : memref<1x4x4400xf32, #tpu.memory_space<vmem>>, vector<1x4x640xf32>
    %358 = vector.shape_cast %357 : vector<1x4x640xf32> to vector<4x640xf32>
    %c0_465 = arith.constant 0 : index
    %c0_466 = arith.constant 0 : index
    %359 = vector.load %arg6[%c0_465, %c0_466] : memref<36x640xf32, #tpu.memory_space<vmem>>, vector<4x640xf32>
    tpu.vector_store %arg6[%c0_465, %c0_466], %358 {strides = array<i32>} : memref<36x640xf32, #tpu.memory_space<vmem>>, vector<4x640xf32>,
    %c0_467 = arith.constant 0 : index
    %c0_468 = arith.constant 0 : index
    %c2721 = arith.constant 2721 : index
    %360 = vector.load %arg1[%c0_467, %c0_468, %c2721] : memref<1x4x4400xf32, #tpu.memory_space<vmem>>, vector<1x4x640xf32>
    %361 = vector.shape_cast %360 : vector<1x4x640xf32> to vector<4x640xf32>
    %c4_469 = arith.constant 4 : index
    %c0_470 = arith.constant 0 : index
    %362 = vector.load %arg6[%c4_469, %c0_470] : memref<36x640xf32, #tpu.memory_space<vmem>>, vector<4x640xf32>
    tpu.vector_store %arg6[%c4_469, %c0_470], %361 {strides = array<i32>} : memref<36x640xf32, #tpu.memory_space<vmem>>, vector<4x640xf32>,
    %c0_471 = arith.constant 0 : index
    %c0_472 = arith.constant 0 : index
    %c2722 = arith.constant 2722 : index
    %363 = vector.load %arg1[%c0_471, %c0_472, %c2722] : memref<1x4x4400xf32, #tpu.memory_space<vmem>>, vector<1x4x640xf32>
    %364 = vector.shape_cast %363 : vector<1x4x640xf32> to vector<4x640xf32>
    %c8_473 = arith.constant 8 : index
    %c0_474 = arith.constant 0 : index
    %365 = vector.load %arg6[%c8_473, %c0_474] : memref<36x640xf32, #tpu.memory_space<vmem>>, vector<4x640xf32>
    tpu.vector_store %arg6[%c8_473, %c0_474], %364 {strides = array<i32>} : memref<36x640xf32, #tpu.memory_space<vmem>>, vector<4x640xf32>,
    %c0_475 = arith.constant 0 : index
    %c0_476 = arith.constant 0 : index
    %c2740 = arith.constant 2740 : index
    %366 = vector.load %arg1[%c0_475, %c0_476, %c2740] : memref<1x4x4400xf32, #tpu.memory_space<vmem>>, vector<1x4x640xf32>
    %367 = vector.shape_cast %366 : vector<1x4x640xf32> to vector<4x640xf32>
    %c12_477 = arith.constant 12 : index
    %c0_478 = arith.constant 0 : index
    %368 = vector.load %arg6[%c12_477, %c0_478] : memref<36x640xf32, #tpu.memory_space<vmem>>, vector<4x640xf32>
    tpu.vector_store %arg6[%c12_477, %c0_478], %367 {strides = array<i32>} : memref<36x640xf32, #tpu.memory_space<vmem>>, vector<4x640xf32>,
    %c0_479 = arith.constant 0 : index
    %c0_480 = arith.constant 0 : index
    %c2741 = arith.constant 2741 : index
    %369 = vector.load %arg1[%c0_479, %c0_480, %c2741] : memref<1x4x4400xf32, #tpu.memory_space<vmem>>, vector<1x4x640xf32>
    %370 = vector.shape_cast %369 : vector<1x4x640xf32> to vector<4x640xf32>
    %c16_481 = arith.constant 16 : index
    %c0_482 = arith.constant 0 : index
    %371 = vector.load %arg6[%c16_481, %c0_482] : memref<36x640xf32, #tpu.memory_space<vmem>>, vector<4x640xf32>
    tpu.vector_store %arg6[%c16_481, %c0_482], %370 {strides = array<i32>} : memref<36x640xf32, #tpu.memory_space<vmem>>, vector<4x640xf32>,
    %c0_483 = arith.constant 0 : index
    %c0_484 = arith.constant 0 : index
    %c2742 = arith.constant 2742 : index
    %372 = vector.load %arg1[%c0_483, %c0_484, %c2742] : memref<1x4x4400xf32, #tpu.memory_space<vmem>>, vector<1x4x640xf32>
    %373 = vector.shape_cast %372 : vector<1x4x640xf32> to vector<4x640xf32>
    %c20_485 = arith.constant 20 : index
    %c0_486 = arith.constant 0 : index
    %374 = vector.load %arg6[%c20_485, %c0_486] : memref<36x640xf32, #tpu.memory_space<vmem>>, vector<4x640xf32>
    tpu.vector_store %arg6[%c20_485, %c0_486], %373 {strides = array<i32>} : memref<36x640xf32, #tpu.memory_space<vmem>>, vector<4x640xf32>,
    %c0_487 = arith.constant 0 : index
    %c0_488 = arith.constant 0 : index
    %c2760 = arith.constant 2760 : index
    %375 = vector.load %arg1[%c0_487, %c0_488, %c2760] : memref<1x4x4400xf32, #tpu.memory_space<vmem>>, vector<1x4x640xf32>
    %376 = vector.shape_cast %375 : vector<1x4x640xf32> to vector<4x640xf32>
    %c24_489 = arith.constant 24 : index
    %c0_490 = arith.constant 0 : index
    %377 = vector.load %arg6[%c24_489, %c0_490] : memref<36x640xf32, #tpu.memory_space<vmem>>, vector<4x640xf32>
    tpu.vector_store %arg6[%c24_489, %c0_490], %376 {strides = array<i32>} : memref<36x640xf32, #tpu.memory_space<vmem>>, vector<4x640xf32>,
    %c0_491 = arith.constant 0 : index
    %c0_492 = arith.constant 0 : index
    %c2761 = arith.constant 2761 : index
    %378 = vector.load %arg1[%c0_491, %c0_492, %c2761] : memref<1x4x4400xf32, #tpu.memory_space<vmem>>, vector<1x4x640xf32>
    %379 = vector.shape_cast %378 : vector<1x4x640xf32> to vector<4x640xf32>
    %c28_493 = arith.constant 28 : index
    %c0_494 = arith.constant 0 : index
    %380 = vector.load %arg6[%c28_493, %c0_494] : memref<36x640xf32, #tpu.memory_space<vmem>>, vector<4x640xf32>
    tpu.vector_store %arg6[%c28_493, %c0_494], %379 {strides = array<i32>} : memref<36x640xf32, #tpu.memory_space<vmem>>, vector<4x640xf32>,
    %c0_495 = arith.constant 0 : index
    %c0_496 = arith.constant 0 : index
    %c2762 = arith.constant 2762 : index
    %381 = vector.load %arg1[%c0_495, %c0_496, %c2762] : memref<1x4x4400xf32, #tpu.memory_space<vmem>>, vector<1x4x640xf32>
    %382 = vector.shape_cast %381 : vector<1x4x640xf32> to vector<4x640xf32>
    %c32_497 = arith.constant 32 : index
    %c0_498 = arith.constant 0 : index
    %383 = vector.load %arg6[%c32_497, %c0_498] : memref<36x640xf32, #tpu.memory_space<vmem>>, vector<4x640xf32>
    tpu.vector_store %arg6[%c32_497, %c0_498], %382 {strides = array<i32>} : memref<36x640xf32, #tpu.memory_space<vmem>>, vector<4x640xf32>,
    %c2_499 = arith.constant 2 : index
    %c0_500 = arith.constant 0 : index
    %c0_501 = arith.constant 0 : index
    %384 = vector.load %arg2[%c2_499, %c0_500, %c0_501] : memref<3x8x36xf32, #tpu.memory_space<vmem>>, vector<1x8x36xf32>
    %385 = vector.shape_cast %384 : vector<1x8x36xf32> to vector<8x36xf32>
    %c0_502 = arith.constant 0 : index
    %c0_503 = arith.constant 0 : index
    %386 = vector.load %arg6[%c0_502, %c0_503] : memref<36x640xf32, #tpu.memory_space<vmem>>, vector<36x640xf32>
    %cst_504 = arith.constant dense<0.000000e+00> : vector<8x640xf32>
    %387 = tpu.matmul %385, %386, %cst_504 {dimension_numbers = #tpu.dot_dimension_numbers<[1], [0], [0], [1], [0, 0, 1, 1], [], []>} : vector<8x36xf32>, vector<36x640xf32>, vector<8x640xf32> -> vector<8x640xf32>
    %388 = arith.addf %356, %387 : vector<8x640xf32>
    %c0_505 = arith.constant 0 : index
    %c0_506 = arith.constant 0 : index
    %c1920_507 = arith.constant 1920 : index
    %389 = vector.load %arg3[%c0_505, %c0_506, %c1920_507] : memref<1x8x3200xf32, #tpu.memory_space<vmem>>, vector<1x8x640xf32>
    %390 = vector.shape_cast %389 : vector<1x8x640xf32> to vector<8x640xf32>
    %391 = vector.shape_cast %388 : vector<8x640xf32> to vector<1x8x640xf32>
    tpu.vector_store %arg3[%c0_505, %c0_506, %c1920_507], %391 {strides = array<i32>} : memref<1x8x3200xf32, #tpu.memory_space<vmem>>, vector<1x8x640xf32>,
    %c0_508 = arith.constant 0 : index
    %c0_509 = arith.constant 0 : index
    %c2560 = arith.constant 2560 : index
    %392 = vector.load %arg1[%c0_508, %c0_509, %c2560] : memref<1x4x4400xf32, #tpu.memory_space<vmem>>, vector<1x4x640xf32>
    %393 = vector.shape_cast %392 : vector<1x4x640xf32> to vector<4x640xf32>
    %c0_510 = arith.constant 0 : index
    %c0_511 = arith.constant 0 : index
    %394 = vector.load %arg4[%c0_510, %c0_511] : memref<36x640xf32, #tpu.memory_space<vmem>>, vector<4x640xf32>
    tpu.vector_store %arg4[%c0_510, %c0_511], %393 {strides = array<i32>} : memref<36x640xf32, #tpu.memory_space<vmem>>, vector<4x640xf32>,
    %c0_512 = arith.constant 0 : index
    %c0_513 = arith.constant 0 : index
    %c2561 = arith.constant 2561 : index
    %395 = vector.load %arg1[%c0_512, %c0_513, %c2561] : memref<1x4x4400xf32, #tpu.memory_space<vmem>>, vector<1x4x640xf32>
    %396 = vector.shape_cast %395 : vector<1x4x640xf32> to vector<4x640xf32>
    %c4_514 = arith.constant 4 : index
    %c0_515 = arith.constant 0 : index
    %397 = vector.load %arg4[%c4_514, %c0_515] : memref<36x640xf32, #tpu.memory_space<vmem>>, vector<4x640xf32>
    tpu.vector_store %arg4[%c4_514, %c0_515], %396 {strides = array<i32>} : memref<36x640xf32, #tpu.memory_space<vmem>>, vector<4x640xf32>,
    %c0_516 = arith.constant 0 : index
    %c0_517 = arith.constant 0 : index
    %c2562 = arith.constant 2562 : index
    %398 = vector.load %arg1[%c0_516, %c0_517, %c2562] : memref<1x4x4400xf32, #tpu.memory_space<vmem>>, vector<1x4x640xf32>
    %399 = vector.shape_cast %398 : vector<1x4x640xf32> to vector<4x640xf32>
    %c8_518 = arith.constant 8 : index
    %c0_519 = arith.constant 0 : index
    %400 = vector.load %arg4[%c8_518, %c0_519] : memref<36x640xf32, #tpu.memory_space<vmem>>, vector<4x640xf32>
    tpu.vector_store %arg4[%c8_518, %c0_519], %399 {strides = array<i32>} : memref<36x640xf32, #tpu.memory_space<vmem>>, vector<4x640xf32>,
    %c0_520 = arith.constant 0 : index
    %c0_521 = arith.constant 0 : index
    %c2580 = arith.constant 2580 : index
    %401 = vector.load %arg1[%c0_520, %c0_521, %c2580] : memref<1x4x4400xf32, #tpu.memory_space<vmem>>, vector<1x4x640xf32>
    %402 = vector.shape_cast %401 : vector<1x4x640xf32> to vector<4x640xf32>
    %c12_522 = arith.constant 12 : index
    %c0_523 = arith.constant 0 : index
    %403 = vector.load %arg4[%c12_522, %c0_523] : memref<36x640xf32, #tpu.memory_space<vmem>>, vector<4x640xf32>
    tpu.vector_store %arg4[%c12_522, %c0_523], %402 {strides = array<i32>} : memref<36x640xf32, #tpu.memory_space<vmem>>, vector<4x640xf32>,
    %c0_524 = arith.constant 0 : index
    %c0_525 = arith.constant 0 : index
    %c2581 = arith.constant 2581 : index
    %404 = vector.load %arg1[%c0_524, %c0_525, %c2581] : memref<1x4x4400xf32, #tpu.memory_space<vmem>>, vector<1x4x640xf32>
    %405 = vector.shape_cast %404 : vector<1x4x640xf32> to vector<4x640xf32>
    %c16_526 = arith.constant 16 : index
    %c0_527 = arith.constant 0 : index
    %406 = vector.load %arg4[%c16_526, %c0_527] : memref<36x640xf32, #tpu.memory_space<vmem>>, vector<4x640xf32>
    tpu.vector_store %arg4[%c16_526, %c0_527], %405 {strides = array<i32>} : memref<36x640xf32, #tpu.memory_space<vmem>>, vector<4x640xf32>,
    %c0_528 = arith.constant 0 : index
    %c0_529 = arith.constant 0 : index
    %c2582 = arith.constant 2582 : index
    %407 = vector.load %arg1[%c0_528, %c0_529, %c2582] : memref<1x4x4400xf32, #tpu.memory_space<vmem>>, vector<1x4x640xf32>
    %408 = vector.shape_cast %407 : vector<1x4x640xf32> to vector<4x640xf32>
    %c20_530 = arith.constant 20 : index
    %c0_531 = arith.constant 0 : index
    %409 = vector.load %arg4[%c20_530, %c0_531] : memref<36x640xf32, #tpu.memory_space<vmem>>, vector<4x640xf32>
    tpu.vector_store %arg4[%c20_530, %c0_531], %408 {strides = array<i32>} : memref<36x640xf32, #tpu.memory_space<vmem>>, vector<4x640xf32>,
    %c0_532 = arith.constant 0 : index
    %c0_533 = arith.constant 0 : index
    %c2600 = arith.constant 2600 : index
    %410 = vector.load %arg1[%c0_532, %c0_533, %c2600] : memref<1x4x4400xf32, #tpu.memory_space<vmem>>, vector<1x4x640xf32>
    %411 = vector.shape_cast %410 : vector<1x4x640xf32> to vector<4x640xf32>
    %c24_534 = arith.constant 24 : index
    %c0_535 = arith.constant 0 : index
    %412 = vector.load %arg4[%c24_534, %c0_535] : memref<36x640xf32, #tpu.memory_space<vmem>>, vector<4x640xf32>
    tpu.vector_store %arg4[%c24_534, %c0_535], %411 {strides = array<i32>} : memref<36x640xf32, #tpu.memory_space<vmem>>, vector<4x640xf32>,
    %c0_536 = arith.constant 0 : index
    %c0_537 = arith.constant 0 : index
    %c2601 = arith.constant 2601 : index
    %413 = vector.load %arg1[%c0_536, %c0_537, %c2601] : memref<1x4x4400xf32, #tpu.memory_space<vmem>>, vector<1x4x640xf32>
    %414 = vector.shape_cast %413 : vector<1x4x640xf32> to vector<4x640xf32>
    %c28_538 = arith.constant 28 : index
    %c0_539 = arith.constant 0 : index
    %415 = vector.load %arg4[%c28_538, %c0_539] : memref<36x640xf32, #tpu.memory_space<vmem>>, vector<4x640xf32>
    tpu.vector_store %arg4[%c28_538, %c0_539], %414 {strides = array<i32>} : memref<36x640xf32, #tpu.memory_space<vmem>>, vector<4x640xf32>,
    %c0_540 = arith.constant 0 : index
    %c0_541 = arith.constant 0 : index
    %c2602 = arith.constant 2602 : index
    %416 = vector.load %arg1[%c0_540, %c0_541, %c2602] : memref<1x4x4400xf32, #tpu.memory_space<vmem>>, vector<1x4x640xf32>
    %417 = vector.shape_cast %416 : vector<1x4x640xf32> to vector<4x640xf32>
    %c32_542 = arith.constant 32 : index
    %c0_543 = arith.constant 0 : index
    %418 = vector.load %arg4[%c32_542, %c0_543] : memref<36x640xf32, #tpu.memory_space<vmem>>, vector<4x640xf32>
    tpu.vector_store %arg4[%c32_542, %c0_543], %417 {strides = array<i32>} : memref<36x640xf32, #tpu.memory_space<vmem>>, vector<4x640xf32>,
    %c0_544 = arith.constant 0 : index
    %c0_545 = arith.constant 0 : index
    %c0_546 = arith.constant 0 : index
    %419 = vector.load %arg2[%c0_544, %c0_545, %c0_546] : memref<3x8x36xf32, #tpu.memory_space<vmem>>, vector<1x8x36xf32>
    %420 = vector.shape_cast %419 : vector<1x8x36xf32> to vector<8x36xf32>
    %c0_547 = arith.constant 0 : index
    %c0_548 = arith.constant 0 : index
    %421 = vector.load %arg4[%c0_547, %c0_548] : memref<36x640xf32, #tpu.memory_space<vmem>>, vector<36x640xf32>
    %cst_549 = arith.constant dense<0.000000e+00> : vector<8x640xf32>
    %422 = tpu.matmul %420, %421, %cst_549 {dimension_numbers = #tpu.dot_dimension_numbers<[1], [0], [0], [1], [0, 0, 1, 1], [], []>} : vector<8x36xf32>, vector<36x640xf32>, vector<8x640xf32> -> vector<8x640xf32>
    %c0_550 = arith.constant 0 : index
    %c0_551 = arith.constant 0 : index
    %c2960 = arith.constant 2960 : index
    %423 = vector.load %arg1[%c0_550, %c0_551, %c2960] : memref<1x4x4400xf32, #tpu.memory_space<vmem>>, vector<1x4x640xf32>
    %424 = vector.shape_cast %423 : vector<1x4x640xf32> to vector<4x640xf32>
    %c0_552 = arith.constant 0 : index
    %c0_553 = arith.constant 0 : index
    %425 = vector.load %arg5[%c0_552, %c0_553] : memref<36x640xf32, #tpu.memory_space<vmem>>, vector<4x640xf32>
    tpu.vector_store %arg5[%c0_552, %c0_553], %424 {strides = array<i32>} : memref<36x640xf32, #tpu.memory_space<vmem>>, vector<4x640xf32>,
    %c0_554 = arith.constant 0 : index
    %c0_555 = arith.constant 0 : index
    %c2961 = arith.constant 2961 : index
    %426 = vector.load %arg1[%c0_554, %c0_555, %c2961] : memref<1x4x4400xf32, #tpu.memory_space<vmem>>, vector<1x4x640xf32>
    %427 = vector.shape_cast %426 : vector<1x4x640xf32> to vector<4x640xf32>
    %c4_556 = arith.constant 4 : index
    %c0_557 = arith.constant 0 : index
    %428 = vector.load %arg5[%c4_556, %c0_557] : memref<36x640xf32, #tpu.memory_space<vmem>>, vector<4x640xf32>
    tpu.vector_store %arg5[%c4_556, %c0_557], %427 {strides = array<i32>} : memref<36x640xf32, #tpu.memory_space<vmem>>, vector<4x640xf32>,
    %c0_558 = arith.constant 0 : index
    %c0_559 = arith.constant 0 : index
    %c2962 = arith.constant 2962 : index
    %429 = vector.load %arg1[%c0_558, %c0_559, %c2962] : memref<1x4x4400xf32, #tpu.memory_space<vmem>>, vector<1x4x640xf32>
    %430 = vector.shape_cast %429 : vector<1x4x640xf32> to vector<4x640xf32>
    %c8_560 = arith.constant 8 : index
    %c0_561 = arith.constant 0 : index
    %431 = vector.load %arg5[%c8_560, %c0_561] : memref<36x640xf32, #tpu.memory_space<vmem>>, vector<4x640xf32>
    tpu.vector_store %arg5[%c8_560, %c0_561], %430 {strides = array<i32>} : memref<36x640xf32, #tpu.memory_space<vmem>>, vector<4x640xf32>,
    %c0_562 = arith.constant 0 : index
    %c0_563 = arith.constant 0 : index
    %c2980 = arith.constant 2980 : index
    %432 = vector.load %arg1[%c0_562, %c0_563, %c2980] : memref<1x4x4400xf32, #tpu.memory_space<vmem>>, vector<1x4x640xf32>
    %433 = vector.shape_cast %432 : vector<1x4x640xf32> to vector<4x640xf32>
    %c12_564 = arith.constant 12 : index
    %c0_565 = arith.constant 0 : index
    %434 = vector.load %arg5[%c12_564, %c0_565] : memref<36x640xf32, #tpu.memory_space<vmem>>, vector<4x640xf32>
    tpu.vector_store %arg5[%c12_564, %c0_565], %433 {strides = array<i32>} : memref<36x640xf32, #tpu.memory_space<vmem>>, vector<4x640xf32>,
    %c0_566 = arith.constant 0 : index
    %c0_567 = arith.constant 0 : index
    %c2981 = arith.constant 2981 : index
    %435 = vector.load %arg1[%c0_566, %c0_567, %c2981] : memref<1x4x4400xf32, #tpu.memory_space<vmem>>, vector<1x4x640xf32>
    %436 = vector.shape_cast %435 : vector<1x4x640xf32> to vector<4x640xf32>
    %c16_568 = arith.constant 16 : index
    %c0_569 = arith.constant 0 : index
    %437 = vector.load %arg5[%c16_568, %c0_569] : memref<36x640xf32, #tpu.memory_space<vmem>>, vector<4x640xf32>
    tpu.vector_store %arg5[%c16_568, %c0_569], %436 {strides = array<i32>} : memref<36x640xf32, #tpu.memory_space<vmem>>, vector<4x640xf32>,
    %c0_570 = arith.constant 0 : index
    %c0_571 = arith.constant 0 : index
    %c2982 = arith.constant 2982 : index
    %438 = vector.load %arg1[%c0_570, %c0_571, %c2982] : memref<1x4x4400xf32, #tpu.memory_space<vmem>>, vector<1x4x640xf32>
    %439 = vector.shape_cast %438 : vector<1x4x640xf32> to vector<4x640xf32>
    %c20_572 = arith.constant 20 : index
    %c0_573 = arith.constant 0 : index
    %440 = vector.load %arg5[%c20_572, %c0_573] : memref<36x640xf32, #tpu.memory_space<vmem>>, vector<4x640xf32>
    tpu.vector_store %arg5[%c20_572, %c0_573], %439 {strides = array<i32>} : memref<36x640xf32, #tpu.memory_space<vmem>>, vector<4x640xf32>,
    %c0_574 = arith.constant 0 : index
    %c0_575 = arith.constant 0 : index
    %c3000 = arith.constant 3000 : index
    %441 = vector.load %arg1[%c0_574, %c0_575, %c3000] : memref<1x4x4400xf32, #tpu.memory_space<vmem>>, vector<1x4x640xf32>
    %442 = vector.shape_cast %441 : vector<1x4x640xf32> to vector<4x640xf32>
    %c24_576 = arith.constant 24 : index
    %c0_577 = arith.constant 0 : index
    %443 = vector.load %arg5[%c24_576, %c0_577] : memref<36x640xf32, #tpu.memory_space<vmem>>, vector<4x640xf32>
    tpu.vector_store %arg5[%c24_576, %c0_577], %442 {strides = array<i32>} : memref<36x640xf32, #tpu.memory_space<vmem>>, vector<4x640xf32>,
    %c0_578 = arith.constant 0 : index
    %c0_579 = arith.constant 0 : index
    %c3001 = arith.constant 3001 : index
    %444 = vector.load %arg1[%c0_578, %c0_579, %c3001] : memref<1x4x4400xf32, #tpu.memory_space<vmem>>, vector<1x4x640xf32>
    %445 = vector.shape_cast %444 : vector<1x4x640xf32> to vector<4x640xf32>
    %c28_580 = arith.constant 28 : index
    %c0_581 = arith.constant 0 : index
    %446 = vector.load %arg5[%c28_580, %c0_581] : memref<36x640xf32, #tpu.memory_space<vmem>>, vector<4x640xf32>
    tpu.vector_store %arg5[%c28_580, %c0_581], %445 {strides = array<i32>} : memref<36x640xf32, #tpu.memory_space<vmem>>, vector<4x640xf32>,
    %c0_582 = arith.constant 0 : index
    %c0_583 = arith.constant 0 : index
    %c3002 = arith.constant 3002 : index
    %447 = vector.load %arg1[%c0_582, %c0_583, %c3002] : memref<1x4x4400xf32, #tpu.memory_space<vmem>>, vector<1x4x640xf32>
    %448 = vector.shape_cast %447 : vector<1x4x640xf32> to vector<4x640xf32>
    %c32_584 = arith.constant 32 : index
    %c0_585 = arith.constant 0 : index
    %449 = vector.load %arg5[%c32_584, %c0_585] : memref<36x640xf32, #tpu.memory_space<vmem>>, vector<4x640xf32>
    tpu.vector_store %arg5[%c32_584, %c0_585], %448 {strides = array<i32>} : memref<36x640xf32, #tpu.memory_space<vmem>>, vector<4x640xf32>,
    %c1_586 = arith.constant 1 : index
    %c0_587 = arith.constant 0 : index
    %c0_588 = arith.constant 0 : index
    %450 = vector.load %arg2[%c1_586, %c0_587, %c0_588] : memref<3x8x36xf32, #tpu.memory_space<vmem>>, vector<1x8x36xf32>
    %451 = vector.shape_cast %450 : vector<1x8x36xf32> to vector<8x36xf32>
    %c0_589 = arith.constant 0 : index
    %c0_590 = arith.constant 0 : index
    %452 = vector.load %arg5[%c0_589, %c0_590] : memref<36x640xf32, #tpu.memory_space<vmem>>, vector<36x640xf32>
    %cst_591 = arith.constant dense<0.000000e+00> : vector<8x640xf32>
    %453 = tpu.matmul %451, %452, %cst_591 {dimension_numbers = #tpu.dot_dimension_numbers<[1], [0], [0], [1], [0, 0, 1, 1], [], []>} : vector<8x36xf32>, vector<36x640xf32>, vector<8x640xf32> -> vector<8x640xf32>
    %454 = arith.addf %422, %453 : vector<8x640xf32>
    %c0_592 = arith.constant 0 : index
    %c0_593 = arith.constant 0 : index
    %c3360 = arith.constant 3360 : index
    %455 = vector.load %arg1[%c0_592, %c0_593, %c3360] : memref<1x4x4400xf32, #tpu.memory_space<vmem>>, vector<1x4x640xf32>
    %456 = vector.shape_cast %455 : vector<1x4x640xf32> to vector<4x640xf32>
    %c0_594 = arith.constant 0 : index
    %c0_595 = arith.constant 0 : index
    %457 = vector.load %arg6[%c0_594, %c0_595] : memref<36x640xf32, #tpu.memory_space<vmem>>, vector<4x640xf32>
    tpu.vector_store %arg6[%c0_594, %c0_595], %456 {strides = array<i32>} : memref<36x640xf32, #tpu.memory_space<vmem>>, vector<4x640xf32>,
    %c0_596 = arith.constant 0 : index
    %c0_597 = arith.constant 0 : index
    %c3361 = arith.constant 3361 : index
    %458 = vector.load %arg1[%c0_596, %c0_597, %c3361] : memref<1x4x4400xf32, #tpu.memory_space<vmem>>, vector<1x4x640xf32>
    %459 = vector.shape_cast %458 : vector<1x4x640xf32> to vector<4x640xf32>
    %c4_598 = arith.constant 4 : index
    %c0_599 = arith.constant 0 : index
    %460 = vector.load %arg6[%c4_598, %c0_599] : memref<36x640xf32, #tpu.memory_space<vmem>>, vector<4x640xf32>
    tpu.vector_store %arg6[%c4_598, %c0_599], %459 {strides = array<i32>} : memref<36x640xf32, #tpu.memory_space<vmem>>, vector<4x640xf32>,
    %c0_600 = arith.constant 0 : index
    %c0_601 = arith.constant 0 : index
    %c3362 = arith.constant 3362 : index
    %461 = vector.load %arg1[%c0_600, %c0_601, %c3362] : memref<1x4x4400xf32, #tpu.memory_space<vmem>>, vector<1x4x640xf32>
    %462 = vector.shape_cast %461 : vector<1x4x640xf32> to vector<4x640xf32>
    %c8_602 = arith.constant 8 : index
    %c0_603 = arith.constant 0 : index
    %463 = vector.load %arg6[%c8_602, %c0_603] : memref<36x640xf32, #tpu.memory_space<vmem>>, vector<4x640xf32>
    tpu.vector_store %arg6[%c8_602, %c0_603], %462 {strides = array<i32>} : memref<36x640xf32, #tpu.memory_space<vmem>>, vector<4x640xf32>,
    %c0_604 = arith.constant 0 : index
    %c0_605 = arith.constant 0 : index
    %c3380 = arith.constant 3380 : index
    %464 = vector.load %arg1[%c0_604, %c0_605, %c3380] : memref<1x4x4400xf32, #tpu.memory_space<vmem>>, vector<1x4x640xf32>
    %465 = vector.shape_cast %464 : vector<1x4x640xf32> to vector<4x640xf32>
    %c12_606 = arith.constant 12 : index
    %c0_607 = arith.constant 0 : index
    %466 = vector.load %arg6[%c12_606, %c0_607] : memref<36x640xf32, #tpu.memory_space<vmem>>, vector<4x640xf32>
    tpu.vector_store %arg6[%c12_606, %c0_607], %465 {strides = array<i32>} : memref<36x640xf32, #tpu.memory_space<vmem>>, vector<4x640xf32>,
    %c0_608 = arith.constant 0 : index
    %c0_609 = arith.constant 0 : index
    %c3381 = arith.constant 3381 : index
    %467 = vector.load %arg1[%c0_608, %c0_609, %c3381] : memref<1x4x4400xf32, #tpu.memory_space<vmem>>, vector<1x4x640xf32>
    %468 = vector.shape_cast %467 : vector<1x4x640xf32> to vector<4x640xf32>
    %c16_610 = arith.constant 16 : index
    %c0_611 = arith.constant 0 : index
    %469 = vector.load %arg6[%c16_610, %c0_611] : memref<36x640xf32, #tpu.memory_space<vmem>>, vector<4x640xf32>
    tpu.vector_store %arg6[%c16_610, %c0_611], %468 {strides = array<i32>} : memref<36x640xf32, #tpu.memory_space<vmem>>, vector<4x640xf32>,
    %c0_612 = arith.constant 0 : index
    %c0_613 = arith.constant 0 : index
    %c3382 = arith.constant 3382 : index
    %470 = vector.load %arg1[%c0_612, %c0_613, %c3382] : memref<1x4x4400xf32, #tpu.memory_space<vmem>>, vector<1x4x640xf32>
    %471 = vector.shape_cast %470 : vector<1x4x640xf32> to vector<4x640xf32>
    %c20_614 = arith.constant 20 : index
    %c0_615 = arith.constant 0 : index
    %472 = vector.load %arg6[%c20_614, %c0_615] : memref<36x640xf32, #tpu.memory_space<vmem>>, vector<4x640xf32>
    tpu.vector_store %arg6[%c20_614, %c0_615], %471 {strides = array<i32>} : memref<36x640xf32, #tpu.memory_space<vmem>>, vector<4x640xf32>,
    %c0_616 = arith.constant 0 : index
    %c0_617 = arith.constant 0 : index
    %c3400 = arith.constant 3400 : index
    %473 = vector.load %arg1[%c0_616, %c0_617, %c3400] : memref<1x4x4400xf32, #tpu.memory_space<vmem>>, vector<1x4x640xf32>
    %474 = vector.shape_cast %473 : vector<1x4x640xf32> to vector<4x640xf32>
    %c24_618 = arith.constant 24 : index
    %c0_619 = arith.constant 0 : index
    %475 = vector.load %arg6[%c24_618, %c0_619] : memref<36x640xf32, #tpu.memory_space<vmem>>, vector<4x640xf32>
    tpu.vector_store %arg6[%c24_618, %c0_619], %474 {strides = array<i32>} : memref<36x640xf32, #tpu.memory_space<vmem>>, vector<4x640xf32>,
    %c0_620 = arith.constant 0 : index
    %c0_621 = arith.constant 0 : index
    %c3401 = arith.constant 3401 : index
    %476 = vector.load %arg1[%c0_620, %c0_621, %c3401] : memref<1x4x4400xf32, #tpu.memory_space<vmem>>, vector<1x4x640xf32>
    %477 = vector.shape_cast %476 : vector<1x4x640xf32> to vector<4x640xf32>
    %c28_622 = arith.constant 28 : index
    %c0_623 = arith.constant 0 : index
    %478 = vector.load %arg6[%c28_622, %c0_623] : memref<36x640xf32, #tpu.memory_space<vmem>>, vector<4x640xf32>
    tpu.vector_store %arg6[%c28_622, %c0_623], %477 {strides = array<i32>} : memref<36x640xf32, #tpu.memory_space<vmem>>, vector<4x640xf32>,
    %c0_624 = arith.constant 0 : index
    %c0_625 = arith.constant 0 : index
    %c3402 = arith.constant 3402 : index
    %479 = vector.load %arg1[%c0_624, %c0_625, %c3402] : memref<1x4x4400xf32, #tpu.memory_space<vmem>>, vector<1x4x640xf32>
    %480 = vector.shape_cast %479 : vector<1x4x640xf32> to vector<4x640xf32>
    %c32_626 = arith.constant 32 : index
    %c0_627 = arith.constant 0 : index
    %481 = vector.load %arg6[%c32_626, %c0_627] : memref<36x640xf32, #tpu.memory_space<vmem>>, vector<4x640xf32>
    tpu.vector_store %arg6[%c32_626, %c0_627], %480 {strides = array<i32>} : memref<36x640xf32, #tpu.memory_space<vmem>>, vector<4x640xf32>,
    %c2_628 = arith.constant 2 : index
    %c0_629 = arith.constant 0 : index
    %c0_630 = arith.constant 0 : index
    %482 = vector.load %arg2[%c2_628, %c0_629, %c0_630] : memref<3x8x36xf32, #tpu.memory_space<vmem>>, vector<1x8x36xf32>
    %483 = vector.shape_cast %482 : vector<1x8x36xf32> to vector<8x36xf32>
    %c0_631 = arith.constant 0 : index
    %c0_632 = arith.constant 0 : index
    %484 = vector.load %arg6[%c0_631, %c0_632] : memref<36x640xf32, #tpu.memory_space<vmem>>, vector<36x640xf32>
    %cst_633 = arith.constant dense<0.000000e+00> : vector<8x640xf32>
    %485 = tpu.matmul %483, %484, %cst_633 {dimension_numbers = #tpu.dot_dimension_numbers<[1], [0], [0], [1], [0, 0, 1, 1], [], []>} : vector<8x36xf32>, vector<36x640xf32>, vector<8x640xf32> -> vector<8x640xf32>
    %486 = arith.addf %454, %485 : vector<8x640xf32>
    %c0_634 = arith.constant 0 : index
    %c0_635 = arith.constant 0 : index
    %c2560_636 = arith.constant 2560 : index
    %487 = vector.load %arg3[%c0_634, %c0_635, %c2560_636] : memref<1x8x3200xf32, #tpu.memory_space<vmem>>, vector<1x8x640xf32>
    %488 = vector.shape_cast %487 : vector<1x8x640xf32> to vector<8x640xf32>
    %489 = vector.shape_cast %486 : vector<8x640xf32> to vector<1x8x640xf32>
    tpu.vector_store %arg3[%c0_634, %c0_635, %c2560_636], %489 {strides = array<i32>} : memref<1x8x3200xf32, #tpu.memory_space<vmem>>, vector<1x8x640xf32>,
    return
  }
  func.func @transform_0(%arg0: i32) -> (i32, i32, i32) {
    %c0_i32 = arith.constant 0 : i32
    %c0_i32_0 = arith.constant 0 : i32
    %c0_i32_1 = arith.constant 0 : i32
    return %arg0, %c0_i32, %c0_i32_0 : i32, i32, i32
  }
  func.func @transform_1(%arg0: i32) -> (i32, i32, i32) {
    %c0_i32 = arith.constant 0 : i32
    %c0_i32_0 = arith.constant 0 : i32
    %c0_i32_1 = arith.constant 0 : i32
    %c0_i32_2 = arith.constant 0 : i32
    return %c0_i32, %c0_i32_0, %c0_i32_1 : i32, i32, i32
  }
  func.func @transform_2(%arg0: i32) -> (i32, i32, i32) {
    %c0_i32 = arith.constant 0 : i32
    %c0_i32_0 = arith.constant 0 : i32
    %c0_i32_1 = arith.constant 0 : i32
    return %arg0, %c0_i32, %c0_i32_0 : i32, i32, i32
  }
}

</mosaic_0001>

<bundles_post_ra>
// kernel: conv3d_same.1
= control target key start
LH: loop header
LB: loop body
LE: loop exit
PB: predicated region body
PF: predicated region fallthrough
CT: control target
= control target key end

     0   :  { %s9871_s9 = smov 0   ;;  %s13220_s0 = inlined_call_operand.vmem [shape: f32[2,4,4400], index: 0, kind: input, shape index: {}]   ;;  %s13221_s1 = inlined_call_operand.vmem [shape: f32[3,8,36], index: 1, kind: input, shape index: {}]   ;;  %s13222_s2 = inlined_call_operand.vmem [shape: f32[2,8,3200], index: 2, kind: output, shape index: {}]  }
   0x1 LB: > { %s8869_s10 = sadd.s32 4294967295, %s9825_s9   ;;  %p8873_p0 = scmp.ge.s32.totalorder %s9825_s9, 1  ;;  %s9825_s9 = sphi %s9871_s9, %s12_s9  }
   0x2   : > { %p112_p1 = scmp.lt.s32.totalorder %s9825_s9, 3 }
   0x4   : > { %p113_p2 = pnand %p8873_p0, %p112_p1 }
   0x5   : > { %p134_p3 = scmp.lt.s32.totalorder (!%p113_p2), %s8869_s10, 1  ;;  %s9827_s15 = smov (!%p113_p2), 127   ;;  %vm179_vm0 = vcmask (!%p113_p2), 1039360   ;;  %vm216_vm1 = vcmask (!%p113_p2), 1031168   ;;  %vm253_vm2 = vcmask (!%p113_p2), 883712   ;;  %v9839_v45 = vmov (!%p113_p2), 0.0|0.0  }
   0x6   : > { %116 = sbr.rel (%p113_p2) target bundleno = 1927 (0x787), region = 28  ;;  %s9828_s16 = smov (!%p113_p2), 126   ;;  %9309 = vmatprep.subr.bf16.mxu0 (!%p113_p2), %v9839_v45  ;;  %vm290_vm3 = vcmask (!%p113_p2), 875520   ;;  %vm327_vm4 = vcmask (!%p113_p2), 867328   ;;  %vm364_vm5 = vcmask (!%p113_p2), 719872   ;;  %vm401_vm6 = vcmask (!%p113_p2), 711680  }
   0x7   : > { %s9829_s17 = smov (!%p113_p2), 108   ;;  %s9830_s18 = smov (!%p113_p2), 107   ;;  %vm13245_vm7 = vcmask (!%p113_p2), 703488   ;;  %vm9846_vm8 = vmmov (!%p113_p2), 0   ;;  %vm13244_vm9 = vcmask (!%p113_p2), 916480   ;;  %vm13242_vm10 = vcmask (!%p113_p2), 908288  }
   0x8   : > { %s9831_s19 = smov (!%p113_p2), 106   ;;  %s13262_s20 = smov (!%p113_p2), 88   ;;  %vm13243_vm11 = vcmask (!%p113_p2), 900096   ;;  %vm13234_vm12 = vcmask (!%p113_p2), 752640   ;;  %vm13228_vm13 = vcmask (!%p113_p2), 744448   ;;  %vm13223_vm14 = vcmask (!%p113_p2), 736256  }
   0x9   : > { %s13260_s21 = smov (!%p113_p2), 87   ;;  %s13258_s22 = smov (!%p113_p2), 86   ;;  %vm13226_vm15 = vcmask (!%p113_p2), 588800  }
   0xa   : > { %s9835_s23 = smov (!%p113_p2), 112   ;;  %s9836_s24 = smov (!%p113_p2), 111  }
   0xb   : > { %s9837_s25 = smov (!%p113_p2), 110   ;;  %s9838_s26 = smov (!%p113_p2), 92  }
   0xc   : > { %s9840_s27 = smov (!%p113_p2), 91   ;;  %s9841_s28 = smov (!%p113_p2), 90  }
   0xd   : > { %s13584_s10 = smov (!%p134_p3, %s8869_s10), 1  ;;  %s9842_s29 = smov 72  }
   0xe   : > { %s9683_s11 = smul.u32 140, %s13584_s10  ;;  %s9843_s30 = smov 71  }
   0xf   : > { %s9844_s3 = smov 70   ;;  %s13256_s4 = smov 96  }
  0x10   : > { %s9885_s14 = scalar_lea.vmem %s13220_s0, %s9683_s11  ;;  %s13254_s5 = smov 95  }
  0x11   : > { %v9888_v0 = vld [vmem:[%s9885_s14 + $0x8] sm:$0xff]  ;;  %v9891_v1 = vld [vmem:[%s9885_s14] sm:$0xff]  ;;  %v9900_v3 = vld [vmem:[%s9885_s14 + $0x10] sm:$0xff]  ;;  %s13252_s6 = smov 94   ;;  %s13250_s7 = smov 76  }
  0x12   : > { %173 = vrot.lane.b32.xlu1 %v9888_v0, %s9827_s15  ;;  %169 = vrot.lane.b32.xlu0 %v9891_v1, %s9827_s15  ;;  %v164_v2 = vcombine.low %v9891_v1, %v9891_v1  ;;  %v144_v4 = vld [vmem:[%s9885_s14] sm:$0xff]  ;;  %v145_v5 = vld [vmem:[%s9885_s14 + $0x8] sm:$0xff]  ;;  %v165_v9 = vcombine.low %v9888_v0, %v9888_v0  ;;  %v166_v10 = vcombine.low %v9900_v3, %v9900_v3  ;;  %s13248_s8 = smov 75   ;;  %s13246_s11 = smov 74  }
  0x13   : > { %153 = vst [vmem:[#allocation2] sm:$0xf] %v144_v4  ;;  %155 = vst [vmem:[#allocation2 + $0x10] sm:$0xf] %v145_v5  ;;  %v146_v6 = vld [vmem:[%s9885_s14 + $0x10] sm:$0xf]  ;;  %v149_v7 = vcombine.high %v144_v4, %v144_v4  ;;  %v150_v8 = vcombine.high %v145_v5, %v145_v5  ;;  %v201_v11 = vcombine.high %v9891_v1, %v9891_v1 }
  0x14   : > { %157 = vst [vmem:[#allocation2 + $0x20] sm:$0xf] %v146_v6  ;;  %v202_v12 = vcombine.high %v9888_v0, %v9888_v0  ;;  %v203_v13 = vcombine.high %v9900_v3, %v9900_v3  ;;  %v9981_v14 = vld [vmem:[%s9885_s14 + $0xc] sm:$0xff]  ;;  %v9991_v16 = vld [vmem:[%s9885_s14 + $0x14] sm:$0xff]  ;;  %v10002_v18 = vld [vmem:[%s9885_s14 + $0x1c] sm:$0xff]  ;;  %s13224_s12 = smov 56  }
  0x15   : > { %154 = vst [vmem:[#allocation2 + $0x8] sm:$0xf] %v149_v7  ;;  %156 = vst [vmem:[#allocation2 + $0x18] sm:$0xf] %v150_v8  ;;  %v9988_v15 = vcombine.high %v9981_v14, %v9981_v14  ;;  %v9999_v17 = vcombine.high %v9991_v16, %v9991_v16  ;;  %v10010_v19 = vcombine.high %v10002_v18, %v10002_v18  ;;  %s13231_s13 = smov 55  }
  0x16   : > { %177 = vrot.lane.b32.xlu1 %v9900_v3, %s9827_s15  ;;  %167 = vrot.lane.b32.xlu0 %v164_v2, %s9827_s15  ;;  %v10018_v20 = vcombine.low %v9981_v14, %v9981_v14  ;;  %v10026_v21 = vcombine.low %v9991_v16, %v9991_v16  ;;  %v10034_v22 = vcombine.low %v10002_v18, %v10002_v18 }
  0x1a   : > { %171 = vrot.lane.b32.xlu1 %v165_v9, %s9827_s15  ;;  %175 = vrot.lane.b32.xlu0 %v166_v10, %s9827_s15 }
  0x1e   : > { %206 = vrot.lane.b32.xlu1 %v201_v11, %s9828_s16  ;;  %204 = vrot.lane.b32.xlu0 %v9891_v1, %s9828_s16 }
  0x22   : > { %210 = vrot.lane.b32.xlu1 %v202_v12, %s9828_s16  ;;  %208 = vrot.lane.b32.xlu0 %v9888_v0, %s9828_s16 }
  0x26   : > { %214 = vrot.lane.b32.xlu1 %v203_v13, %s9828_s16  ;;  %212 = vrot.lane.b32.xlu0 %v9900_v3, %s9828_s16 }
  0x2a   : > { %243 = vrot.lane.b32.xlu1 %v9891_v1, %s9829_s17  ;;  %241 = vrot.lane.b32.xlu0 %v164_v2, %s9829_s17 }
  0x2e   : > { %247 = vrot.lane.b32.xlu1 %v9888_v0, %s9829_s17  ;;  %245 = vrot.lane.b32.xlu0 %v165_v9, %s9829_s17 }
  0x32   : > { %251 = vrot.lane.b32.xlu1 %v9900_v3, %s9829_s17  ;;  %249 = vrot.lane.b32.xlu0 %v166_v10, %s9829_s17 }
  0x36   : > { %280 = vrot.lane.b32.xlu1 %v201_v11, %s9830_s18  ;;  %278 = vrot.lane.b32.xlu0 %v9891_v1, %s9830_s18 }
  0x3a   : > { %284 = vrot.lane.b32.xlu1 %v202_v12, %s9830_s18  ;;  %282 = vrot.lane.b32.xlu0 %v9888_v0, %s9830_s18 }
  0x3e   : > { %288 = vrot.lane.b32.xlu1 %v203_v13, %s9830_s18  ;;  %286 = vrot.lane.b32.xlu0 %v9900_v3, %s9830_s18 }
  0x42   : > { %317 = vrot.lane.b32.xlu1 %v9891_v1, %s9831_s19  ;;  %315 = vrot.lane.b32.xlu0 %v164_v2, %s9831_s19 }
  0x46   : > { %321 = vrot.lane.b32.xlu1 %v9888_v0, %s9831_s19  ;;  %319 = vrot.lane.b32.xlu0 %v165_v9, %s9831_s19 }
  0x4a   : > { %325 = vrot.lane.b32.xlu1 %v9900_v3, %s9831_s19  ;;  %323 = vrot.lane.b32.xlu0 %v166_v10, %s9831_s19 }
  0x4e   : > { %354 = vrot.lane.b32.xlu1 %v201_v11, %s13262_s20  ;;  %352 = vrot.lane.b32.xlu0 %v9891_v1, %s13262_s20 }
  0x52   : > { %358 = vrot.lane.b32.xlu1 %v202_v12, %s13262_s20  ;;  %356 = vrot.lane.b32.xlu0 %v9888_v0, %s13262_s20 }
  0x56   : > { %362 = vrot.lane.b32.xlu1 %v203_v13, %s13262_s20  ;;  %360 = vrot.lane.b32.xlu0 %v9900_v3, %s13262_s20 }
  0x5a   : > { %391 = vrot.lane.b32.xlu1 %v9891_v1, %s13260_s21  ;;  %389 = vrot.lane.b32.xlu0 %v164_v2, %s13260_s21 }
  0x5e   : > { %395 = vrot.lane.b32.xlu1 %v9888_v0, %s13260_s21  ;;  %393 = vrot.lane.b32.xlu0 %v165_v9, %s13260_s21 }
  0x62   : > { %399 = vrot.lane.b32.xlu1 %v9900_v3, %s13260_s21  ;;  %397 = vrot.lane.b32.xlu0 %v166_v10, %s13260_s21 }
  0x66   : > { %428 = vrot.lane.b32.xlu1 %v201_v11, %s13258_s22  ;;  %426 = vrot.lane.b32.xlu0 %v9891_v1, %s13258_s22 }
  0x6a   : > { %432 = vrot.lane.b32.xlu1 %v202_v12, %s13258_s22  ;;  %430 = vrot.lane.b32.xlu0 %v9888_v0, %s13258_s22 }
  0x6e   : > { %436 = vrot.lane.b32.xlu1 %v203_v13, %s13258_s22  ;;  %434 = vrot.lane.b32.xlu0 %v9900_v3, %s13258_s22 }
  0x72   : > { %491 = vrot.lane.b32.xlu1 %v9988_v15, %s9835_s23  ;;  %489 = vrot.lane.b32.xlu0 %v9981_v14, %s9835_s23 }
  0x76   : > { %495 = vrot.lane.b32.xlu1 %v9999_v17, %s9835_s23  ;;  %493 = vrot.lane.b32.xlu0 %v9991_v16, %s9835_s23 }
  0x7a   : > { %499 = vrot.lane.b32.xlu1 %v10010_v19, %s9835_s23  ;;  %497 = vrot.lane.b32.xlu0 %v10002_v18, %s9835_s23 }
  0x7e   : > { %528 = vrot.lane.b32.xlu1 %v9981_v14, %s9836_s24  ;;  %526 = vrot.lane.b32.xlu0 %v10018_v20, %s9836_s24 }
  0x82   : > { %532 = vrot.lane.b32.xlu1 %v9991_v16, %s9836_s24  ;;  %530 = vrot.lane.b32.xlu0 %v10026_v21, %s9836_s24 }
  0x84   : > { %v174_v23 = vpop.permute.xlu1 %173  ;;  %v170_v24 = vpop.permute.xlu0 %169 }
  0x86   : > { %536 = vrot.lane.b32.xlu1 %v10002_v18, %s9836_s24  ;;  %534 = vrot.lane.b32.xlu0 %v10034_v22, %s9836_s24 }
  0x88   : > { %v178_v25 = vpop.permute.xlu1 %177  ;;  %v168_v26 = vpop.permute.xlu0 %167 }
  0x89   : > { %v180_v27 = vsel %vm179_vm0, %v168_v26, %v170_v24 }
  0x8a   : > { %190 = vst [vmem:[#allocation2] sm:$0xf0] %v180_v27  ;;  %565 = vrot.lane.b32.xlu1 %v9988_v15, %s9837_s25  ;;  %563 = vrot.lane.b32.xlu0 %v9981_v14, %s9837_s25 }
  0x8c   : > { %v172_v28 = vpop.permute.xlu1 %171  ;;  %v176_v29 = vpop.permute.xlu0 %175 }
  0x8d   : > { %v181_v30 = vsel %vm179_vm0, %v170_v24, %v172_v28  ;;  %v182_v31 = vsel %vm179_vm0, %v172_v28, %v174_v23  ;;  %v183_v32 = vsel %vm179_vm0, %v174_v23, %v176_v29  ;;  %v184_v33 = vsel %vm179_vm0, %v176_v29, %v178_v25 }
  0x8e   : > { %191 = vst [vmem:[#allocation2 + $0x8] sm:$0xf0] %v181_v30  ;;  %192 = vst [vmem:[#allocation2 + $0x10] sm:$0xf0] %v182_v31  ;;  %569 = vrot.lane.b32.xlu1 %v9999_v17, %s9837_s25  ;;  %567 = vrot.lane.b32.xlu0 %v9991_v16, %s9837_s25  ;;  %v10134_v31 = vld [vmem:[%s9885_s14 + $0x14] sm:$0xff] }
  0x8f   : > { %193 = vst [vmem:[#allocation2 + $0x18] sm:$0xf0] %v183_v32  ;;  %194 = vst [vmem:[#allocation2 + $0x20] sm:$0xf0] %v184_v33 }
  0x90   : > { %v207_v34 = vpop.permute.xlu1 %206  ;;  %v205_v35 = vpop.permute.xlu0 %204 }
  0x91   : > { %v217_v36 = vsel %vm216_vm1, %v205_v35, %v207_v34  ;;  %v10136_v32 = vld [vmem:[#allocation2] sm:$0xff] }
  0x92   : > { %227 = vst [vmem:[#allocation2 + $0x28] sm:$0xf] %v217_v36  ;;  %573 = vrot.lane.b32.xlu1 %v10010_v19, %s9837_s25  ;;  %571 = vrot.lane.b32.xlu0 %v10002_v18, %s9837_s25  ;;  %1911 = vst [vmem:[#allocation2] sm:$0xf] %v10134_v31 }
  0x94   : > { %v211_v37 = vpop.permute.xlu1 %210  ;;  %v209_v38 = vpop.permute.xlu0 %208 }
  0x95   : > { %v218_v39 = vsel %vm216_vm1, %v207_v34, %v209_v38  ;;  %v219_v40 = vsel %vm216_vm1, %v209_v38, %v211_v37 }
  0x96   : > { %228 = vst [vmem:[#allocation2 + $0x30] sm:$0xf] %v218_v39  ;;  %229 = vst [vmem:[#allocation2 + $0x38] sm:$0xf] %v219_v40  ;;  %602 = vrot.lane.b32.xlu1 %v9981_v14, %s9838_s26  ;;  %600 = vrot.lane.b32.xlu0 %v10018_v20, %s9838_s26 }
  0x98   : > { %v215_v41 = vpop.permute.xlu1 %214  ;;  %v213_v42 = vpop.permute.xlu0 %212 }
  0x99   : > { %v220_v43 = vsel %vm216_vm1, %v211_v37, %v213_v42  ;;  %v221_v44 = vsel %vm216_vm1, %v213_v42, %v215_v41  ;;  %v10148_v37 = vld [vmem:[#allocation2 + $0x10] sm:$0xff] }
  0x9a   : > { %230 = vst [vmem:[#allocation2 + $0x40] sm:$0xf] %v220_v43  ;;  %231 = vst [vmem:[#allocation2 + $0x48] sm:$0xf] %v221_v44  ;;  %606 = vrot.lane.b32.xlu1 %v9991_v16, %s9838_s26  ;;  %604 = vrot.lane.b32.xlu0 %v10026_v21, %s9838_s26 }
  0x9c   : > { %v244_v46 = vpop.permute.xlu1 %243  ;;  %v242_v47 = vpop.permute.xlu0 %241 }
  0x9d   : > { %v254_v48 = vsel %vm253_vm2, %v242_v47, %v244_v46 }
  0x9e   : > { %264 = vst [vmem:[#allocation2 + $0x28] sm:$0xf0] %v254_v48  ;;  %610 = vrot.lane.b32.xlu1 %v10002_v18, %s9838_s26  ;;  %608 = vrot.lane.b32.xlu0 %v10034_v22, %s9838_s26  ;;  %v9845_v48 = vmov 0.0  }
  0x9f   : > { %924 = vmatprep.mubr.f32.mxu1 %v9845_v48  ;;  %9108 = vmatprep.mubr.msk.f32.mxu0 %vm9846_vm8, %v9845_v48 }
  0xa0   : > { %v248_v49 = vpop.permute.xlu1 %247  ;;  %v246_v50 = vpop.permute.xlu0 %245 }
  0xa1   : > { %v255_v51 = vsel %vm253_vm2, %v244_v46, %v246_v50  ;;  %v256_v52 = vsel %vm253_vm2, %v246_v50, %v248_v49 }
  0xa2   : > { %265 = vst [vmem:[#allocation2 + $0x30] sm:$0xf0] %v255_v51  ;;  %266 = vst [vmem:[#allocation2 + $0x38] sm:$0xf0] %v256_v52  ;;  %639 = vrot.lane.b32.xlu1 %v9988_v15, %s9840_s27  ;;  %637 = vrot.lane.b32.xlu0 %v9981_v14, %s9840_s27 }
  0xa4   : > { %v252_v53 = vpop.permute.xlu1 %251  ;;  %v250_v54 = vpop.permute.xlu0 %249 }
  0xa5   : > { %v257_v55 = vsel %vm253_vm2, %v248_v49, %v250_v54  ;;  %v258_v56 = vsel %vm253_vm2, %v250_v54, %v252_v53  ;;  %v10167_v49 = vcombine.high %v10134_v31, %v10134_v31  ;;  %v10195_v53 = vld [vmem:[%s9885_s14 + $0x20] sm:$0xff]  ;;  %v10197_v54 = vld [vmem:[#allocation2 + $0x18] sm:$0xff] }
  0xa6   : > { %267 = vst [vmem:[#allocation2 + $0x40] sm:$0xf0] %v257_v55  ;;  %268 = vst [vmem:[#allocation2 + $0x48] sm:$0xf0] %v258_v56  ;;  %643 = vrot.lane.b32.xlu1 %v9999_v17, %s9840_s27  ;;  %641 = vrot.lane.b32.xlu0 %v9991_v16, %s9840_s27 }
  0xa8   : > { %v281_v57 = vpop.permute.xlu1 %280  ;;  %v279_v58 = vpop.permute.xlu0 %278 }
  0xa9   : > { %v291_v59 = vsel %vm290_vm3, %v279_v58, %v281_v57  ;;  %v10211_v58 = vld [vmem:[%s9885_s14 + $0x28] sm:$0xff] }
  0xaa   : > { %301 = vst [vmem:[#allocation2 + $0x50] sm:$0xf] %v291_v59  ;;  %647 = vrot.lane.b32.xlu1 %v10010_v19, %s9840_s27  ;;  %645 = vrot.lane.b32.xlu0 %v10002_v18, %s9840_s27 }
  0xac   : > { %v285_v60 = vpop.permute.xlu1 %284  ;;  %v283_v61 = vpop.permute.xlu0 %282 }
  0xad   : > { %v292_v62 = vsel %vm290_vm3, %v281_v57, %v283_v61  ;;  %v293_v63 = vsel %vm290_vm3, %v283_v61, %v285_v60  ;;  %v10208_v57 = vcombine.high %v10195_v53, %v10195_v53 }
  0xae   : > { %302 = vst [vmem:[#allocation2 + $0x58] sm:$0xf] %v292_v62  ;;  %303 = vst [vmem:[#allocation2 + $0x60] sm:$0xf] %v293_v63  ;;  %676 = vrot.lane.b32.xlu1 %v9981_v14, %s9841_s28  ;;  %674 = vrot.lane.b32.xlu0 %v10018_v20, %s9841_s28  ;;  %v10221_v63 = vcombine.high %v10211_v58, %v10211_v58 }
  0xb0   : > { %v289_v0 = vpop.permute.xlu1 %288  ;;  %v287_v1 = vpop.permute.xlu0 %286 }
  0xb1   : > { %v294_v2 = vsel %vm290_vm3, %v285_v60, %v287_v1  ;;  %v295_v3 = vsel %vm290_vm3, %v287_v1, %v289_v0 }
  0xb2   : > { %304 = vst [vmem:[#allocation2 + $0x68] sm:$0xf] %v294_v2  ;;  %305 = vst [vmem:[#allocation2 + $0x70] sm:$0xf] %v295_v3  ;;  %680 = vrot.lane.b32.xlu1 %v9991_v16, %s9841_s28  ;;  %678 = vrot.lane.b32.xlu0 %v10026_v21, %s9841_s28 }
  0xb4   : > { %v318_v4 = vpop.permute.xlu1 %317  ;;  %v316_v5 = vpop.permute.xlu0 %315 }
  0xb5   : > { %v328_v6 = vsel %vm327_vm4, %v316_v5, %v318_v4  ;;  %v1904_v5 = vld [vmem:[%s9885_s14 + $0x24] sm:$0xf] }
  0xb6   : > { %338 = vst [vmem:[#allocation2 + $0x50] sm:$0xf0] %v328_v6  ;;  %684 = vrot.lane.b32.xlu1 %v10002_v18, %s9841_s28  ;;  %682 = vrot.lane.b32.xlu0 %v10034_v22, %s9841_s28 }
  0xb8   : > { %v322_v7 = vpop.permute.xlu1 %321  ;;  %v320_v8 = vpop.permute.xlu0 %319 }
  0xb9   : > { %v329_v9 = vsel %vm327_vm4, %v318_v4, %v320_v8  ;;  %v330_v10 = vsel %vm327_vm4, %v320_v8, %v322_v7  ;;  %v10232_v4 = vld [vmem:[#allocation2 + $0x20] sm:$0xff] }
  0xba   : > { %339 = vst [vmem:[#allocation2 + $0x58] sm:$0xf0] %v329_v9  ;;  %340 = vst [vmem:[#allocation2 + $0x60] sm:$0xf0] %v330_v10  ;;  %713 = vrot.lane.b32.xlu1 %v9988_v15, %s9842_s29  ;;  %711 = vrot.lane.b32.xlu0 %v9981_v14, %s9842_s29  ;;  %v10243_v10 = vcombine.low %v10195_v53, %v10195_v53 }
  0xbb   : > { %1915 = vst [vmem:[#allocation2 + $0x20] sm:$0xf] %v1904_v5 }
  0xbc   : > { %v326_v11 = vpop.permute.xlu1 %325  ;;  %v324_v12 = vpop.permute.xlu0 %323 }
  0xbd   : > { %v331_v13 = vsel %vm327_vm4, %v322_v7, %v324_v12  ;;  %v332_v23 = vsel %vm327_vm4, %v324_v12, %v326_v11 }
  0xbe   : > { %341 = vst [vmem:[#allocation2 + $0x68] sm:$0xf0] %v331_v13  ;;  %342 = vst [vmem:[#allocation2 + $0x70] sm:$0xf0] %v332_v23  ;;  %717 = vrot.lane.b32.xlu1 %v9999_v17, %s9842_s29  ;;  %715 = vrot.lane.b32.xlu0 %v9991_v16, %s9842_s29 }
  0xc0   : > { %v355_v24 = vpop.permute.xlu1 %354  ;;  %v353_v25 = vpop.permute.xlu0 %352 }
  0xc1   : > { %v365_v26 = vsel %vm364_vm5, %v353_v25, %v355_v24 }
  0xc2   : > { %375 = vst [vmem:[#allocation2 + $0x78] sm:$0xf] %v365_v26  ;;  %721 = vrot.lane.b32.xlu1 %v10010_v19, %s9842_s29  ;;  %719 = vrot.lane.b32.xlu0 %v10002_v18, %s9842_s29 }
  0xc4   : > { %v359_v27 = vpop.permute.xlu1 %358  ;;  %v357_v28 = vpop.permute.xlu0 %356 }
  0xc5   : > { %v366_v29 = vsel %vm364_vm5, %v355_v24, %v357_v28  ;;  %v367_v30 = vsel %vm364_vm5, %v357_v28, %v359_v27  ;;  %v10253_v24 = vcombine.low %v10211_v58, %v10211_v58 }
  0xc6   : > { %376 = vst [vmem:[#allocation2 + $0x80] sm:$0xf] %v366_v29  ;;  %377 = vst [vmem:[#allocation2 + $0x88] sm:$0xf] %v367_v30  ;;  %750 = vrot.lane.b32.xlu1 %v9981_v14, %s9843_s30  ;;  %748 = vrot.lane.b32.xlu0 %v10018_v20, %s9843_s30  ;;  %v10146_v20 = vld [vmem:[%s9885_s14 + $0x1c] sm:$0xff] }
  0xc7   : > { %1913 = vst [vmem:[#allocation2 + $0x10] sm:$0xf] %v10146_v20 }
  0xc8   : > { %v363_v33 = vpop.permute.xlu1 %362  ;;  %v361_v34 = vpop.permute.xlu0 %360 }
  0xc9   : > { %v368_v35 = vsel %vm364_vm5, %v359_v27, %v361_v34  ;;  %v369_v36 = vsel %vm364_vm5, %v361_v34, %v363_v33 }
  0xca   : > { %378 = vst [vmem:[#allocation2 + $0x90] sm:$0xf] %v368_v35  ;;  %379 = vst [vmem:[#allocation2 + $0x98] sm:$0xf] %v369_v36  ;;  %754 = vrot.lane.b32.xlu1 %v9991_v16, %s9843_s30  ;;  %752 = vrot.lane.b32.xlu0 %v10026_v21, %s9843_s30 }
  0xcc   : > { %v392_v38 = vpop.permute.xlu1 %391  ;;  %v390_v39 = vpop.permute.xlu0 %389 }
  0xcd   : > { %v402_v40 = vsel %vm401_vm6, %v390_v39, %v392_v38 }
  0xce   : > { %412 = vst [vmem:[#allocation2 + $0x78] sm:$0xf0] %v402_v40  ;;  %758 = vrot.lane.b32.xlu1 %v10002_v18, %s9843_s30  ;;  %756 = vrot.lane.b32.xlu0 %v10034_v22, %s9843_s30 }
  0xd0   : > { %v396_v41 = vpop.permute.xlu1 %395  ;;  %v394_v21 = vpop.permute.xlu0 %393 }
  0xd1   : > { %v403_v42 = vsel %vm401_vm6, %v392_v38, %v394_v21  ;;  %v404_v43 = vsel %vm401_vm6, %v394_v21, %v396_v41 }
  0xd2   : > { %413 = vst [vmem:[#allocation2 + $0x80] sm:$0xf0] %v403_v42  ;;  %414 = vst [vmem:[#allocation2 + $0x88] sm:$0xf0] %v404_v43  ;;  %787 = vrot.lane.b32.xlu1 %v9988_v15, %s9844_s3  ;;  %785 = vrot.lane.b32.xlu0 %v9981_v14, %s9844_s3  ;;  %v10173_v14 = vld [vmem:[#allocation2 + $0x8] sm:$0xff]  ;;  %v10176_v15 = vld [vmem:[%s9885_s14 + $0x18] sm:$0xff] }
  0xd3   : > { %1912 = vst [vmem:[#allocation2 + $0x8] sm:$0xf] %v10167_v49  ;;  %v10230_v3 = vcombine.low %v10176_v15, %v10176_v15 }
  0xd4   : > { %v400_v44 = vpop.permute.xlu1 %399  ;;  %v398_v46 = vpop.permute.xlu0 %397 }
  0xd5   : > { %v405_v22 = vsel %vm401_vm6, %v396_v41, %v398_v46  ;;  %v406_v47 = vsel %vm401_vm6, %v398_v46, %v400_v44 }
  0xd6   : > { %415 = vst [vmem:[#allocation2 + $0x90] sm:$0xf0] %v405_v22  ;;  %416 = vst [vmem:[#allocation2 + $0x98] sm:$0xf0] %v406_v47  ;;  %791 = vrot.lane.b32.xlu1 %v9999_v17, %s9844_s3  ;;  %789 = vrot.lane.b32.xlu0 %v9991_v16, %s9844_s3  ;;  %v10188_v16 = vcombine.high %v10176_v15, %v10176_v15  ;;  %v10192_v17 = vcombine.high %v10146_v20, %v10146_v20 }
  0xd8   : > { %v429_v50 = vpop.permute.xlu1 %428  ;;  %v427_v51 = vpop.permute.xlu0 %426  ;;  %1914 = vst [vmem:[#allocation2 + $0x18] sm:$0xf] %v10192_v17 }
  0xd9   : > { %v439_v52 = vsel %vm13245_vm7, %v427_v51, %v429_v50 }
  0xda   : > { %449 = vst [vmem:[#allocation2 + $0xa0] sm:$0xf] %v439_v52  ;;  %795 = vrot.lane.b32.xlu1 %v10010_v19, %s9844_s3  ;;  %793 = vrot.lane.b32.xlu0 %v10002_v18, %s9844_s3 }
  0xdc   : > { %v433_v55 = vpop.permute.xlu1 %432  ;;  %v431_v56 = vpop.permute.xlu0 %430 }
  0xdd   : > { %v440_v19 = vsel %vm13245_vm7, %v429_v50, %v431_v56  ;;  %v441_v18 = vsel %vm13245_vm7, %v431_v56, %v433_v55 }
  0xde   : > { %450 = vst [vmem:[#allocation2 + $0xa8] sm:$0xf] %v440_v19  ;;  %451 = vst [vmem:[#allocation2 + $0xb0] sm:$0xf] %v441_v18  ;;  %1313 = vrot.lane.b32.xlu1 %v10188_v16, %s13256_s4  ;;  %1311 = vrot.lane.b32.xlu0 %v10176_v15, %s13256_s4 }
  0xe0   : > { %v437_v59 = vpop.permute.xlu1 %436  ;;  %v435_v60 = vpop.permute.xlu0 %434 }
  0xe1   : > { %v442_v61 = vsel %vm13245_vm7, %v433_v55, %v435_v60  ;;  %v443_v62 = vsel %vm13245_vm7, %v435_v60, %v437_v59 }
  0xe2   : > { %452 = vst [vmem:[#allocation2 + $0xb8] sm:$0xf] %v442_v61  ;;  %453 = vst [vmem:[#allocation2 + $0xc0] sm:$0xf] %v443_v62  ;;  %1317 = vrot.lane.b32.xlu1 %v10208_v57, %s13256_s4  ;;  %1315 = vrot.lane.b32.xlu0 %v10195_v53, %s13256_s4 }
  0xe4   : > { %v492_v0 = vpop.permute.xlu1 %491  ;;  %v490_v1 = vpop.permute.xlu0 %489 }
  0xe5   : > { %v502_v2 = vsel %vm13244_vm9, %v490_v1, %v492_v0 }
  0xe6   : > { %512 = vst [vmem:[#allocation3] sm:$0xf] %v502_v2  ;;  %1321 = vrot.lane.b32.xlu1 %v10221_v63, %s13256_s4  ;;  %1319 = vrot.lane.b32.xlu0 %v10211_v58, %s13256_s4 }
  0xe8   : > { %v496_v6 = vpop.permute.xlu1 %495  ;;  %v494_v7 = vpop.permute.xlu0 %493 }
  0xe9   : > { %v503_v8 = vsel %vm13244_vm9, %v492_v0, %v494_v7  ;;  %v504_v9 = vsel %vm13244_vm9, %v494_v7, %v496_v6 }
  0xea   : > { %513 = vst [vmem:[#allocation3 + $0x8] sm:$0xf] %v503_v8  ;;  %514 = vst [vmem:[#allocation3 + $0x10] sm:$0xf] %v504_v9  ;;  %1350 = vrot.lane.b32.xlu1 %v10176_v15, %s13254_s5  ;;  %1348 = vrot.lane.b32.xlu0 %v10230_v3, %s13254_s5 }
  0xec   : > { %v500_v11 = vpop.permute.xlu1 %499  ;;  %v498_v12 = vpop.permute.xlu0 %497 }
  0xed   : > { %v505_v13 = vsel %vm13244_vm9, %v496_v6, %v498_v12  ;;  %v506_v23 = vsel %vm13244_vm9, %v498_v12, %v500_v11 }
  0xee   : > { %515 = vst [vmem:[#allocation3 + $0x18] sm:$0xf] %v505_v13  ;;  %516 = vst [vmem:[#allocation3 + $0x20] sm:$0xf] %v506_v23  ;;  %1354 = vrot.lane.b32.xlu1 %v10195_v53, %s13254_s5  ;;  %1352 = vrot.lane.b32.xlu0 %v10243_v10, %s13254_s5 }
  0xf0   : > { %v529_v25 = vpop.permute.xlu1 %528  ;;  %v527_v26 = vpop.permute.xlu0 %526 }
  0xf1   : > { %v539_v27 = vsel %vm13242_vm10, %v527_v26, %v529_v25 }
  0xf2   : > { %549 = vst [vmem:[#allocation3] sm:$0xf0] %v539_v27  ;;  %1358 = vrot.lane.b32.xlu1 %v10211_v58, %s13254_s5  ;;  %1356 = vrot.lane.b32.xlu0 %v10253_v24, %s13254_s5 }
  0xf4   : > { %v533_v28 = vpop.permute.xlu1 %532  ;;  %v531_v29 = vpop.permute.xlu0 %530 }
  0xf5   : > { %v540_v30 = vsel %vm13242_vm10, %v529_v25, %v531_v29  ;;  %v541_v33 = vsel %vm13242_vm10, %v531_v29, %v533_v28 }
  0xf6   : > { %550 = vst [vmem:[#allocation3 + $0x8] sm:$0xf0] %v540_v30  ;;  %551 = vst [vmem:[#allocation3 + $0x10] sm:$0xf0] %v541_v33  ;;  %1387 = vrot.lane.b32.xlu1 %v10188_v16, %s13252_s6  ;;  %1385 = vrot.lane.b32.xlu0 %v10176_v15, %s13252_s6 }
  0xf8   : > { %v537_v34 = vpop.permute.xlu1 %536  ;;  %v535_v35 = vpop.permute.xlu0 %534 }
  0xf9   : > { %v542_v36 = vsel %vm13242_vm10, %v533_v28, %v535_v35  ;;  %v543_v38 = vsel %vm13242_vm10, %v535_v35, %v537_v34  ;;  %v815_v11 = vld [vmem:[#allocation3] sm:$0xff] }
  0xfa   : > { %552 = vst [vmem:[#allocation3 + $0x18] sm:$0xf0] %v542_v36  ;;  %553 = vst [vmem:[#allocation3 + $0x20] sm:$0xf0] %v543_v38  ;;  %1391 = vrot.lane.b32.xlu1 %v10208_v57, %s13252_s6  ;;  %1389 = vrot.lane.b32.xlu0 %v10195_v53, %s13252_s6 }
  0xfc   : > { %v566_v39 = vpop.permute.xlu1 %565  ;;  %v564_v40 = vpop.permute.xlu0 %563 }
  0xfd   : > { %v576_v41 = vsel %vm13243_vm11, %v564_v40, %v566_v39  ;;  %v816_v7 = vld [vmem:[#allocation3 + $0x8] sm:$0xff] }
  0xfe   : > { %586 = vst [vmem:[#allocation3 + $0x28] sm:$0xf] %v576_v41  ;;  %1395 = vrot.lane.b32.xlu1 %v10221_v63, %s13252_s6  ;;  %1393 = vrot.lane.b32.xlu0 %v10211_v58, %s13252_s6 }
 0x100   : > { %v570_v21 = vpop.permute.xlu1 %569  ;;  %v568_v42 = vpop.permute.xlu0 %567 }
 0x101   : > { %v577_v43 = vsel %vm13243_vm11, %v566_v39, %v568_v42  ;;  %v578_v44 = vsel %vm13243_vm11, %v568_v42, %v570_v21  ;;  %v819_v27 = vld [vmem:[#allocation3 + $0x20] sm:$0xff] }
 0x102   : > { %587 = vst [vmem:[#allocation3 + $0x30] sm:$0xf] %v577_v43  ;;  %588 = vst [vmem:[#allocation3 + $0x38] sm:$0xf] %v578_v44  ;;  %1424 = vrot.lane.b32.xlu1 %v10176_v15, %s13250_s7  ;;  %1422 = vrot.lane.b32.xlu0 %v10230_v3, %s13250_s7 }
 0x104   : > { %v574_v46 = vpop.permute.xlu1 %573  ;;  %v572_v22 = vpop.permute.xlu0 %571 }
 0x105   : > { %v579_v47 = vsel %vm13243_vm11, %v570_v21, %v572_v22  ;;  %v580_v50 = vsel %vm13243_vm11, %v572_v22, %v574_v46 }
 0x106   : > { %589 = vst [vmem:[#allocation3 + $0x40] sm:$0xf] %v579_v47  ;;  %590 = vst [vmem:[#allocation3 + $0x48] sm:$0xf] %v580_v50  ;;  %1428 = vrot.lane.b32.xlu1 %v10195_v53, %s13250_s7  ;;  %1426 = vrot.lane.b32.xlu0 %v10243_v10, %s13250_s7 }
 0x108   : > { %v603_v51 = vpop.permute.xlu1 %602  ;;  %v601_v52 = vpop.permute.xlu0 %600 }
 0x109   : > { %v613_v55 = vsel %vm13234_vm12, %v601_v52, %v603_v51 }
 0x10a   : > { %623 = vst [vmem:[#allocation3 + $0x28] sm:$0xf0] %v613_v55  ;;  %1432 = vrot.lane.b32.xlu1 %v10211_v58, %s13250_s7  ;;  %1430 = vrot.lane.b32.xlu0 %v10253_v24, %s13250_s7 }
 0x10c   : > { %v607_v56 = vpop.permute.xlu1 %606  ;;  %v605_v19 = vpop.permute.xlu0 %604 }
 0x10d   : > { %v614_v18 = vsel %vm13234_vm12, %v603_v51, %v605_v19  ;;  %v615_v59 = vsel %vm13234_vm12, %v605_v19, %v607_v56 }
 0x10e   : > { %624 = vst [vmem:[#allocation3 + $0x30] sm:$0xf0] %v614_v18  ;;  %625 = vst [vmem:[#allocation3 + $0x38] sm:$0xf0] %v615_v59  ;;  %1461 = vrot.lane.b32.xlu1 %v10188_v16, %s13248_s8  ;;  %1459 = vrot.lane.b32.xlu0 %v10176_v15, %s13248_s8 }
 0x110   : > { %v611_v60 = vpop.permute.xlu1 %610  ;;  %v609_v61 = vpop.permute.xlu0 %608 }
 0x111   : > { %v616_v62 = vsel %vm13234_vm12, %v607_v56, %v609_v61  ;;  %v617_v0 = vsel %vm13234_vm12, %v609_v61, %v611_v60  ;;  %v820_v5 = vld [vmem:[#allocation3 + $0x28] sm:$0xff]  ;;  %vm13236_vm12 = vcmask 777216  }
 0x112   : > { %626 = vst [vmem:[#allocation3 + $0x40] sm:$0xf0] %v616_v62  ;;  %627 = vst [vmem:[#allocation3 + $0x48] sm:$0xf0] %v617_v0  ;;  %1465 = vrot.lane.b32.xlu1 %v10208_v57, %s13248_s8  ;;  %1463 = vrot.lane.b32.xlu0 %v10195_v53, %s13248_s8  ;;  %v9295_v12 = vpack.c.bf16 %v820_v5, %v815_v11 }
 0x114   : > { %v640_v1 = vpop.permute.xlu1 %639  ;;  %v638_v2 = vpop.permute.xlu0 %637 }
 0x115   : > { %v650_v6 = vsel %vm13228_vm13, %v638_v2, %v640_v1  ;;  %v821_v8 = vld [vmem:[#allocation3 + $0x30] sm:$0xff] }
 0x116   : > { %660 = vst [vmem:[#allocation3 + $0x50] sm:$0xf] %v650_v6  ;;  %1469 = vrot.lane.b32.xlu1 %v10221_v63, %s13248_s8  ;;  %1467 = vrot.lane.b32.xlu0 %v10211_v58, %s13248_s8  ;;  %v9293_v9 = vpack.c.bf16 %v821_v8, %v816_v7 }
 0x118   : > { %v644_v13 = vpop.permute.xlu1 %643  ;;  %9294 = vmatprep.subr.bf16.mxu1 %v9293_v9  ;;  %v642_v23 = vpop.permute.xlu0 %641 }
 0x119   : > { %v651_v25 = vsel %vm13228_vm13, %v640_v1, %v642_v23  ;;  %v652_v26 = vsel %vm13228_vm13, %v642_v23, %v644_v13  ;;  %9296 = vmatpush1.bf16.msra.mxu1 %v9295_v12  ;;  %v824_v28 = vld [vmem:[#allocation3 + $0x48] sm:$0xff] }
 0x11a   : > { %661 = vst [vmem:[#allocation3 + $0x58] sm:$0xf] %v651_v25  ;;  %662 = vst [vmem:[#allocation3 + $0x60] sm:$0xf] %v652_v26  ;;  %1498 = vrot.lane.b32.xlu1 %v10176_v15, %s13246_s11  ;;  %1496 = vrot.lane.b32.xlu0 %v10230_v3, %s13246_s11  ;;  %v9310_v29 = vpack.c.bf16 %v824_v28, %v819_v27 }
 0x11c   : > { %v648_v30 = vpop.permute.xlu1 %647  ;;  %9311 = vmatpush3.bf16.msra.mxu0 %v9310_v29  ;;  %v646_v33 = vpop.permute.xlu0 %645 }
 0x11d   : > { %v653_v34 = vsel %vm13228_vm13, %v644_v13, %v646_v33  ;;  %v654_v35 = vsel %vm13228_vm13, %v646_v33, %v648_v30  ;;  %9312 = vmatprep.subr.bf16.mxu0 %v9839_v45  ;;  %v10392_v33 = vcombine.low %v10146_v20, %v10146_v20  ;;  %vm844_vm13 = vcmask 1043456  }
 0x11e   : > { %663 = vst [vmem:[#allocation3 + $0x68] sm:$0xf] %v653_v34  ;;  %664 = vst [vmem:[#allocation3 + $0x70] sm:$0xf] %v654_v35  ;;  %1502 = vrot.lane.b32.xlu1 %v10195_v53, %s13246_s11  ;;  %1500 = vrot.lane.b32.xlu0 %v10243_v10, %s13246_s11  ;;  %v10395_v34 = vld [vmem:[%s9885_s14 + $0x24] sm:$0xff] }
 0x120   : > { %v677_v36 = vpop.permute.xlu1 %676  ;;  %v675_v38 = vpop.permute.xlu0 %674 }
 0x121   : > { %v687_v39 = vsel %vm13223_vm14, %v675_v38, %v677_v36 }
 0x122   : > { %697 = vst [vmem:[#allocation3 + $0x50] sm:$0xf0] %v687_v39  ;;  %1506 = vrot.lane.b32.xlu1 %v10211_v58, %s13246_s11  ;;  %1504 = vrot.lane.b32.xlu0 %v10253_v24, %s13246_s11 }
 0x124   : > { %v681_v40 = vpop.permute.xlu1 %680  ;;  %v679_v41 = vpop.permute.xlu0 %678 }
 0x125   : > { %v688_v21 = vsel %vm13223_vm14, %v677_v36, %v679_v41  ;;  %v689_v42 = vsel %vm13223_vm14, %v679_v41, %v681_v40 }
 0x126   : > { %698 = vst [vmem:[#allocation3 + $0x58] sm:$0xf0] %v688_v21  ;;  %699 = vst [vmem:[#allocation3 + $0x60] sm:$0xf0] %v689_v42  ;;  %1535 = vrot.lane.b32.xlu1 %v10188_v16, %s13224_s12  ;;  %1533 = vrot.lane.b32.xlu0 %v10176_v15, %s13224_s12  ;;  %v823_v42 = vld [vmem:[#allocation3 + $0x40] sm:$0xff] }
 0x128   : > { %v685_v43 = vpop.permute.xlu1 %684  ;;  %v683_v44 = vpop.permute.xlu0 %682 }
 0x129   : > { %v690_v46 = vsel %vm13223_vm14, %v681_v40, %v683_v44  ;;  %v691_v22 = vsel %vm13223_vm14, %v683_v44, %v685_v43  ;;  %vm13227_vm14 = vcmask 580608   ;;  %v10406_v40 = vcombine.low %v10395_v34, %v10395_v34 }
 0x12a   : > { %700 = vst [vmem:[#allocation3 + $0x68] sm:$0xf0] %v690_v46  ;;  %701 = vst [vmem:[#allocation3 + $0x70] sm:$0xf0] %v691_v22  ;;  %1539 = vrot.lane.b32.xlu1 %v10208_v57, %s13224_s12  ;;  %1537 = vrot.lane.b32.xlu0 %v10195_v53, %s13224_s12  ;;  %v822_v46 = vld [vmem:[#allocation3 + $0x38] sm:$0xff] }
 0x12b   : > { %v818_v22 = vld [vmem:[#allocation3 + $0x18] sm:$0xff] }
 0x12c   : > { %v714_v47 = vpop.permute.xlu1 %713  ;;  %v712_v50 = vpop.permute.xlu0 %711 }
 0x12d   : > { %v724_v51 = vsel %vm13226_vm15, %v712_v50, %v714_v47  ;;  %v826_v12 = vld [vmem:[#allocation3 + $0x58] sm:$0xff] }
 0x12e   : > { %734 = vst [vmem:[#allocation3 + $0x78] sm:$0xf] %v724_v51  ;;  %1543 = vrot.lane.b32.xlu1 %v10221_v63, %s13224_s12  ;;  %1541 = vrot.lane.b32.xlu0 %v10211_v58, %s13224_s12  ;;  %s13229_s12 = smov 54  }
 0x130   : > { %v718_v52 = vpop.permute.xlu1 %717  ;;  %v716_v55 = vpop.permute.xlu0 %715 }
 0x131   : > { %v725_v56 = vsel %vm13226_vm15, %v714_v47, %v716_v55  ;;  %v726_v19 = vsel %vm13226_vm15, %v716_v55, %v718_v52  ;;  %v10416_v47 = vld [vmem:[%s13221_s1 + $0x8] sm:$0xff]  ;;  %v817_v55 = vld [vmem:[#allocation3 + $0x10] sm:$0xff] }
 0x132   : > { %735 = vst [vmem:[#allocation3 + $0x80] sm:$0xf] %v725_v56  ;;  %736 = vst [vmem:[#allocation3 + $0x88] sm:$0xf] %v726_v19  ;;  %1572 = vrot.lane.b32.xlu1 %v10176_v15, %s13231_s13  ;;  %1570 = vrot.lane.b32.xlu0 %v10230_v3, %s13231_s13 }
 0x134   : > { %v722_v18 = vpop.permute.xlu1 %721  ;;  %v720_v59 = vpop.permute.xlu0 %719 }
 0x135   : > { %v727_v60 = vsel %vm13226_vm15, %v718_v52, %v720_v59  ;;  %v728_v61 = vsel %vm13226_vm15, %v720_v59, %v722_v18  ;;  %vm13233_vm15 = vcmask 572416   ;;  %v9301_v52 = vpack.c.bf16 %v823_v42, %v818_v22  ;;  %v828_v59 = vld [vmem:[#allocation3 + $0x68] sm:$0xff]  ;;  %v475_v42 = vld [vmem:[#allocation2 + $0xa0] sm:$0xf] }
 0x136   : > { %737 = vst [vmem:[#allocation3 + $0x90] sm:$0xf] %v727_v60  ;;  %738 = vst [vmem:[#allocation3 + $0x98] sm:$0xf] %v728_v61  ;;  %1576 = vrot.lane.b32.xlu1 %v10195_v53, %s13231_s13  ;;  %1574 = vrot.lane.b32.xlu0 %v10243_v10, %s13231_s13  ;;  %v9303_v18 = vpack.c.bf16 %v822_v46, %v817_v55  ;;  %v461_v60 = vld [vmem:[#allocation2 + $0x30] sm:$0xff]  ;;  %v472_v46 = vld [vmem:[#allocation2 + $0x88] sm:$0xff] }
 0x137   : > { %v467_v22 = vld [vmem:[#allocation2 + $0x60] sm:$0xff] }
 0x138   : > { %v751_v62 = vpop.permute.xlu1 %750  ;;  %v749_v0 = vpop.permute.xlu0 %748 }
 0x139   : > { %v761_v1 = vsel %vm13227_vm14, %v749_v0, %v751_v62 }
 0x13a   : > { %771 = vst [vmem:[#allocation3 + $0x78] sm:$0xf0] %v761_v1  ;;  %1580 = vrot.lane.b32.xlu1 %v10211_v58, %s13231_s13  ;;  %1578 = vrot.lane.b32.xlu0 %v10253_v24, %s13231_s13  ;;  %s13282_s13 = smov 55  }
 0x13c   : > { %v755_v3 = vpop.permute.xlu1 %754  ;;  %v753_v2 = vpop.permute.xlu0 %752 }
 0x13d   : > { %v762_v5 = vsel %vm13227_vm14, %v751_v62, %v753_v2  ;;  %v763_v6 = vsel %vm13227_vm14, %v753_v2, %v755_v3 }
 0x13e   : > { %772 = vst [vmem:[#allocation3 + $0x80] sm:$0xf0] %v762_v5  ;;  %773 = vst [vmem:[#allocation3 + $0x88] sm:$0xf0] %v763_v6  ;;  %1609 = vrot.lane.b32.xlu1 %v10188_v16, %s13229_s12  ;;  %1607 = vrot.lane.b32.xlu0 %v10176_v15, %s13229_s12  ;;  %v471_v5 = vld [vmem:[#allocation2 + $0x80] sm:$0xff]  ;;  %v9315_v6 = vpack.c.bf16 %v461_v60, %v10173_v14 }
 0x140   : > { %v759_v10 = vpop.permute.xlu1 %758  ;;  %v757_v7 = vpop.permute.xlu0 %756 }
 0x141   : > { %v764_v8 = vsel %vm13227_vm14, %v755_v3, %v757_v7  ;;  %v765_v24 = vsel %vm13227_vm14, %v757_v7, %v759_v10  ;;  %v830_v11 = vld [vmem:[#allocation3 + $0x78] sm:$0xff]  ;;  %vm13235_vm14 = vcmask 785408   ;;  %v460_v3 = vld [vmem:[#allocation2 + $0x28] sm:$0xff] }
 0x142   : > { %774 = vst [vmem:[#allocation3 + $0x90] sm:$0xf0] %v764_v8  ;;  %775 = vst [vmem:[#allocation3 + $0x98] sm:$0xf0] %v765_v24  ;;  %1613 = vrot.lane.b32.xlu1 %v10208_v57, %s13229_s12  ;;  %1611 = vrot.lane.b32.xlu0 %v10195_v53, %s13229_s12  ;;  %v825_v57 = vld [vmem:[#allocation3 + $0x50] sm:$0xff]  ;;  %v10382_v53 = vcombine.low %v10134_v31, %v10134_v31  ;;  %v827_v10 = vld [vmem:[#allocation3 + $0x60] sm:$0xff]  ;;  %v9317_v24 = vpack.c.bf16 %v460_v3, %v10136_v32 }
 0x143   : > { %v9299_v25 = vpack.c.bf16 %v830_v11, %v825_v57  ;;  %v463_v57 = vld [vmem:[#allocation2 + $0x40] sm:$0xff] }
 0x144   : > { %v788_v9 = vpop.permute.xlu1 %787  ;;  %v786_v16 = vpop.permute.xlu0 %785 }
 0x145   : > { %v798_v15 = vsel %vm13233_vm15, %v786_v16, %v788_v9  ;;  %v831_v13 = vld [vmem:[#allocation3 + $0x80] sm:$0xff]  ;;  %v832_v2 = vld [vmem:[#allocation3 + $0x88] sm:$0xff]  ;;  %v466_v16 = vld [vmem:[#allocation2 + $0x58] sm:$0xff] }
 0x146   : > { %808 = vst [vmem:[#allocation3 + $0xa0] sm:$0xf] %v798_v15  ;;  %1617 = vrot.lane.b32.xlu1 %v10221_v63, %s13229_s12  ;;  %1615 = vrot.lane.b32.xlu0 %v10211_v58, %s13229_s12  ;;  %v9297_v23 = vpack.c.bf16 %v831_v13, %v826_v12  ;;  %v829_v63 = vld [vmem:[#allocation3 + $0x70] sm:$0xff]  ;;  %v9319_v14 = vpack.c.bf16 %v471_v5, %v466_v16  ;;  %v465_v13 = vld [vmem:[#allocation2 + $0x50] sm:$0xff]  ;;  %s13277_s12 = smov 56  }
 0x147   : > { %v470_v12 = vld [vmem:[#allocation2 + $0x78] sm:$0xff] }
 0x148   : > { %v792_v26 = vpop.permute.xlu1 %791  ;;  %9298 = vmatprep.subr.bf16.mxu1 %v9297_v23  ;;  %v790_v27 = vpop.permute.xlu0 %789  ;;  %v10440_v23 = vcombine.high %v10395_v34, %v10395_v34 }
 0x149   : > { %v799_v28 = vsel %vm13233_vm15, %v788_v9, %v790_v27  ;;  %v800_v29 = vsel %vm13233_vm15, %v790_v27, %v792_v26  ;;  %9300 = vmatpush1.bf16.msra.mxu1 %v9299_v25  ;;  %v834_v30 = vld [vmem:[#allocation3 + $0x98] sm:$0xff]  ;;  %v833_v50 = vld [vmem:[#allocation3 + $0x90] sm:$0xff]  ;;  %v9307_v9 = vpack.c.bf16 %v832_v2, %v827_v10  ;;  %v9321_v27 = vpack.c.bf16 %v470_v12, %v465_v13 }
 0x14a   : > { %809 = vst [vmem:[#allocation3 + $0xa8] sm:$0xf] %v799_v28  ;;  %810 = vst [vmem:[#allocation3 + $0xb0] sm:$0xf] %v800_v29  ;;  %1927 = vrot.lane.b32.xlu1 %v10134_v31, %s9827_s15  ;;  %1925 = vrot.lane.b32.xlu0 %v10382_v53, %s9827_s15  ;;  %v9313_v58 = vpack.c.bf16 %v834_v30, %v829_v63  ;;  %v9305_v0 = vpack.c.bf16 %v833_v50, %v828_v59  ;;  %v462_v63 = vld [vmem:[#allocation2 + $0x38] sm:$0xff] }
 0x14b   : > { %v476_v30 = vld [vmem:[#allocation2 + $0xa8] sm:$0xf]  ;;  %v9329_v50 = vpack.c.bf16 %v472_v46, %v467_v22  ;;  %v479_v2 = vld [vmem:[#allocation2 + $0xc0] sm:$0xf] }
 0x14c   : > { %v796_v35 = vpop.permute.xlu1 %795  ;;  %9314 = vmatpush3.bf16.msra.mxu0 %v9313_v58  ;;  %v794_v36 = vpop.permute.xlu0 %793  ;;  %v9323_v58 = vpack.c.bf16 %v463_v57, %v10197_v54 }
 0x14d   : > { %v801_v38 = vsel %vm13233_vm15, %v792_v26, %v794_v36  ;;  %v802_v39 = vsel %vm13233_vm15, %v794_v36, %v796_v35  ;;  %9106 = vmatprep.subr.mxu0 %v9845_v48  ;;  %vm840_vm15 = vcmask 293888   ;;  %v835_v51 = vld [vmem:[#allocation3 + $0xa0] sm:$0xf]  ;;  %v473_v35 = vld [vmem:[#allocation2 + $0x90] sm:$0xff]  ;;  %v9325_v36 = vpack.c.bf16 %v462_v63, %v10148_v37  ;;  %v454_v37 = vld [vmem:[%s13221_s1] sm:$0xff] }
 0x14e   : > { %811 = vst [vmem:[#allocation3 + $0xb8] sm:$0xf] %v801_v38  ;;  %812 = vst [vmem:[#allocation3 + $0xc0] sm:$0xf] %v802_v39  ;;  %1931 = vrot.lane.b32.xlu1 %v10146_v20, %s9827_s15  ;;  %1929 = vrot.lane.b32.xlu0 %v10392_v33, %s9827_s15 }
 0x150   : > { %v1314_v41 = vpop.permute.xlu1 %1313  ;;  %v1312_v21 = vpop.permute.xlu0 %1311 }
 0x151   : > { %v1324_v43 = vsel %vm13235_vm14, %v1312_v21, %v1314_v41  ;;  %v836_v44 = vld [vmem:[#allocation3 + $0xa8] sm:$0xf]  ;;  %v837_v29 = vld [vmem:[#allocation3 + $0xb0] sm:$0xf] }
 0x152   : > { %1334 = vst [vmem:[#allocation4] sm:$0xf] %v1324_v43  ;;  %1935 = vrot.lane.b32.xlu1 %v10395_v34, %s9827_s15  ;;  %1933 = vrot.lane.b32.xlu0 %v10406_v40, %s9827_s15 }
 0x153   : > { %8877 = vmatprep.subr.msk.mxu1 %vm844_vm13, %v836_v44  ;;  %v464_v44 = vld [vmem:[#allocation2 + $0x48] sm:$0xff] }
 0x154   : > { %8878 = vmatpush1.msk.msra.mxu1 %vm844_vm13, %v835_v51  ;;  %v1318_v56 = vpop.permute.xlu1 %1317  ;;  %v1316_v19 = vpop.permute.xlu0 %1315 }
 0x155   : > { %9302 = vmatprep.subr.bf16.mxu1 %v9301_v52  ;;  %v1325_v61 = vsel %vm13235_vm14, %v1314_v41, %v1316_v19  ;;  %v1326_v62 = vsel %vm13235_vm14, %v1316_v19, %v1318_v56  ;;  %8879 = vmatmul.mubr.msk.f32.vlgmr.msra.gmra.mrb[0].mxu1 %vm840_vm15, %v10416_v47  ;;  %v839_v1 = vld [vmem:[#allocation3 + $0xc0] sm:$0xf]  ;;  %v838_v32 = vld [vmem:[#allocation3 + $0xb8] sm:$0xf]  ;;  %v474_v19 = vld [vmem:[#allocation2 + $0x98] sm:$0xff] }
 0x156   : > { %1335 = vst [vmem:[#allocation4 + $0x8] sm:$0xf] %v1325_v61  ;;  %1336 = vst [vmem:[#allocation4 + $0x10] sm:$0xf] %v1326_v62  ;;  %9304 = vmatpush1.bf16.msra.mxu1 %v9303_v18  ;;  %1963 = vrot.lane.b32.xlu1 %v10167_v49, %s9828_s16  ;;  %v468_v41 = vld [vmem:[#allocation2 + $0x68] sm:$0xff] }
 0x157   : > { %1961 = vrot.lane.b32.xlu0 %v10134_v31, %s9828_s16  ;;  %9306 = vmatprep.subr.bf16.mxu1 %v9305_v0  ;;  %v9327_v43 = vpack.c.bf16 %v473_v35, %v468_v41  ;;  %v478_v18 = vld [vmem:[#allocation2 + $0xb8] sm:$0xf]  ;;  %v477_v62 = vld [vmem:[#allocation2 + $0xb0] sm:$0xf] }
 0x158   : > { %9107 = vmatpush3.msk.msra.mxu0 %vm844_vm13, %v839_v1  ;;  %v1322_v7 = vpop.permute.xlu1 %1321  ;;  %v1320_v8 = vpop.permute.xlu0 %1319  ;;  %995 = vmatprep.mubr.f32.mxu1 %v9845_v48 }
 0x159   : > { %9316 = vmatprep.subr.bf16.mxu0 %v9315_v6  ;;  %9109 = vmatmul.mubr.msk.f32.vlgmr.msra.gmra.mrb[0].mxu0 %vm840_vm15, %v10416_v47  ;;  %v1327_v11 = vsel %vm13235_vm14, %v1318_v56, %v1320_v8  ;;  %v1328_v15 = vsel %vm13235_vm14, %v1320_v8, %v1322_v7  ;;  %vm13237_vm14 = vcmask 769024  }
 0x15a   : > { %1337 = vst [vmem:[#allocation4 + $0x18] sm:$0xf] %v1327_v11  ;;  %1338 = vst [vmem:[#allocation4 + $0x20] sm:$0xf] %v1328_v15  ;;  %9318 = vmatpush1.bf16.msra.mxu0 %v9317_v24  ;;  %9308 = vmatpush1.bf16.msra.mxu1 %v9307_v9 }
 0x15b   : > { %9320 = vmatprep.subr.bf16.mxu0 %v9319_v14  ;;  %1967 = vrot.lane.b32.xlu1 %v10192_v17, %s9828_s16 }
 0x15c   : > { %1965 = vrot.lane.b32.xlu0 %v10146_v20, %s9828_s16  ;;  %8880 = vmatprep.subr.msk.mxu1 %vm844_vm13, %v838_v32  ;;  %v1351_v25 = vpop.permute.xlu1 %1350  ;;  %v1349_v26 = vpop.permute.xlu0 %1348 }
 0x15d   : > { %v1361_v28 = vsel %vm13236_vm12, %v1349_v26, %v1351_v25  ;;  %1154 = vmatprep.mubr.f32.mxu0 %v9845_v48 }
 0x15e   : > { %1371 = vst [vmem:[#allocation4] sm:$0xf0] %v1361_v28  ;;  %9322 = vmatpush1.bf16.msra.mxu0 %v9321_v27  ;;  %8881 = vmatpush1.msk.msra.mxu1 %vm844_vm13, %v837_v29 }
 0x15f   : > { %8885 = vmatprep.subr.msk.mxu0 %vm844_vm13, %v476_v30  ;;  %1971 = vrot.lane.b32.xlu1 %v10440_v23, %s9828_s16 }
 0x160   : > { %1969 = vrot.lane.b32.xlu0 %v10395_v34, %s9828_s16  ;;  %9324 = vmatprep.subr.bf16.mxu1 %v9323_v58  ;;  %v1355_v38 = vpop.permute.xlu1 %1354  ;;  %v1353_v39 = vpop.permute.xlu0 %1352 }
 0x161   : > { %8882 = vmatmul.mubr.msk.f32.vlgmr.msra.gmra.mrb[2].mxu1 %vm840_vm15, %v10416_v47  ;;  %v1362_v54 = vsel %vm13236_vm12, %v1351_v25, %v1353_v39  ;;  %v1363_v21 = vsel %vm13236_vm12, %v1353_v39, %v1355_v38  ;;  %v9332_v47 = vpack.c.bf16 %v464_v44, %v10232_v4  ;;  %v469_v4 = vld [vmem:[#allocation2 + $0x70] sm:$0xff] }
 0x162   : > { %9326 = vmatpush1.bf16.msra.mxu1 %v9325_v36  ;;  %1372 = vst [vmem:[#allocation4 + $0x8] sm:$0xf0] %v1362_v54  ;;  %1373 = vst [vmem:[#allocation4 + $0x10] sm:$0xf0] %v1363_v21  ;;  %8886 = vmatpush1.msk.msra.mxu0 %vm844_vm13, %v475_v42  ;;  %v9335_v59 = vpack.c.bf16 %v474_v19, %v469_v4 }
 0x163   : > { %9328 = vmatprep.subr.bf16.mxu1 %v9327_v43  ;;  %9331 = vmatprep.subr.bf16.mxu0 %v9839_v45 }
 0x164   : > { %1999 = vrot.lane.b32.xlu1 %v10134_v31, %s9829_s17  ;;  %1997 = vrot.lane.b32.xlu0 %v10382_v53, %s9829_s17  ;;  %v1359_v51 = vpop.permute.xlu1 %1358  ;;  %v1357_v52 = vpop.permute.xlu0 %1356 }
 0x165   : > { %8887 = vmatmul.mubr.msk.f32.vlgmr.msra.gmra.mrb[2].mxu0 %vm840_vm15, %v454_v37  ;;  %v1364_v55 = vsel %vm13236_vm12, %v1355_v38, %v1357_v52  ;;  %v1365_v56 = vsel %vm13236_vm12, %v1357_v52, %v1359_v51  ;;  %1225 = vmatprep.mubr.f32.mxu1 %v9845_v48  ;;  %vm13238_vm12 = vcmask 621568   ;;  %v1637_v36 = vld [vmem:[#allocation4] sm:$0xff] }
 0x166   : > { %9333 = vmatpush3.bf16.msra.mxu0 %v9332_v47  ;;  %9330 = vmatpush1.bf16.msra.mxu1 %v9329_v50  ;;  %1374 = vst [vmem:[#allocation4 + $0x18] sm:$0xf0] %v1364_v55  ;;  %1375 = vst [vmem:[#allocation4 + $0x20] sm:$0xf0] %v1365_v56 }
 0x167   : > { %8888 = vmatprep.subr.msk.mxu1 %vm844_vm13, %v478_v18  ;;  %9334 = vmatprep.subr.bf16.mxu0 %v9839_v45 }
 0x168   : > { %2003 = vrot.lane.b32.xlu1 %v10146_v20, %s9829_s17  ;;  %2001 = vrot.lane.b32.xlu0 %v10392_v33, %s9829_s17  ;;  %v1388_v60 = vpop.permute.xlu1 %1387  ;;  %v1386_v61 = vpop.permute.xlu0 %1385 }
 0x169   : > { %v1398_v0 = vsel %vm13237_vm14, %v1386_v61, %v1388_v60  ;;  %9121 = vmatprep.mubr.msk.f32.mxu0 %vm9846_vm8, %v9845_v48  ;;  %v1638_v63 = vld [vmem:[#allocation4 + $0x8] sm:$0xff] }
 0x16a   : > { %9336 = vmatpush3.bf16.msra.mxu0 %v9335_v59  ;;  %8889 = vmatpush1.msk.msra.mxu1 %vm844_vm13, %v477_v62  ;;  %1408 = vst [vmem:[#allocation4 + $0x28] sm:$0xf] %v1398_v0 }
 0x16b   : > { %9119 = vmatprep.subr.mxu0 %v9845_v48  ;;  %8890 = vmatmul.mubr.msk.f32.vlgmr.msra.gmra.mrb[2].mxu1 %vm840_vm15, %v454_v37 }
 0x16c   : > { %2007 = vrot.lane.b32.xlu1 %v10395_v34, %s9829_s17  ;;  %2005 = vrot.lane.b32.xlu0 %v10406_v40, %s9829_s17  ;;  %v1392_v1 = vpop.permute.xlu1 %1391  ;;  %v1390_v3 = vpop.permute.xlu0 %1389 }
 0x16d   : > { %v1399_v5 = vsel %vm13237_vm14, %v1388_v60, %v1390_v3  ;;  %v1400_v6 = vsel %vm13237_vm14, %v1390_v3, %v1392_v1  ;;  %1815 = vmatprep.mubr.f32.mxu1 %v9845_v48  ;;  %v1640_v42 = vld [vmem:[#allocation4 + $0x18] sm:$0xff] }
 0x16e   : > { %9120 = vmatpush3.msk.msra.mxu0 %vm844_vm13, %v479_v2  ;;  %1409 = vst [vmem:[#allocation4 + $0x30] sm:$0xf] %v1399_v5  ;;  %1410 = vst [vmem:[#allocation4 + $0x38] sm:$0xf] %v1400_v6 }
 0x16f   : > { %9122 = vmatmul.mubr.msk.f32.vlgmr.msra.gmra.mrb[0].mxu0 %vm840_vm15, %v454_v37  ;;  %v1639_v37 = vld [vmem:[#allocation4 + $0x10] sm:$0xff] }
 0x170   : > { %2035 = vrot.lane.b32.xlu1 %v10167_v49, %s9830_s18  ;;  %2033 = vrot.lane.b32.xlu0 %v10134_v31, %s9830_s18  ;;  %v1396_v10 = vpop.permute.xlu1 %1395  ;;  %v1394_v7 = vpop.permute.xlu0 %1393 }
 0x171   : > { %v1401_v8 = vsel %vm13237_vm14, %v1392_v1, %v1394_v7  ;;  %v1402_v24 = vsel %vm13237_vm14, %v1394_v7, %v1396_v10  ;;  %1744 = vmatprep.mubr.f32.mxu0 %v9845_v48  ;;  %vm13239_vm14 = vcmask 613376  }
 0x172   : > { %1411 = vst [vmem:[#allocation4 + $0x40] sm:$0xf] %v1401_v8  ;;  %1412 = vst [vmem:[#allocation4 + $0x48] sm:$0xf] %v1402_v24 }
 0x174   : > { %2039 = vrot.lane.b32.xlu1 %v10192_v17, %s9830_s18  ;;  %2037 = vrot.lane.b32.xlu0 %v10146_v20, %s9830_s18  ;;  %v1425_v9 = vpop.permute.xlu1 %1424  ;;  %v1423_v16 = vpop.permute.xlu0 %1422 }
 0x175   : > { %v1435_v11 = vsel %vm13238_vm12, %v1423_v16, %v1425_v9  ;;  %v10575_v16 = vld [vmem:[%s9885_s14 + $0x20] sm:$0xff] }
 0x176   : > { %1445 = vst [vmem:[#allocation4 + $0x28] sm:$0xf0] %v1435_v11 }
 0x178   : > { %2043 = vrot.lane.b32.xlu1 %v10440_v23, %s9830_s18  ;;  %2041 = vrot.lane.b32.xlu0 %v10395_v34, %s9830_s18  ;;  %v1429_v15 = vpop.permute.xlu1 %1428  ;;  %v1427_v14 = vpop.permute.xlu0 %1426 }
 0x179   : > { %v1436_v12 = vsel %vm13238_vm12, %v1425_v9, %v1427_v14  ;;  %v1437_v32 = vsel %vm13238_vm12, %v1427_v14, %v1429_v15 }
 0x17a   : > { %1446 = vst [vmem:[#allocation4 + $0x30] sm:$0xf0] %v1436_v12  ;;  %1447 = vst [vmem:[#allocation4 + $0x38] sm:$0xf0] %v1437_v32  ;;  %v10588_v12 = vld [vmem:[%s9885_s14 + $0x28] sm:$0xff] }
 0x17b   : > { %v10596_v32 = vcombine.high %v10588_v12, %v10588_v12 }
 0x17c   : > { %2071 = vrot.lane.b32.xlu1 %v10134_v31, %s9831_s19  ;;  %2069 = vrot.lane.b32.xlu0 %v10382_v53, %s9831_s19  ;;  %v1433_v13 = vpop.permute.xlu1 %1432  ;;  %v1431_v57 = vpop.permute.xlu0 %1430 }
 0x17d   : > { %v1438_v25 = vsel %vm13238_vm12, %v1429_v15, %v1431_v57  ;;  %v1439_v26 = vsel %vm13238_vm12, %v1431_v57, %v1433_v13  ;;  %v1642_v58 = vld [vmem:[#allocation4 + $0x28] sm:$0xff]  ;;  %vm13240_vm12 = vcmask 605184  }
 0x17e   : > { %1448 = vst [vmem:[#allocation4 + $0x40] sm:$0xf0] %v1438_v25  ;;  %1449 = vst [vmem:[#allocation4 + $0x48] sm:$0xf0] %v1439_v26  ;;  %v9339_v41 = vpack.c.bf16 %v1642_v58, %v1637_v36  ;;  %v10601_v25 = vld [vmem:[%s9885_s14 + $0x30] sm:$0xff] }
 0x180   : > { %2075 = vrot.lane.b32.xlu1 %v10146_v20, %s9831_s19  ;;  %2073 = vrot.lane.b32.xlu0 %v10392_v33, %s9831_s19  ;;  %v1462_v27 = vpop.permute.xlu1 %1461  ;;  %v1460_v28 = vpop.permute.xlu0 %1459 }
 0x181   : > { %v1472_v29 = vsel %vm13239_vm14, %v1460_v28, %v1462_v27  ;;  %v1643_v30 = vld [vmem:[#allocation4 + $0x30] sm:$0xff]  ;;  %v1644_v44 = vld [vmem:[#allocation4 + $0x38] sm:$0xff]  ;;  %v10609_v28 = vcombine.high %v10601_v25, %v10601_v25 }
 0x182   : > { %1482 = vst [vmem:[#allocation4 + $0x50] sm:$0xf] %v1472_v29  ;;  %v9337_v35 = vpack.c.bf16 %v1643_v30, %v1638_v63  ;;  %v9347_v50 = vpack.c.bf16 %v1644_v44, %v1639_v37 }
 0x184   : > { %2079 = vrot.lane.b32.xlu1 %v10395_v34, %s9831_s19  ;;  %2077 = vrot.lane.b32.xlu0 %v10406_v40, %s9831_s19  ;;  %v1466_v38 = vpop.permute.xlu1 %1465  ;;  %v1464_v39 = vpop.permute.xlu0 %1463 }
 0x185   : > { %v1473_v54 = vsel %vm13239_vm14, %v1462_v27, %v1464_v39  ;;  %v1474_v21 = vsel %vm13239_vm14, %v1464_v39, %v1466_v38  ;;  %9338 = vmatprep.subr.bf16.mxu0 %v9337_v35  ;;  %v1645_v43 = vld [vmem:[#allocation4 + $0x40] sm:$0xff] }
 0x186   : > { %1483 = vst [vmem:[#allocation4 + $0x58] sm:$0xf] %v1473_v54  ;;  %1484 = vst [vmem:[#allocation4 + $0x60] sm:$0xf] %v1474_v21  ;;  %9340 = vmatpush1.bf16.msra.mxu0 %v9339_v41  ;;  %v9345_v46 = vpack.c.bf16 %v1645_v43, %v1640_v42  ;;  %v10618_v54 = vcombine.low %v10575_v16, %v10575_v16 }
 0x188   : > { %2107 = vrot.lane.b32.xlu1 %v10167_v49, %s13262_s20  ;;  %2105 = vrot.lane.b32.xlu0 %v10134_v31, %s13262_s20  ;;  %v1470_v22 = vpop.permute.xlu1 %1469  ;;  %v1468_v47 = vpop.permute.xlu0 %1467 }
 0x189   : > { %v1475_v51 = vsel %vm13239_vm14, %v1466_v38, %v1468_v47  ;;  %v1476_v52 = vsel %vm13239_vm14, %v1468_v47, %v1470_v22  ;;  %9346 = vmatprep.subr.bf16.mxu1 %v9345_v46  ;;  %vm13241_vm14 = vcmask 457728  }
 0x18a   : > { %1485 = vst [vmem:[#allocation4 + $0x68] sm:$0xf] %v1475_v51  ;;  %1486 = vst [vmem:[#allocation4 + $0x70] sm:$0xf] %v1476_v52  ;;  %9348 = vmatpush1.bf16.msra.mxu1 %v9347_v50  ;;  %v10628_v52 = vcombine.low %v10588_v12, %v10588_v12 }
 0x18c   : > { %2111 = vrot.lane.b32.xlu1 %v10192_v17, %s13262_s20  ;;  %2109 = vrot.lane.b32.xlu0 %v10146_v20, %s13262_s20  ;;  %v1499_v55 = vpop.permute.xlu1 %1498  ;;  %v1497_v56 = vpop.permute.xlu0 %1496 }
 0x18d   : > { %v1509_v19 = vsel %vm13240_vm12, %v1497_v56, %v1499_v55 }
 0x18e   : > { %1519 = vst [vmem:[#allocation4 + $0x50] sm:$0xf0] %v1509_v19 }
 0x190   : > { %2115 = vrot.lane.b32.xlu1 %v10440_v23, %s13262_s20  ;;  %2113 = vrot.lane.b32.xlu0 %v10395_v34, %s13262_s20  ;;  %v1503_v18 = vpop.permute.xlu1 %1502  ;;  %v1501_v4 = vpop.permute.xlu0 %1500 }
 0x191   : > { %v1510_v59 = vsel %vm13240_vm12, %v1499_v55, %v1501_v4  ;;  %v1511_v60 = vsel %vm13240_vm12, %v1501_v4, %v1503_v18  ;;  %v10638_v4 = vcombine.low %v10601_v25, %v10601_v25 }
 0x192   : > { %1520 = vst [vmem:[#allocation4 + $0x58] sm:$0xf0] %v1510_v59  ;;  %1521 = vst [vmem:[#allocation4 + $0x60] sm:$0xf0] %v1511_v60 }
 0x194   : > { %2143 = vrot.lane.b32.xlu1 %v10134_v31, %s13260_s21  ;;  %2141 = vrot.lane.b32.xlu0 %v10382_v53, %s13260_s21  ;;  %v1507_v61 = vpop.permute.xlu1 %1506  ;;  %v1505_v62 = vpop.permute.xlu0 %1504 }
 0x195   : > { %v1512_v0 = vsel %vm13240_vm12, %v1503_v18, %v1505_v62  ;;  %v1513_v1 = vsel %vm13240_vm12, %v1505_v62, %v1507_v61  ;;  %vm1582_vm12 = vcmask 449536   ;;  %v1647_v36 = vld [vmem:[#allocation4 + $0x50] sm:$0xff]  ;;  %v1646_v61 = vld [vmem:[#allocation4 + $0x48] sm:$0xff] }
 0x196   : > { %1522 = vst [vmem:[#allocation4 + $0x68] sm:$0xf0] %v1512_v0  ;;  %1523 = vst [vmem:[#allocation4 + $0x70] sm:$0xf0] %v1513_v1  ;;  %v8893_v0 = vld [vmem:[%s13221_s1 + $0x10] sm:$0xff] }
 0x197   : > { %v1641_v1 = vld [vmem:[#allocation4 + $0x20] sm:$0xff] }
 0x198   : > { %2147 = vrot.lane.b32.xlu1 %v10146_v20, %s13260_s21  ;;  %2145 = vrot.lane.b32.xlu0 %v10392_v33, %s13260_s21  ;;  %v1536_v3 = vpop.permute.xlu1 %1535  ;;  %v1534_v2 = vpop.permute.xlu0 %1533 }
 0x199   : > { %v1546_v5 = vsel %vm13241_vm14, %v1534_v2, %v1536_v3  ;;  %v1648_v63 = vld [vmem:[#allocation4 + $0x58] sm:$0xff]  ;;  %v1649_v22 = vld [vmem:[#allocation4 + $0x60] sm:$0xff] }
 0x19a   : > { %1556 = vst [vmem:[#allocation4 + $0x78] sm:$0xf] %v1546_v5  ;;  %v9354_v5 = vpack.c.bf16 %v1646_v61, %v1641_v1 }
 0x19c   : > { %2151 = vrot.lane.b32.xlu1 %v10395_v34, %s13260_s21  ;;  %2149 = vrot.lane.b32.xlu0 %v10406_v40, %s13260_s21  ;;  %v1540_v53 = vpop.permute.xlu1 %1539  ;;  %v1538_v6 = vpop.permute.xlu0 %1537 }
 0x19d   : > { %v1547_v10 = vsel %vm13241_vm14, %v1536_v3, %v1538_v6  ;;  %v1548_v7 = vsel %vm13241_vm14, %v1538_v6, %v1540_v53  ;;  %v1650_v43 = vld [vmem:[#allocation4 + $0x68] sm:$0xff] }
 0x19e   : > { %1557 = vst [vmem:[#allocation4 + $0x80] sm:$0xf] %v1547_v10  ;;  %1558 = vst [vmem:[#allocation4 + $0x88] sm:$0xf] %v1548_v7 }
 0x1a0   : > { %2179 = vrot.lane.b32.xlu1 %v10167_v49, %s13258_s22  ;;  %2177 = vrot.lane.b32.xlu0 %v10134_v31, %s13258_s22  ;;  %v1544_v33 = vpop.permute.xlu1 %1543  ;;  %v1542_v8 = vpop.permute.xlu0 %1541 }
 0x1a1   : > { %v1549_v24 = vsel %vm13241_vm14, %v1540_v53, %v1542_v8  ;;  %v1550_v40 = vsel %vm13241_vm14, %v1542_v8, %v1544_v33  ;;  %vm1619_vm14 = vcmask 441344   ;;  %v1651_v8 = vld [vmem:[#allocation4 + $0x70] sm:$0xff] }
 0x1a2   : > { %1559 = vst [vmem:[#allocation4 + $0x90] sm:$0xf] %v1549_v24  ;;  %1560 = vst [vmem:[#allocation4 + $0x98] sm:$0xf] %v1550_v40 }
 0x1a4   : > { %2183 = vrot.lane.b32.xlu1 %v10192_v17, %s13258_s22  ;;  %2181 = vrot.lane.b32.xlu0 %v10146_v20, %s13258_s22  ;;  %v1573_v49 = vpop.permute.xlu1 %1572  ;;  %v1571_v9 = vpop.permute.xlu0 %1570  ;;  %v10583_v17 = vcombine.high %v10575_v16, %v10575_v16 }
 0x1a5   : > { %v1583_v31 = vsel %vm1582_vm12, %v1571_v9, %v1573_v49 }
 0x1a6   : > { %1593 = vst [vmem:[#allocation4 + $0x78] sm:$0xf0] %v1583_v31 }
 0x1a8   : > { %2187 = vrot.lane.b32.xlu1 %v10440_v23, %s13258_s22  ;;  %2185 = vrot.lane.b32.xlu0 %v10395_v34, %s13258_s22  ;;  %v1577_v11 = vpop.permute.xlu1 %1576  ;;  %v1575_v15 = vpop.permute.xlu0 %1574 }
 0x1a9   : > { %v1584_v20 = vsel %vm1582_vm12, %v1573_v49, %v1575_v15  ;;  %v1585_v14 = vsel %vm1582_vm12, %v1575_v15, %v1577_v11 }
 0x1aa   : > { %1594 = vst [vmem:[#allocation4 + $0x80] sm:$0xf0] %v1584_v20  ;;  %1595 = vst [vmem:[#allocation4 + $0x88] sm:$0xf0] %v1585_v14 }
 0x1ac   : > { %2241 = vrot.lane.b32.xlu1 %v10583_v17, %s9835_s23  ;;  %2239 = vrot.lane.b32.xlu0 %v10575_v16, %s9835_s23  ;;  %v1581_v34 = vpop.permute.xlu1 %1580  ;;  %v1579_v23 = vpop.permute.xlu0 %1578 }
 0x1ad   : > { %v1586_v13 = vsel %vm1582_vm12, %v1577_v11, %v1579_v23  ;;  %v1587_v57 = vsel %vm1582_vm12, %v1579_v23, %v1581_v34  ;;  %v1652_v58 = vld [vmem:[#allocation4 + $0x78] sm:$0xff] }
 0x1ae   : > { %1596 = vst [vmem:[#allocation4 + $0x90] sm:$0xf0] %v1586_v13  ;;  %1597 = vst [vmem:[#allocation4 + $0x98] sm:$0xf0] %v1587_v57  ;;  %v9343_v41 = vpack.c.bf16 %v1652_v58, %v1647_v36 }
 0x1b0   : > { %2245 = vrot.lane.b32.xlu1 %v10596_v32, %s9835_s23  ;;  %2243 = vrot.lane.b32.xlu0 %v10588_v12, %s9835_s23  ;;  %v1610_v26 = vpop.permute.xlu1 %1609  ;;  %v1608_v27 = vpop.permute.xlu0 %1607 }
 0x1b1   : > { %v1620_v29 = vsel %vm1619_vm14, %v1608_v27, %v1610_v26  ;;  %v1653_v30 = vld [vmem:[#allocation4 + $0x80] sm:$0xff]  ;;  %v1654_v46 = vld [vmem:[#allocation4 + $0x88] sm:$0xff] }
 0x1b2   : > { %1630 = vst [vmem:[#allocation4 + $0xa0] sm:$0xf] %v1620_v29  ;;  %v9341_v35 = vpack.c.bf16 %v1653_v30, %v1648_v63  ;;  %v9351_v51 = vpack.c.bf16 %v1654_v46, %v1649_v22 }
 0x1b4   : > { %2249 = vrot.lane.b32.xlu1 %v10609_v28, %s9835_s23  ;;  %2247 = vrot.lane.b32.xlu0 %v10601_v25, %s9835_s23  ;;  %v1614_v38 = vpop.permute.xlu1 %1613  ;;  %v1612_v39 = vpop.permute.xlu0 %1611 }
 0x1b5   : > { %v1621_v21 = vsel %vm1619_vm14, %v1610_v26, %v1612_v39  ;;  %v1622_v42 = vsel %vm1619_vm14, %v1612_v39, %v1614_v38  ;;  %9342 = vmatprep.subr.bf16.mxu0 %v9341_v35  ;;  %v1655_v44 = vld [vmem:[#allocation4 + $0x90] sm:$0xff]  ;;  %v1656_v7 = vld [vmem:[#allocation4 + $0x98] sm:$0xff] }
 0x1b6   : > { %1631 = vst [vmem:[#allocation4 + $0xa8] sm:$0xf] %v1621_v21  ;;  %1632 = vst [vmem:[#allocation4 + $0xb0] sm:$0xf] %v1622_v42  ;;  %9344 = vmatpush1.bf16.msra.mxu0 %v9343_v41  ;;  %v9349_v37 = vpack.c.bf16 %v1655_v44, %v1650_v43  ;;  %v9357_v49 = vpack.c.bf16 %v1656_v7, %v1651_v8 }
 0x1b8   : > { %2277 = vrot.lane.b32.xlu1 %v10575_v16, %s9836_s24  ;;  %2275 = vrot.lane.b32.xlu0 %v10618_v54, %s9836_s24  ;;  %v1618_v47 = vpop.permute.xlu1 %1617  ;;  %v1616_v50 = vpop.permute.xlu0 %1615 }
 0x1b9   : > { %v1623_v55 = vsel %vm1619_vm14, %v1614_v38, %v1616_v50  ;;  %v1624_v56 = vsel %vm1619_vm14, %v1616_v50, %v1618_v47  ;;  %9350 = vmatprep.subr.bf16.mxu1 %v9349_v37  ;;  %v1657_v62 = vld [vmem:[#allocation4 + $0xa0] sm:$0xf] }
 0x1ba   : > { %1633 = vst [vmem:[#allocation4 + $0xb8] sm:$0xf] %v1623_v55  ;;  %1634 = vst [vmem:[#allocation4 + $0xc0] sm:$0xf] %v1624_v56  ;;  %9352 = vmatpush1.bf16.msra.mxu1 %v9351_v51 }
 0x1bc   : > { %2281 = vrot.lane.b32.xlu1 %v10588_v12, %s9836_s24  ;;  %2279 = vrot.lane.b32.xlu0 %v10628_v52, %s9836_s24  ;;  %v1928_v19 = vpop.permute.xlu1 %1927  ;;  %v1926_v18 = vpop.permute.xlu0 %1925 }
 0x1bd   : > { %v1937_v59 = vsel %vm179_vm0, %v1926_v18, %v1928_v19  ;;  %v1658_v60 = vld [vmem:[#allocation4 + $0xa8] sm:$0xf]  ;;  %v1659_v33 = vld [vmem:[#allocation4 + $0xb0] sm:$0xf] }
 0x1be   : > { %1947 = vst [vmem:[#allocation2] sm:$0xf0] %v1937_v59  ;;  %8894 = vmatprep.subr.msk.mxu0 %vm844_vm13, %v1658_v60 }
 0x1bf   : > { %8895 = vmatpush1.msk.msra.mxu0 %vm844_vm13, %v1657_v62 }
 0x1c0   : > { %2285 = vrot.lane.b32.xlu1 %v10601_v25, %s9836_s24  ;;  %2283 = vrot.lane.b32.xlu0 %v10638_v4, %s9836_s24  ;;  %v1932_v3 = vpop.permute.xlu1 %1931  ;;  %v1930_v2 = vpop.permute.xlu0 %1929 }
 0x1c1   : > { %v1938_v53 = vsel %vm179_vm0, %v1928_v19, %v1930_v2  ;;  %v1939_v6 = vsel %vm179_vm0, %v1930_v2, %v1932_v3  ;;  %9353 = vmatprep.subr.bf16.mxu0 %v9839_v45  ;;  %8896 = vmatmul.mubr.msk.f32.vlgmr.msra.gmra.mrb[2].mxu0 %vm840_vm15, %v8893_v0  ;;  %v1660_v10 = vld [vmem:[#allocation4 + $0xb8] sm:$0xf]  ;;  %v1661_v20 = vld [vmem:[#allocation4 + $0xc0] sm:$0xf] }
 0x1c2   : > { %1948 = vst [vmem:[#allocation2 + $0x8] sm:$0xf0] %v1938_v53  ;;  %1949 = vst [vmem:[#allocation2 + $0x10] sm:$0xf0] %v1939_v6  ;;  %9355 = vmatpush3.bf16.msra.mxu0 %v9354_v5  ;;  %8897 = vmatprep.subr.msk.mxu1 %vm844_vm13, %v1660_v10 }
 0x1c3   : > { %8898 = vmatpush1.msk.msra.mxu1 %vm844_vm13, %v1659_v33  ;;  %9356 = vmatprep.subr.bf16.mxu0 %v9839_v45 }
 0x1c4   : > { %2313 = vrot.lane.b32.xlu1 %v10583_v17, %s9837_s25  ;;  %2311 = vrot.lane.b32.xlu0 %v10575_v16, %s9837_s25  ;;  %v1936_v24 = vpop.permute.xlu1 %1935  ;;  %v1934_v40 = vpop.permute.xlu0 %1933 }
 0x1c5   : > { %v1940_v9 = vsel %vm179_vm0, %v1932_v3, %v1934_v40  ;;  %v1941_v31 = vsel %vm179_vm0, %v1934_v40, %v1936_v24  ;;  %8899 = vmatmul.mubr.msk.f32.vlgmr.msra.gmra.mrb[2].mxu1 %vm840_vm15, %v8893_v0  ;;  %9134 = vmatprep.mubr.msk.f32.mxu0 %vm9846_vm8, %v9845_v48 }
 0x1c6   : > { %1950 = vst [vmem:[#allocation2 + $0x18] sm:$0xf0] %v1940_v9  ;;  %1951 = vst [vmem:[#allocation2 + $0x20] sm:$0xf0] %v1941_v31  ;;  %9358 = vmatpush3.bf16.msra.mxu0 %v9357_v49  ;;  %2662 = vmatprep.mubr.f32.mxu1 %v9845_v48 }
 0x1c7   : > { %9132 = vmatprep.subr.mxu0 %v9845_v48 }
 0x1c8   : > { %2317 = vrot.lane.b32.xlu1 %v10596_v32, %s9837_s25  ;;  %2315 = vrot.lane.b32.xlu0 %v10588_v12, %s9837_s25  ;;  %v1964_v11 = vpop.permute.xlu1 %1963 }
 0x1c9   : > { %v1962_v15 = vpop.permute.xlu0 %1961 }
 0x1ca   : > { %v1973_v14 = vsel %vm216_vm1, %v1962_v15, %v1964_v11  ;;  %9133 = vmatpush3.msk.msra.mxu0 %vm844_vm13, %v1661_v20 }
 0x1cb   : > { %1983 = vst [vmem:[#allocation2 + $0x28] sm:$0xf] %v1973_v14  ;;  %9135 = vmatmul.mubr.msk.f32.vlgmr.msra.gmra.mrb[0].mxu0 %vm840_vm15, %v8893_v0 }
 0x1cc   : > { %2321 = vrot.lane.b32.xlu1 %v10609_v28, %s9837_s25  ;;  %2319 = vrot.lane.b32.xlu0 %v10601_v25, %s9837_s25 }
 0x1cd   : > { %v1968_v34 = vpop.permute.xlu1 %1967  ;;  %4390 = vmatprep.mubr.f32.mxu0 %v9845_v48 }
 0x1ce   : > { %v1966_v23 = vpop.permute.xlu0 %1965 }
 0x1cf   : > { %v1974_v13 = vsel %vm216_vm1, %v1964_v11, %v1966_v23  ;;  %v1975_v57 = vsel %vm216_vm1, %v1966_v23, %v1968_v34 }
 0x1d0   : > { %1984 = vst [vmem:[#allocation2 + $0x30] sm:$0xf] %v1974_v13  ;;  %1985 = vst [vmem:[#allocation2 + $0x38] sm:$0xf] %v1975_v57  ;;  %2349 = vrot.lane.b32.xlu1 %v10575_v16, %s9838_s26  ;;  %2347 = vrot.lane.b32.xlu0 %v10618_v54, %s9838_s26 }
 0x1d1   : > { %v1972_v26 = vpop.permute.xlu1 %1971 }
 0x1d2   : > { %v1970_v27 = vpop.permute.xlu0 %1969 }
 0x1d3   : > { %v1976_v29 = vsel %vm216_vm1, %v1968_v34, %v1970_v27  ;;  %v1977_v63 = vsel %vm216_vm1, %v1970_v27, %v1972_v26 }
 0x1d4   : > { %1986 = vst [vmem:[#allocation2 + $0x40] sm:$0xf] %v1976_v29  ;;  %1987 = vst [vmem:[#allocation2 + $0x48] sm:$0xf] %v1977_v63  ;;  %2353 = vrot.lane.b32.xlu1 %v10588_v12, %s9838_s26  ;;  %2351 = vrot.lane.b32.xlu0 %v10628_v52, %s9838_s26  ;;  %v10778_v63 = vld [vmem:[%s9885_s14 + $0x2c] sm:$0xff] }
 0x1d6   : > { %v2000_v30 = vpop.permute.xlu1 %1999  ;;  %v1998_v58 = vpop.permute.xlu0 %1997 }
 0x1d7   : > { %v2009_v35 = vsel %vm253_vm2, %v1998_v58, %v2000_v30  ;;  %v10790_v58 = vld [vmem:[%s9885_s14 + $0x34] sm:$0xff] }
 0x1d8   : > { %2019 = vst [vmem:[#allocation2 + $0x28] sm:$0xf0] %v2009_v35  ;;  %2357 = vrot.lane.b32.xlu1 %v10601_v25, %s9838_s26  ;;  %2355 = vrot.lane.b32.xlu0 %v10638_v4, %s9838_s26 }
 0x1da   : > { %v2004_v36 = vpop.permute.xlu1 %2003  ;;  %v2002_v38 = vpop.permute.xlu0 %2001 }
 0x1db   : > { %v2010_v39 = vsel %vm253_vm2, %v2000_v30, %v2002_v38  ;;  %v2011_v41 = vsel %vm253_vm2, %v2002_v38, %v2004_v36 }
 0x1dc   : > { %2020 = vst [vmem:[#allocation2 + $0x30] sm:$0xf0] %v2010_v39  ;;  %2021 = vst [vmem:[#allocation2 + $0x38] sm:$0xf0] %v2011_v41  ;;  %2385 = vrot.lane.b32.xlu1 %v10583_v17, %s9840_s27  ;;  %2383 = vrot.lane.b32.xlu0 %v10575_v16, %s9840_s27 }
 0x1de   : > { %v2008_v21 = vpop.permute.xlu1 %2007  ;;  %v2006_v42 = vpop.permute.xlu0 %2005 }
 0x1df   : > { %v2012_v43 = vsel %vm253_vm2, %v2004_v36, %v2006_v42  ;;  %v2013_v44 = vsel %vm253_vm2, %v2006_v42, %v2008_v21 }
 0x1e0   : > { %2022 = vst [vmem:[#allocation2 + $0x40] sm:$0xf0] %v2012_v43  ;;  %2023 = vst [vmem:[#allocation2 + $0x48] sm:$0xf0] %v2013_v44  ;;  %2389 = vrot.lane.b32.xlu1 %v10596_v32, %s9840_s27  ;;  %2387 = vrot.lane.b32.xlu0 %v10588_v12, %s9840_s27 }
 0x1e2   : > { %v2036_v46 = vpop.permute.xlu1 %2035  ;;  %v2034_v37 = vpop.permute.xlu0 %2033 }
 0x1e3   : > { %v2045_v22 = vsel %vm290_vm3, %v2034_v37, %v2036_v46 }
 0x1e4   : > { %2055 = vst [vmem:[#allocation2 + $0x50] sm:$0xf] %v2045_v22  ;;  %2393 = vrot.lane.b32.xlu1 %v10609_v28, %s9840_s27  ;;  %2391 = vrot.lane.b32.xlu0 %v10601_v25, %s9840_s27  ;;  %v10822_v22 = vcombine.low %v10778_v63, %v10778_v63 }
 0x1e6   : > { %v2040_v47 = vpop.permute.xlu1 %2039  ;;  %v2038_v50 = vpop.permute.xlu0 %2037 }
 0x1e7   : > { %v2046_v51 = vsel %vm290_vm3, %v2036_v46, %v2038_v50  ;;  %v2047_v55 = vsel %vm290_vm3, %v2038_v50, %v2040_v47 }
 0x1e8   : > { %2056 = vst [vmem:[#allocation2 + $0x58] sm:$0xf] %v2046_v51  ;;  %2057 = vst [vmem:[#allocation2 + $0x60] sm:$0xf] %v2047_v55  ;;  %2421 = vrot.lane.b32.xlu1 %v10575_v16, %s9841_s28  ;;  %2419 = vrot.lane.b32.xlu0 %v10618_v54, %s9841_s28 }
 0x1ea   : > { %v2044_v56 = vpop.permute.xlu1 %2043  ;;  %v2042_v19 = vpop.permute.xlu0 %2041 }
 0x1eb   : > { %v2048_v18 = vsel %vm290_vm3, %v2040_v47, %v2042_v19  ;;  %v2049_v59 = vsel %vm290_vm3, %v2042_v19, %v2044_v56  ;;  %v10832_v56 = vcombine.low %v10790_v58, %v10790_v58 }
 0x1ec   : > { %2058 = vst [vmem:[#allocation2 + $0x68] sm:$0xf] %v2048_v18  ;;  %2059 = vst [vmem:[#allocation2 + $0x70] sm:$0xf] %v2049_v59  ;;  %2425 = vrot.lane.b32.xlu1 %v10588_v12, %s9841_s28  ;;  %2423 = vrot.lane.b32.xlu0 %v10628_v52, %s9841_s28 }
 0x1ee   : > { %v2072_v60 = vpop.permute.xlu1 %2071  ;;  %v2070_v61 = vpop.permute.xlu0 %2069 }
 0x1ef   : > { %v2081_v62 = vsel %vm327_vm4, %v2070_v61, %v2072_v60 }
 0x1f0   : > { %2091 = vst [vmem:[#allocation2 + $0x50] sm:$0xf0] %v2081_v62  ;;  %2429 = vrot.lane.b32.xlu1 %v10601_v25, %s9841_s28  ;;  %2427 = vrot.lane.b32.xlu0 %v10638_v4, %s9841_s28 }
 0x1f2   : > { %v2076_v0 = vpop.permute.xlu1 %2075  ;;  %v2074_v1 = vpop.permute.xlu0 %2073 }
 0x1f3   : > { %v2082_v3 = vsel %vm327_vm4, %v2072_v60, %v2074_v1  ;;  %v2083_v2 = vsel %vm327_vm4, %v2074_v1, %v2076_v0 }
 0x1f4   : > { %2092 = vst [vmem:[#allocation2 + $0x58] sm:$0xf0] %v2082_v3  ;;  %2093 = vst [vmem:[#allocation2 + $0x60] sm:$0xf0] %v2083_v2  ;;  %2457 = vrot.lane.b32.xlu1 %v10583_v17, %s9842_s29  ;;  %2455 = vrot.lane.b32.xlu0 %v10575_v16, %s9842_s29 }
 0x1f6   : > { %v2080_v5 = vpop.permute.xlu1 %2079  ;;  %v2078_v53 = vpop.permute.xlu0 %2077 }
 0x1f7   : > { %v2084_v6 = vsel %vm327_vm4, %v2076_v0, %v2078_v53  ;;  %v2085_v10 = vsel %vm327_vm4, %v2078_v53, %v2080_v5 }
 0x1f8   : > { %2094 = vst [vmem:[#allocation2 + $0x68] sm:$0xf0] %v2084_v6  ;;  %2095 = vst [vmem:[#allocation2 + $0x70] sm:$0xf0] %v2085_v10  ;;  %2461 = vrot.lane.b32.xlu1 %v10596_v32, %s9842_s29  ;;  %2459 = vrot.lane.b32.xlu0 %v10588_v12, %s9842_s29 }
 0x1fa   : > { %v2108_v7 = vpop.permute.xlu1 %2107  ;;  %v2106_v33 = vpop.permute.xlu0 %2105 }
 0x1fb   : > { %v2117_v8 = vsel %vm364_vm5, %v2106_v33, %v2108_v7 }
 0x1fc   : > { %2127 = vst [vmem:[#allocation2 + $0x78] sm:$0xf] %v2117_v8  ;;  %2465 = vrot.lane.b32.xlu1 %v10609_v28, %s9842_s29  ;;  %2463 = vrot.lane.b32.xlu0 %v10601_v25, %s9842_s29 }
 0x1fe   : > { %v2112_v24 = vpop.permute.xlu1 %2111  ;;  %v2110_v40 = vpop.permute.xlu0 %2109 }
 0x1ff   : > { %v2118_v49 = vsel %vm364_vm5, %v2108_v7, %v2110_v40  ;;  %v2119_v9 = vsel %vm364_vm5, %v2110_v40, %v2112_v24 }
 0x200   : > { %2128 = vst [vmem:[#allocation2 + $0x80] sm:$0xf] %v2118_v49  ;;  %2129 = vst [vmem:[#allocation2 + $0x88] sm:$0xf] %v2119_v9  ;;  %2493 = vrot.lane.b32.xlu1 %v10575_v16, %s9843_s30  ;;  %2491 = vrot.lane.b32.xlu0 %v10618_v54, %s9843_s30 }
 0x202   : > { %v2116_v31 = vpop.permute.xlu1 %2115  ;;  %v2114_v11 = vpop.permute.xlu0 %2113 }
 0x203   : > { %v2120_v15 = vsel %vm364_vm5, %v2112_v24, %v2114_v11  ;;  %v2121_v20 = vsel %vm364_vm5, %v2114_v11, %v2116_v31 }
 0x204   : > { %2130 = vst [vmem:[#allocation2 + $0x90] sm:$0xf] %v2120_v15  ;;  %2131 = vst [vmem:[#allocation2 + $0x98] sm:$0xf] %v2121_v20  ;;  %2497 = vrot.lane.b32.xlu1 %v10588_v12, %s9843_s30  ;;  %2495 = vrot.lane.b32.xlu0 %v10628_v52, %s9843_s30 }
 0x206   : > { %v2144_v14 = vpop.permute.xlu1 %2143  ;;  %v2142_v34 = vpop.permute.xlu0 %2141 }
 0x207   : > { %v2153_v23 = vsel %vm401_vm6, %v2142_v34, %v2144_v14 }
 0x208   : > { %2163 = vst [vmem:[#allocation2 + $0x78] sm:$0xf0] %v2153_v23  ;;  %2501 = vrot.lane.b32.xlu1 %v10601_v25, %s9843_s30  ;;  %2499 = vrot.lane.b32.xlu0 %v10638_v4, %s9843_s30 }
 0x20a   : > { %v2148_v54 = vpop.permute.xlu1 %2147  ;;  %v2146_v13 = vpop.permute.xlu0 %2145 }
 0x20b   : > { %v2154_v57 = vsel %vm401_vm6, %v2144_v14, %v2146_v13  ;;  %v2155_v26 = vsel %vm401_vm6, %v2146_v13, %v2148_v54 }
 0x20c   : > { %2164 = vst [vmem:[#allocation2 + $0x80] sm:$0xf0] %v2154_v57  ;;  %2165 = vst [vmem:[#allocation2 + $0x88] sm:$0xf0] %v2155_v26  ;;  %2529 = vrot.lane.b32.xlu1 %v10583_v17, %s9844_s3  ;;  %2527 = vrot.lane.b32.xlu0 %v10575_v16, %s9844_s3 }
 0x20e   : > { %v2152_v52 = vpop.permute.xlu1 %2151  ;;  %v2150_v27 = vpop.permute.xlu0 %2149 }
 0x20f   : > { %v2156_v4 = vsel %vm401_vm6, %v2148_v54, %v2150_v27  ;;  %v2157_v29 = vsel %vm401_vm6, %v2150_v27, %v2152_v52 }
 0x210   : > { %2166 = vst [vmem:[#allocation2 + $0x90] sm:$0xf0] %v2156_v4  ;;  %2167 = vst [vmem:[#allocation2 + $0x98] sm:$0xf0] %v2157_v29  ;;  %2533 = vrot.lane.b32.xlu1 %v10596_v32, %s9844_s3  ;;  %2531 = vrot.lane.b32.xlu0 %v10588_v12, %s9844_s3  ;;  %v10787_v32 = vcombine.high %v10778_v63, %v10778_v63 }
 0x212   : > { %v2180_v17 = vpop.permute.xlu1 %2179  ;;  %v2178_v30 = vpop.permute.xlu0 %2177 }
 0x213   : > { %v2189_v16 = vsel %vm13245_vm7, %v2178_v30, %v2180_v17 }
 0x214   : > { %2199 = vst [vmem:[#allocation2 + $0xa0] sm:$0xf] %v2189_v16  ;;  %2537 = vrot.lane.b32.xlu1 %v10609_v28, %s9844_s3  ;;  %2535 = vrot.lane.b32.xlu0 %v10601_v25, %s9844_s3  ;;  %v10800_v25 = vcombine.high %v10790_v58, %v10790_v58  ;;  %v10803_v28 = vld [vmem:[%s9885_s14 + $0x3c] sm:$0xff] }
 0x215   : > { %v10813_v43 = vcombine.high %v10803_v28, %v10803_v28  ;;  %v10842_v61 = vcombine.low %v10803_v28, %v10803_v28 }
 0x216   : > { %v2184_v12 = vpop.permute.xlu1 %2183  ;;  %v2182_v35 = vpop.permute.xlu0 %2181 }
 0x217   : > { %v2190_v36 = vsel %vm13245_vm7, %v2180_v17, %v2182_v35  ;;  %v2191_v38 = vsel %vm13245_vm7, %v2182_v35, %v2184_v12 }
 0x218   : > { %2200 = vst [vmem:[#allocation2 + $0xa8] sm:$0xf] %v2190_v36  ;;  %2201 = vst [vmem:[#allocation2 + $0xb0] sm:$0xf] %v2191_v38  ;;  %3051 = vrot.lane.b32.xlu1 %v10787_v32, %s13256_s4  ;;  %3049 = vrot.lane.b32.xlu0 %v10778_v63, %s13256_s4 }
 0x21a   : > { %v2188_v39 = vpop.permute.xlu1 %2187  ;;  %v2186_v41 = vpop.permute.xlu0 %2185 }
 0x21b   : > { %v2192_v21 = vsel %vm13245_vm7, %v2184_v12, %v2186_v41  ;;  %v2193_v42 = vsel %vm13245_vm7, %v2186_v41, %v2188_v39 }
 0x21c   : > { %2202 = vst [vmem:[#allocation2 + $0xb8] sm:$0xf] %v2192_v21  ;;  %2203 = vst [vmem:[#allocation2 + $0xc0] sm:$0xf] %v2193_v42  ;;  %3055 = vrot.lane.b32.xlu1 %v10800_v25, %s13256_s4  ;;  %3053 = vrot.lane.b32.xlu0 %v10790_v58, %s13256_s4 }
 0x21e   : > { %v2242_v44 = vpop.permute.xlu1 %2241  ;;  %v2240_v46 = vpop.permute.xlu0 %2239 }
 0x21f   : > { %v2251_v37 = vsel %vm13244_vm9, %v2240_v46, %v2242_v44 }
 0x220   : > { %2261 = vst [vmem:[#allocation3] sm:$0xf] %v2251_v37  ;;  %3059 = vrot.lane.b32.xlu1 %v10813_v43, %s13256_s4  ;;  %3057 = vrot.lane.b32.xlu0 %v10803_v28, %s13256_s4 }
 0x222   : > { %v2246_v47 = vpop.permute.xlu1 %2245  ;;  %v2244_v50 = vpop.permute.xlu0 %2243 }
 0x223   : > { %v2252_v51 = vsel %vm13244_vm9, %v2242_v44, %v2244_v50  ;;  %v2253_v55 = vsel %vm13244_vm9, %v2244_v50, %v2246_v47 }
 0x224   : > { %2262 = vst [vmem:[#allocation3 + $0x8] sm:$0xf] %v2252_v51  ;;  %2263 = vst [vmem:[#allocation3 + $0x10] sm:$0xf] %v2253_v55  ;;  %3087 = vrot.lane.b32.xlu1 %v10778_v63, %s13254_s5  ;;  %3085 = vrot.lane.b32.xlu0 %v10822_v22, %s13254_s5 }
 0x226   : > { %v2250_v19 = vpop.permute.xlu1 %2249  ;;  %v2248_v18 = vpop.permute.xlu0 %2247 }
 0x227   : > { %v2254_v59 = vsel %vm13244_vm9, %v2246_v47, %v2248_v18  ;;  %v2255_v60 = vsel %vm13244_vm9, %v2248_v18, %v2250_v19 }
 0x228   : > { %2264 = vst [vmem:[#allocation3 + $0x18] sm:$0xf] %v2254_v59  ;;  %2265 = vst [vmem:[#allocation3 + $0x20] sm:$0xf] %v2255_v60  ;;  %3091 = vrot.lane.b32.xlu1 %v10790_v58, %s13254_s5  ;;  %3089 = vrot.lane.b32.xlu0 %v10832_v56, %s13254_s5 }
 0x22a   : > { %v2278_v62 = vpop.permute.xlu1 %2277  ;;  %v2276_v0 = vpop.permute.xlu0 %2275 }
 0x22b   : > { %v2287_v1 = vsel %vm13242_vm10, %v2276_v0, %v2278_v62 }
 0x22c   : > { %2297 = vst [vmem:[#allocation3] sm:$0xf0] %v2287_v1  ;;  %3095 = vrot.lane.b32.xlu1 %v10803_v28, %s13254_s5  ;;  %3093 = vrot.lane.b32.xlu0 %v10842_v61, %s13254_s5 }
 0x22e   : > { %v2282_v3 = vpop.permute.xlu1 %2281  ;;  %v2280_v2 = vpop.permute.xlu0 %2279 }
 0x22f   : > { %v2288_v5 = vsel %vm13242_vm10, %v2278_v62, %v2280_v2  ;;  %v2289_v53 = vsel %vm13242_vm10, %v2280_v2, %v2282_v3 }
 0x230   : > { %2298 = vst [vmem:[#allocation3 + $0x8] sm:$0xf0] %v2288_v5  ;;  %2299 = vst [vmem:[#allocation3 + $0x10] sm:$0xf0] %v2289_v53  ;;  %3123 = vrot.lane.b32.xlu1 %v10787_v32, %s13252_s6  ;;  %3121 = vrot.lane.b32.xlu0 %v10778_v63, %s13252_s6 }
 0x232   : > { %v2286_v6 = vpop.permute.xlu1 %2285  ;;  %v2284_v10 = vpop.permute.xlu0 %2283 }
 0x233   : > { %v2290_v7 = vsel %vm13242_vm10, %v2282_v3, %v2284_v10  ;;  %v2291_v33 = vsel %vm13242_vm10, %v2284_v10, %v2286_v6  ;;  %vm13264_vm10 = vcmask 752640   ;;  %v2555_v21 = vld [vmem:[#allocation3] sm:$0xff] }
 0x234   : > { %2300 = vst [vmem:[#allocation3 + $0x18] sm:$0xf0] %v2290_v7  ;;  %2301 = vst [vmem:[#allocation3 + $0x20] sm:$0xf0] %v2291_v33  ;;  %3127 = vrot.lane.b32.xlu1 %v10800_v25, %s13252_s6  ;;  %3125 = vrot.lane.b32.xlu0 %v10790_v58, %s13252_s6 }
 0x235   : > { %vm13266_vm9 = vmmov %vm13264_vm10 }
 0x236   : > { %v2314_v8 = vpop.permute.xlu1 %2313  ;;  %v2312_v24 = vpop.permute.xlu0 %2311  ;;  %vm13268_vm7 = vmmov %vm13266_vm9 }
 0x237   : > { %v2323_v40 = vsel %vm13243_vm11, %v2312_v24, %v2314_v8  ;;  %v2556_v38 = vld [vmem:[#allocation3 + $0x8] sm:$0xff] }
 0x238   : > { %2333 = vst [vmem:[#allocation3 + $0x28] sm:$0xf] %v2323_v40  ;;  %3131 = vrot.lane.b32.xlu1 %v10813_v43, %s13252_s6  ;;  %3129 = vrot.lane.b32.xlu0 %v10803_v28, %s13252_s6 }
 0x23a   : > { %v2318_v49 = vpop.permute.xlu1 %2317  ;;  %v2316_v9 = vpop.permute.xlu0 %2315 }
 0x23b   : > { %v2324_v31 = vsel %vm13243_vm11, %v2314_v8, %v2316_v9  ;;  %v2325_v11 = vsel %vm13243_vm11, %v2316_v9, %v2318_v49 }
 0x23c   : > { %2334 = vst [vmem:[#allocation3 + $0x30] sm:$0xf] %v2324_v31  ;;  %2335 = vst [vmem:[#allocation3 + $0x38] sm:$0xf] %v2325_v11  ;;  %3159 = vrot.lane.b32.xlu1 %v10778_v63, %s13250_s7  ;;  %3157 = vrot.lane.b32.xlu0 %v10822_v22, %s13250_s7 }
 0x23e   : > { %v2322_v15 = vpop.permute.xlu1 %2321  ;;  %v2320_v20 = vpop.permute.xlu0 %2319 }
 0x23f   : > { %v2326_v14 = vsel %vm13243_vm11, %v2318_v49, %v2320_v20  ;;  %v2327_v34 = vsel %vm13243_vm11, %v2320_v20, %v2322_v15  ;;  %vm13265_vm11 = vmmov %vm13264_vm10 }
 0x240   : > { %2336 = vst [vmem:[#allocation3 + $0x40] sm:$0xf] %v2326_v14  ;;  %2337 = vst [vmem:[#allocation3 + $0x48] sm:$0xf] %v2327_v34  ;;  %3163 = vrot.lane.b32.xlu1 %v10790_v58, %s13250_s7  ;;  %3161 = vrot.lane.b32.xlu0 %v10832_v56, %s13250_s7 }
 0x242   : > { %v2350_v23 = vpop.permute.xlu1 %2349  ;;  %v2348_v54 = vpop.permute.xlu0 %2347 }
 0x243   : > { %v2359_v13 = vsel %vm13264_vm10, %v2348_v54, %v2350_v23  ;;  %vm13267_vm10 = vmmov %vm13266_vm9 }
 0x244   : > { %2369 = vst [vmem:[#allocation3 + $0x28] sm:$0xf0] %v2359_v13  ;;  %3167 = vrot.lane.b32.xlu1 %v10803_v28, %s13250_s7  ;;  %3165 = vrot.lane.b32.xlu0 %v10842_v61, %s13250_s7  ;;  %s13346_s7 = smov 76  }
 0x246   : > { %v2354_v57 = vpop.permute.xlu1 %2353  ;;  %v2352_v26 = vpop.permute.xlu0 %2351 }
 0x247   : > { %v2360_v52 = vsel %vm13265_vm11, %v2350_v23, %v2352_v26  ;;  %v2361_v27 = vsel %vm13266_vm9, %v2352_v26, %v2354_v57  ;;  %vm13269_vm9 = vcmask 744448  }
 0x248   : > { %2370 = vst [vmem:[#allocation3 + $0x30] sm:$0xf0] %v2360_v52  ;;  %2371 = vst [vmem:[#allocation3 + $0x38] sm:$0xf0] %v2361_v27  ;;  %3195 = vrot.lane.b32.xlu1 %v10787_v32, %s13248_s8  ;;  %3193 = vrot.lane.b32.xlu0 %v10778_v63, %s13248_s8  ;;  %v10959_v52 = vld [vmem:[#allocation2] sm:$0xff]  ;;  %v3630_v27 = vld [vmem:[%s9885_s14 + $0x28] sm:$0xff] }
 0x249   : > { %3639 = vst [vmem:[#allocation2] sm:$0xf] %v3630_v27 }
 0x24a   : > { %v2358_v4 = vpop.permute.xlu1 %2357  ;;  %v2356_v29 = vpop.permute.xlu0 %2355 }
 0x24b   : > { %v2362_v17 = vsel %vm13267_vm10, %v2354_v57, %v2356_v29  ;;  %v2363_v30 = vsel %vm13268_vm7, %v2356_v29, %v2358_v4  ;;  %v2560_v35 = vld [vmem:[#allocation3 + $0x28] sm:$0xff]  ;;  %vm13270_vm7 = vmmov %vm13269_vm9 }
 0x24c   : > { %2372 = vst [vmem:[#allocation3 + $0x40] sm:$0xf0] %v2362_v17  ;;  %2373 = vst [vmem:[#allocation3 + $0x48] sm:$0xf0] %v2363_v30  ;;  %3199 = vrot.lane.b32.xlu1 %v10800_v25, %s13248_s8  ;;  %3197 = vrot.lane.b32.xlu0 %v10790_v58, %s13248_s8  ;;  %v9361_v42 = vpack.c.bf16 %v2560_v35, %v2555_v21  ;;  %v10969_v17 = vld [vmem:[#allocation2 + $0x8] sm:$0xff]  ;;  %v10971_v30 = vld [vmem:[#allocation2 + $0x10] sm:$0xff] }
 0x24d   : > { %vm13271_vm11 = vmmov %vm13270_vm7  ;;  %v10984_v21 = vld [vmem:[%s9885_s14 + $0x30] sm:$0xff] }
 0x24e   : > { %v2386_v16 = vpop.permute.xlu1 %2385  ;;  %v2384_v12 = vpop.permute.xlu0 %2383  ;;  %vm13272_vm10 = vmmov %vm13270_vm7 }
 0x24f   : > { %v2395_v36 = vsel %vm13269_vm9, %v2384_v12, %v2386_v16  ;;  %v2561_v39 = vld [vmem:[#allocation3 + $0x30] sm:$0xff]  ;;  %vm13273_vm9 = vmmov %vm13270_vm7 }
 0x250   : > { %2405 = vst [vmem:[#allocation3 + $0x50] sm:$0xf] %v2395_v36  ;;  %3203 = vrot.lane.b32.xlu1 %v10813_v43, %s13248_s8  ;;  %3201 = vrot.lane.b32.xlu0 %v10803_v28, %s13248_s8  ;;  %v9359_v41 = vpack.c.bf16 %v2561_v39, %v2556_v38  ;;  %s13352_s8 = smov 75  }
 0x252   : > { %v2390_v44 = vpop.permute.xlu1 %2389  ;;  %v2388_v46 = vpop.permute.xlu0 %2387  ;;  %9360 = vmatprep.subr.bf16.mxu1 %v9359_v41 }
 0x253   : > { %v2396_v37 = vsel %vm13270_vm7, %v2386_v16, %v2388_v46  ;;  %v2397_v47 = vsel %vm13271_vm11, %v2388_v46, %v2390_v44  ;;  %9362 = vmatpush1.bf16.msra.mxu1 %v9361_v42  ;;  %vm13274_vm7 = vcmask 736256   ;;  %v3635_v16 = vcombine.high %v3630_v27, %v3630_v27 }
 0x254   : > { %2406 = vst [vmem:[#allocation3 + $0x58] sm:$0xf] %v2396_v37  ;;  %2407 = vst [vmem:[#allocation3 + $0x60] sm:$0xf] %v2397_v47  ;;  %3231 = vrot.lane.b32.xlu1 %v10778_v63, %s13246_s11  ;;  %3229 = vrot.lane.b32.xlu0 %v10822_v22, %s13246_s11  ;;  %v10988_v37 = vld [vmem:[#allocation2 + $0x18] sm:$0xff]  ;;  %v10996_v47 = vcombine.low %v10984_v21, %v10984_v21 }
 0x255   : > { %vm13275_vm11 = vmmov %vm13274_vm7  ;;  %3640 = vst [vmem:[#allocation2 + $0x8] sm:$0xf] %v3635_v16 }
 0x256   : > { %v2394_v50 = vpop.permute.xlu1 %2393  ;;  %v2392_v51 = vpop.permute.xlu0 %2391 }
 0x257   : > { %v2398_v55 = vsel %vm13272_vm10, %v2390_v44, %v2392_v51  ;;  %v2399_v19 = vsel %vm13273_vm9, %v2392_v51, %v2394_v50  ;;  %vm13276_vm10 = vmmov %vm13274_vm7  ;;  %v10998_v50 = vld [vmem:[#allocation2 + $0x20] sm:$0xff]  ;;  %v3632_v51 = vld [vmem:[%s9885_s14 + $0x38] sm:$0xf] }
 0x258   : > { %2408 = vst [vmem:[#allocation3 + $0x68] sm:$0xf] %v2398_v55  ;;  %2409 = vst [vmem:[#allocation3 + $0x70] sm:$0xf] %v2399_v19  ;;  %3235 = vrot.lane.b32.xlu1 %v10790_v58, %s13246_s11  ;;  %3233 = vrot.lane.b32.xlu0 %v10832_v56, %s13246_s11  ;;  %v11002_v55 = vld [vmem:[%s9885_s14 + $0x38] sm:$0xff] }
 0x259   : > { %vm13278_vm9 = vmmov %vm13274_vm7  ;;  %3643 = vst [vmem:[#allocation2 + $0x20] sm:$0xf] %v3632_v51  ;;  %v11049_v27 = vcombine.high %v11002_v55, %v11002_v55 }
 0x25a   : > { %v2422_v18 = vpop.permute.xlu1 %2421  ;;  %v2420_v59 = vpop.permute.xlu0 %2419 }
 0x25b   : > { %v2431_v60 = vsel %vm13274_vm7, %v2420_v59, %v2422_v18 }
 0x25c   : > { %2441 = vst [vmem:[#allocation3 + $0x50] sm:$0xf0] %v2431_v60  ;;  %3239 = vrot.lane.b32.xlu1 %v10803_v28, %s13246_s11  ;;  %3237 = vrot.lane.b32.xlu0 %v10842_v61, %s13246_s11  ;;  %s13288_s11 = smov 54  }
 0x25e   : > { %v2426_v62 = vpop.permute.xlu1 %2425  ;;  %v2424_v0 = vpop.permute.xlu0 %2423 }
 0x25f   : > { %v2432_v1 = vsel %vm13275_vm11, %v2422_v18, %v2424_v0  ;;  %v2433_v3 = vsel %vm13276_vm10, %v2424_v0, %v2426_v62  ;;  %vm13279_vm11 = vcmask 588800  }
 0x260   : > { %2442 = vst [vmem:[#allocation3 + $0x58] sm:$0xf0] %v2432_v1  ;;  %2443 = vst [vmem:[#allocation3 + $0x60] sm:$0xf0] %v2433_v3  ;;  %3267 = vrot.lane.b32.xlu1 %v10787_v32, %s13277_s12  ;;  %3265 = vrot.lane.b32.xlu0 %v10778_v63, %s13277_s12  ;;  %v2563_v3 = vld [vmem:[#allocation3 + $0x40] sm:$0xff] }
 0x261   : > { %vm13280_vm10 = vmmov %vm13279_vm11 }
 0x262   : > { %v2430_v2 = vpop.permute.xlu1 %2429  ;;  %v2428_v5 = vpop.permute.xlu0 %2427 }
 0x263   : > { %v2434_v53 = vsel %vm13278_vm9, %v2426_v62, %v2428_v5  ;;  %v2435_v6 = vsel %vm13274_vm7, %v2428_v5, %v2430_v2  ;;  %vm13281_vm9 = vmmov %vm13280_vm10  ;;  %v2565_v38 = vld [vmem:[#allocation3 + $0x50] sm:$0xff]  ;;  %v11012_v62 = vcombine.low %v11002_v55, %v11002_v55 }
 0x264   : > { %2444 = vst [vmem:[#allocation3 + $0x68] sm:$0xf0] %v2434_v53  ;;  %2445 = vst [vmem:[#allocation3 + $0x70] sm:$0xf0] %v2435_v6  ;;  %3271 = vrot.lane.b32.xlu1 %v10800_v25, %s13277_s12  ;;  %3269 = vrot.lane.b32.xlu0 %v10790_v58, %s13277_s12  ;;  %v2562_v53 = vld [vmem:[#allocation3 + $0x38] sm:$0xff] }
 0x265   : > { %vm13283_vm7 = vmmov %vm13281_vm9  ;;  %v2558_v6 = vld [vmem:[#allocation3 + $0x18] sm:$0xff] }
 0x266   : > { %v2458_v10 = vpop.permute.xlu1 %2457  ;;  %v2456_v7 = vpop.permute.xlu0 %2455 }
 0x267   : > { %v2467_v33 = vsel %vm13279_vm11, %v2456_v7, %v2458_v10  ;;  %vm13284_vm11 = vmmov %vm13283_vm7  ;;  %v2566_v35 = vld [vmem:[#allocation3 + $0x58] sm:$0xff] }
 0x268   : > { %2477 = vst [vmem:[#allocation3 + $0x78] sm:$0xf] %v2467_v33  ;;  %3275 = vrot.lane.b32.xlu1 %v10813_v43, %s13277_s12  ;;  %3273 = vrot.lane.b32.xlu0 %v10803_v28, %s13277_s12 }
 0x26a   : > { %v2462_v8 = vpop.permute.xlu1 %2461  ;;  %v2460_v24 = vpop.permute.xlu0 %2459 }
 0x26b   : > { %v2468_v40 = vsel %vm13280_vm10, %v2458_v10, %v2460_v24  ;;  %v2469_v49 = vsel %vm13281_vm9, %v2460_v24, %v2462_v8  ;;  %vm13285_vm10 = vcmask 580608   ;;  %v11022_v10 = vld [vmem:[%s13221_s1 + $0x8] sm:$0xff]  ;;  %v9367_v24 = vpack.c.bf16 %v2563_v3, %v2558_v6  ;;  %v2216_v6 = vld [vmem:[#allocation2 + $0x58] sm:$0xff] }
 0x26c   : > { %2478 = vst [vmem:[#allocation3 + $0x80] sm:$0xf] %v2468_v40  ;;  %2479 = vst [vmem:[#allocation3 + $0x88] sm:$0xf] %v2469_v49  ;;  %3303 = vrot.lane.b32.xlu1 %v10778_v63, %s13282_s13  ;;  %3301 = vrot.lane.b32.xlu0 %v10822_v22, %s13282_s13  ;;  %v2557_v40 = vld [vmem:[#allocation3 + $0x10] sm:$0xff] }
 0x26d   : > { %vm13286_vm9 = vmmov %vm13285_vm10 }
 0x26e   : > { %v2466_v9 = vpop.permute.xlu1 %2465  ;;  %v2464_v31 = vpop.permute.xlu0 %2463 }
 0x26f   : > { %v2470_v11 = vsel %vm13283_vm7, %v2462_v8, %v2464_v31  ;;  %v2471_v15 = vsel %vm13284_vm11, %v2464_v31, %v2466_v9  ;;  %vm13287_vm7 = vmmov %vm13286_vm9  ;;  %v9369_v31 = vpack.c.bf16 %v2562_v53, %v2557_v40  ;;  %v2215_v40 = vld [vmem:[#allocation2 + $0x50] sm:$0xff] }
 0x270   : > { %2480 = vst [vmem:[#allocation3 + $0x90] sm:$0xf] %v2470_v11  ;;  %2481 = vst [vmem:[#allocation3 + $0x98] sm:$0xf] %v2471_v15  ;;  %3307 = vrot.lane.b32.xlu1 %v10790_v58, %s13282_s13  ;;  %3305 = vrot.lane.b32.xlu0 %v10832_v56, %s13282_s13  ;;  %v2568_v11 = vld [vmem:[#allocation3 + $0x68] sm:$0xff] }
 0x271   : > { %vm13289_vm11 = vmmov %vm13287_vm7 }
 0x272   : > { %v2494_v20 = vpop.permute.xlu1 %2493  ;;  %v2492_v14 = vpop.permute.xlu0 %2491 }
 0x273   : > { %v2503_v34 = vsel %vm13285_vm10, %v2492_v14, %v2494_v20  ;;  %vm13290_vm10 = vmmov %vm13287_vm7 }
 0x274   : > { %2513 = vst [vmem:[#allocation3 + $0x78] sm:$0xf0] %v2503_v34  ;;  %3311 = vrot.lane.b32.xlu1 %v10803_v28, %s13282_s13  ;;  %3309 = vrot.lane.b32.xlu0 %v10842_v61, %s13282_s13 }
 0x276   : > { %v2498_v22 = vpop.permute.xlu1 %2497  ;;  %v2496_v23 = vpop.permute.xlu0 %2495 }
 0x277   : > { %v2504_v54 = vsel %vm13286_vm9, %v2494_v20, %v2496_v23  ;;  %v2505_v13 = vsel %vm13287_vm7, %v2496_v23, %v2498_v22  ;;  %vm13291_vm9 = vcmask 572416   ;;  %v2567_v23 = vld [vmem:[#allocation3 + $0x60] sm:$0xff] }
 0x278   : > { %2514 = vst [vmem:[#allocation3 + $0x80] sm:$0xf0] %v2504_v54  ;;  %2515 = vst [vmem:[#allocation3 + $0x88] sm:$0xf0] %v2505_v13  ;;  %3339 = vrot.lane.b32.xlu1 %v10787_v32, %s13288_s11  ;;  %3337 = vrot.lane.b32.xlu0 %v10778_v63, %s13288_s11  ;;  %v10967_v63 = vld [vmem:[%s9885_s14 + $0x28] sm:$0xff] }
 0x279   : > { %v10981_v39 = vcombine.low %v10967_v63, %v10967_v63  ;;  %vm13292_vm7 = vmmov %vm13291_vm9  ;;  %v11026_v7 = vcombine.high %v10967_v63, %v10967_v63 }
 0x27a   : > { %v2502_v56 = vpop.permute.xlu1 %2501  ;;  %v2500_v57 = vpop.permute.xlu0 %2499 }
 0x27b   : > { %v2506_v26 = vsel %vm13289_vm11, %v2498_v22, %v2500_v57  ;;  %v2507_v61 = vsel %vm13290_vm10, %v2500_v57, %v2502_v56  ;;  %v2570_v29 = vld [vmem:[#allocation3 + $0x78] sm:$0xff]  ;;  %vm13293_vm11 = vmmov %vm13292_vm7  ;;  %v11038_v22 = vcombine.high %v10984_v21, %v10984_v21 }
 0x27c   : > { %2516 = vst [vmem:[#allocation3 + $0x90] sm:$0xf0] %v2506_v26  ;;  %2517 = vst [vmem:[#allocation3 + $0x98] sm:$0xf0] %v2507_v61  ;;  %3343 = vrot.lane.b32.xlu1 %v10800_v25, %s13288_s11  ;;  %3341 = vrot.lane.b32.xlu0 %v10790_v58, %s13288_s11  ;;  %v3631_v25 = vld [vmem:[%s9885_s14 + $0x30] sm:$0xff]  ;;  %v9365_v41 = vpack.c.bf16 %v2570_v29, %v2565_v38 }
 0x27d   : > { %3641 = vst [vmem:[#allocation2 + $0x10] sm:$0xf] %v3631_v25  ;;  %vm13294_vm10 = vmmov %vm13292_vm7  ;;  %v2564_v29 = vld [vmem:[#allocation3 + $0x48] sm:$0xff] }
 0x27e   : > { %v2530_v32 = vpop.permute.xlu1 %2529  ;;  %v2528_v4 = vpop.permute.xlu0 %2527 }
 0x27f   : > { %v2539_v12 = vsel %vm13291_vm9, %v2528_v4, %v2530_v32  ;;  %v2571_v36 = vld [vmem:[#allocation3 + $0x80] sm:$0xff]  ;;  %vm13295_vm9 = vmmov %vm13292_vm7  ;;  %v2572_v34 = vld [vmem:[#allocation3 + $0x88] sm:$0xff] }
 0x280   : > { %2549 = vst [vmem:[#allocation3 + $0xa0] sm:$0xf] %v2539_v12  ;;  %3347 = vrot.lane.b32.xlu1 %v10813_v43, %s13288_s11  ;;  %3345 = vrot.lane.b32.xlu0 %v10803_v28, %s13288_s11  ;;  %v9363_v58 = vpack.c.bf16 %v2571_v36, %v2566_v35  ;;  %v3636_v43 = vcombine.high %v3631_v25, %v3631_v25  ;;  %v2559_v35 = vld [vmem:[#allocation3 + $0x20] sm:$0xff] }
 0x281   : > { %v9373_v56 = vpack.c.bf16 %v2572_v34, %v2567_v23  ;;  %v9376_v36 = vpack.c.bf16 %v2564_v29, %v2559_v35  ;;  %v2212_v34 = vld [vmem:[#allocation2 + $0x38] sm:$0xff]  ;;  %v2225_v23 = vld [vmem:[#allocation2 + $0xa0] sm:$0xf]  ;;  %v2222_v29 = vld [vmem:[#allocation2 + $0x88] sm:$0xff] }
 0x282   : > { %v2534_v42 = vpop.permute.xlu1 %2533  ;;  %v2532_v44 = vpop.permute.xlu0 %2531  ;;  %9364 = vmatprep.subr.bf16.mxu1 %v9363_v58  ;;  %3642 = vst [vmem:[#allocation2 + $0x18] sm:$0xf] %v3636_v43 }
 0x283   : > { %v2540_v46 = vsel %vm13292_vm7, %v2530_v32, %v2532_v44  ;;  %v2541_v28 = vsel %vm13293_vm11, %v2532_v44, %v2534_v42  ;;  %9366 = vmatpush1.bf16.msra.mxu1 %v9365_v41  ;;  %vm13296_vm7 = vcmask 785408   ;;  %v2573_v33 = vld [vmem:[#allocation3 + $0x90] sm:$0xff]  ;;  %v2574_v38 = vld [vmem:[#allocation3 + $0x98] sm:$0xff] }
 0x284   : > { %2550 = vst [vmem:[#allocation3 + $0xa8] sm:$0xf] %v2540_v46  ;;  %2551 = vst [vmem:[#allocation3 + $0xb0] sm:$0xf] %v2541_v28  ;;  %3655 = vrot.lane.b32.xlu1 %v10967_v63, %s9827_s15  ;;  %3653 = vrot.lane.b32.xlu0 %v10981_v39, %s9827_s15  ;;  %v9371_v14 = vpack.c.bf16 %v2573_v33, %v2568_v11  ;;  %v2569_v44 = vld [vmem:[#allocation3 + $0x70] sm:$0xff] }
 0x285   : > { %vm13297_vm11 = vmmov %vm13296_vm7  ;;  %v9379_v43 = vpack.c.bf16 %v2574_v38, %v2569_v44  ;;  %v2214_v38 = vld [vmem:[#allocation2 + $0x48] sm:$0xff]  ;;  %v2227_v44 = vld [vmem:[#allocation2 + $0xb0] sm:$0xf] }
 0x286   : > { %v2538_v19 = vpop.permute.xlu1 %2537  ;;  %v2536_v18 = vpop.permute.xlu0 %2535 }
 0x287   : > { %v2542_v59 = vsel %vm13294_vm10, %v2534_v42, %v2536_v18  ;;  %v2543_v60 = vsel %vm13295_vm9, %v2536_v18, %v2538_v19  ;;  %v2575_v8 = vld [vmem:[#allocation3 + $0xa0] sm:$0xf]  ;;  %vm13298_vm10 = vmmov %vm13296_vm7  ;;  %v2211_v18 = vld [vmem:[#allocation2 + $0x30] sm:$0xff] }
 0x288   : > { %2552 = vst [vmem:[#allocation3 + $0xb8] sm:$0xf] %v2542_v59  ;;  %2553 = vst [vmem:[#allocation3 + $0xc0] sm:$0xf] %v2543_v60  ;;  %3659 = vrot.lane.b32.xlu1 %v10984_v21, %s9827_s15  ;;  %3657 = vrot.lane.b32.xlu0 %v10996_v47, %s9827_s15  ;;  %v2210_v59 = vld [vmem:[#allocation2 + $0x28] sm:$0xff]  ;;  %v2221_v60 = vld [vmem:[#allocation2 + $0x80] sm:$0xff] }
 0x289   : > { %vm13299_vm9 = vmmov %vm13296_vm7  ;;  %v9383_v53 = vpack.c.bf16 %v2210_v59, %v10959_v52  ;;  %v9385_v33 = vpack.c.bf16 %v2221_v60, %v2216_v6 }
 0x28a   : > { %v3052_v0 = vpop.permute.xlu1 %3051  ;;  %v3050_v1 = vpop.permute.xlu0 %3049 }
 0x28b   : > { %v3061_v2 = vsel %vm13296_vm7, %v3050_v1, %v3052_v0  ;;  %v2576_v5 = vld [vmem:[#allocation3 + $0xa8] sm:$0xf]  ;;  %v2577_v12 = vld [vmem:[#allocation3 + $0xb0] sm:$0xf] }
 0x28c   : > { %3071 = vst [vmem:[#allocation4] sm:$0xf] %v3061_v2  ;;  %3663 = vrot.lane.b32.xlu1 %v11002_v55, %s9827_s15  ;;  %3661 = vrot.lane.b32.xlu0 %v11012_v62, %s9827_s15  ;;  %v9381_v2 = vpack.c.bf16 %v2211_v18, %v10969_v17 }
 0x28d   : > { %8903 = vmatprep.subr.msk.mxu1 %vm844_vm13, %v2576_v5 }
 0x28e   : > { %8904 = vmatpush1.msk.msra.mxu1 %vm844_vm13, %v2575_v8  ;;  %v3056_v49 = vpop.permute.xlu1 %3055  ;;  %v3054_v9 = vpop.permute.xlu0 %3053  ;;  %v2220_v8 = vld [vmem:[#allocation2 + $0x78] sm:$0xff] }
 0x28f   : > { %v3062_v15 = vsel %vm13297_vm11, %v3052_v0, %v3054_v9  ;;  %v3063_v20 = vsel %vm13298_vm10, %v3054_v9, %v3056_v49  ;;  %9368 = vmatprep.subr.bf16.mxu1 %v9367_v24  ;;  %8905 = vmatmul.mubr.msk.f32.vlgmr.msra.gmra.mrb[4].mxu1 %vm840_vm15, %v11022_v10  ;;  %v2578_v61 = vld [vmem:[#allocation3 + $0xb8] sm:$0xf]  ;;  %vm13300_vm11 = vcmask 777216   ;;  %v2579_v0 = vld [vmem:[#allocation3 + $0xc0] sm:$0xf]  ;;  %v9387_v9 = vpack.c.bf16 %v2220_v8, %v2215_v40 }
 0x290   : > { %3072 = vst [vmem:[#allocation4 + $0x8] sm:$0xf] %v3062_v15  ;;  %3073 = vst [vmem:[#allocation4 + $0x10] sm:$0xf] %v3063_v20  ;;  %9370 = vmatpush1.bf16.msra.mxu1 %v9369_v31  ;;  %3691 = vrot.lane.b32.xlu1 %v11026_v7, %s9828_s16  ;;  %v2213_v31 = vld [vmem:[#allocation2 + $0x40] sm:$0xff] }
 0x291   : > { %3689 = vrot.lane.b32.xlu0 %v10967_v63, %s9828_s16  ;;  %9372 = vmatprep.subr.bf16.mxu1 %v9371_v14  ;;  %vm13301_vm10 = vmmov %vm13300_vm11 }
 0x292   : > { %v3060_v54 = vpop.permute.xlu1 %3059  ;;  %v3058_v13 = vpop.permute.xlu0 %3057  ;;  %2733 = vmatprep.mubr.f32.mxu1 %v9845_v48 }
 0x293   : > { %v3064_v57 = vsel %vm13299_vm9, %v3056_v49, %v3058_v13  ;;  %v3065_v26 = vsel %vm13296_vm7, %v3058_v13, %v3060_v54  ;;  %vm13302_vm9 = vmmov %vm13301_vm10  ;;  %v9389_v54 = vpack.c.bf16 %v2213_v31, %v10988_v37  ;;  %v11103_v13 = vld [vmem:[%s13221_s1] sm:$0xff]  ;;  %v2218_v37 = vld [vmem:[#allocation2 + $0x68] sm:$0xff] }
 0x294   : > { %3074 = vst [vmem:[#allocation4 + $0x18] sm:$0xf] %v3064_v57  ;;  %3075 = vst [vmem:[#allocation4 + $0x20] sm:$0xf] %v3065_v26  ;;  %9374 = vmatpush1.bf16.msra.mxu1 %v9373_v56  ;;  %3695 = vrot.lane.b32.xlu1 %v11038_v22, %s9828_s16  ;;  %v2223_v56 = vld [vmem:[#allocation2 + $0x90] sm:$0xff]  ;;  %v9391_v57 = vpack.c.bf16 %v2212_v34, %v10971_v30 }
 0x295   : > { %3693 = vrot.lane.b32.xlu0 %v10984_v21, %s9828_s16  ;;  %8906 = vmatprep.subr.msk.mxu1 %vm844_vm13, %v2578_v61  ;;  %vm13303_vm7 = vmmov %vm13302_vm9 }
 0x296   : > { %v3088_v32 = vpop.permute.xlu1 %3087  ;;  %v3086_v4 = vpop.permute.xlu0 %3085 }
 0x297   : > { %v3097_v16 = vsel %vm13300_vm11, %v3086_v4, %v3088_v32  ;;  %vm13304_vm11 = vmmov %vm13303_vm7  ;;  %v9393_v4 = vpack.c.bf16 %v2223_v56, %v2218_v37 }
 0x298   : > { %3107 = vst [vmem:[#allocation4] sm:$0xf0] %v3097_v16  ;;  %8907 = vmatpush1.msk.msra.mxu1 %vm844_vm13, %v2577_v12  ;;  %3699 = vrot.lane.b32.xlu1 %v11049_v27, %s9828_s16  ;;  %v2217_v16 = vld [vmem:[#allocation2 + $0x60] sm:$0xff] }
 0x299   : > { %3697 = vrot.lane.b32.xlu0 %v11002_v55, %s9828_s16  ;;  %9375 = vmatprep.subr.bf16.mxu1 %v9839_v45  ;;  %v9395_v30 = vpack.c.bf16 %v2222_v29, %v2217_v16 }
 0x29a   : > { %8908 = vmatmul.mubr.msk.f32.vlgmr.msra.gmra.mrb[6].mxu1 %vm840_vm15, %v11022_v10  ;;  %v3092_v25 = vpop.permute.xlu1 %3091  ;;  %v3090_v58 = vpop.permute.xlu0 %3089 }
 0x29b   : > { %9377 = vmatpush3.bf16.msra.mxu1 %v9376_v36  ;;  %v3098_v41 = vsel %vm13301_vm10, %v3088_v32, %v3090_v58  ;;  %v3099_v42 = vsel %vm13302_vm9, %v3090_v58, %v3092_v25  ;;  %9147 = vmatprep.mubr.msk.f32.mxu1 %vm9846_vm8, %v9845_v48  ;;  %vm13305_vm10 = vcmask 769024   ;;  %v2228_v58 = vld [vmem:[#allocation2 + $0xb8] sm:$0xf] }
 0x29c   : > { %3108 = vst [vmem:[#allocation4 + $0x8] sm:$0xf0] %v3098_v41  ;;  %3109 = vst [vmem:[#allocation4 + $0x10] sm:$0xf0] %v3099_v42  ;;  %3727 = vrot.lane.b32.xlu1 %v10967_v63, %s9829_s17  ;;  %9378 = vmatprep.subr.bf16.mxu1 %v9839_v45 }
 0x29d   : > { %3725 = vrot.lane.b32.xlu0 %v10981_v39, %s9829_s17  ;;  %vm13306_vm9 = vmmov %vm13305_vm10 }
 0x29e   : > { %v3096_v46 = vpop.permute.xlu1 %3095  ;;  %v3094_v28 = vpop.permute.xlu0 %3093 }
 0x29f   : > { %9380 = vmatpush3.bf16.msra.mxu1 %v9379_v43  ;;  %v3100_v51 = vsel %vm13303_vm7, %v3092_v25, %v3094_v28  ;;  %v3101_v19 = vsel %vm13304_vm11, %v3094_v28, %v3096_v46  ;;  %vm13307_vm7 = vmmov %vm13306_vm9  ;;  %v9398_v28 = vpack.c.bf16 %v2214_v38, %v10998_v50  ;;  %v2219_v50 = vld [vmem:[#allocation2 + $0x70] sm:$0xff] }
 0x2a0   : > { %3110 = vst [vmem:[#allocation4 + $0x18] sm:$0xf0] %v3100_v51  ;;  %3111 = vst [vmem:[#allocation4 + $0x20] sm:$0xf0] %v3101_v19  ;;  %3731 = vrot.lane.b32.xlu1 %v10984_v21, %s9829_s17  ;;  %9145 = vmatprep.subr.mxu1 %v9845_v48  ;;  %v2224_v51 = vld [vmem:[#allocation2 + $0x98] sm:$0xff] }
 0x2a1   : > { %3729 = vrot.lane.b32.xlu0 %v10996_v47, %s9829_s17  ;;  %vm13308_vm11 = vmmov %vm13307_vm7  ;;  %v9401_v60 = vpack.c.bf16 %v2224_v51, %v2219_v50 }
 0x2a2   : > { %v3124_v1 = vpop.permute.xlu1 %3123  ;;  %v3122_v3 = vpop.permute.xlu0 %3121 }
 0x2a3   : > { %9146 = vmatpush3.msk.msra.mxu1 %vm844_vm13, %v2579_v0  ;;  %v3133_v5 = vsel %vm13305_vm10, %v3122_v3, %v3124_v1  ;;  %vm13309_vm10 = vmmov %vm13307_vm7 }
 0x2a4   : > { %3143 = vst [vmem:[#allocation4 + $0x28] sm:$0xf] %v3133_v5  ;;  %9382 = vmatprep.subr.bf16.mxu1 %v9381_v2  ;;  %9148 = vmatmul.mubr.msk.f32.vlgmr.msra.gmra.mrb[8].mxu1 %vm840_vm15, %v11022_v10  ;;  %v2226_v10 = vld [vmem:[#allocation2 + $0xa8] sm:$0xf] }
 0x2a5   : > { %9384 = vmatpush1.bf16.msra.mxu1 %v9383_v53  ;;  %3735 = vrot.lane.b32.xlu1 %v11002_v55, %s9829_s17  ;;  %v3366_v53 = vld [vmem:[#allocation4 + $0x8] sm:$0xff] }
 0x2a6   : > { %3733 = vrot.lane.b32.xlu0 %v11012_v62, %s9829_s17  ;;  %9386 = vmatprep.subr.bf16.mxu1 %v9385_v33  ;;  %v3128_v17 = vpop.permute.xlu1 %3127  ;;  %v3126_v24 = vpop.permute.xlu0 %3125  ;;  %v2229_v33 = vld [vmem:[#allocation2 + $0xc0] sm:$0xf] }
 0x2a7   : > { %v3134_v52 = vsel %vm13306_vm9, %v3124_v1, %v3126_v24  ;;  %v3135_v49 = vsel %vm13307_vm7, %v3126_v24, %v3128_v17  ;;  %2892 = vmatprep.mubr.f32.mxu1 %v9845_v48  ;;  %vm13310_vm9 = vcmask 621568  }
 0x2a8   : > { %3144 = vst [vmem:[#allocation4 + $0x30] sm:$0xf] %v3134_v52  ;;  %3145 = vst [vmem:[#allocation4 + $0x38] sm:$0xf] %v3135_v49 }
 0x2a9   : > { %9388 = vmatpush1.bf16.msra.mxu1 %v9387_v9  ;;  %3763 = vrot.lane.b32.xlu1 %v11026_v7, %s9830_s18  ;;  %vm13311_vm7 = vmmov %vm13310_vm9 }
 0x2aa   : > { %3761 = vrot.lane.b32.xlu0 %v10967_v63, %s9830_s18  ;;  %8911 = vmatprep.subr.msk.mxu1 %vm844_vm13, %v2226_v10  ;;  %v3132_v11 = vpop.permute.xlu1 %3131  ;;  %v3130_v15 = vpop.permute.xlu0 %3129 }
 0x2ab   : > { %v3136_v20 = vsel %vm13308_vm11, %v3128_v17, %v3130_v15  ;;  %v3137_v14 = vsel %vm13309_vm10, %v3130_v15, %v3132_v11  ;;  %vm13312_vm11 = vmmov %vm13311_vm7  ;;  %v3365_v17 = vld [vmem:[#allocation4] sm:$0xff] }
 0x2ac   : > { %3146 = vst [vmem:[#allocation4 + $0x40] sm:$0xf] %v3136_v20  ;;  %3147 = vst [vmem:[#allocation4 + $0x48] sm:$0xf] %v3137_v14 }
 0x2ad   : > { %8912 = vmatpush1.msk.msra.mxu1 %vm844_vm13, %v2225_v23  ;;  %3767 = vrot.lane.b32.xlu1 %v11038_v22, %s9830_s18  ;;  %vm13313_vm10 = vmmov %vm13311_vm7 }
 0x2ae   : > { %3765 = vrot.lane.b32.xlu0 %v10984_v21, %s9830_s18  ;;  %9390 = vmatprep.subr.bf16.mxu1 %v9389_v54  ;;  %v3160_v26 = vpop.permute.xlu1 %3159  ;;  %v3158_v61 = vpop.permute.xlu0 %3157 }
 0x2af   : > { %8913 = vmatmul.mubr.msk.f32.vlgmr.msra.gmra.mrb[4].mxu1 %vm840_vm15, %v11103_v13  ;;  %v3169_v32 = vsel %vm13310_vm9, %v3158_v61, %v3160_v26  ;;  %vm13314_vm9 = vmmov %vm13311_vm7 }
 0x2b0   : > { %9392 = vmatpush1.bf16.msra.mxu1 %v9391_v57  ;;  %3179 = vst [vmem:[#allocation4 + $0x28] sm:$0xf0] %v3169_v32  ;;  %2963 = vmatprep.mubr.f32.mxu1 %v9845_v48 }
 0x2b1   : > { %9394 = vmatprep.subr.bf16.mxu1 %v9393_v4  ;;  %3771 = vrot.lane.b32.xlu1 %v11049_v27, %s9830_s18 }
 0x2b2   : > { %3769 = vrot.lane.b32.xlu0 %v11002_v55, %s9830_s18  ;;  %v3164_v12 = vpop.permute.xlu1 %3163  ;;  %v3162_v35 = vpop.permute.xlu0 %3161 }
 0x2b3   : > { %v3170_v36 = vsel %vm13311_vm7, %v3160_v26, %v3162_v35  ;;  %v3171_v25 = vsel %vm13312_vm11, %v3162_v35, %v3164_v12  ;;  %vm13315_vm7 = vcmask 613376   ;;  %v11198_v35 = vld [vmem:[%s9885_s14 + $0x34] sm:$0xff] }
 0x2b4   : > { %9396 = vmatpush1.bf16.msra.mxu1 %v9395_v30  ;;  %3180 = vst [vmem:[#allocation4 + $0x30] sm:$0xf0] %v3170_v36  ;;  %3181 = vst [vmem:[#allocation4 + $0x38] sm:$0xf0] %v3171_v25  ;;  %v11204_v25 = vcombine.high %v11198_v35, %v11198_v35 }
 0x2b5   : > { %8914 = vmatprep.subr.msk.mxu1 %vm844_vm13, %v2228_v58  ;;  %3799 = vrot.lane.b32.xlu1 %v10967_v63, %s9831_s19  ;;  %vm13316_vm11 = vmmov %vm13315_vm7  ;;  %v11211_v58 = vld [vmem:[%s9885_s14 + $0x3c] sm:$0xff] }
 0x2b6   : > { %3797 = vrot.lane.b32.xlu0 %v10981_v39, %s9831_s19  ;;  %v3168_v41 = vpop.permute.xlu1 %3167  ;;  %v3166_v42 = vpop.permute.xlu0 %3165 }
 0x2b7   : > { %v3172_v43 = vsel %vm13313_vm10, %v3164_v12, %v3166_v42  ;;  %v3173_v46 = vsel %vm13314_vm9, %v3166_v42, %v3168_v41  ;;  %vm13317_vm10 = vmmov %vm13315_vm7  ;;  %v3370_v6 = vld [vmem:[#allocation4 + $0x28] sm:$0xff]  ;;  %v11217_v41 = vcombine.high %v11211_v58, %v11211_v58 }
 0x2b8   : > { %8915 = vmatpush1.msk.msra.mxu1 %vm844_vm13, %v2227_v44  ;;  %3182 = vst [vmem:[#allocation4 + $0x40] sm:$0xf0] %v3172_v43  ;;  %3183 = vst [vmem:[#allocation4 + $0x48] sm:$0xf0] %v3173_v46  ;;  %v9405_v52 = vpack.c.bf16 %v3370_v6, %v3365_v17  ;;  %v11224_v44 = vld [vmem:[%s9885_s14 + $0x44] sm:$0xff] }
 0x2b9   : > { %9397 = vmatprep.subr.bf16.mxu1 %v9839_v45  ;;  %8916 = vmatmul.mubr.msk.f32.vlgmr.msra.gmra.mrb[6].mxu1 %vm840_vm15, %v11103_v13  ;;  %vm13318_vm9 = vmmov %vm13315_vm7 }
 0x2ba   : > { %9399 = vmatpush3.bf16.msra.mxu1 %v9398_v28  ;;  %3803 = vrot.lane.b32.xlu1 %v10984_v21, %s9831_s19  ;;  %v3196_v19 = vpop.permute.xlu1 %3195  ;;  %v3194_v18 = vpop.permute.xlu0 %3193  ;;  %v11230_v28 = vcombine.high %v11224_v44, %v11224_v44 }
 0x2bb   : > { %3801 = vrot.lane.b32.xlu0 %v10996_v47, %s9831_s19  ;;  %v3205_v59 = vsel %vm13315_vm7, %v3194_v18, %v3196_v19  ;;  %9400 = vmatprep.subr.bf16.mxu1 %v9839_v45  ;;  %v3371_v3 = vld [vmem:[#allocation4 + $0x30] sm:$0xff] }
 0x2bc   : > { %3215 = vst [vmem:[#allocation4 + $0x50] sm:$0xf] %v3205_v59  ;;  %9160 = vmatprep.mubr.msk.f32.mxu1 %vm9846_vm8, %v9845_v48  ;;  %v9403_v8 = vpack.c.bf16 %v3371_v3, %v3366_v53  ;;  %v11243_v53 = vcombine.low %v11198_v35, %v11198_v35 }
 0x2be   : > { %9402 = vmatpush3.bf16.msra.mxu1 %v9401_v60  ;;  %3807 = vrot.lane.b32.xlu1 %v11002_v55, %s9831_s19  ;;  %v3200_v0 = vpop.permute.xlu1 %3199  ;;  %v3198_v1 = vpop.permute.xlu0 %3197 }
 0x2bf   : > { %3805 = vrot.lane.b32.xlu0 %v11012_v62, %s9831_s19  ;;  %v3206_v2 = vsel %vm13316_vm11, %v3196_v19, %v3198_v1  ;;  %v3207_v5 = vsel %vm13317_vm10, %v3198_v1, %v3200_v0  ;;  %9158 = vmatprep.subr.mxu1 %v9845_v48  ;;  %vm13319_vm11 = vcmask 605184  }
 0x2c0   : > { %3216 = vst [vmem:[#allocation4 + $0x58] sm:$0xf] %v3206_v2  ;;  %3217 = vst [vmem:[#allocation4 + $0x60] sm:$0xf] %v3207_v5 }
 0x2c1   : > { %vm13320_vm10 = vmmov %vm13319_vm11 }
 0x2c2   : > { %9159 = vmatpush3.msk.msra.mxu1 %vm844_vm13, %v2229_v33  ;;  %3835 = vrot.lane.b32.xlu1 %v11026_v7, %s13262_s20  ;;  %v3204_v24 = vpop.permute.xlu1 %3203  ;;  %v3202_v40 = vpop.permute.xlu0 %3201 }
 0x2c3   : > { %3833 = vrot.lane.b32.xlu0 %v10967_v63, %s13262_s20  ;;  %9404 = vmatprep.subr.bf16.mxu1 %v9403_v8  ;;  %v3208_v49 = vsel %vm13318_vm9, %v3200_v0, %v3202_v40  ;;  %v3209_v9 = vsel %vm13315_vm7, %v3202_v40, %v3204_v24  ;;  %vm13321_vm9 = vmmov %vm13320_vm10  ;;  %v11253_v24 = vcombine.low %v11211_v58, %v11211_v58  ;;  %v3373_v40 = vld [vmem:[#allocation4 + $0x40] sm:$0xff] }
 0x2c4   : > { %9161 = vmatmul.mubr.msk.f32.vlgmr.msra.gmra.mrb[8].mxu1 %vm840_vm15, %v11103_v13  ;;  %3218 = vst [vmem:[#allocation4 + $0x68] sm:$0xf] %v3208_v49  ;;  %3219 = vst [vmem:[#allocation4 + $0x70] sm:$0xf] %v3209_v9 }
 0x2c5   : > { %9406 = vmatpush1.bf16.msra.mxu1 %v9405_v52  ;;  %3472 = vmatprep.mubr.f32.mxu1 %v9845_v48  ;;  %vm13322_vm7 = vmmov %vm13321_vm9 }
 0x2c6   : > { %3839 = vrot.lane.b32.xlu1 %v11038_v22, %s13262_s20  ;;  %v3232_v10 = vpop.permute.xlu1 %3231  ;;  %v3230_v31 = vpop.permute.xlu0 %3229 }
 0x2c7   : > { %3837 = vrot.lane.b32.xlu0 %v10984_v21, %s13262_s20  ;;  %v3241_v11 = vsel %vm13319_vm11, %v3230_v31, %v3232_v10  ;;  %vm13323_vm11 = vmmov %vm13322_vm7 }
 0x2c8   : > { %3251 = vst [vmem:[#allocation4 + $0x50] sm:$0xf0] %v3241_v11  ;;  %v3368_v11 = vld [vmem:[#allocation4 + $0x18] sm:$0xff] }
 0x2ca   : > { %3843 = vrot.lane.b32.xlu1 %v11049_v27, %s13262_s20  ;;  %v3236_v15 = vpop.permute.xlu1 %3235  ;;  %v3234_v20 = vpop.permute.xlu0 %3233 }
 0x2cb   : > { %3841 = vrot.lane.b32.xlu0 %v11002_v55, %s13262_s20  ;;  %v3242_v14 = vsel %vm13320_vm10, %v3232_v10, %v3234_v20  ;;  %v3243_v34 = vsel %vm13321_vm9, %v3234_v20, %v3236_v15  ;;  %vm13324_vm10 = vcmask 457728   ;;  %v11262_v10 = vcombine.low %v11224_v44, %v11224_v44 }
 0x2cc   : > { %3252 = vst [vmem:[#allocation4 + $0x58] sm:$0xf0] %v3242_v14  ;;  %3253 = vst [vmem:[#allocation4 + $0x60] sm:$0xf0] %v3243_v34  ;;  %v9411_v14 = vpack.c.bf16 %v3373_v40, %v3368_v11  ;;  %v11268_v34 = vld [vmem:[%s13221_s1 + $0x10] sm:$0xff] }
 0x2cd   : > { %vm13325_vm9 = vmmov %vm13324_vm10 }
 0x2ce   : > { %3871 = vrot.lane.b32.xlu1 %v10967_v63, %s13260_s21  ;;  %v3240_v23 = vpop.permute.xlu1 %3239  ;;  %v3238_v54 = vpop.permute.xlu0 %3237 }
 0x2cf   : > { %3869 = vrot.lane.b32.xlu0 %v10981_v39, %s13260_s21  ;;  %v3244_v13 = vsel %vm13322_vm7, %v3236_v15, %v3238_v54  ;;  %v3245_v56 = vsel %vm13323_vm11, %v3238_v54, %v3240_v23  ;;  %vm13326_vm7 = vmmov %vm13325_vm9  ;;  %v3375_v60 = vld [vmem:[#allocation4 + $0x50] sm:$0xff]  ;;  %v3372_v15 = vld [vmem:[#allocation4 + $0x38] sm:$0xff] }
 0x2d0   : > { %3254 = vst [vmem:[#allocation4 + $0x68] sm:$0xf0] %v3244_v13  ;;  %3255 = vst [vmem:[#allocation4 + $0x70] sm:$0xf0] %v3245_v56  ;;  %v3367_v54 = vld [vmem:[#allocation4 + $0x10] sm:$0xff] }
 0x2d1   : > { %vm13327_vm11 = vmmov %vm13326_vm7 }
 0x2d2   : > { %3875 = vrot.lane.b32.xlu1 %v10984_v21, %s13260_s21  ;;  %v3268_v57 = vpop.permute.xlu1 %3267  ;;  %v3266_v26 = vpop.permute.xlu0 %3265 }
 0x2d3   : > { %3873 = vrot.lane.b32.xlu0 %v10996_v47, %s13260_s21  ;;  %v3277_v61 = vsel %vm13324_vm10, %v3266_v26, %v3268_v57  ;;  %vm13328_vm10 = vmmov %vm13326_vm7  ;;  %v3376_v18 = vld [vmem:[#allocation4 + $0x58] sm:$0xff] }
 0x2d4   : > { %3287 = vst [vmem:[#allocation4 + $0x78] sm:$0xf] %v3277_v61 }
 0x2d6   : > { %3879 = vrot.lane.b32.xlu1 %v11002_v55, %s13260_s21  ;;  %v3272_v39 = vpop.permute.xlu1 %3271  ;;  %v3270_v37 = vpop.permute.xlu0 %3269 }
 0x2d7   : > { %3877 = vrot.lane.b32.xlu0 %v11012_v62, %s13260_s21  ;;  %v3278_v32 = vsel %vm13325_vm9, %v3268_v57, %v3270_v37  ;;  %v3279_v4 = vsel %vm13326_vm7, %v3270_v37, %v3272_v39  ;;  %v9413_v57 = vpack.c.bf16 %v3372_v15, %v3367_v54  ;;  %v3378_v26 = vld [vmem:[#allocation4 + $0x68] sm:$0xff]  ;;  %vm13329_vm9 = vcmask 703488  }
 0x2d8   : > { %3288 = vst [vmem:[#allocation4 + $0x80] sm:$0xf] %v3278_v32  ;;  %3289 = vst [vmem:[#allocation4 + $0x88] sm:$0xf] %v3279_v4  ;;  %v3377_v4 = vld [vmem:[#allocation4 + $0x60] sm:$0xff] }
 0x2d9   : > { %vm13330_vm7 = vmmov %vm13329_vm9 }
 0x2da   : > { %3907 = vrot.lane.b32.xlu1 %v11026_v7, %s13258_s22  ;;  %v3276_v47 = vpop.permute.xlu1 %3275  ;;  %v3274_v29 = vpop.permute.xlu0 %3273 }
 0x2db   : > { %3905 = vrot.lane.b32.xlu0 %v10967_v63, %s13258_s22  ;;  %v3280_v16 = vsel %vm13327_vm11, %v3272_v39, %v3274_v29  ;;  %v3281_v30 = vsel %vm13328_vm10, %v3274_v29, %v3276_v47  ;;  %vm13331_vm11 = vmmov %vm13330_vm7 }
 0x2dc   : > { %3290 = vst [vmem:[#allocation4 + $0x90] sm:$0xf] %v3280_v16  ;;  %3291 = vst [vmem:[#allocation4 + $0x98] sm:$0xf] %v3281_v30 }
 0x2dd   : > { %vm13332_vm10 = vmmov %vm13330_vm7 }
 0x2de   : > { %3911 = vrot.lane.b32.xlu1 %v11038_v22, %s13258_s22  ;;  %v3304_v62 = vpop.permute.xlu1 %3303  ;;  %v3302_v12 = vpop.permute.xlu0 %3301 }
 0x2df   : > { %3909 = vrot.lane.b32.xlu0 %v10984_v21, %s13258_s22  ;;  %v3313_v7 = vsel %vm1582_vm12, %v3302_v12, %v3304_v62 }
 0x2e0   : > { %3323 = vst [vmem:[#allocation4 + $0x78] sm:$0xf0] %v3313_v7  ;;  %v3374_v7 = vld [vmem:[#allocation4 + $0x48] sm:$0xff] }
 0x2e2   : > { %3915 = vrot.lane.b32.xlu1 %v11049_v27, %s13258_s22  ;;  %v3308_v63 = vpop.permute.xlu1 %3307  ;;  %v3306_v36 = vpop.permute.xlu0 %3305 }
 0x2e3   : > { %3913 = vrot.lane.b32.xlu0 %v11002_v55, %s13258_s22  ;;  %v3314_v21 = vsel %vm1582_vm12, %v3304_v62, %v3306_v36  ;;  %v3315_v22 = vsel %vm1582_vm12, %v3306_v36, %v3308_v63 }
 0x2e4   : > { %3324 = vst [vmem:[#allocation4 + $0x80] sm:$0xf0] %v3314_v21  ;;  %3325 = vst [vmem:[#allocation4 + $0x88] sm:$0xf0] %v3315_v22  ;;  %v3369_v22 = vld [vmem:[#allocation4 + $0x20] sm:$0xff] }
 0x2e6   : > { %3969 = vrot.lane.b32.xlu1 %v11204_v25, %s9835_s23  ;;  %v3312_v27 = vpop.permute.xlu1 %3311  ;;  %v3310_v38 = vpop.permute.xlu0 %3309 }
 0x2e7   : > { %3967 = vrot.lane.b32.xlu0 %v11198_v35, %s9835_s23  ;;  %v3316_v55 = vsel %vm1582_vm12, %v3308_v63, %v3310_v38  ;;  %v3317_v42 = vsel %vm1582_vm12, %v3310_v38, %v3312_v27  ;;  %v3380_v51 = vld [vmem:[#allocation4 + $0x78] sm:$0xff]  ;;  %v9420_v38 = vpack.c.bf16 %v3374_v7, %v3369_v22 }
 0x2e8   : > { %3326 = vst [vmem:[#allocation4 + $0x90] sm:$0xf0] %v3316_v55  ;;  %3327 = vst [vmem:[#allocation4 + $0x98] sm:$0xf0] %v3317_v42  ;;  %v9409_v0 = vpack.c.bf16 %v3380_v51, %v3375_v60 }
 0x2ea   : > { %3973 = vrot.lane.b32.xlu1 %v11217_v41, %s9835_s23  ;;  %v3340_v43 = vpop.permute.xlu1 %3339  ;;  %v3338_v46 = vpop.permute.xlu0 %3337 }
 0x2eb   : > { %3971 = vrot.lane.b32.xlu0 %v11211_v58, %s9835_s23  ;;  %v3349_v19 = vsel %vm1619_vm14, %v3338_v46, %v3340_v43  ;;  %v3381_v59 = vld [vmem:[#allocation4 + $0x80] sm:$0xff]  ;;  %v3382_v32 = vld [vmem:[#allocation4 + $0x88] sm:$0xff]  ;;  %v3379_v46 = vld [vmem:[#allocation4 + $0x70] sm:$0xff] }
 0x2ec   : > { %3359 = vst [vmem:[#allocation4 + $0xa0] sm:$0xf] %v3349_v19  ;;  %v9407_v50 = vpack.c.bf16 %v3381_v59, %v3376_v18  ;;  %v9417_v16 = vpack.c.bf16 %v3382_v32, %v3377_v4 }
 0x2ee   : > { %3977 = vrot.lane.b32.xlu1 %v11230_v28, %s9835_s23  ;;  %v3344_v1 = vpop.permute.xlu1 %3343  ;;  %v3342_v3 = vpop.permute.xlu0 %3341  ;;  %9408 = vmatprep.subr.bf16.mxu1 %v9407_v50 }
 0x2ef   : > { %3975 = vrot.lane.b32.xlu0 %v11224_v44, %s9835_s23  ;;  %v3350_v2 = vsel %vm1619_vm14, %v3340_v43, %v3342_v3  ;;  %v3351_v5 = vsel %vm1619_vm14, %v3342_v3, %v3344_v1  ;;  %9410 = vmatpush1.bf16.msra.mxu1 %v9409_v0  ;;  %v3383_v23 = vld [vmem:[#allocation4 + $0x90] sm:$0xff]  ;;  %v3384_v55 = vld [vmem:[#allocation4 + $0x98] sm:$0xff] }
 0x2f0   : > { %3360 = vst [vmem:[#allocation4 + $0xa8] sm:$0xf] %v3350_v2  ;;  %3361 = vst [vmem:[#allocation4 + $0xb0] sm:$0xf] %v3351_v5  ;;  %v9415_v37 = vpack.c.bf16 %v3383_v23, %v3378_v26  ;;  %v9423_v18 = vpack.c.bf16 %v3384_v55, %v3379_v46 }
 0x2f2   : > { %4005 = vrot.lane.b32.xlu1 %v11198_v35, %s9836_s24  ;;  %v3348_v6 = vpop.permute.xlu1 %3347  ;;  %v3346_v33 = vpop.permute.xlu0 %3345 }
 0x2f3   : > { %4003 = vrot.lane.b32.xlu0 %v11243_v53, %s9836_s24  ;;  %v3352_v8 = vsel %vm1619_vm14, %v3344_v1, %v3346_v33  ;;  %v3353_v17 = vsel %vm1619_vm14, %v3346_v33, %v3348_v6  ;;  %v3385_v20 = vld [vmem:[#allocation4 + $0xa0] sm:$0xf] }
 0x2f4   : > { %3362 = vst [vmem:[#allocation4 + $0xb8] sm:$0xf] %v3352_v8  ;;  %3363 = vst [vmem:[#allocation4 + $0xc0] sm:$0xf] %v3353_v17 }
 0x2f6   : > { %4009 = vrot.lane.b32.xlu1 %v11211_v58, %s9836_s24  ;;  %v3656_v52 = vpop.permute.xlu1 %3655  ;;  %v3654_v49 = vpop.permute.xlu0 %3653 }
 0x2f7   : > { %4007 = vrot.lane.b32.xlu0 %v11253_v24, %s9836_s24  ;;  %v3665_v9 = vsel %vm179_vm0, %v3654_v49, %v3656_v52  ;;  %v3386_v31 = vld [vmem:[#allocation4 + $0xa8] sm:$0xf]  ;;  %v3387_v21 = vld [vmem:[#allocation4 + $0xb0] sm:$0xf] }
 0x2f8   : > { %3675 = vst [vmem:[#allocation2] sm:$0xf0] %v3665_v9  ;;  %8920 = vmatprep.subr.msk.mxu1 %vm844_vm13, %v3386_v31 }
 0x2f9   : > { %8921 = vmatpush1.msk.msra.mxu1 %vm844_vm13, %v3385_v20 }
 0x2fa   : > { %4013 = vrot.lane.b32.xlu1 %v11224_v44, %s9836_s24  ;;  %v3660_v13 = vpop.permute.xlu1 %3659  ;;  %v3658_v56 = vpop.permute.xlu0 %3657  ;;  %9412 = vmatprep.subr.bf16.mxu1 %v9411_v14 }
 0x2fb   : > { %4011 = vrot.lane.b32.xlu0 %v11262_v10, %s9836_s24  ;;  %v3666_v61 = vsel %vm179_vm0, %v3656_v52, %v3658_v56  ;;  %v3667_v39 = vsel %vm179_vm0, %v3658_v56, %v3660_v13  ;;  %8922 = vmatmul.mubr.msk.f32.vlgmr.msra.gmra.mrb[4].mxu1 %vm840_vm15, %v11268_v34  ;;  %v3388_v12 = vld [vmem:[#allocation4 + $0xb8] sm:$0xf]  ;;  %v3389_v1 = vld [vmem:[#allocation4 + $0xc0] sm:$0xf] }
 0x2fc   : > { %3676 = vst [vmem:[#allocation2 + $0x8] sm:$0xf0] %v3666_v61  ;;  %3677 = vst [vmem:[#allocation2 + $0x10] sm:$0xf0] %v3667_v39  ;;  %9414 = vmatpush1.bf16.msra.mxu1 %v9413_v57  ;;  %3543 = vmatprep.mubr.f32.mxu1 %v9845_v48 }
 0x2fd   : > { %9416 = vmatprep.subr.bf16.mxu1 %v9415_v37 }
 0x2fe   : > { %4041 = vrot.lane.b32.xlu1 %v11204_v25, %s9837_s25  ;;  %v3664_v47 = vpop.permute.xlu1 %3663  ;;  %v3662_v29 = vpop.permute.xlu0 %3661 }
 0x2ff   : > { %4039 = vrot.lane.b32.xlu0 %v11198_v35, %s9837_s25  ;;  %v3668_v30 = vsel %vm179_vm0, %v3660_v13, %v3662_v29  ;;  %v3669_v62 = vsel %vm179_vm0, %v3662_v29, %v3664_v47 }
 0x300   : > { %3678 = vst [vmem:[#allocation2 + $0x18] sm:$0xf0] %v3668_v30  ;;  %3679 = vst [vmem:[#allocation2 + $0x20] sm:$0xf0] %v3669_v62  ;;  %9418 = vmatpush1.bf16.msra.mxu1 %v9417_v16 }
 0x301   : > { %8923 = vmatprep.subr.msk.mxu1 %vm844_vm13, %v3388_v12 }
 0x302   : > { %4045 = vrot.lane.b32.xlu1 %v11217_v41, %s9837_s25  ;;  %v3692_v63 = vpop.permute.xlu1 %3691 }
 0x303   : > { %4043 = vrot.lane.b32.xlu0 %v11211_v58, %s9837_s25  ;;  %v3690_v36 = vpop.permute.xlu0 %3689 }
 0x304   : > { %v3701_v27 = vsel %vm216_vm1, %v3690_v36, %v3692_v63  ;;  %8924 = vmatpush1.msk.msra.mxu1 %vm844_vm13, %v3387_v21 }
 0x305   : > { %3711 = vst [vmem:[#allocation2 + $0x28] sm:$0xf] %v3701_v27  ;;  %9419 = vmatprep.subr.bf16.mxu1 %v9839_v45  ;;  %8925 = vmatmul.mubr.msk.f32.vlgmr.msra.gmra.mrb[6].mxu1 %vm840_vm15, %v11268_v34 }
 0x306   : > { %4049 = vrot.lane.b32.xlu1 %v11230_v28, %s9837_s25  ;;  %9421 = vmatpush3.bf16.msra.mxu1 %v9420_v38  ;;  %v3696_v42 = vpop.permute.xlu1 %3695 }
 0x307   : > { %4047 = vrot.lane.b32.xlu0 %v11224_v44, %s9837_s25  ;;  %v3694_v43 = vpop.permute.xlu0 %3693  ;;  %9422 = vmatprep.subr.bf16.mxu1 %v9839_v45 }
 0x308   : > { %v3702_v51 = vsel %vm216_vm1, %v3692_v63, %v3694_v43  ;;  %v3703_v19 = vsel %vm216_vm1, %v3694_v43, %v3696_v42  ;;  %9173 = vmatprep.mubr.msk.f32.mxu1 %vm9846_vm8, %v9845_v48  ;;  %v11385_v43 = vld [vmem:[#allocation2] sm:$0xff] }
 0x309   : > { %3712 = vst [vmem:[#allocation2 + $0x30] sm:$0xf] %v3702_v51  ;;  %3713 = vst [vmem:[#allocation2 + $0x38] sm:$0xf] %v3703_v19 }
 0x30a   : > { %4077 = vrot.lane.b32.xlu1 %v11198_v35, %s9838_s26  ;;  %9424 = vmatpush3.bf16.msra.mxu1 %v9423_v18  ;;  %v3700_v59 = vpop.permute.xlu1 %3699  ;;  %v11395_v18 = vld [vmem:[%s9885_s14 + $0x44] sm:$0xff] }
 0x30b   : > { %4075 = vrot.lane.b32.xlu0 %v11243_v53, %s9838_s26  ;;  %v3698_v50 = vpop.permute.xlu0 %3697  ;;  %9171 = vmatprep.subr.mxu1 %v9845_v48 }
 0x30c   : > { %v3704_v60 = vsel %vm216_vm1, %v3696_v42, %v3698_v50  ;;  %v3705_v0 = vsel %vm216_vm1, %v3698_v50, %v3700_v59  ;;  %v11383_v42 = vld [vmem:[%s9885_s14 + $0x3c] sm:$0xff]  ;;  %v11397_v59 = vld [vmem:[#allocation2 + $0x10] sm:$0xff] }
 0x30d   : > { %3714 = vst [vmem:[#allocation2 + $0x40] sm:$0xf] %v3704_v60  ;;  %3715 = vst [vmem:[#allocation2 + $0x48] sm:$0xf] %v3705_v0 }
 0x30e   : > { %4081 = vrot.lane.b32.xlu1 %v11211_v58, %s9838_s26  ;;  %9172 = vmatpush3.msk.msra.mxu1 %vm844_vm13, %v3389_v1  ;;  %v3728_v3 = vpop.permute.xlu1 %3727  ;;  %5367 = vst [vmem:[#allocation2] sm:$0xf] %v11383_v42  ;;  %5369 = vst [vmem:[#allocation2 + $0x10] sm:$0xf] %v11395_v18 }
 0x30f   : > { %4079 = vrot.lane.b32.xlu0 %v11253_v24, %s9838_s26  ;;  %v3726_v2 = vpop.permute.xlu0 %3725  ;;  %9174 = vmatmul.mubr.msk.f32.vlgmr.msra.gmra.mrb[8].mxu1 %vm840_vm15, %v11268_v34 }
 0x310   : > { %v3737_v5 = vsel %vm253_vm2, %v3726_v2, %v3728_v3  ;;  %6118 = vmatprep.mubr.f32.mxu1 %v9845_v48 }
 0x311   : > { %3747 = vst [vmem:[#allocation2 + $0x28] sm:$0xf0] %v3737_v5 }
 0x312   : > { %4085 = vrot.lane.b32.xlu1 %v11224_v44, %s9838_s26  ;;  %v3732_v6 = vpop.permute.xlu1 %3731 }
 0x313   : > { %4083 = vrot.lane.b32.xlu0 %v11262_v10, %s9838_s26  ;;  %v3730_v33 = vpop.permute.xlu0 %3729 }
 0x314   : > { %v3738_v8 = vsel %vm253_vm2, %v3728_v3, %v3730_v33  ;;  %v3739_v17 = vsel %vm253_vm2, %v3730_v33, %v3732_v6 }
 0x315   : > { %3748 = vst [vmem:[#allocation2 + $0x30] sm:$0xf0] %v3738_v8  ;;  %3749 = vst [vmem:[#allocation2 + $0x38] sm:$0xf0] %v3739_v17 }
 0x316   : > { %4113 = vrot.lane.b32.xlu1 %v11204_v25, %s9840_s27 }
 0x317   : > { %4111 = vrot.lane.b32.xlu0 %v11198_v35, %s9840_s27  ;;  %v3736_v40 = vpop.permute.xlu1 %3735 }
 0x318   : > { %v3734_v52 = vpop.permute.xlu0 %3733 }
 0x319   : > { %v3740_v49 = vsel %vm253_vm2, %v3732_v6, %v3734_v52  ;;  %v3741_v9 = vsel %vm253_vm2, %v3734_v52, %v3736_v40  ;;  %v11417_v6 = vcombine.high %v11383_v42, %v11383_v42  ;;  %v11441_v40 = vld [vmem:[%s9885_s14 + $0x48] sm:$0xff]  ;;  %v11443_v52 = vld [vmem:[#allocation2 + $0x18] sm:$0xff] }
 0x31a   : > { %3750 = vst [vmem:[#allocation2 + $0x40] sm:$0xf0] %v3740_v49  ;;  %3751 = vst [vmem:[#allocation2 + $0x48] sm:$0xf0] %v3741_v9  ;;  %4117 = vrot.lane.b32.xlu1 %v11217_v41, %s9840_s27 }
 0x31b   : > { %4115 = vrot.lane.b32.xlu0 %v11211_v58, %s9840_s27  ;;  %v3764_v31 = vpop.permute.xlu1 %3763 }
 0x31c   : > { %v3762_v11 = vpop.permute.xlu0 %3761 }
 0x31d   : > { %v3773_v15 = vsel %vm290_vm3, %v3762_v11, %v3764_v31  ;;  %v11452_v11 = vcombine.high %v11441_v40, %v11441_v40 }
 0x31e   : > { %3783 = vst [vmem:[#allocation2 + $0x50] sm:$0xf] %v3773_v15  ;;  %4121 = vrot.lane.b32.xlu1 %v11230_v28, %s9840_s27 }
 0x31f   : > { %4119 = vrot.lane.b32.xlu0 %v11224_v44, %s9840_s27  ;;  %v3768_v20 = vpop.permute.xlu1 %3767 }
 0x320   : > { %v3766_v14 = vpop.permute.xlu0 %3765 }
 0x321   : > { %v3774_v34 = vsel %vm290_vm3, %v3764_v31, %v3766_v14  ;;  %v3775_v23 = vsel %vm290_vm3, %v3766_v14, %v3768_v20 }
 0x322   : > { %3784 = vst [vmem:[#allocation2 + $0x58] sm:$0xf] %v3774_v34  ;;  %3785 = vst [vmem:[#allocation2 + $0x60] sm:$0xf] %v3775_v23  ;;  %4149 = vrot.lane.b32.xlu1 %v11198_v35, %s9841_s28 }
 0x323   : > { %4147 = vrot.lane.b32.xlu0 %v11243_v53, %s9841_s28  ;;  %v3772_v54 = vpop.permute.xlu1 %3771 }
 0x324   : > { %v3770_v13 = vpop.permute.xlu0 %3769 }
 0x325   : > { %v3776_v56 = vsel %vm290_vm3, %v3768_v20, %v3770_v13  ;;  %v3777_v57 = vsel %vm290_vm3, %v3770_v13, %v3772_v54 }
 0x326   : > { %3786 = vst [vmem:[#allocation2 + $0x68] sm:$0xf] %v3776_v56  ;;  %3787 = vst [vmem:[#allocation2 + $0x70] sm:$0xf] %v3777_v57  ;;  %4153 = vrot.lane.b32.xlu1 %v11211_v58, %s9841_s28 }
 0x327   : > { %4151 = vrot.lane.b32.xlu0 %v11253_v24, %s9841_s28  ;;  %v3800_v26 = vpop.permute.xlu1 %3799 }
 0x328   : > { %v3798_v61 = vpop.permute.xlu0 %3797 }
 0x329   : > { %v3809_v39 = vsel %vm327_vm4, %v3798_v61, %v3800_v26 }
 0x32a   : > { %3819 = vst [vmem:[#allocation2 + $0x50] sm:$0xf0] %v3809_v39  ;;  %4157 = vrot.lane.b32.xlu1 %v11224_v44, %s9841_s28 }
 0x32b   : > { %4155 = vrot.lane.b32.xlu0 %v11262_v10, %s9841_s28 }
 0x32c   : > { %v3804_v37 = vpop.permute.xlu1 %3803 }
 0x32d   : > { %v3802_v32 = vpop.permute.xlu0 %3801 }
 0x32e   : > { %v3810_v4 = vsel %vm327_vm4, %v3800_v26, %v3802_v32  ;;  %v3811_v47 = vsel %vm327_vm4, %v3802_v32, %v3804_v37  ;;  %4185 = vrot.lane.b32.xlu1 %v11204_v25, %s9842_s29  ;;  %v11486_v32 = vcombine.low %v11441_v40, %v11441_v40 }
 0x32f   : > { %3820 = vst [vmem:[#allocation2 + $0x58] sm:$0xf0] %v3810_v4  ;;  %3821 = vst [vmem:[#allocation2 + $0x60] sm:$0xf0] %v3811_v47  ;;  %4183 = vrot.lane.b32.xlu0 %v11198_v35, %s9842_s29 }
 0x330   : > { %v3808_v29 = vpop.permute.xlu1 %3807 }
 0x331   : > { %v3806_v16 = vpop.permute.xlu0 %3805 }
 0x332   : > { %v3812_v30 = vsel %vm327_vm4, %v3804_v37, %v3806_v16  ;;  %v3813_v62 = vsel %vm327_vm4, %v3806_v16, %v3808_v29  ;;  %4189 = vrot.lane.b32.xlu1 %v11217_v41, %s9842_s29 }
 0x333   : > { %3822 = vst [vmem:[#allocation2 + $0x68] sm:$0xf0] %v3812_v30  ;;  %3823 = vst [vmem:[#allocation2 + $0x70] sm:$0xf0] %v3813_v62  ;;  %4187 = vrot.lane.b32.xlu0 %v11211_v58, %s9842_s29 }
 0x334   : > { %v3836_v12 = vpop.permute.xlu1 %3835 }
 0x335   : > { %v3834_v7 = vpop.permute.xlu0 %3833 }
 0x336   : > { %v3845_v63 = vsel %vm364_vm5, %v3834_v7, %v3836_v12  ;;  %4193 = vrot.lane.b32.xlu1 %v11230_v28, %s9842_s29 }
 0x337   : > { %3855 = vst [vmem:[#allocation2 + $0x78] sm:$0xf] %v3845_v63  ;;  %4191 = vrot.lane.b32.xlu0 %v11224_v44, %s9842_s29 }
 0x338   : > { %v3840_v36 = vpop.permute.xlu1 %3839 }
 0x339   : > { %v3838_v21 = vpop.permute.xlu0 %3837 }
 0x33a   : > { %v3846_v22 = vsel %vm364_vm5, %v3836_v12, %v3838_v21  ;;  %v3847_v27 = vsel %vm364_vm5, %v3838_v21, %v3840_v36  ;;  %4221 = vrot.lane.b32.xlu1 %v11198_v35, %s9843_s30 }
 0x33b   : > { %3856 = vst [vmem:[#allocation2 + $0x80] sm:$0xf] %v3846_v22  ;;  %3857 = vst [vmem:[#allocation2 + $0x88] sm:$0xf] %v3847_v27  ;;  %4219 = vrot.lane.b32.xlu0 %v11243_v53, %s9843_s30 }
 0x33c   : > { %v3844_v38 = vpop.permute.xlu1 %3843 }
 0x33d   : > { %v3842_v55 = vpop.permute.xlu0 %3841 }
 0x33e   : > { %v3848_v46 = vsel %vm364_vm5, %v3840_v36, %v3842_v55  ;;  %v3849_v51 = vsel %vm364_vm5, %v3842_v55, %v3844_v38  ;;  %4225 = vrot.lane.b32.xlu1 %v11211_v58, %s9843_s30 }
 0x33f   : > { %3858 = vst [vmem:[#allocation2 + $0x90] sm:$0xf] %v3848_v46  ;;  %3859 = vst [vmem:[#allocation2 + $0x98] sm:$0xf] %v3849_v51  ;;  %4223 = vrot.lane.b32.xlu0 %v11253_v24, %s9843_s30 }
 0x340   : > { %v3872_v53 = vpop.permute.xlu1 %3871 }
 0x341   : > { %v3870_v19 = vpop.permute.xlu0 %3869 }
 0x342   : > { %v3881_v50 = vsel %vm401_vm6, %v3870_v19, %v3872_v53  ;;  %4229 = vrot.lane.b32.xlu1 %v11224_v44, %s9843_s30 }
 0x343   : > { %3891 = vst [vmem:[#allocation2 + $0x78] sm:$0xf0] %v3881_v50  ;;  %4227 = vrot.lane.b32.xlu0 %v11262_v10, %s9843_s30 }
 0x344   : > { %v3876_v60 = vpop.permute.xlu1 %3875 }
 0x345   : > { %v3874_v0 = vpop.permute.xlu0 %3873 }
 0x346   : > { %v3882_v24 = vsel %vm401_vm6, %v3872_v53, %v3874_v0  ;;  %v3883_v1 = vsel %vm401_vm6, %v3874_v0, %v3876_v60  ;;  %4257 = vrot.lane.b32.xlu1 %v11204_v25, %s9844_s3  ;;  %v11424_v25 = vld [vmem:[#allocation2 + $0x8] sm:$0xff] }
 0x347   : > { %3892 = vst [vmem:[#allocation2 + $0x80] sm:$0xf0] %v3882_v24  ;;  %3893 = vst [vmem:[#allocation2 + $0x88] sm:$0xf0] %v3883_v1  ;;  %4255 = vrot.lane.b32.xlu0 %v11198_v35, %s9844_s3  ;;  %v11422_v35 = vld [vmem:[%s9885_s14 + $0x40] sm:$0xff] }
 0x348   : > { %v3880_v3 = vpop.permute.xlu1 %3879  ;;  %5368 = vst [vmem:[#allocation2 + $0x8] sm:$0xf] %v11417_v6  ;;  %v11432_v17 = vcombine.high %v11422_v35, %v11422_v35  ;;  %v11476_v57 = vcombine.low %v11422_v35, %v11422_v35  ;;  %v5360_v0 = vld [vmem:[%s9885_s14 + $0x4c] sm:$0xf] }
 0x349   : > { %v3878_v2 = vpop.permute.xlu0 %3877 }
 0x34a   : > { %v3884_v5 = vsel %vm401_vm6, %v3876_v60, %v3878_v2  ;;  %v3885_v10 = vsel %vm401_vm6, %v3878_v2, %v3880_v3  ;;  %4261 = vrot.lane.b32.xlu1 %v11217_v41, %s9844_s3  ;;  %v11520_v60 = vld [vmem:[#allocation2 + $0x20] sm:$0xff] }
 0x34b   : > { %3894 = vst [vmem:[#allocation2 + $0x90] sm:$0xf0] %v3884_v5  ;;  %3895 = vst [vmem:[#allocation2 + $0x98] sm:$0xf0] %v3885_v10  ;;  %4259 = vrot.lane.b32.xlu0 %v11211_v58, %s9844_s3  ;;  %v11436_v58 = vcombine.high %v11395_v18, %v11395_v18 }
 0x34c   : > { %v3908_v33 = vpop.permute.xlu1 %3907  ;;  %5371 = vst [vmem:[#allocation2 + $0x20] sm:$0xf] %v5360_v0 }
 0x34d   : > { %v3906_v8 = vpop.permute.xlu0 %3905  ;;  %5370 = vst [vmem:[#allocation2 + $0x18] sm:$0xf] %v11436_v58 }
 0x34e   : > { %v3917_v41 = vsel %vm13329_vm9, %v3906_v8, %v3908_v33  ;;  %4265 = vrot.lane.b32.xlu1 %v11230_v28, %s9844_s3  ;;  %vm13333_vm9 = vmmov %vm13330_vm7 }
 0x34f   : > { %3927 = vst [vmem:[#allocation2 + $0xa0] sm:$0xf] %v3917_v41  ;;  %4263 = vrot.lane.b32.xlu0 %v11224_v44, %s9844_s3  ;;  %v11457_v44 = vld [vmem:[%s9885_s14 + $0x50] sm:$0xff] }
 0x350   : > { %v3912_v49 = vpop.permute.xlu1 %3911  ;;  %v11465_v23 = vcombine.high %v11457_v44, %v11457_v44  ;;  %v11496_v30 = vcombine.low %v11457_v44, %v11457_v44 }
 0x351   : > { %v3910_v28 = vpop.permute.xlu0 %3909 }
 0x352   : > { %v3918_v9 = vsel %vm13330_vm7, %v3908_v33, %v3910_v28  ;;  %v3919_v31 = vsel %vm13331_vm11, %v3910_v28, %v3912_v49  ;;  %4779 = vrot.lane.b32.xlu1 %v11432_v17, %s13256_s4  ;;  %vm13334_vm7 = vcmask 916480  }
 0x353   : > { %3928 = vst [vmem:[#allocation2 + $0xa8] sm:$0xf] %v3918_v9  ;;  %3929 = vst [vmem:[#allocation2 + $0xb0] sm:$0xf] %v3919_v31  ;;  %4777 = vrot.lane.b32.xlu0 %v11422_v35, %s13256_s4 }
 0x354   : > { %v3916_v15 = vpop.permute.xlu1 %3915  ;;  %vm13335_vm11 = vmmov %vm13334_vm7 }
 0x355   : > { %v3914_v20 = vpop.permute.xlu0 %3913 }
 0x356   : > { %v3920_v14 = vsel %vm13332_vm10, %v3912_v49, %v3914_v20  ;;  %v3921_v34 = vsel %vm13333_vm9, %v3914_v20, %v3916_v15  ;;  %4783 = vrot.lane.b32.xlu1 %v11452_v11, %s13256_s4  ;;  %vm13336_vm10 = vmmov %vm13334_vm7 }
 0x357   : > { %3930 = vst [vmem:[#allocation2 + $0xb8] sm:$0xf] %v3920_v14  ;;  %3931 = vst [vmem:[#allocation2 + $0xc0] sm:$0xf] %v3921_v34  ;;  %4781 = vrot.lane.b32.xlu0 %v11441_v40, %s13256_s4 }
 0x358   : > { %v3970_v54 = vpop.permute.xlu1 %3969  ;;  %vm13337_vm9 = vmmov %vm13334_vm7 }
 0x359   : > { %v3968_v13 = vpop.permute.xlu0 %3967 }
 0x35a   : > { %v3979_v56 = vsel %vm13334_vm7, %v3968_v13, %v3970_v54  ;;  %4787 = vrot.lane.b32.xlu1 %v11465_v23, %s13256_s4 }
 0x35b   : > { %3989 = vst [vmem:[#allocation3] sm:$0xf] %v3979_v56  ;;  %4785 = vrot.lane.b32.xlu0 %v11457_v44, %s13256_s4  ;;  %s13416_s4 = smov 96  }
 0x35c   : > { %v3974_v26 = vpop.permute.xlu1 %3973 }
 0x35d   : > { %v3972_v61 = vpop.permute.xlu0 %3971 }
 0x35e   : > { %v3980_v39 = vsel %vm13335_vm11, %v3970_v54, %v3972_v61  ;;  %v3981_v37 = vsel %vm13336_vm10, %v3972_v61, %v3974_v26  ;;  %4815 = vrot.lane.b32.xlu1 %v11422_v35, %s13254_s5  ;;  %vm13338_vm11 = vcmask 908288  }
 0x35f   : > { %3990 = vst [vmem:[#allocation3 + $0x8] sm:$0xf] %v3980_v39  ;;  %3991 = vst [vmem:[#allocation3 + $0x10] sm:$0xf] %v3981_v37  ;;  %4813 = vrot.lane.b32.xlu0 %v11476_v57, %s13254_s5 }
 0x360   : > { %v3978_v4 = vpop.permute.xlu1 %3977  ;;  %vm13339_vm10 = vmmov %vm13338_vm11 }
 0x361   : > { %v3976_v47 = vpop.permute.xlu0 %3975 }
 0x362   : > { %v3982_v29 = vsel %vm13337_vm9, %v3974_v26, %v3976_v47  ;;  %v3983_v16 = vsel %vm13334_vm7, %v3976_v47, %v3978_v4  ;;  %4819 = vrot.lane.b32.xlu1 %v11441_v40, %s13254_s5  ;;  %vm13340_vm9 = vmmov %vm13339_vm10 }
 0x363   : > { %3992 = vst [vmem:[#allocation3 + $0x18] sm:$0xf] %v3982_v29  ;;  %3993 = vst [vmem:[#allocation3 + $0x20] sm:$0xf] %v3983_v16  ;;  %4817 = vrot.lane.b32.xlu0 %v11486_v32, %s13254_s5 }
 0x364   : > { %v4006_v62 = vpop.permute.xlu1 %4005  ;;  %vm13341_vm7 = vmmov %vm13340_vm9 }
 0x365   : > { %v4004_v12 = vpop.permute.xlu0 %4003 }
 0x366   : > { %v4015_v7 = vsel %vm13338_vm11, %v4004_v12, %v4006_v62  ;;  %4823 = vrot.lane.b32.xlu1 %v11457_v44, %s13254_s5  ;;  %vm13342_vm11 = vmmov %vm13341_vm7 }
 0x367   : > { %4025 = vst [vmem:[#allocation3] sm:$0xf0] %v4015_v7  ;;  %4821 = vrot.lane.b32.xlu0 %v11496_v30, %s13254_s5  ;;  %s13421_s5 = smov 95  }
 0x368   : > { %v4010_v63 = vpop.permute.xlu1 %4009 }
 0x369   : > { %v4008_v36 = vpop.permute.xlu0 %4007 }
 0x36a   : > { %v4016_v21 = vsel %vm13339_vm10, %v4006_v62, %v4008_v36  ;;  %v4017_v22 = vsel %vm13340_vm9, %v4008_v36, %v4010_v63  ;;  %4851 = vrot.lane.b32.xlu1 %v11432_v17, %s13252_s6  ;;  %vm13343_vm10 = vcmask 900096  }
 0x36b   : > { %4026 = vst [vmem:[#allocation3 + $0x8] sm:$0xf0] %v4016_v21  ;;  %4027 = vst [vmem:[#allocation3 + $0x10] sm:$0xf0] %v4017_v22  ;;  %4849 = vrot.lane.b32.xlu0 %v11422_v35, %s13252_s6 }
 0x36c   : > { %v4014_v27 = vpop.permute.xlu1 %4013  ;;  %vm13344_vm9 = vmmov %vm13343_vm10 }
 0x36d   : > { %v4012_v38 = vpop.permute.xlu0 %4011 }
 0x36e   : > { %v4018_v55 = vsel %vm13341_vm7, %v4010_v63, %v4012_v38  ;;  %v4019_v46 = vsel %vm13342_vm11, %v4012_v38, %v4014_v27  ;;  %4855 = vrot.lane.b32.xlu1 %v11452_v11, %s13252_s6  ;;  %vm13345_vm7 = vmmov %vm13344_vm9  ;;  %v4283_v47 = vld [vmem:[#allocation3] sm:$0xff] }
 0x36f   : > { %4028 = vst [vmem:[#allocation3 + $0x18] sm:$0xf0] %v4018_v55  ;;  %4029 = vst [vmem:[#allocation3 + $0x20] sm:$0xf0] %v4019_v46  ;;  %4853 = vrot.lane.b32.xlu0 %v11441_v40, %s13252_s6 }
 0x370   : > { %v4042_v51 = vpop.permute.xlu1 %4041  ;;  %vm13347_vm11 = vmmov %vm13345_vm7 }
 0x371   : > { %v4040_v53 = vpop.permute.xlu0 %4039 }
 0x372   : > { %v4051_v19 = vsel %vm13343_vm10, %v4040_v53, %v4042_v51  ;;  %4859 = vrot.lane.b32.xlu1 %v11465_v23, %s13252_s6  ;;  %vm13348_vm10 = vmmov %vm13345_vm7  ;;  %v4284_v39 = vld [vmem:[#allocation3 + $0x8] sm:$0xff] }
 0x373   : > { %4061 = vst [vmem:[#allocation3 + $0x28] sm:$0xf] %v4051_v19  ;;  %4857 = vrot.lane.b32.xlu0 %v11457_v44, %s13252_s6  ;;  %s13358_s6 = smov 74  }
 0x374   : > { %v4046_v50 = vpop.permute.xlu1 %4045 }
 0x375   : > { %v4044_v24 = vpop.permute.xlu0 %4043 }
 0x376   : > { %v4052_v1 = vsel %vm13344_vm9, %v4042_v51, %v4044_v24  ;;  %v4053_v3 = vsel %vm13345_vm7, %v4044_v24, %v4046_v50  ;;  %4887 = vrot.lane.b32.xlu1 %v11422_v35, %s13346_s7  ;;  %vm13349_vm9 = vcmask 752640  }
 0x377   : > { %4062 = vst [vmem:[#allocation3 + $0x30] sm:$0xf] %v4052_v1  ;;  %4063 = vst [vmem:[#allocation3 + $0x38] sm:$0xf] %v4053_v3  ;;  %4885 = vrot.lane.b32.xlu0 %v11476_v57, %s13346_s7 }
 0x378   : > { %v4050_v2 = vpop.permute.xlu1 %4049  ;;  %vm13350_vm7 = vmmov %vm13349_vm9 }
 0x379   : > { %v4048_v5 = vpop.permute.xlu0 %4047 }
 0x37a   : > { %v4054_v10 = vsel %vm13347_vm11, %v4046_v50, %v4048_v5  ;;  %v4055_v33 = vsel %vm13348_vm10, %v4048_v5, %v4050_v2  ;;  %4891 = vrot.lane.b32.xlu1 %v11441_v40, %s13346_s7  ;;  %vm13351_vm11 = vmmov %vm13350_vm7 }
 0x37b   : > { %4064 = vst [vmem:[#allocation3 + $0x40] sm:$0xf] %v4054_v10  ;;  %4065 = vst [vmem:[#allocation3 + $0x48] sm:$0xf] %v4055_v33  ;;  %4889 = vrot.lane.b32.xlu0 %v11486_v32, %s13346_s7 }
 0x37c   : > { %v4078_v8 = vpop.permute.xlu1 %4077  ;;  %vm13353_vm10 = vmmov %vm13350_vm7 }
 0x37d   : > { %v4076_v41 = vpop.permute.xlu0 %4075 }
 0x37e   : > { %v4087_v49 = vsel %vm13349_vm9, %v4076_v41, %v4078_v8  ;;  %4895 = vrot.lane.b32.xlu1 %v11457_v44, %s13346_s7  ;;  %vm13354_vm9 = vmmov %vm13350_vm7 }
 0x37f   : > { %4097 = vst [vmem:[#allocation3 + $0x28] sm:$0xf0] %v4087_v49  ;;  %4893 = vrot.lane.b32.xlu0 %v11496_v30, %s13346_s7 }
 0x380   : > { %v4082_v28 = vpop.permute.xlu1 %4081 }
 0x381   : > { %v4080_v9 = vpop.permute.xlu0 %4079 }
 0x382   : > { %v4088_v31 = vsel %vm13350_vm7, %v4078_v8, %v4080_v9  ;;  %v4089_v15 = vsel %vm13351_vm11, %v4080_v9, %v4082_v28  ;;  %4923 = vrot.lane.b32.xlu1 %v11432_v17, %s13352_s8  ;;  %vm13355_vm7 = vcmask 744448  }
 0x383   : > { %4098 = vst [vmem:[#allocation3 + $0x30] sm:$0xf0] %v4088_v31  ;;  %4099 = vst [vmem:[#allocation3 + $0x38] sm:$0xf0] %v4089_v15  ;;  %4921 = vrot.lane.b32.xlu0 %v11422_v35, %s13352_s8 }
 0x384   : > { %v4086_v20 = vpop.permute.xlu1 %4085  ;;  %vm13356_vm11 = vmmov %vm13355_vm7 }
 0x385   : > { %v4084_v14 = vpop.permute.xlu0 %4083 }
 0x386   : > { %v4090_v34 = vsel %vm13353_vm10, %v4082_v28, %v4084_v14  ;;  %v4091_v54 = vsel %vm13354_vm9, %v4084_v14, %v4086_v20  ;;  %4927 = vrot.lane.b32.xlu1 %v11452_v11, %s13352_s8  ;;  %v4288_v26 = vld [vmem:[#allocation3 + $0x28] sm:$0xff]  ;;  %vm13357_vm10 = vmmov %vm13355_vm7 }
 0x387   : > { %4100 = vst [vmem:[#allocation3 + $0x40] sm:$0xf0] %v4090_v34  ;;  %4101 = vst [vmem:[#allocation3 + $0x48] sm:$0xf0] %v4091_v54  ;;  %4925 = vrot.lane.b32.xlu0 %v11441_v40, %s13352_s8  ;;  %v9427_v16 = vpack.c.bf16 %v4288_v26, %v4283_v47 }
 0x388   : > { %v4114_v13 = vpop.permute.xlu1 %4113  ;;  %vm13359_vm9 = vmmov %vm13355_vm7 }
 0x389   : > { %v4112_v56 = vpop.permute.xlu0 %4111 }
 0x38a   : > { %v4123_v61 = vsel %vm13355_vm7, %v4112_v56, %v4114_v13  ;;  %4931 = vrot.lane.b32.xlu1 %v11465_v23, %s13352_s8  ;;  %v4289_v37 = vld [vmem:[#allocation3 + $0x30] sm:$0xff] }
 0x38b   : > { %4133 = vst [vmem:[#allocation3 + $0x50] sm:$0xf] %v4123_v61  ;;  %4929 = vrot.lane.b32.xlu0 %v11457_v44, %s13352_s8  ;;  %v9425_v4 = vpack.c.bf16 %v4289_v37, %v4284_v39 }
 0x38c   : > { %v4118_v29 = vpop.permute.xlu1 %4117 }
 0x38d   : > { %v4116_v62 = vpop.permute.xlu0 %4115  ;;  %9426 = vmatprep.subr.bf16.mxu0 %v9425_v4 }
 0x38e   : > { %v4124_v12 = vsel %vm13356_vm11, %v4114_v13, %v4116_v62  ;;  %v4125_v7 = vsel %vm13357_vm10, %v4116_v62, %v4118_v29  ;;  %9428 = vmatpush1.bf16.msra.mxu0 %v9427_v16  ;;  %4959 = vrot.lane.b32.xlu1 %v11422_v35, %s13358_s6  ;;  %vm13360_vm11 = vcmask 736256  }
 0x38f   : > { %4134 = vst [vmem:[#allocation3 + $0x58] sm:$0xf] %v4124_v12  ;;  %4135 = vst [vmem:[#allocation3 + $0x60] sm:$0xf] %v4125_v7  ;;  %4957 = vrot.lane.b32.xlu0 %v11476_v57, %s13358_s6 }
 0x390   : > { %v4122_v63 = vpop.permute.xlu1 %4121  ;;  %vm13361_vm10 = vmmov %vm13360_vm11 }
 0x391   : > { %v4120_v36 = vpop.permute.xlu0 %4119 }
 0x392   : > { %v4126_v21 = vsel %vm13359_vm9, %v4118_v29, %v4120_v36  ;;  %v4127_v22 = vsel %vm13355_vm7, %v4120_v36, %v4122_v63  ;;  %4963 = vrot.lane.b32.xlu1 %v11441_v40, %s13358_s6  ;;  %vm13362_vm9 = vmmov %vm13361_vm10  ;;  %v11640_v63 = vld [vmem:[%s9885_s14 + $0x4c] sm:$0xff] }
 0x393   : > { %4136 = vst [vmem:[#allocation3 + $0x68] sm:$0xf] %v4126_v21  ;;  %4137 = vst [vmem:[#allocation3 + $0x70] sm:$0xf] %v4127_v22  ;;  %4961 = vrot.lane.b32.xlu0 %v11486_v32, %s13358_s6 }
 0x394   : > { %v4150_v27 = vpop.permute.xlu1 %4149  ;;  %vm13363_vm7 = vmmov %vm13362_vm9 }
 0x395   : > { %v4148_v38 = vpop.permute.xlu0 %4147 }
 0x396   : > { %v4159_v55 = vsel %vm13360_vm11, %v4148_v38, %v4150_v27  ;;  %4967 = vrot.lane.b32.xlu1 %v11457_v44, %s13358_s6  ;;  %vm13364_vm11 = vmmov %vm13363_vm7 }
 0x397   : > { %4169 = vst [vmem:[#allocation3 + $0x50] sm:$0xf0] %v4159_v55  ;;  %4965 = vrot.lane.b32.xlu0 %v11496_v30, %s13358_s6  ;;  %v4291_v55 = vld [vmem:[#allocation3 + $0x40] sm:$0xff] }
 0x398   : > { %v4154_v46 = vpop.permute.xlu1 %4153 }
 0x399   : > { %v4152_v51 = vpop.permute.xlu0 %4151 }
 0x39a   : > { %v4160_v53 = vsel %vm13361_vm10, %v4150_v27, %v4152_v51  ;;  %v4161_v19 = vsel %vm13362_vm9, %v4152_v51, %v4154_v46  ;;  %4995 = vrot.lane.b32.xlu1 %v11432_v17, %s13277_s12  ;;  %vm13365_vm10 = vcmask 588800   ;;  %v11650_v27 = vcombine.low %v11640_v63, %v11640_v63  ;;  %v11655_v51 = vld [vmem:[%s13221_s1 + $0x8] sm:$0xff] }
 0x39b   : > { %4170 = vst [vmem:[#allocation3 + $0x58] sm:$0xf0] %v4160_v53  ;;  %4171 = vst [vmem:[#allocation3 + $0x60] sm:$0xf0] %v4161_v19  ;;  %4993 = vrot.lane.b32.xlu0 %v11422_v35, %s13277_s12  ;;  %v4290_v53 = vld [vmem:[#allocation3 + $0x38] sm:$0xff] }
 0x39c   : > { %v4158_v50 = vpop.permute.xlu1 %4157  ;;  %vm13366_vm9 = vmmov %vm13365_vm10 }
 0x39d   : > { %v4156_v0 = vpop.permute.xlu0 %4155 }
 0x39e   : > { %v4162_v24 = vsel %vm13363_vm7, %v4154_v46, %v4156_v0  ;;  %v4163_v1 = vsel %vm13364_vm11, %v4156_v0, %v4158_v50  ;;  %4999 = vrot.lane.b32.xlu1 %v11452_v11, %s13277_s12  ;;  %vm13367_vm7 = vmmov %vm13366_vm9  ;;  %v4293_v47 = vld [vmem:[#allocation3 + $0x50] sm:$0xff]  ;;  %v4286_v0 = vld [vmem:[#allocation3 + $0x18] sm:$0xff] }
 0x39f   : > { %4172 = vst [vmem:[#allocation3 + $0x68] sm:$0xf0] %v4162_v24  ;;  %4173 = vst [vmem:[#allocation3 + $0x70] sm:$0xf0] %v4163_v1  ;;  %4997 = vrot.lane.b32.xlu0 %v11441_v40, %s13277_s12 }
 0x3a0   : > { %v4186_v3 = vpop.permute.xlu1 %4185  ;;  %vm13368_vm11 = vmmov %vm13367_vm7 }
 0x3a1   : > { %v4184_v2 = vpop.permute.xlu0 %4183 }
 0x3a2   : > { %v4195_v5 = vsel %vm13365_vm10, %v4184_v2, %v4186_v3  ;;  %5003 = vrot.lane.b32.xlu1 %v11465_v23, %s13277_s12  ;;  %vm13369_vm10 = vmmov %vm13367_vm7  ;;  %v4285_v2 = vld [vmem:[#allocation3 + $0x10] sm:$0xff] }
 0x3a3   : > { %4205 = vst [vmem:[#allocation3 + $0x78] sm:$0xf] %v4195_v5  ;;  %5001 = vrot.lane.b32.xlu0 %v11457_v44, %s13277_s12 }
 0x3a4   : > { %v4190_v10 = vpop.permute.xlu1 %4189 }
 0x3a5   : > { %v4188_v33 = vpop.permute.xlu0 %4187 }
 0x3a6   : > { %v4196_v8 = vsel %vm13366_vm9, %v4186_v3, %v4188_v33  ;;  %v4197_v41 = vsel %vm13367_vm7, %v4188_v33, %v4190_v10  ;;  %5031 = vrot.lane.b32.xlu1 %v11422_v35, %s13282_s13  ;;  %vm13370_vm9 = vcmask 580608   ;;  %v9433_v3 = vpack.c.bf16 %v4291_v55, %v4286_v0  ;;  %v4296_v33 = vld [vmem:[#allocation3 + $0x68] sm:$0xff] }
 0x3a7   : > { %4206 = vst [vmem:[#allocation3 + $0x80] sm:$0xf] %v4196_v8  ;;  %4207 = vst [vmem:[#allocation3 + $0x88] sm:$0xf] %v4197_v41  ;;  %5029 = vrot.lane.b32.xlu0 %v11476_v57, %s13282_s13 }
 0x3a8   : > { %v4194_v49 = vpop.permute.xlu1 %4193  ;;  %vm13371_vm7 = vmmov %vm13370_vm9 }
 0x3a9   : > { %v4192_v28 = vpop.permute.xlu0 %4191 }
 0x3aa   : > { %v4198_v9 = vsel %vm13368_vm11, %v4190_v10, %v4192_v28  ;;  %v4199_v31 = vsel %vm13369_vm10, %v4192_v28, %v4194_v49  ;;  %5035 = vrot.lane.b32.xlu1 %v11441_v40, %s13282_s13  ;;  %vm13372_vm11 = vmmov %vm13371_vm7  ;;  %v9435_v10 = vpack.c.bf16 %v4290_v53, %v4285_v2 }
 0x3ab   : > { %4208 = vst [vmem:[#allocation3 + $0x90] sm:$0xf] %v4198_v9  ;;  %4209 = vst [vmem:[#allocation3 + $0x98] sm:$0xf] %v4199_v31  ;;  %5033 = vrot.lane.b32.xlu0 %v11486_v32, %s13282_s13  ;;  %v4295_v31 = vld [vmem:[#allocation3 + $0x60] sm:$0xff] }
 0x3ac   : > { %v4222_v15 = vpop.permute.xlu1 %4221  ;;  %vm13373_vm10 = vmmov %vm13371_vm7 }
 0x3ad   : > { %v4220_v20 = vpop.permute.xlu0 %4219 }
 0x3ae   : > { %v4231_v14 = vsel %vm13370_vm9, %v4220_v20, %v4222_v15  ;;  %5039 = vrot.lane.b32.xlu1 %v11457_v44, %s13282_s13  ;;  %vm13374_vm9 = vmmov %vm13371_vm7 }
 0x3af   : > { %4241 = vst [vmem:[#allocation3 + $0x78] sm:$0xf0] %v4231_v14  ;;  %5037 = vrot.lane.b32.xlu0 %v11496_v30, %s13282_s13 }
 0x3b0   : > { %v4226_v57 = vpop.permute.xlu1 %4225 }
 0x3b1   : > { %v4224_v34 = vpop.permute.xlu0 %4223 }
 0x3b2   : > { %v4232_v54 = vsel %vm13371_vm7, %v4222_v15, %v4224_v34  ;;  %v4233_v13 = vsel %vm13372_vm11, %v4224_v34, %v4226_v57  ;;  %5067 = vrot.lane.b32.xlu1 %v11432_v17, %s13288_s11  ;;  %vm13375_vm7 = vcmask 572416  }
 0x3b3   : > { %4242 = vst [vmem:[#allocation3 + $0x80] sm:$0xf0] %v4232_v54  ;;  %4243 = vst [vmem:[#allocation3 + $0x88] sm:$0xf0] %v4233_v13  ;;  %5065 = vrot.lane.b32.xlu0 %v11422_v35, %s13288_s11  ;;  %v4294_v35 = vld [vmem:[#allocation3 + $0x58] sm:$0xff]  ;;  %v11679_v13 = vcombine.high %v11640_v63, %v11640_v63 }
 0x3b4   : > { %v4230_v32 = vpop.permute.xlu1 %4229  ;;  %vm13376_vm11 = vmmov %vm13375_vm7 }
 0x3b5   : > { %v4228_v56 = vpop.permute.xlu0 %4227 }
 0x3b6   : > { %v4234_v26 = vsel %vm13373_vm10, %v4226_v57, %v4228_v56  ;;  %v4235_v30 = vsel %vm13374_vm9, %v4228_v56, %v4230_v32  ;;  %5071 = vrot.lane.b32.xlu1 %v11452_v11, %s13288_s11  ;;  %v4298_v39 = vld [vmem:[#allocation3 + $0x78] sm:$0xff]  ;;  %vm13377_vm10 = vmmov %vm13375_vm7  ;;  %v4292_v56 = vld [vmem:[#allocation3 + $0x48] sm:$0xff] }
 0x3b7   : > { %4244 = vst [vmem:[#allocation3 + $0x90] sm:$0xf0] %v4234_v26  ;;  %4245 = vst [vmem:[#allocation3 + $0x98] sm:$0xf0] %v4235_v30  ;;  %5069 = vrot.lane.b32.xlu0 %v11441_v40, %s13288_s11  ;;  %v11627_v40 = vcombine.low %v11383_v42, %v11383_v42  ;;  %v9431_v16 = vpack.c.bf16 %v4298_v39, %v4293_v47 }
 0x3b8   : > { %v4258_v17 = vpop.permute.xlu1 %4257  ;;  %vm13378_vm9 = vmmov %vm13375_vm7 }
 0x3b9   : > { %v4256_v61 = vpop.permute.xlu0 %4255 }
 0x3ba   : > { %v4267_v37 = vsel %vm13375_vm7, %v4256_v61, %v4258_v17  ;;  %5075 = vrot.lane.b32.xlu1 %v11465_v23, %s13288_s11  ;;  %v4299_v4 = vld [vmem:[#allocation3 + $0x80] sm:$0xff]  ;;  %v4300_v49 = vld [vmem:[#allocation3 + $0x88] sm:$0xff] }
 0x3bb   : > { %4277 = vst [vmem:[#allocation3 + $0xa0] sm:$0xf] %v4267_v37  ;;  %5073 = vrot.lane.b32.xlu0 %v11457_v44, %s13288_s11  ;;  %v9429_v11 = vpack.c.bf16 %v4299_v4, %v4294_v35  ;;  %v11637_v44 = vcombine.low %v11395_v18, %v11395_v18  ;;  %v9439_v20 = vpack.c.bf16 %v4300_v49, %v4295_v31  ;;  %v4287_v61 = vld [vmem:[#allocation3 + $0x20] sm:$0xff]  ;;  %v3940_v49 = vld [vmem:[#allocation2 + $0x38] sm:$0xff]  ;;  %v3953_v31 = vld [vmem:[#allocation2 + $0xa0] sm:$0xf] }
 0x3bc   : > { %v4262_v29 = vpop.permute.xlu1 %4261  ;;  %v9442_v39 = vpack.c.bf16 %v4292_v56, %v4287_v61  ;;  %v3950_v56 = vld [vmem:[#allocation2 + $0x88] sm:$0xff] }
 0x3bd   : > { %v4260_v62 = vpop.permute.xlu0 %4259  ;;  %9430 = vmatprep.subr.bf16.mxu0 %v9429_v11 }
 0x3be   : > { %v4268_v12 = vsel %vm13376_vm11, %v4258_v17, %v4260_v62  ;;  %v4269_v23 = vsel %vm13377_vm10, %v4260_v62, %v4262_v29  ;;  %9432 = vmatpush1.bf16.msra.mxu0 %v9431_v16  ;;  %5383 = vrot.lane.b32.xlu1 %v11383_v42, %s9827_s15  ;;  %vm13379_vm11 = vcmask 785408   ;;  %v4301_v24 = vld [vmem:[#allocation3 + $0x90] sm:$0xff]  ;;  %v4302_v35 = vld [vmem:[#allocation3 + $0x98] sm:$0xff] }
 0x3bf   : > { %4278 = vst [vmem:[#allocation3 + $0xa8] sm:$0xf] %v4268_v12  ;;  %4279 = vst [vmem:[#allocation3 + $0xb0] sm:$0xf] %v4269_v23  ;;  %5381 = vrot.lane.b32.xlu0 %v11627_v40, %s9827_s15  ;;  %v9437_v41 = vpack.c.bf16 %v4301_v24, %v4296_v33  ;;  %v3939_v23 = vld [vmem:[#allocation2 + $0x30] sm:$0xff]  ;;  %v3941_v33 = vld [vmem:[#allocation2 + $0x40] sm:$0xff] }
 0x3c0   : > { %v4266_v7 = vpop.permute.xlu1 %4265  ;;  %vm13380_vm10 = vmmov %vm13379_vm11 }
 0x3c1   : > { %v4264_v36 = vpop.permute.xlu0 %4263 }
 0x3c2   : > { %v4270_v21 = vsel %vm13378_vm9, %v4262_v29, %v4264_v36  ;;  %v4271_v22 = vsel %vm13375_vm7, %v4264_v36, %v4266_v7  ;;  %5387 = vrot.lane.b32.xlu1 %v11395_v18, %s9827_s15  ;;  %v4303_v1 = vld [vmem:[#allocation3 + $0xa0] sm:$0xf]  ;;  %vm13381_vm9 = vmmov %vm13380_vm10  ;;  %v4297_v29 = vld [vmem:[#allocation3 + $0x70] sm:$0xff] }
 0x3c3   : > { %4280 = vst [vmem:[#allocation3 + $0xb8] sm:$0xf] %v4270_v21  ;;  %4281 = vst [vmem:[#allocation3 + $0xc0] sm:$0xf] %v4271_v22  ;;  %5385 = vrot.lane.b32.xlu0 %v11637_v44, %s9827_s15  ;;  %v9445_v16 = vpack.c.bf16 %v4302_v35, %v4297_v29  ;;  %v3938_v21 = vld [vmem:[#allocation2 + $0x28] sm:$0xff]  ;;  %v3949_v22 = vld [vmem:[#allocation2 + $0x80] sm:$0xff] }
 0x3c4   : > { %v4780_v38 = vpop.permute.xlu1 %4779  ;;  %vm13382_vm7 = vmmov %vm13381_vm9  ;;  %v3956_v35 = vld [vmem:[#allocation2 + $0xb8] sm:$0xf] }
 0x3c5   : > { %v4778_v46 = vpop.permute.xlu0 %4777 }
 0x3c6   : > { %v4789_v19 = vsel %vm13379_vm11, %v4778_v46, %v4780_v38  ;;  %5391 = vrot.lane.b32.xlu1 %v11640_v63, %s9827_s15  ;;  %v4304_v50 = vld [vmem:[#allocation3 + $0xa8] sm:$0xf]  ;;  %vm13383_vm11 = vmmov %vm13382_vm7  ;;  %v4305_v30 = vld [vmem:[#allocation3 + $0xb0] sm:$0xf]  ;;  %v9447_v46 = vpack.c.bf16 %v3939_v23, %v11424_v25 }
 0x3c7   : > { %4799 = vst [vmem:[#allocation4] sm:$0xf] %v4789_v19  ;;  %5389 = vrot.lane.b32.xlu0 %v11650_v27, %s9827_s15  ;;  %8929 = vmatprep.subr.msk.mxu0 %vm844_vm13, %v4304_v50  ;;  %v9449_v19 = vpack.c.bf16 %v3938_v21, %v11385_v43  ;;  %v3944_v50 = vld [vmem:[#allocation2 + $0x58] sm:$0xff]  ;;  %v3943_v43 = vld [vmem:[#allocation2 + $0x50] sm:$0xff] }
 0x3c8   : > { %8930 = vmatpush1.msk.msra.mxu0 %vm844_vm13, %v4303_v1  ;;  %v4784_v5 = vpop.permute.xlu1 %4783  ;;  %v9451_v24 = vpack.c.bf16 %v3949_v22, %v3944_v50  ;;  %v3948_v1 = vld [vmem:[#allocation2 + $0x78] sm:$0xff] }
 0x3c9   : > { %v4782_v8 = vpop.permute.xlu0 %4781  ;;  %9434 = vmatprep.subr.bf16.mxu0 %v9433_v3  ;;  %8931 = vmatmul.mubr.msk.f32.vlgmr.msra.gmra.mrb[4].mxu0 %vm840_vm15, %v11655_v51  ;;  %v9453_v2 = vpack.c.bf16 %v3948_v1, %v3943_v43  ;;  %v3952_v23 = vld [vmem:[#allocation2 + $0x98] sm:$0xff] }
 0x3ca   : > { %v4790_v28 = vsel %vm13380_vm10, %v4780_v38, %v4782_v8  ;;  %v4791_v9 = vsel %vm13381_vm9, %v4782_v8, %v4784_v5  ;;  %9436 = vmatpush1.bf16.msra.mxu0 %v9435_v10  ;;  %5419 = vrot.lane.b32.xlu1 %v11417_v6, %s9828_s16  ;;  %v4306_v54 = vld [vmem:[#allocation3 + $0xb8] sm:$0xf]  ;;  %vm13384_vm10 = vcmask 777216   ;;  %v4307_v38 = vld [vmem:[#allocation3 + $0xc0] sm:$0xf] }
 0x3cb   : > { %4800 = vst [vmem:[#allocation4 + $0x8] sm:$0xf] %v4790_v28  ;;  %4801 = vst [vmem:[#allocation4 + $0x10] sm:$0xf] %v4791_v9  ;;  %5417 = vrot.lane.b32.xlu0 %v11383_v42, %s9828_s16  ;;  %9438 = vmatprep.subr.bf16.mxu0 %v9437_v41  ;;  %v3954_v10 = vld [vmem:[#allocation2 + $0xa8] sm:$0xf] }
 0x3cc   : > { %v4788_v15 = vpop.permute.xlu1 %4787  ;;  %4461 = vmatprep.mubr.f32.mxu0 %v9845_v48  ;;  %vm13385_vm9 = vmmov %vm13384_vm10 }
 0x3cd   : > { %v4786_v14 = vpop.permute.xlu0 %4785 }
 0x3ce   : > { %v4792_v57 = vsel %vm13382_vm7, %v4784_v5, %v4786_v14  ;;  %v4793_v34 = vsel %vm13383_vm11, %v4786_v14, %v4788_v15  ;;  %9440 = vmatpush1.bf16.msra.mxu0 %v9439_v20  ;;  %5423 = vrot.lane.b32.xlu1 %v11436_v58, %s9828_s16  ;;  %vm13386_vm7 = vmmov %vm13385_vm9  ;;  %v9455_v15 = vpack.c.bf16 %v3941_v33, %v11443_v52  ;;  %v11733_v20 = vld [vmem:[%s13221_s1] sm:$0xff]  ;;  %v3951_v14 = vld [vmem:[#allocation2 + $0x90] sm:$0xff] }
 0x3cf   : > { %4802 = vst [vmem:[#allocation4 + $0x18] sm:$0xf] %v4792_v57  ;;  %4803 = vst [vmem:[#allocation4 + $0x20] sm:$0xf] %v4793_v34  ;;  %5421 = vrot.lane.b32.xlu0 %v11395_v18, %s9828_s16  ;;  %8932 = vmatprep.subr.msk.mxu0 %vm844_vm13, %v4306_v54  ;;  %v9457_v57 = vpack.c.bf16 %v3940_v49, %v11397_v59  ;;  %v3946_v34 = vld [vmem:[#allocation2 + $0x68] sm:$0xff] }
 0x3d0   : > { %v4816_v32 = vpop.permute.xlu1 %4815  ;;  %vm13387_vm11 = vmmov %vm13386_vm7 }
 0x3d1   : > { %v4814_v26 = vpop.permute.xlu0 %4813 }
 0x3d2   : > { %v4825_v17 = vsel %vm13384_vm10, %v4814_v26, %v4816_v32  ;;  %8933 = vmatpush1.msk.msra.mxu0 %vm844_vm13, %v4305_v30  ;;  %5427 = vrot.lane.b32.xlu1 %v11679_v13, %s9828_s16  ;;  %vm13388_vm10 = vmmov %vm13386_vm7  ;;  %v3945_v30 = vld [vmem:[#allocation2 + $0x60] sm:$0xff] }
 0x3d3   : > { %4835 = vst [vmem:[#allocation4] sm:$0xf0] %v4825_v17  ;;  %5425 = vrot.lane.b32.xlu0 %v11640_v63, %s9828_s16  ;;  %9441 = vmatprep.subr.bf16.mxu0 %v9839_v45  ;;  %v9461_v59 = vpack.c.bf16 %v3950_v56, %v3945_v30 }
 0x3d4   : > { %8934 = vmatmul.mubr.msk.f32.vlgmr.msra.gmra.mrb[6].mxu0 %vm840_vm15, %v11655_v51  ;;  %v4820_v37 = vpop.permute.xlu1 %4819 }
 0x3d5   : > { %9443 = vmatpush3.bf16.msra.mxu0 %v9442_v39  ;;  %v4818_v4 = vpop.permute.xlu0 %4817  ;;  %9186 = vmatprep.mubr.msk.f32.mxu0 %vm9846_vm8, %v9845_v48 }
 0x3d6   : > { %v4826_v11 = vsel %vm13385_vm9, %v4816_v32, %v4818_v4  ;;  %v4827_v47 = vsel %vm13386_vm7, %v4818_v4, %v4820_v37  ;;  %5455 = vrot.lane.b32.xlu1 %v11383_v42, %s9829_s17  ;;  %9444 = vmatprep.subr.bf16.mxu0 %v9839_v45  ;;  %vm13389_vm9 = vcmask 769024   ;;  %v9459_v32 = vpack.c.bf16 %v3951_v14, %v3946_v34  ;;  %v3942_v4 = vld [vmem:[#allocation2 + $0x48] sm:$0xff] }
 0x3d7   : > { %4836 = vst [vmem:[#allocation4 + $0x8] sm:$0xf0] %v4826_v11  ;;  %4837 = vst [vmem:[#allocation4 + $0x10] sm:$0xf0] %v4827_v47  ;;  %5453 = vrot.lane.b32.xlu0 %v11627_v40, %s9829_s17  ;;  %v3955_v47 = vld [vmem:[#allocation2 + $0xb0] sm:$0xf] }
 0x3d8   : > { %v4824_v62 = vpop.permute.xlu1 %4823  ;;  %vm13390_vm7 = vmmov %vm13389_vm9 }
 0x3d9   : > { %9446 = vmatpush3.bf16.msra.mxu0 %v9445_v16  ;;  %v4822_v12 = vpop.permute.xlu0 %4821 }
 0x3da   : > { %v4828_v7 = vsel %vm13387_vm11, %v4820_v37, %v4822_v12  ;;  %v4829_v36 = vsel %vm13388_vm10, %v4822_v12, %v4824_v62  ;;  %5459 = vrot.lane.b32.xlu1 %v11395_v18, %s9829_s17  ;;  %9184 = vmatprep.subr.mxu0 %v9845_v48  ;;  %vm13391_vm11 = vmmov %vm13390_vm7  ;;  %v9464_v12 = vpack.c.bf16 %v3942_v4, %v11520_v60  ;;  %v3947_v60 = vld [vmem:[#allocation2 + $0x70] sm:$0xff] }
 0x3db   : > { %4838 = vst [vmem:[#allocation4 + $0x18] sm:$0xf0] %v4828_v7  ;;  %4839 = vst [vmem:[#allocation4 + $0x20] sm:$0xf0] %v4829_v36  ;;  %5457 = vrot.lane.b32.xlu0 %v11637_v44, %s9829_s17  ;;  %v9467_v22 = vpack.c.bf16 %v3952_v23, %v3947_v60 }
 0x3dc   : > { %v4852_v55 = vpop.permute.xlu1 %4851  ;;  %vm13392_vm10 = vmmov %vm13390_vm7 }
 0x3dd   : > { %9185 = vmatpush3.msk.msra.mxu0 %vm844_vm13, %v4307_v38  ;;  %v4850_v53 = vpop.permute.xlu0 %4849 }
 0x3de   : > { %v4861_v0 = vsel %vm13389_vm9, %v4850_v53, %v4852_v55  ;;  %9448 = vmatprep.subr.bf16.mxu0 %v9447_v46  ;;  %9187 = vmatmul.mubr.msk.f32.vlgmr.msra.gmra.mrb[8].mxu0 %vm840_vm15, %v11655_v51  ;;  %vm13393_vm9 = vmmov %vm13390_vm7  ;;  %v5094_v50 = vld [vmem:[#allocation4 + $0x8] sm:$0xff] }
 0x3df   : > { %4871 = vst [vmem:[#allocation4 + $0x28] sm:$0xf] %v4861_v0  ;;  %9450 = vmatpush1.bf16.msra.mxu0 %v9449_v19  ;;  %5463 = vrot.lane.b32.xlu1 %v11640_v63, %s9829_s17 }
 0x3e0   : > { %5461 = vrot.lane.b32.xlu0 %v11650_v27, %s9829_s17  ;;  %9452 = vmatprep.subr.bf16.mxu0 %v9451_v24  ;;  %v4856_v25 = vpop.permute.xlu1 %4855  ;;  %v3957_v24 = vld [vmem:[#allocation2 + $0xc0] sm:$0xf] }
 0x3e1   : > { %v4854_v3 = vpop.permute.xlu0 %4853  ;;  %4620 = vmatprep.mubr.f32.mxu0 %v9845_v48 }
 0x3e2   : > { %v4862_v5 = vsel %vm13390_vm7, %v4852_v55, %v4854_v3  ;;  %v4863_v51 = vsel %vm13391_vm11, %v4854_v3, %v4856_v25  ;;  %vm13394_vm7 = vcmask 621568  }
 0x3e3   : > { %4872 = vst [vmem:[#allocation4 + $0x30] sm:$0xf] %v4862_v5  ;;  %4873 = vst [vmem:[#allocation4 + $0x38] sm:$0xf] %v4863_v51  ;;  %9454 = vmatpush1.bf16.msra.mxu0 %v9453_v2  ;;  %5491 = vrot.lane.b32.xlu1 %v11417_v6, %s9830_s18 }
 0x3e4   : > { %5489 = vrot.lane.b32.xlu0 %v11383_v42, %s9830_s18  ;;  %8937 = vmatprep.subr.msk.mxu0 %vm844_vm13, %v3954_v10  ;;  %v4860_v8 = vpop.permute.xlu1 %4859  ;;  %vm13395_vm11 = vmmov %vm13394_vm7 }
 0x3e5   : > { %v4858_v41 = vpop.permute.xlu0 %4857 }
 0x3e6   : > { %v4864_v28 = vsel %vm13392_vm10, %v4856_v25, %v4858_v41  ;;  %v4865_v9 = vsel %vm13393_vm9, %v4858_v41, %v4860_v8  ;;  %vm13396_vm10 = vmmov %vm13394_vm7  ;;  %v5093_v25 = vld [vmem:[#allocation4] sm:$0xff] }
 0x3e7   : > { %4874 = vst [vmem:[#allocation4 + $0x40] sm:$0xf] %v4864_v28  ;;  %4875 = vst [vmem:[#allocation4 + $0x48] sm:$0xf] %v4865_v9  ;;  %8938 = vmatpush1.msk.msra.mxu0 %vm844_vm13, %v3953_v31  ;;  %5495 = vrot.lane.b32.xlu1 %v11436_v58, %s9830_s18 }
 0x3e8   : > { %5493 = vrot.lane.b32.xlu0 %v11395_v18, %s9830_s18  ;;  %9456 = vmatprep.subr.bf16.mxu0 %v9455_v15  ;;  %v4888_v52 = vpop.permute.xlu1 %4887  ;;  %vm13397_vm9 = vmmov %vm13394_vm7 }
 0x3e9   : > { %8939 = vmatmul.mubr.msk.f32.vlgmr.msra.gmra.mrb[4].mxu0 %vm840_vm15, %v11733_v20  ;;  %v4886_v54 = vpop.permute.xlu0 %4885 }
 0x3ea   : > { %9458 = vmatpush1.bf16.msra.mxu0 %v9457_v57  ;;  %v4897_v26 = vsel %vm13394_vm7, %v4886_v54, %v4888_v52  ;;  %4691 = vmatprep.mubr.f32.mxu0 %v9845_v48 }
 0x3eb   : > { %4907 = vst [vmem:[#allocation4 + $0x28] sm:$0xf0] %v4897_v26  ;;  %9460 = vmatprep.subr.bf16.mxu0 %v9459_v32  ;;  %5499 = vrot.lane.b32.xlu1 %v11679_v13, %s9830_s18 }
 0x3ec   : > { %5497 = vrot.lane.b32.xlu0 %v11640_v63, %s9830_s18  ;;  %v4892_v17 = vpop.permute.xlu1 %4891 }
 0x3ed   : > { %v4890_v61 = vpop.permute.xlu0 %4889 }
 0x3ee   : > { %9462 = vmatpush1.bf16.msra.mxu0 %v9461_v59  ;;  %v4898_v39 = vsel %vm13395_vm11, %v4888_v52, %v4890_v61  ;;  %v4899_v37 = vsel %vm13396_vm10, %v4890_v61, %v4892_v17  ;;  %vm13398_vm11 = vcmask 613376  }
 0x3ef   : > { %4908 = vst [vmem:[#allocation4 + $0x30] sm:$0xf0] %v4898_v39  ;;  %4909 = vst [vmem:[#allocation4 + $0x38] sm:$0xf0] %v4899_v37  ;;  %8940 = vmatprep.subr.msk.mxu0 %vm844_vm13, %v3956_v35  ;;  %5527 = vrot.lane.b32.xlu1 %v11383_v42, %s9831_s19 }
 0x3f0   : > { %5525 = vrot.lane.b32.xlu0 %v11627_v40, %s9831_s19  ;;  %v4896_v11 = vpop.permute.xlu1 %4895  ;;  %vm13399_vm10 = vmmov %vm13398_vm11 }
 0x3f1   : > { %v4894_v29 = vpop.permute.xlu0 %4893 }
 0x3f2   : > { %8941 = vmatpush1.msk.msra.mxu0 %vm844_vm13, %v3955_v47  ;;  %v4900_v16 = vsel %vm13397_vm9, %v4892_v17, %v4894_v29  ;;  %v4901_v62 = vsel %vm13394_vm7, %v4894_v29, %v4896_v11  ;;  %vm13400_vm9 = vmmov %vm13399_vm10  ;;  %v5098_v0 = vld [vmem:[#allocation4 + $0x28] sm:$0xff]  ;;  %v11827_v17 = vld [vmem:[%s9885_s14 + $0x48] sm:$0xff] }
 0x3f3   : > { %4910 = vst [vmem:[#allocation4 + $0x40] sm:$0xf0] %v4900_v16  ;;  %4911 = vst [vmem:[#allocation4 + $0x48] sm:$0xf0] %v4901_v62  ;;  %9463 = vmatprep.subr.bf16.mxu0 %v9839_v45  ;;  %8942 = vmatmul.mubr.msk.f32.vlgmr.msra.gmra.mrb[6].mxu0 %vm840_vm15, %v11733_v20  ;;  %v9471_v3 = vpack.c.bf16 %v5098_v0, %v5093_v25  ;;  %v11834_v39 = vcombine.high %v11827_v17, %v11827_v17  ;;  %v11852_v11 = vld [vmem:[%s9885_s14 + $0x58] sm:$0xff] }
 0x3f4   : > { %9465 = vmatpush3.bf16.msra.mxu0 %v9464_v12  ;;  %5531 = vrot.lane.b32.xlu1 %v11395_v18, %s9831_s19  ;;  %v4924_v7 = vpop.permute.xlu1 %4923  ;;  %vm13401_vm7 = vmmov %vm13400_vm9  ;;  %v11860_v62 = vcombine.high %v11852_v11, %v11852_v11 }
 0x3f5   : > { %5529 = vrot.lane.b32.xlu0 %v11637_v44, %s9831_s19  ;;  %v4922_v36 = vpop.permute.xlu0 %4921  ;;  %9466 = vmatprep.subr.bf16.mxu0 %v9839_v45 }
 0x3f6   : > { %v4933_v21 = vsel %vm13398_vm11, %v4922_v36, %v4924_v7  ;;  %9199 = vmatprep.mubr.msk.f32.mxu0 %vm9846_vm8, %v9845_v48  ;;  %v5099_v55 = vld [vmem:[#allocation4 + $0x30] sm:$0xff]  ;;  %vm13402_vm11 = vmmov %vm13401_vm7 }
 0x3f7   : > { %4943 = vst [vmem:[#allocation4 + $0x50] sm:$0xf] %v4933_v21  ;;  %v9469_v1 = vpack.c.bf16 %v5099_v55, %v5094_v50 }
 0x3f8   : > { %9468 = vmatpush3.bf16.msra.mxu0 %v9467_v22  ;;  %5535 = vrot.lane.b32.xlu1 %v11640_v63, %s9831_s19  ;;  %v4928_v38 = vpop.permute.xlu1 %4927 }
 0x3f9   : > { %5533 = vrot.lane.b32.xlu0 %v11650_v27, %s9831_s19  ;;  %v4926_v46 = vpop.permute.xlu0 %4925  ;;  %9197 = vmatprep.subr.mxu0 %v9845_v48 }
 0x3fa   : > { %v4934_v53 = vsel %vm13399_vm10, %v4924_v7, %v4926_v46  ;;  %v4935_v19 = vsel %vm13400_vm9, %v4926_v46, %v4928_v38  ;;  %vm13403_vm10 = vcmask 605184  }
 0x3fb   : > { %4944 = vst [vmem:[#allocation4 + $0x58] sm:$0xf] %v4934_v53  ;;  %4945 = vst [vmem:[#allocation4 + $0x60] sm:$0xf] %v4935_v19  ;;  %v11871_v53 = vcombine.low %v11827_v17, %v11827_v17 }
 0x3fc   : > { %9198 = vmatpush3.msk.msra.mxu0 %vm844_vm13, %v3957_v24  ;;  %5563 = vrot.lane.b32.xlu1 %v11417_v6, %s13262_s20  ;;  %v4932_v43 = vpop.permute.xlu1 %4931  ;;  %vm13404_vm9 = vmmov %vm13403_vm10 }
 0x3fd   : > { %5561 = vrot.lane.b32.xlu0 %v11383_v42, %s13262_s20  ;;  %9470 = vmatprep.subr.bf16.mxu0 %v9469_v1  ;;  %v4930_v2 = vpop.permute.xlu0 %4929 }
 0x3fe   : > { %9200 = vmatmul.mubr.msk.f32.vlgmr.msra.gmra.mrb[8].mxu0 %vm840_vm15, %v11733_v20  ;;  %v4936_v5 = vsel %vm13401_vm7, %v4928_v38, %v4930_v2  ;;  %v4937_v51 = vsel %vm13402_vm11, %v4930_v2, %v4932_v43  ;;  %vm13405_vm7 = vmmov %vm13404_vm9  ;;  %v5101_v2 = vld [vmem:[#allocation4 + $0x40] sm:$0xff] }
 0x3ff   : > { %9472 = vmatpush1.bf16.msra.mxu0 %v9471_v3  ;;  %4946 = vst [vmem:[#allocation4 + $0x68] sm:$0xf] %v4936_v5  ;;  %4947 = vst [vmem:[#allocation4 + $0x70] sm:$0xf] %v4937_v51  ;;  %5200 = vmatprep.mubr.f32.mxu0 %v9845_v48  ;;  %v11891_v51 = vcombine.low %v11852_v11, %v11852_v11 }
 0x400   : > { %5567 = vrot.lane.b32.xlu1 %v11436_v58, %s13262_s20  ;;  %v4960_v10 = vpop.permute.xlu1 %4959  ;;  %vm13406_vm11 = vmmov %vm13405_vm7 }
 0x401   : > { %5565 = vrot.lane.b32.xlu0 %v11395_v18, %s13262_s20  ;;  %v4958_v33 = vpop.permute.xlu0 %4957 }
 0x402   : > { %v4969_v8 = vsel %vm13403_vm10, %v4958_v33, %v4960_v10  ;;  %vm13407_vm10 = vmmov %vm13405_vm7 }
 0x403   : > { %4979 = vst [vmem:[#allocation4 + $0x50] sm:$0xf0] %v4969_v8  ;;  %v5096_v8 = vld [vmem:[#allocation4 + $0x18] sm:$0xff] }
 0x404   : > { %5571 = vrot.lane.b32.xlu1 %v11679_v13, %s13262_s20  ;;  %v4964_v41 = vpop.permute.xlu1 %4963 }
 0x405   : > { %5569 = vrot.lane.b32.xlu0 %v11640_v63, %s13262_s20  ;;  %v4962_v49 = vpop.permute.xlu0 %4961 }
 0x406   : > { %v4970_v28 = vsel %vm13404_vm9, %v4960_v10, %v4962_v49  ;;  %v4971_v9 = vsel %vm13405_vm7, %v4962_v49, %v4964_v41  ;;  %vm13408_vm9 = vcmask 457728  }
 0x407   : > { %4980 = vst [vmem:[#allocation4 + $0x58] sm:$0xf0] %v4970_v28  ;;  %4981 = vst [vmem:[#allocation4 + $0x60] sm:$0xf0] %v4971_v9  ;;  %v9477_v28 = vpack.c.bf16 %v5101_v2, %v5096_v8  ;;  %v11898_v9 = vld [vmem:[%s13221_s1 + $0x10] sm:$0xff] }
 0x408   : > { %5599 = vrot.lane.b32.xlu1 %v11383_v42, %s13260_s21  ;;  %v4968_v31 = vpop.permute.xlu1 %4967  ;;  %vm13409_vm7 = vmmov %vm13408_vm9 }
 0x409   : > { %5597 = vrot.lane.b32.xlu0 %v11627_v40, %s13260_s21  ;;  %v4966_v15 = vpop.permute.xlu0 %4965 }
 0x40a   : > { %v4972_v20 = vsel %vm13406_vm11, %v4964_v41, %v4966_v15  ;;  %v4973_v14 = vsel %vm13407_vm10, %v4966_v15, %v4968_v31  ;;  %vm13410_vm11 = vmmov %vm13409_vm7  ;;  %v5103_v22 = vld [vmem:[#allocation4 + $0x50] sm:$0xff]  ;;  %v5100_v41 = vld [vmem:[#allocation4 + $0x38] sm:$0xff] }
 0x40b   : > { %4982 = vst [vmem:[#allocation4 + $0x68] sm:$0xf0] %v4972_v20  ;;  %4983 = vst [vmem:[#allocation4 + $0x70] sm:$0xf0] %v4973_v14  ;;  %v5095_v20 = vld [vmem:[#allocation4 + $0x10] sm:$0xff] }
 0x40c   : > { %5603 = vrot.lane.b32.xlu1 %v11395_v18, %s13260_s21  ;;  %v4996_v57 = vpop.permute.xlu1 %4995  ;;  %vm13411_vm10 = vmmov %vm13409_vm7 }
 0x40d   : > { %5601 = vrot.lane.b32.xlu0 %v11637_v44, %s13260_s21  ;;  %v4994_v52 = vpop.permute.xlu0 %4993 }
 0x40e   : > { %v5005_v34 = vsel %vm13408_vm9, %v4994_v52, %v4996_v57  ;;  %vm13412_vm9 = vmmov %vm13409_vm7  ;;  %v5104_v36 = vld [vmem:[#allocation4 + $0x58] sm:$0xff] }
 0x40f   : > { %5015 = vst [vmem:[#allocation4 + $0x78] sm:$0xf] %v5005_v34 }
 0x410   : > { %5607 = vrot.lane.b32.xlu1 %v11640_v63, %s13260_s21  ;;  %v5000_v40 = vpop.permute.xlu1 %4999 }
 0x411   : > { %5605 = vrot.lane.b32.xlu0 %v11650_v27, %s13260_s21  ;;  %v4998_v54 = vpop.permute.xlu0 %4997 }
 0x412   : > { %v5006_v32 = vsel %vm13409_vm7, %v4996_v57, %v4998_v54  ;;  %v5007_v56 = vsel %vm13410_vm11, %v4998_v54, %v5000_v40  ;;  %v9479_v57 = vpack.c.bf16 %v5100_v41, %v5095_v20  ;;  %v5106_v52 = vld [vmem:[#allocation4 + $0x68] sm:$0xff]  ;;  %vm13413_vm7 = vcmask 703488  }
 0x413   : > { %5016 = vst [vmem:[#allocation4 + $0x80] sm:$0xf] %v5006_v32  ;;  %5017 = vst [vmem:[#allocation4 + $0x88] sm:$0xf] %v5007_v56 }
 0x414   : > { %5635 = vrot.lane.b32.xlu1 %v11417_v6, %s13258_s22  ;;  %v5004_v44 = vpop.permute.xlu1 %5003  ;;  %vm13414_vm11 = vmmov %vm13413_vm7 }
 0x415   : > { %5633 = vrot.lane.b32.xlu0 %v11383_v42, %s13258_s22  ;;  %v5002_v26 = vpop.permute.xlu0 %5001 }
 0x416   : > { %v5008_v30 = vsel %vm13411_vm10, %v5000_v40, %v5002_v26  ;;  %v5009_v27 = vsel %vm13412_vm9, %v5002_v26, %v5004_v44  ;;  %v5105_v44 = vld [vmem:[#allocation4 + $0x60] sm:$0xff]  ;;  %vm13415_vm10 = vmmov %vm13413_vm7 }
 0x417   : > { %5018 = vst [vmem:[#allocation4 + $0x90] sm:$0xf] %v5008_v30  ;;  %5019 = vst [vmem:[#allocation4 + $0x98] sm:$0xf] %v5009_v27 }
 0x418   : > { %5639 = vrot.lane.b32.xlu1 %v11436_v58, %s13258_s22  ;;  %v5032_v59 = vpop.permute.xlu1 %5031  ;;  %vm13417_vm9 = vmmov %vm13413_vm7 }
 0x419   : > { %5637 = vrot.lane.b32.xlu0 %v11395_v18, %s13258_s22  ;;  %v5030_v6 = vpop.permute.xlu0 %5029  ;;  %v11839_v18 = vld [vmem:[%s9885_s14 + $0x50] sm:$0xff] }
 0x41a   : > { %v5041_v42 = vsel %vm1582_vm12, %v5030_v6, %v5032_v59  ;;  %v11847_v4 = vcombine.high %v11839_v18, %v11839_v18  ;;  %v11881_v1 = vcombine.low %v11839_v18, %v11839_v18 }
 0x41b   : > { %5051 = vst [vmem:[#allocation4 + $0x78] sm:$0xf0] %v5041_v42 }
 0x41c   : > { %5643 = vrot.lane.b32.xlu1 %v11679_v13, %s13258_s22  ;;  %v5036_v61 = vpop.permute.xlu1 %5035 }
 0x41d   : > { %5641 = vrot.lane.b32.xlu0 %v11640_v63, %s13258_s22  ;;  %v5034_v58 = vpop.permute.xlu0 %5033  ;;  %s13427_s22 = smov 94  }
 0x41e   : > { %v5042_v37 = vsel %vm1582_vm12, %v5032_v59, %v5034_v58  ;;  %v5043_v35 = vsel %vm1582_vm12, %v5034_v58, %v5036_v61  ;;  %v5102_v58 = vld [vmem:[#allocation4 + $0x48] sm:$0xff] }
 0x41f   : > { %5052 = vst [vmem:[#allocation4 + $0x80] sm:$0xf0] %v5042_v37  ;;  %5053 = vst [vmem:[#allocation4 + $0x88] sm:$0xf0] %v5043_v35 }
 0x420   : > { %5697 = vrot.lane.b32.xlu1 %v11834_v39, %s9835_s23  ;;  %v5040_v13 = vpop.permute.xlu1 %5039 }
 0x421   : > { %5695 = vrot.lane.b32.xlu0 %v11827_v17, %s9835_s23  ;;  %v5038_v63 = vpop.permute.xlu0 %5037 }
 0x422   : > { %v5044_v47 = vsel %vm1582_vm12, %v5036_v61, %v5038_v63  ;;  %v5045_v29 = vsel %vm1582_vm12, %v5038_v63, %v5040_v13  ;;  %v5108_v23 = vld [vmem:[#allocation4 + $0x78] sm:$0xff]  ;;  %v5097_v13 = vld [vmem:[#allocation4 + $0x20] sm:$0xff] }
 0x423   : > { %5054 = vst [vmem:[#allocation4 + $0x90] sm:$0xf0] %v5044_v47  ;;  %5055 = vst [vmem:[#allocation4 + $0x98] sm:$0xf0] %v5045_v29  ;;  %v9475_v55 = vpack.c.bf16 %v5108_v23, %v5103_v22  ;;  %v9486_v63 = vpack.c.bf16 %v5102_v58, %v5097_v13 }
 0x424   : > { %5701 = vrot.lane.b32.xlu1 %v11847_v4, %s9835_s23  ;;  %v5068_v16 = vpop.permute.xlu1 %5067 }
 0x425   : > { %5699 = vrot.lane.b32.xlu0 %v11839_v18, %s9835_s23  ;;  %v5066_v12 = vpop.permute.xlu0 %5065 }
 0x426   : > { %v5077_v7 = vsel %vm1619_vm14, %v5066_v12, %v5068_v16  ;;  %v5109_v60 = vld [vmem:[#allocation4 + $0x80] sm:$0xff]  ;;  %v5110_v32 = vld [vmem:[#allocation4 + $0x88] sm:$0xff] }
 0x427   : > { %5087 = vst [vmem:[#allocation4 + $0xa0] sm:$0xf] %v5077_v7  ;;  %v9473_v21 = vpack.c.bf16 %v5109_v60, %v5104_v36  ;;  %v9483_v30 = vpack.c.bf16 %v5110_v32, %v5105_v44  ;;  %v5107_v7 = vld [vmem:[#allocation4 + $0x70] sm:$0xff] }
 0x428   : > { %5705 = vrot.lane.b32.xlu1 %v11860_v62, %s9835_s23  ;;  %v5072_v38 = vpop.permute.xlu1 %5071 }
 0x429   : > { %5703 = vrot.lane.b32.xlu0 %v11852_v11, %s9835_s23  ;;  %v5070_v46 = vpop.permute.xlu0 %5069  ;;  %9474 = vmatprep.subr.bf16.mxu0 %v9473_v21 }
 0x42a   : > { %v5078_v19 = vsel %vm1619_vm14, %v5068_v16, %v5070_v46  ;;  %v5079_v50 = vsel %vm1619_vm14, %v5070_v46, %v5072_v38  ;;  %9476 = vmatpush1.bf16.msra.mxu0 %v9475_v55  ;;  %v5111_v31 = vld [vmem:[#allocation4 + $0x90] sm:$0xff]  ;;  %v5112_v16 = vld [vmem:[#allocation4 + $0x98] sm:$0xff] }
 0x42b   : > { %5088 = vst [vmem:[#allocation4 + $0xa8] sm:$0xf] %v5078_v19  ;;  %5089 = vst [vmem:[#allocation4 + $0xb0] sm:$0xf] %v5079_v50  ;;  %v9481_v54 = vpack.c.bf16 %v5111_v31, %v5106_v52  ;;  %v9489_v36 = vpack.c.bf16 %v5112_v16, %v5107_v7 }
 0x42c   : > { %5733 = vrot.lane.b32.xlu1 %v11827_v17, %s9836_s24  ;;  %v5076_v0 = vpop.permute.xlu1 %5075 }
 0x42d   : > { %5731 = vrot.lane.b32.xlu0 %v11871_v53, %s9836_s24  ;;  %v5074_v24 = vpop.permute.xlu0 %5073 }
 0x42e   : > { %v5080_v25 = vsel %vm1619_vm14, %v5072_v38, %v5074_v24  ;;  %v5081_v43 = vsel %vm1619_vm14, %v5074_v24, %v5076_v0  ;;  %v5113_v49 = vld [vmem:[#allocation4 + $0xa0] sm:$0xf] }
 0x42f   : > { %5090 = vst [vmem:[#allocation4 + $0xb8] sm:$0xf] %v5080_v25  ;;  %5091 = vst [vmem:[#allocation4 + $0xc0] sm:$0xf] %v5081_v43 }
 0x430   : > { %5737 = vrot.lane.b32.xlu1 %v11839_v18, %s9836_s24  ;;  %v5384_v3 = vpop.permute.xlu1 %5383 }
 0x431   : > { %5735 = vrot.lane.b32.xlu0 %v11881_v1, %s9836_s24  ;;  %v5382_v5 = vpop.permute.xlu0 %5381 }
 0x432   : > { %v5393_v10 = vsel %vm179_vm0, %v5382_v5, %v5384_v3  ;;  %v5114_v33 = vld [vmem:[#allocation4 + $0xa8] sm:$0xf]  ;;  %v5115_v35 = vld [vmem:[#allocation4 + $0xb0] sm:$0xf] }
 0x433   : > { %5403 = vst [vmem:[#allocation2] sm:$0xf0] %v5393_v10  ;;  %8946 = vmatprep.subr.msk.mxu0 %vm844_vm13, %v5114_v33 }
 0x434   : > { %5741 = vrot.lane.b32.xlu1 %v11852_v11, %s9836_s24  ;;  %8947 = vmatpush1.msk.msra.mxu0 %vm844_vm13, %v5113_v49  ;;  %v5388_v15 = vpop.permute.xlu1 %5387 }
 0x435   : > { %5739 = vrot.lane.b32.xlu0 %v11891_v51, %s9836_s24  ;;  %v5386_v14 = vpop.permute.xlu0 %5385  ;;  %9478 = vmatprep.subr.bf16.mxu0 %v9477_v28 }
 0x436   : > { %v5394_v34 = vsel %vm179_vm0, %v5384_v3, %v5386_v14  ;;  %v5395_v40 = vsel %vm179_vm0, %v5386_v14, %v5388_v15  ;;  %8948 = vmatmul.mubr.msk.f32.vlgmr.msra.gmra.mrb[4].mxu0 %vm840_vm15, %v11898_v9  ;;  %v5116_v6 = vld [vmem:[#allocation4 + $0xb8] sm:$0xf]  ;;  %v5117_v46 = vld [vmem:[#allocation4 + $0xc0] sm:$0xf] }
 0x437   : > { %5404 = vst [vmem:[#allocation2 + $0x8] sm:$0xf0] %v5394_v34  ;;  %5405 = vst [vmem:[#allocation2 + $0x10] sm:$0xf0] %v5395_v40  ;;  %9480 = vmatpush1.bf16.msra.mxu0 %v9479_v57  ;;  %5271 = vmatprep.mubr.f32.mxu0 %v9845_v48 }
 0x438   : > { %5769 = vrot.lane.b32.xlu1 %v11834_v39, %s9837_s25  ;;  %9482 = vmatprep.subr.bf16.mxu0 %v9481_v54  ;;  %v5392_v56 = vpop.permute.xlu1 %5391 }
 0x439   : > { %5767 = vrot.lane.b32.xlu0 %v11827_v17, %s9837_s25  ;;  %v5390_v26 = vpop.permute.xlu0 %5389 }
 0x43a   : > { %v5396_v27 = vsel %vm179_vm0, %v5388_v15, %v5390_v26  ;;  %v5397_v59 = vsel %vm179_vm0, %v5390_v26, %v5392_v56 }
 0x43b   : > { %5406 = vst [vmem:[#allocation2 + $0x18] sm:$0xf0] %v5396_v27  ;;  %5407 = vst [vmem:[#allocation2 + $0x20] sm:$0xf0] %v5397_v59  ;;  %9484 = vmatpush1.bf16.msra.mxu0 %v9483_v30 }
 0x43c   : > { %5773 = vrot.lane.b32.xlu1 %v11847_v4, %s9837_s25  ;;  %8949 = vmatprep.subr.msk.mxu0 %vm844_vm13, %v5116_v6  ;;  %v5420_v42 = vpop.permute.xlu1 %5419 }
 0x43d   : > { %5771 = vrot.lane.b32.xlu0 %v11839_v18, %s9837_s25  ;;  %v5418_v61 = vpop.permute.xlu0 %5417 }
 0x43e   : > { %v5429_v37 = vsel %vm216_vm1, %v5418_v61, %v5420_v42 }
 0x43f   : > { %5439 = vst [vmem:[#allocation2 + $0x28] sm:$0xf] %v5429_v37  ;;  %8950 = vmatpush1.msk.msra.mxu0 %vm844_vm13, %v5115_v35 }
 0x440   : > { %5777 = vrot.lane.b32.xlu1 %v11860_v62, %s9837_s25  ;;  %9485 = vmatprep.subr.bf16.mxu0 %v9839_v45  ;;  %v5424_v47 = vpop.permute.xlu1 %5423 }
 0x441   : > { %5775 = vrot.lane.b32.xlu0 %v11852_v11, %s9837_s25  ;;  %8951 = vmatmul.mubr.msk.f32.vlgmr.msra.gmra.mrb[6].mxu0 %vm840_vm15, %v11898_v9  ;;  %v5422_v29 = vpop.permute.xlu0 %5421 }
 0x442   : > { %9487 = vmatpush3.bf16.msra.mxu0 %v9486_v63  ;;  %v5430_v12 = vsel %vm216_vm1, %v5420_v42, %v5422_v29  ;;  %v5431_v23 = vsel %vm216_vm1, %v5422_v29, %v5424_v47  ;;  %9212 = vmatprep.mubr.msk.f32.mxu0 %vm9846_vm8, %v9845_v48 }
 0x443   : > { %5440 = vst [vmem:[#allocation2 + $0x30] sm:$0xf] %v5430_v12  ;;  %5441 = vst [vmem:[#allocation2 + $0x38] sm:$0xf] %v5431_v23  ;;  %9488 = vmatprep.subr.bf16.mxu0 %v9839_v45 }
 0x444   : > { %5805 = vrot.lane.b32.xlu1 %v11827_v17, %s9838_s26  ;;  %v5428_v60 = vpop.permute.xlu1 %5427 }
 0x445   : > { %5803 = vrot.lane.b32.xlu0 %v11871_v53, %s9838_s26  ;;  %v5426_v21 = vpop.permute.xlu0 %5425 }
 0x446   : > { %9490 = vmatpush3.bf16.msra.mxu0 %v9489_v36  ;;  %v5432_v22 = vsel %vm216_vm1, %v5424_v47, %v5426_v21  ;;  %v5433_v38 = vsel %vm216_vm1, %v5426_v21, %v5428_v60 }
 0x447   : > { %5442 = vst [vmem:[#allocation2 + $0x40] sm:$0xf] %v5432_v22  ;;  %5443 = vst [vmem:[#allocation2 + $0x48] sm:$0xf] %v5433_v38  ;;  %9210 = vmatprep.subr.mxu0 %v9845_v48 }
 0x448   : > { %5809 = vrot.lane.b32.xlu1 %v11839_v18, %s9838_s26  ;;  %v5456_v55 = vpop.permute.xlu1 %5455 }
 0x449   : > { %5807 = vrot.lane.b32.xlu0 %v11881_v1, %s9838_s26  ;;  %v5454_v19 = vpop.permute.xlu0 %5453 }
 0x44a   : > { %9211 = vmatpush3.msk.msra.mxu0 %vm844_vm13, %v5117_v46  ;;  %v5465_v50 = vsel %vm253_vm2, %v5454_v19, %v5456_v55 }
 0x44b   : > { %5475 = vst [vmem:[#allocation2 + $0x28] sm:$0xf0] %v5465_v50  ;;  %9213 = vmatmul.mubr.msk.f32.vlgmr.msra.gmra.mrb[8].mxu0 %vm840_vm15, %v11898_v9 }
 0x44c   : > { %5813 = vrot.lane.b32.xlu1 %v11852_v11, %s9838_s26  ;;  %v5460_v0 = vpop.permute.xlu1 %5459  ;;  %7846 = vmatprep.mubr.f32.mxu0 %v9845_v48 }
 0x44d   : > { %5811 = vrot.lane.b32.xlu0 %v11891_v51, %s9838_s26  ;;  %v5458_v24 = vpop.permute.xlu0 %5457 }
 0x44e   : > { %v5466_v25 = vsel %vm253_vm2, %v5456_v55, %v5458_v24  ;;  %v5467_v43 = vsel %vm253_vm2, %v5458_v24, %v5460_v0 }
 0x44f   : > { %5476 = vst [vmem:[#allocation2 + $0x30] sm:$0xf0] %v5466_v25  ;;  %5477 = vst [vmem:[#allocation2 + $0x38] sm:$0xf0] %v5467_v43 }
 0x450   : > { %5841 = vrot.lane.b32.xlu1 %v11834_v39, %s9840_s27 }
 0x451   : > { %5839 = vrot.lane.b32.xlu0 %v11827_v17, %s9840_s27  ;;  %v5464_v3 = vpop.permute.xlu1 %5463 }
 0x452   : > { %v5462_v2 = vpop.permute.xlu0 %5461 }
 0x453   : > { %v5468_v5 = vsel %vm253_vm2, %v5460_v0, %v5462_v2  ;;  %v5469_v10 = vsel %vm253_vm2, %v5462_v2, %v5464_v3 }
 0x454   : > { %5478 = vst [vmem:[#allocation2 + $0x40] sm:$0xf0] %v5468_v5  ;;  %5479 = vst [vmem:[#allocation2 + $0x48] sm:$0xf0] %v5469_v10  ;;  %5845 = vrot.lane.b32.xlu1 %v11847_v4, %s9840_s27 }
 0x455   : > { %5843 = vrot.lane.b32.xlu0 %v11839_v18, %s9840_s27  ;;  %v5492_v33 = vpop.permute.xlu1 %5491 }
 0x456   : > { %v5490_v8 = vpop.permute.xlu0 %5489 }
 0x457   : > { %v5501_v41 = vsel %vm290_vm3, %v5490_v8, %v5492_v33 }
 0x458   : > { %5511 = vst [vmem:[#allocation2 + $0x50] sm:$0xf] %v5501_v41  ;;  %5849 = vrot.lane.b32.xlu1 %v11860_v62, %s9840_s27 }
 0x459   : > { %5847 = vrot.lane.b32.xlu0 %v11852_v11, %s9840_s27  ;;  %v5496_v49 = vpop.permute.xlu1 %5495 }
 0x45a   : > { %v5494_v28 = vpop.permute.xlu0 %5493 }
 0x45b   : > { %v5502_v9 = vsel %vm290_vm3, %v5492_v33, %v5494_v28  ;;  %v5503_v31 = vsel %vm290_vm3, %v5494_v28, %v5496_v49 }
 0x45c   : > { %5512 = vst [vmem:[#allocation2 + $0x58] sm:$0xf] %v5502_v9  ;;  %5513 = vst [vmem:[#allocation2 + $0x60] sm:$0xf] %v5503_v31  ;;  %5877 = vrot.lane.b32.xlu1 %v11827_v17, %s9841_s28 }
 0x45d   : > { %5875 = vrot.lane.b32.xlu0 %v11871_v53, %s9841_s28  ;;  %v5500_v15 = vpop.permute.xlu1 %5499 }
 0x45e   : > { %v5498_v20 = vpop.permute.xlu0 %5497 }
 0x45f   : > { %v5504_v14 = vsel %vm290_vm3, %v5496_v49, %v5498_v20  ;;  %v5505_v57 = vsel %vm290_vm3, %v5498_v20, %v5500_v15  ;;  %v12093_v20 = vld [vmem:[%s9885_s14 + $0x50] sm:$0xff] }
 0x460   : > { %5514 = vst [vmem:[#allocation2 + $0x68] sm:$0xf] %v5504_v14  ;;  %5515 = vst [vmem:[#allocation2 + $0x70] sm:$0xf] %v5505_v57  ;;  %5881 = vrot.lane.b32.xlu1 %v11839_v18, %s9841_s28  ;;  %v12095_v14 = vld [vmem:[#allocation2] sm:$0xff] }
 0x461   : > { %5879 = vrot.lane.b32.xlu0 %v11881_v1, %s9841_s28  ;;  %v5528_v52 = vpop.permute.xlu1 %5527  ;;  %7095 = vst [vmem:[#allocation2] sm:$0xf] %v12093_v20 }
 0x462   : > { %v5526_v34 = vpop.permute.xlu0 %5525 }
 0x463   : > { %v5537_v40 = vsel %vm327_vm4, %v5526_v34, %v5528_v52 }
 0x464   : > { %5547 = vst [vmem:[#allocation2 + $0x50] sm:$0xf0] %v5537_v40  ;;  %5885 = vrot.lane.b32.xlu1 %v11852_v11, %s9841_s28  ;;  %v12102_v40 = vld [vmem:[#allocation2 + $0x8] sm:$0xff] }
 0x465   : > { %5883 = vrot.lane.b32.xlu0 %v11891_v51, %s9841_s28 }
 0x466   : > { %v5532_v54 = vpop.permute.xlu1 %5531 }
 0x467   : > { %v5530_v32 = vpop.permute.xlu0 %5529 }
 0x468   : > { %v5538_v56 = vsel %vm327_vm4, %v5528_v52, %v5530_v32  ;;  %v5539_v44 = vsel %vm327_vm4, %v5530_v32, %v5532_v54  ;;  %5913 = vrot.lane.b32.xlu1 %v11834_v39, %s9842_s29  ;;  %v12099_v52 = vcombine.high %v12093_v20, %v12093_v20 }
 0x469   : > { %5548 = vst [vmem:[#allocation2 + $0x58] sm:$0xf0] %v5538_v56  ;;  %5549 = vst [vmem:[#allocation2 + $0x60] sm:$0xf0] %v5539_v44  ;;  %5911 = vrot.lane.b32.xlu0 %v11827_v17, %s9842_s29 }
 0x46a   : > { %v5536_v26 = vpop.permute.xlu1 %5535  ;;  %7096 = vst [vmem:[#allocation2 + $0x8] sm:$0xf] %v12099_v52 }
 0x46b   : > { %v5534_v30 = vpop.permute.xlu0 %5533 }
 0x46c   : > { %v5540_v27 = vsel %vm327_vm4, %v5532_v54, %v5534_v30  ;;  %v5541_v59 = vsel %vm327_vm4, %v5534_v30, %v5536_v26  ;;  %5917 = vrot.lane.b32.xlu1 %v11847_v4, %s9842_s29 }
 0x46d   : > { %5550 = vst [vmem:[#allocation2 + $0x68] sm:$0xf0] %v5540_v27  ;;  %5551 = vst [vmem:[#allocation2 + $0x70] sm:$0xf0] %v5541_v59  ;;  %5915 = vrot.lane.b32.xlu0 %v11839_v18, %s9842_s29  ;;  %v12121_v59 = vld [vmem:[%s9885_s14 + $0x58] sm:$0xff] }
 0x46e   : > { %v5564_v6 = vpop.permute.xlu1 %5563 }
 0x46f   : > { %v5562_v42 = vpop.permute.xlu0 %5561 }
 0x470   : > { %v5573_v61 = vsel %vm364_vm5, %v5562_v42, %v5564_v6  ;;  %5921 = vrot.lane.b32.xlu1 %v11860_v62, %s9842_s29 }
 0x471   : > { %5583 = vst [vmem:[#allocation2 + $0x78] sm:$0xf] %v5573_v61  ;;  %5919 = vrot.lane.b32.xlu0 %v11852_v11, %s9842_s29  ;;  %v12127_v61 = vcombine.high %v12121_v59, %v12121_v59 }
 0x472   : > { %v5568_v58 = vpop.permute.xlu1 %5567 }
 0x473   : > { %v5566_v37 = vpop.permute.xlu0 %5565 }
 0x474   : > { %v5574_v35 = vsel %vm364_vm5, %v5564_v6, %v5566_v37  ;;  %v5575_v13 = vsel %vm364_vm5, %v5566_v37, %v5568_v58  ;;  %5949 = vrot.lane.b32.xlu1 %v11827_v17, %s9843_s30  ;;  %v12123_v6 = vld [vmem:[#allocation2 + $0x10] sm:$0xff] }
 0x475   : > { %5584 = vst [vmem:[#allocation2 + $0x80] sm:$0xf] %v5574_v35  ;;  %5585 = vst [vmem:[#allocation2 + $0x88] sm:$0xf] %v5575_v13  ;;  %5947 = vrot.lane.b32.xlu0 %v11871_v53, %s9843_s30  ;;  %v12134_v35 = vld [vmem:[#allocation2 + $0x18] sm:$0xff] }
 0x476   : > { %v5572_v63 = vpop.permute.xlu1 %5571  ;;  %7097 = vst [vmem:[#allocation2 + $0x10] sm:$0xf] %v12121_v59  ;;  %7098 = vst [vmem:[#allocation2 + $0x18] sm:$0xf] %v12127_v61 }
 0x477   : > { %v5570_v47 = vpop.permute.xlu0 %5569 }
 0x478   : > { %v5576_v29 = vsel %vm364_vm5, %v5568_v58, %v5570_v47  ;;  %v5577_v16 = vsel %vm364_vm5, %v5570_v47, %v5572_v63  ;;  %5953 = vrot.lane.b32.xlu1 %v11839_v18, %s9843_s30 }
 0x479   : > { %5586 = vst [vmem:[#allocation2 + $0x90] sm:$0xf] %v5576_v29  ;;  %5587 = vst [vmem:[#allocation2 + $0x98] sm:$0xf] %v5577_v16  ;;  %5951 = vrot.lane.b32.xlu0 %v11881_v1, %s9843_s30 }
 0x47a   : > { %v5600_v12 = vpop.permute.xlu1 %5599 }
 0x47b   : > { %v5598_v23 = vpop.permute.xlu0 %5597 }
 0x47c   : > { %v5609_v7 = vsel %vm401_vm6, %v5598_v23, %v5600_v12  ;;  %5957 = vrot.lane.b32.xlu1 %v11852_v11, %s9843_s30 }
 0x47d   : > { %5619 = vst [vmem:[#allocation2 + $0x78] sm:$0xf0] %v5609_v7  ;;  %5955 = vrot.lane.b32.xlu0 %v11891_v51, %s9843_s30 }
 0x47e   : > { %v5604_v53 = vpop.permute.xlu1 %5603 }
 0x47f   : > { %v5602_v36 = vpop.permute.xlu0 %5601 }
 0x480   : > { %v5610_v60 = vsel %vm401_vm6, %v5600_v12, %v5602_v36  ;;  %v5611_v21 = vsel %vm401_vm6, %v5602_v36, %v5604_v53  ;;  %5985 = vrot.lane.b32.xlu1 %v11834_v39, %s9844_s3  ;;  %v12036_v39 = vld [vmem:[%s9885_s14 + $0x54] sm:$0xff]  ;;  %v7088_v36 = vld [vmem:[%s9885_s14 + $0x60] sm:$0xf] }
 0x481   : > { %5620 = vst [vmem:[#allocation2 + $0x80] sm:$0xf0] %v5610_v60  ;;  %5621 = vst [vmem:[#allocation2 + $0x88] sm:$0xf0] %v5611_v21  ;;  %5983 = vrot.lane.b32.xlu0 %v11827_v17, %s9844_s3  ;;  %v12043_v19 = vcombine.high %v12036_v39, %v12036_v39  ;;  %v12080_v41 = vcombine.low %v12036_v39, %v12036_v39 }
 0x482   : > { %v5608_v1 = vpop.permute.xlu1 %5607 }
 0x483   : > { %v5606_v22 = vpop.permute.xlu0 %5605 }
 0x484   : > { %v5612_v51 = vsel %vm401_vm6, %v5604_v53, %v5606_v22  ;;  %v5613_v38 = vsel %vm401_vm6, %v5606_v22, %v5608_v1  ;;  %5989 = vrot.lane.b32.xlu1 %v11847_v4, %s9844_s3  ;;  %v12048_v4 = vld [vmem:[%s9885_s14 + $0x5c] sm:$0xff] }
 0x485   : > { %5622 = vst [vmem:[#allocation2 + $0x90] sm:$0xf0] %v5612_v51  ;;  %5623 = vst [vmem:[#allocation2 + $0x98] sm:$0xf0] %v5613_v38  ;;  %5987 = vrot.lane.b32.xlu0 %v11839_v18, %s9844_s3  ;;  %v12090_v15 = vcombine.low %v12048_v4, %v12048_v4  ;;  %v12150_v53 = vld [vmem:[#allocation2 + $0x20] sm:$0xff] }
 0x486   : > { %v5636_v55 = vpop.permute.xlu1 %5635  ;;  %7099 = vst [vmem:[#allocation2 + $0x20] sm:$0xf] %v7088_v36 }
 0x487   : > { %v5634_v46 = vpop.permute.xlu0 %5633 }
 0x488   : > { %v5645_v17 = vsel %vm13413_vm7, %v5634_v46, %v5636_v55  ;;  %5993 = vrot.lane.b32.xlu1 %v11860_v62, %s9844_s3  ;;  %v12056_v62 = vcombine.high %v12048_v4, %v12048_v4 }
 0x489   : > { %5655 = vst [vmem:[#allocation2 + $0xa0] sm:$0xf] %v5645_v17  ;;  %5991 = vrot.lane.b32.xlu0 %v11852_v11, %s9844_s3  ;;  %v12061_v11 = vld [vmem:[%s9885_s14 + $0x64] sm:$0xff] }
 0x48a   : > { %v5640_v18 = vpop.permute.xlu1 %5639  ;;  %v12069_v5 = vcombine.high %v12061_v11, %v12061_v11  ;;  %v12113_v56 = vcombine.low %v12061_v11, %v12061_v11 }
 0x48b   : > { %v5638_v50 = vpop.permute.xlu0 %5637 }
 0x48c   : > { %v5646_v0 = vsel %vm13414_vm11, %v5636_v55, %v5638_v50  ;;  %v5647_v24 = vsel %vm13415_vm10, %v5638_v50, %v5640_v18  ;;  %6507 = vrot.lane.b32.xlu1 %v12043_v19, %s13416_s4  ;;  %vm13418_vm11 = vcmask 916480  }
 0x48d   : > { %5656 = vst [vmem:[#allocation2 + $0xa8] sm:$0xf] %v5646_v0  ;;  %5657 = vst [vmem:[#allocation2 + $0xb0] sm:$0xf] %v5647_v24  ;;  %6505 = vrot.lane.b32.xlu0 %v12036_v39, %s13416_s4 }
 0x48e   : > { %v5644_v25 = vpop.permute.xlu1 %5643  ;;  %vm13419_vm10 = vmmov %vm13418_vm11 }
 0x48f   : > { %v5642_v43 = vpop.permute.xlu0 %5641 }
 0x490   : > { %v5648_v3 = vsel %vm13417_vm9, %v5640_v18, %v5642_v43  ;;  %v5649_v2 = vsel %vm13413_vm7, %v5642_v43, %v5644_v25  ;;  %6511 = vrot.lane.b32.xlu1 %v12056_v62, %s13416_s4  ;;  %vm13420_vm9 = vmmov %vm13419_vm10 }
 0x491   : > { %5658 = vst [vmem:[#allocation2 + $0xb8] sm:$0xf] %v5648_v3  ;;  %5659 = vst [vmem:[#allocation2 + $0xc0] sm:$0xf] %v5649_v2  ;;  %6509 = vrot.lane.b32.xlu0 %v12048_v4, %s13416_s4 }
 0x492   : > { %v5698_v10 = vpop.permute.xlu1 %5697  ;;  %vm13422_vm7 = vmmov %vm13420_vm9 }
 0x493   : > { %v5696_v33 = vpop.permute.xlu0 %5695 }
 0x494   : > { %v5707_v8 = vsel %vm13418_vm11, %v5696_v33, %v5698_v10  ;;  %6515 = vrot.lane.b32.xlu1 %v12069_v5, %s13416_s4  ;;  %vm13423_vm11 = vmmov %vm13422_vm7 }
 0x495   : > { %5717 = vst [vmem:[#allocation3] sm:$0xf] %v5707_v8  ;;  %6513 = vrot.lane.b32.xlu0 %v12061_v11, %s13416_s4 }
 0x496   : > { %v5702_v49 = vpop.permute.xlu1 %5701 }
 0x497   : > { %v5700_v28 = vpop.permute.xlu0 %5699 }
 0x498   : > { %v5708_v9 = vsel %vm13419_vm10, %v5698_v10, %v5700_v28  ;;  %v5709_v31 = vsel %vm13420_vm9, %v5700_v28, %v5702_v49  ;;  %6543 = vrot.lane.b32.xlu1 %v12036_v39, %s13421_s5  ;;  %vm13424_vm10 = vcmask 908288  }
 0x499   : > { %5718 = vst [vmem:[#allocation3 + $0x8] sm:$0xf] %v5708_v9  ;;  %5719 = vst [vmem:[#allocation3 + $0x10] sm:$0xf] %v5709_v31  ;;  %6541 = vrot.lane.b32.xlu0 %v12080_v41, %s13421_s5 }
 0x49a   : > { %v5706_v57 = vpop.permute.xlu1 %5705  ;;  %vm13425_vm9 = vmmov %vm13424_vm10 }
 0x49b   : > { %v5704_v34 = vpop.permute.xlu0 %5703 }
 0x49c   : > { %v5710_v54 = vsel %vm13422_vm7, %v5702_v49, %v5704_v34  ;;  %v5711_v32 = vsel %vm13423_vm11, %v5704_v34, %v5706_v57  ;;  %6547 = vrot.lane.b32.xlu1 %v12048_v4, %s13421_s5  ;;  %vm13426_vm7 = vmmov %vm13425_vm9 }
 0x49d   : > { %5720 = vst [vmem:[#allocation3 + $0x18] sm:$0xf] %v5710_v54  ;;  %5721 = vst [vmem:[#allocation3 + $0x20] sm:$0xf] %v5711_v32  ;;  %6545 = vrot.lane.b32.xlu0 %v12090_v15, %s13421_s5 }
 0x49e   : > { %v5734_v44 = vpop.permute.xlu1 %5733  ;;  %vm13428_vm11 = vmmov %vm13426_vm7 }
 0x49f   : > { %v5732_v26 = vpop.permute.xlu0 %5731 }
 0x4a0   : > { %v5743_v30 = vsel %vm13424_vm10, %v5732_v26, %v5734_v44  ;;  %6551 = vrot.lane.b32.xlu1 %v12061_v11, %s13421_s5  ;;  %vm13429_vm10 = vmmov %vm13426_vm7 }
 0x4a1   : > { %5753 = vst [vmem:[#allocation3] sm:$0xf0] %v5743_v30  ;;  %6549 = vrot.lane.b32.xlu0 %v12113_v56, %s13421_s5 }
 0x4a2   : > { %v5738_v27 = vpop.permute.xlu1 %5737 }
 0x4a3   : > { %v5736_v42 = vpop.permute.xlu0 %5735 }
 0x4a4   : > { %v5744_v58 = vsel %vm13425_vm9, %v5734_v44, %v5736_v42  ;;  %v5745_v37 = vsel %vm13426_vm7, %v5736_v42, %v5738_v27  ;;  %6579 = vrot.lane.b32.xlu1 %v12043_v19, %s13427_s22  ;;  %vm13430_vm9 = vcmask 900096  }
 0x4a5   : > { %5754 = vst [vmem:[#allocation3 + $0x8] sm:$0xf0] %v5744_v58  ;;  %5755 = vst [vmem:[#allocation3 + $0x10] sm:$0xf0] %v5745_v37  ;;  %6577 = vrot.lane.b32.xlu0 %v12036_v39, %s13427_s22 }
 0x4a6   : > { %v5742_v13 = vpop.permute.xlu1 %5741  ;;  %vm13431_vm7 = vmmov %vm13430_vm9 }
 0x4a7   : > { %v5740_v63 = vpop.permute.xlu0 %5739 }
 0x4a8   : > { %v5746_v47 = vsel %vm13428_vm11, %v5738_v27, %v5740_v63  ;;  %v5747_v29 = vsel %vm13429_vm10, %v5740_v63, %v5742_v13  ;;  %6583 = vrot.lane.b32.xlu1 %v12056_v62, %s13427_s22  ;;  %vm13432_vm11 = vmmov %vm13431_vm7  ;;  %v6011_v31 = vld [vmem:[#allocation3] sm:$0xff] }
 0x4a9   : > { %5756 = vst [vmem:[#allocation3 + $0x18] sm:$0xf0] %v5746_v47  ;;  %5757 = vst [vmem:[#allocation3 + $0x20] sm:$0xf0] %v5747_v29  ;;  %6581 = vrot.lane.b32.xlu0 %v12048_v4, %s13427_s22 }
 0x4aa   : > { %v5770_v16 = vpop.permute.xlu1 %5769  ;;  %vm13433_vm10 = vmmov %vm13431_vm7 }
 0x4ab   : > { %v5768_v12 = vpop.permute.xlu0 %5767 }
 0x4ac   : > { %v5779_v23 = vsel %vm13430_vm9, %v5768_v12, %v5770_v16  ;;  %6587 = vrot.lane.b32.xlu1 %v12069_v5, %s13427_s22  ;;  %vm13434_vm9 = vmmov %vm13431_vm7 }
 0x4ad   : > { %5789 = vst [vmem:[#allocation3 + $0x28] sm:$0xf] %v5779_v23  ;;  %6585 = vrot.lane.b32.xlu0 %v12061_v11, %s13427_s22 }
 0x4ae   : > { %v5774_v7 = vpop.permute.xlu1 %5773 }
 0x4af   : > { %v5772_v60 = vpop.permute.xlu0 %5771 }
 0x4b0   : > { %v5780_v21 = vsel %vm13431_vm7, %v5770_v16, %v5772_v60  ;;  %v5781_v1 = vsel %vm13432_vm11, %v5772_v60, %v5774_v7  ;;  %6615 = vrot.lane.b32.xlu1 %v12036_v39, %s13346_s7  ;;  %vm13435_vm7 = vcmask 752640  }
 0x4b1   : > { %5790 = vst [vmem:[#allocation3 + $0x30] sm:$0xf] %v5780_v21  ;;  %5791 = vst [vmem:[#allocation3 + $0x38] sm:$0xf] %v5781_v1  ;;  %6613 = vrot.lane.b32.xlu0 %v12080_v41, %s13346_s7 }
 0x4b2   : > { %v5778_v22 = vpop.permute.xlu1 %5777  ;;  %vm13436_vm11 = vmmov %vm13435_vm7 }
 0x4b3   : > { %v5776_v51 = vpop.permute.xlu0 %5775 }
 0x4b4   : > { %v5782_v38 = vsel %vm13433_vm10, %v5774_v7, %v5776_v51  ;;  %v5783_v55 = vsel %vm13434_vm9, %v5776_v51, %v5778_v22  ;;  %6619 = vrot.lane.b32.xlu1 %v12048_v4, %s13346_s7  ;;  %vm13437_vm10 = vmmov %vm13435_vm7 }
 0x4b5   : > { %5792 = vst [vmem:[#allocation3 + $0x40] sm:$0xf] %v5782_v38  ;;  %5793 = vst [vmem:[#allocation3 + $0x48] sm:$0xf] %v5783_v55  ;;  %6617 = vrot.lane.b32.xlu0 %v12090_v15, %s13346_s7 }
 0x4b6   : > { %v5806_v46 = vpop.permute.xlu1 %5805  ;;  %vm13438_vm9 = vmmov %vm13435_vm7 }
 0x4b7   : > { %v5804_v17 = vpop.permute.xlu0 %5803 }
 0x4b8   : > { %v5815_v18 = vsel %vm13435_vm7, %v5804_v17, %v5806_v46  ;;  %6623 = vrot.lane.b32.xlu1 %v12061_v11, %s13346_s7 }
 0x4b9   : > { %5825 = vst [vmem:[#allocation3 + $0x28] sm:$0xf0] %v5815_v18  ;;  %6621 = vrot.lane.b32.xlu0 %v12113_v56, %s13346_s7 }
 0x4ba   : > { %v5810_v50 = vpop.permute.xlu1 %5809 }
 0x4bb   : > { %v5808_v0 = vpop.permute.xlu0 %5807 }
 0x4bc   : > { %v5816_v24 = vsel %vm13436_vm11, %v5806_v46, %v5808_v0  ;;  %v5817_v25 = vsel %vm13437_vm10, %v5808_v0, %v5810_v50  ;;  %7425 = vrot.lane.b32.xlu1 %v12056_v62, %s9835_s23  ;;  %vm13439_vm11 = vcmask 744448  }
 0x4bd   : > { %5826 = vst [vmem:[#allocation3 + $0x30] sm:$0xf0] %v5816_v24  ;;  %5827 = vst [vmem:[#allocation3 + $0x38] sm:$0xf0] %v5817_v25  ;;  %6649 = vrot.lane.b32.xlu0 %v12036_v39, %s13352_s8  ;;  %v6012_v39 = vld [vmem:[#allocation3 + $0x8] sm:$0xff] }
 0x4be   : > { %v5814_v43 = vpop.permute.xlu1 %5813  ;;  %vm13440_vm10 = vmmov %vm13439_vm11 }
 0x4bf   : > { %v5812_v3 = vpop.permute.xlu0 %5811 }
 0x4c0   : > { %v5818_v2 = vsel %vm13438_vm9, %v5810_v50, %v5812_v3  ;;  %v5819_v10 = vsel %vm13435_vm7, %v5812_v3, %v5814_v43  ;;  %7461 = vrot.lane.b32.xlu1 %v12048_v4, %s9836_s24  ;;  %v6016_v41 = vld [vmem:[#allocation3 + $0x28] sm:$0xff]  ;;  %vm13441_vm9 = vmmov %vm13440_vm10 }
 0x4c1   : > { %5828 = vst [vmem:[#allocation3 + $0x40] sm:$0xf0] %v5818_v2  ;;  %5829 = vst [vmem:[#allocation3 + $0x48] sm:$0xf0] %v5819_v10  ;;  %7427 = vrot.lane.b32.xlu0 %v12061_v11, %s9835_s23  ;;  %v9493_v34 = vpack.c.bf16 %v6016_v41, %v6011_v31 }
 0x4c2   : > { %v5842_v33 = vpop.permute.xlu1 %5841  ;;  %vm13442_vm7 = vmmov %vm13441_vm9 }
 0x4c3   : > { %v5840_v8 = vpop.permute.xlu0 %5839 }
 0x4c4   : > { %v5851_v49 = vsel %vm13439_vm11, %v5840_v8, %v5842_v33  ;;  %7497 = vrot.lane.b32.xlu1 %v12056_v62, %s9837_s25  ;;  %v6017_v28 = vld [vmem:[#allocation3 + $0x30] sm:$0xff]  ;;  %vm13443_vm11 = vmmov %vm13442_vm7 }
 0x4c5   : > { %5861 = vst [vmem:[#allocation3 + $0x50] sm:$0xf] %v5851_v49  ;;  %7463 = vrot.lane.b32.xlu0 %v12113_v56, %s9836_s24  ;;  %v9491_v9 = vpack.c.bf16 %v6017_v28, %v6012_v39 }
 0x4c6   : > { %v5846_v57 = vpop.permute.xlu1 %5845 }
 0x4c7   : > { %v5844_v54 = vpop.permute.xlu0 %5843  ;;  %9492 = vmatprep.subr.bf16.mxu1 %v9491_v9 }
 0x4c8   : > { %v5852_v32 = vsel %vm13440_vm10, %v5842_v33, %v5844_v54  ;;  %v5853_v44 = vsel %vm13441_vm9, %v5844_v54, %v5846_v57  ;;  %9494 = vmatpush1.bf16.msra.mxu1 %v9493_v34  ;;  %7533 = vrot.lane.b32.xlu1 %v12048_v4, %s9838_s26  ;;  %vm13444_vm10 = vcmask 736256   ;;  %v12245_v33 = vld [vmem:[%s9885_s14 + $0x6c] sm:$0xff] }
 0x4c9   : > { %5862 = vst [vmem:[#allocation3 + $0x58] sm:$0xf] %v5852_v32  ;;  %5863 = vst [vmem:[#allocation3 + $0x60] sm:$0xf] %v5853_v44  ;;  %7499 = vrot.lane.b32.xlu0 %v12061_v11, %s9837_s25  ;;  %v12255_v39 = vcombine.low %v12245_v33, %v12245_v33 }
 0x4ca   : > { %v5850_v26 = vpop.permute.xlu1 %5849  ;;  %vm13445_vm9 = vmmov %vm13444_vm10 }
 0x4cb   : > { %v5848_v30 = vpop.permute.xlu0 %5847 }
 0x4cc   : > { %v5854_v27 = vsel %vm13442_vm7, %v5846_v57, %v5848_v30  ;;  %v5855_v42 = vsel %vm13443_vm11, %v5848_v30, %v5850_v26  ;;  %7423 = vrot.lane.b32.xlu1 %v12048_v4, %s9835_s23  ;;  %vm13446_vm7 = vmmov %vm13445_vm9 }
 0x4cd   : > { %5864 = vst [vmem:[#allocation3 + $0x68] sm:$0xf] %v5854_v27  ;;  %5865 = vst [vmem:[#allocation3 + $0x70] sm:$0xf] %v5855_v42  ;;  %7535 = vrot.lane.b32.xlu0 %v12113_v56, %s9838_s26 }
 0x4ce   : > { %v5878_v58 = vpop.permute.xlu1 %5877  ;;  %vm13447_vm11 = vmmov %vm13446_vm7 }
 0x4cf   : > { %v5876_v37 = vpop.permute.xlu0 %5875 }
 0x4d0   : > { %v5887_v13 = vsel %vm13444_vm10, %v5876_v37, %v5878_v58  ;;  %7495 = vrot.lane.b32.xlu1 %v12048_v4, %s9837_s25  ;;  %vm13448_vm10 = vmmov %vm13446_vm7 }
 0x4d1   : > { %5897 = vst [vmem:[#allocation3 + $0x50] sm:$0xf0] %v5887_v13  ;;  %7459 = vrot.lane.b32.xlu0 %v12090_v15, %s9836_s24 }
 0x4d2   : > { %v5882_v63 = vpop.permute.xlu1 %5881 }
 0x4d3   : > { %v5880_v47 = vpop.permute.xlu0 %5879 }
 0x4d4   : > { %v5888_v29 = vsel %vm13445_vm9, %v5878_v58, %v5880_v47  ;;  %v5889_v16 = vsel %vm13446_vm7, %v5880_v47, %v5882_v63  ;;  %7569 = vrot.lane.b32.xlu1 %v12056_v62, %s9840_s27  ;;  %vm13449_vm9 = vcmask 588800  }
 0x4d5   : > { %5898 = vst [vmem:[#allocation3 + $0x58] sm:$0xf0] %v5888_v29  ;;  %5899 = vst [vmem:[#allocation3 + $0x60] sm:$0xf0] %v5889_v16  ;;  %7531 = vrot.lane.b32.xlu0 %v12090_v15, %s9838_s26  ;;  %v6019_v29 = vld [vmem:[#allocation3 + $0x40] sm:$0xff] }
 0x4d6   : > { %v5886_v12 = vpop.permute.xlu1 %5885  ;;  %vm13450_vm7 = vmmov %vm13449_vm9 }
 0x4d7   : > { %v5884_v23 = vpop.permute.xlu0 %5883 }
 0x4d8   : > { %v5890_v7 = vsel %vm13447_vm11, %v5882_v63, %v5884_v23  ;;  %v5891_v36 = vsel %vm13448_vm10, %v5884_v23, %v5886_v12  ;;  %7605 = vrot.lane.b32.xlu1 %v12048_v4, %s9841_s28  ;;  %vm13451_vm11 = vmmov %vm13450_vm7  ;;  %v6021_v32 = vld [vmem:[#allocation3 + $0x50] sm:$0xff]  ;;  %v12277_v12 = vld [vmem:[%s13221_s1 + $0x8] sm:$0xff] }
 0x4d9   : > { %5900 = vst [vmem:[#allocation3 + $0x68] sm:$0xf0] %v5890_v7  ;;  %5901 = vst [vmem:[#allocation3 + $0x70] sm:$0xf0] %v5891_v36  ;;  %7571 = vrot.lane.b32.xlu0 %v12061_v11, %s9840_s27  ;;  %v6018_v23 = vld [vmem:[#allocation3 + $0x38] sm:$0xff] }
 0x4da   : > { %v5914_v60 = vpop.permute.xlu1 %5913  ;;  %vm13452_vm10 = vmmov %vm13450_vm7  ;;  %v6014_v36 = vld [vmem:[#allocation3 + $0x18] sm:$0xff] }
 0x4db   : > { %v5912_v21 = vpop.permute.xlu0 %5911 }
 0x4dc   : > { %v5923_v1 = vsel %vm13449_vm9, %v5912_v21, %v5914_v60  ;;  %7641 = vrot.lane.b32.xlu1 %v12056_v62, %s9842_s29  ;;  %vm13453_vm9 = vmmov %vm13450_vm7  ;;  %v6022_v57 = vld [vmem:[#allocation3 + $0x58] sm:$0xff] }
 0x4dd   : > { %5933 = vst [vmem:[#allocation3 + $0x78] sm:$0xf] %v5923_v1  ;;  %7607 = vrot.lane.b32.xlu0 %v12113_v56, %s9841_s28  ;;  %v9499_v1 = vpack.c.bf16 %v6019_v29, %v6014_v36  ;;  %v5676_v36 = vld [vmem:[#allocation2 + $0x78] sm:$0xff] }
 0x4de   : > { %v5918_v22 = vpop.permute.xlu1 %5917 }
 0x4df   : > { %v5916_v51 = vpop.permute.xlu0 %5915 }
 0x4e0   : > { %v5924_v38 = vsel %vm13450_vm7, %v5914_v60, %v5916_v51  ;;  %v5925_v55 = vsel %vm13451_vm11, %v5916_v51, %v5918_v22  ;;  %7677 = vrot.lane.b32.xlu1 %v12048_v4, %s9843_s30  ;;  %vm13454_vm7 = vcmask 580608  }
 0x4e1   : > { %5934 = vst [vmem:[#allocation3 + $0x80] sm:$0xf] %v5924_v38  ;;  %5935 = vst [vmem:[#allocation3 + $0x88] sm:$0xf] %v5925_v55  ;;  %7643 = vrot.lane.b32.xlu0 %v12061_v11, %s9842_s29  ;;  %v6024_v55 = vld [vmem:[#allocation3 + $0x68] sm:$0xff] }
 0x4e2   : > { %v5922_v46 = vpop.permute.xlu1 %5921  ;;  %vm13455_vm11 = vmmov %vm13454_vm7 }
 0x4e3   : > { %v5920_v17 = vpop.permute.xlu0 %5919 }
 0x4e4   : > { %v5926_v18 = vsel %vm13452_vm10, %v5918_v22, %v5920_v17  ;;  %v5927_v50 = vsel %vm13453_vm9, %v5920_v17, %v5922_v46  ;;  %7567 = vrot.lane.b32.xlu1 %v12048_v4, %s9840_s27  ;;  %vm13456_vm10 = vmmov %vm13454_vm7  ;;  %v6013_v22 = vld [vmem:[#allocation3 + $0x10] sm:$0xff] }
 0x4e5   : > { %5936 = vst [vmem:[#allocation3 + $0x90] sm:$0xf] %v5926_v18  ;;  %5937 = vst [vmem:[#allocation3 + $0x98] sm:$0xf] %v5927_v50  ;;  %7679 = vrot.lane.b32.xlu0 %v12113_v56, %s9843_s30  ;;  %v9501_v38 = vpack.c.bf16 %v6018_v23, %v6013_v22 }
 0x4e6   : > { %v5950_v0 = vpop.permute.xlu1 %5949  ;;  %vm13457_vm9 = vmmov %vm13454_vm7 }
 0x4e7   : > { %v5948_v24 = vpop.permute.xlu0 %5947 }
 0x4e8   : > { %v5959_v25 = vsel %vm13454_vm7, %v5948_v24, %v5950_v0  ;;  %7639 = vrot.lane.b32.xlu1 %v12048_v4, %s9842_s29 }
 0x4e9   : > { %5969 = vst [vmem:[#allocation3 + $0x78] sm:$0xf0] %v5959_v25  ;;  %7603 = vrot.lane.b32.xlu0 %v12090_v15, %s9841_s28 }
 0x4ea   : > { %v5954_v43 = vpop.permute.xlu1 %5953 }
 0x4eb   : > { %v5952_v3 = vpop.permute.xlu0 %5951 }
 0x4ec   : > { %v5960_v2 = vsel %vm13455_vm11, %v5950_v0, %v5952_v3  ;;  %v5961_v10 = vsel %vm13456_vm10, %v5952_v3, %v5954_v43  ;;  %7429 = vrot.lane.b32.xlu1 %v12069_v5, %s9835_s23  ;;  %vm13458_vm11 = vcmask 572416   ;;  %v6023_v0 = vld [vmem:[#allocation3 + $0x60] sm:$0xff] }
 0x4ed   : > { %5970 = vst [vmem:[#allocation3 + $0x80] sm:$0xf0] %v5960_v2  ;;  %5971 = vst [vmem:[#allocation3 + $0x88] sm:$0xf0] %v5961_v10  ;;  %7675 = vrot.lane.b32.xlu0 %v12090_v15, %s9843_s30 }
 0x4ee   : > { %v5958_v56 = vpop.permute.xlu1 %5957  ;;  %vm13459_vm10 = vmmov %vm13458_vm11 }
 0x4ef   : > { %v5956_v8 = vpop.permute.xlu0 %5955 }
 0x4f0   : > { %v5962_v41 = vsel %vm13457_vm9, %v5954_v43, %v5956_v8  ;;  %v5963_v49 = vsel %vm13454_vm7, %v5956_v8, %v5958_v56  ;;  %7465 = vrot.lane.b32.xlu1 %v12061_v11, %s9836_s24  ;;  %v6026_v9 = vld [vmem:[#allocation3 + $0x78] sm:$0xff]  ;;  %vm13460_vm9 = vmmov %vm13459_vm10  ;;  %v6020_v8 = vld [vmem:[#allocation3 + $0x48] sm:$0xff] }
 0x4f1   : > { %5972 = vst [vmem:[#allocation3 + $0x90] sm:$0xf0] %v5962_v41  ;;  %5973 = vst [vmem:[#allocation3 + $0x98] sm:$0xf0] %v5963_v49  ;;  %7431 = vrot.lane.b32.xlu0 %v12245_v33, %s9835_s23  ;;  %v9497_v26 = vpack.c.bf16 %v6026_v9, %v6021_v32 }
 0x4f2   : > { %v5986_v15 = vpop.permute.xlu1 %5985  ;;  %vm13461_vm7 = vmmov %vm13460_vm9 }
 0x4f3   : > { %v5984_v28 = vpop.permute.xlu0 %5983 }
 0x4f4   : > { %v5995_v31 = vsel %vm13458_vm11, %v5984_v28, %v5986_v15  ;;  %7501 = vrot.lane.b32.xlu1 %v12069_v5, %s9837_s25  ;;  %v6027_v34 = vld [vmem:[#allocation3 + $0x80] sm:$0xff]  ;;  %vm13462_vm11 = vmmov %vm13461_vm7  ;;  %v6028_v17 = vld [vmem:[#allocation3 + $0x88] sm:$0xff] }
 0x4f5   : > { %6005 = vst [vmem:[#allocation3 + $0xa0] sm:$0xf] %v5995_v31  ;;  %7467 = vrot.lane.b32.xlu0 %v12255_v39, %s9836_s24  ;;  %v9495_v54 = vpack.c.bf16 %v6027_v34, %v6022_v57  ;;  %v9505_v25 = vpack.c.bf16 %v6028_v17, %v6023_v0  ;;  %v6015_v28 = vld [vmem:[#allocation3 + $0x20] sm:$0xff] }
 0x4f6   : > { %v5990_v44 = vpop.permute.xlu1 %5989  ;;  %v9508_v9 = vpack.c.bf16 %v6020_v8, %v6015_v28 }
 0x4f7   : > { %v5988_v30 = vpop.permute.xlu0 %5987  ;;  %9496 = vmatprep.subr.bf16.mxu1 %v9495_v54 }
 0x4f8   : > { %v5996_v27 = vsel %vm13459_vm10, %v5986_v15, %v5988_v30  ;;  %v5997_v42 = vsel %vm13460_vm9, %v5988_v30, %v5990_v44  ;;  %9498 = vmatpush1.bf16.msra.mxu1 %v9497_v26  ;;  %7537 = vrot.lane.b32.xlu1 %v12061_v11, %s9838_s26  ;;  %vm13463_vm10 = vcmask 785408   ;;  %v6029_v60 = vld [vmem:[#allocation3 + $0x90] sm:$0xff]  ;;  %v6030_v57 = vld [vmem:[#allocation3 + $0x98] sm:$0xff] }
 0x4f9   : > { %6006 = vst [vmem:[#allocation3 + $0xa8] sm:$0xf] %v5996_v27  ;;  %6007 = vst [vmem:[#allocation3 + $0xb0] sm:$0xf] %v5997_v42  ;;  %7503 = vrot.lane.b32.xlu0 %v12245_v33, %s9837_s25  ;;  %v5667_v42 = vld [vmem:[#allocation2 + $0x30] sm:$0xff] }
 0x4fa   : > { %v5994_v58 = vpop.permute.xlu1 %5993  ;;  %vm13464_vm9 = vmmov %vm13463_vm10  ;;  %v9513_v29 = vpack.c.bf16 %v5667_v42, %v12102_v40 }
 0x4fb   : > { %v5992_v37 = vpop.permute.xlu0 %5991 }
 0x4fc   : > { %v5998_v13 = vsel %vm13461_vm7, %v5990_v44, %v5992_v37  ;;  %v5999_v63 = vsel %vm13462_vm11, %v5992_v37, %v5994_v58  ;;  %7713 = vrot.lane.b32.xlu1 %v12056_v62, %s9844_s3  ;;  %v6031_v21 = vld [vmem:[#allocation3 + $0xa0] sm:$0xf]  ;;  %vm13465_vm7 = vmmov %vm13464_vm9  ;;  %v6025_v44 = vld [vmem:[#allocation3 + $0x70] sm:$0xff] }
 0x4fd   : > { %6008 = vst [vmem:[#allocation3 + $0xb8] sm:$0xf] %v5998_v13  ;;  %6009 = vst [vmem:[#allocation3 + $0xc0] sm:$0xf] %v5999_v63  ;;  %7539 = vrot.lane.b32.xlu0 %v12255_v39, %s9838_s26  ;;  %v9511_v26 = vpack.c.bf16 %v6030_v57, %v6025_v44  ;;  %v12329_v13 = vcombine.high %v12245_v33, %v12245_v33  ;;  %v5684_v57 = vld [vmem:[#allocation2 + $0xb8] sm:$0xf] }
 0x4fe   : > { %v6508_v47 = vpop.permute.xlu1 %6507  ;;  %vm13466_vm11 = vmmov %vm13465_vm7 }
 0x4ff   : > { %v6506_v16 = vpop.permute.xlu0 %6505 }
 0x500   : > { %v6517_v7 = vsel %vm13463_vm10, %v6506_v16, %v6508_v47  ;;  %7711 = vrot.lane.b32.xlu1 %v12048_v4, %s9844_s3  ;;  %v6032_v62 = vld [vmem:[#allocation3 + $0xa8] sm:$0xf]  ;;  %v9503_v4 = vpack.c.bf16 %v6029_v60, %v6024_v55  ;;  %vm13467_vm10 = vmmov %vm13465_vm7  ;;  %v6033_v49 = vld [vmem:[#allocation3 + $0xb0] sm:$0xf] }
 0x501   : > { %6527 = vst [vmem:[#allocation4] sm:$0xf] %v6517_v7  ;;  %7715 = vrot.lane.b32.xlu0 %v12061_v11, %s9844_s3  ;;  %8955 = vmatprep.subr.msk.mxu1 %vm844_vm13, %v6032_v62  ;;  %v5672_v7 = vld [vmem:[#allocation2 + $0x58] sm:$0xff] }
 0x502   : > { %8956 = vmatpush1.msk.msra.mxu1 %vm844_vm13, %v6031_v21  ;;  %v6512_v51 = vpop.permute.xlu1 %6511 }
 0x503   : > { %v6510_v46 = vpop.permute.xlu0 %6509  ;;  %9500 = vmatprep.subr.bf16.mxu1 %v9499_v1  ;;  %8957 = vmatmul.mubr.msk.f32.vlgmr.msra.gmra.mrb[10].mxu1 %vm840_vm15, %v12277_v12 }
 0x504   : > { %v6518_v18 = vsel %vm13464_vm9, %v6508_v47, %v6510_v46  ;;  %v6519_v50 = vsel %vm13465_vm7, %v6510_v46, %v6512_v51  ;;  %9502 = vmatpush1.bf16.msra.mxu1 %v9501_v38  ;;  %7575 = vrot.lane.b32.xlu1 %v12245_v33, %s9840_s27  ;;  %v6034_v10 = vld [vmem:[#allocation3 + $0xb8] sm:$0xf]  ;;  %vm13468_vm9 = vcmask 777216   ;;  %v6035_v63 = vld [vmem:[#allocation3 + $0xc0] sm:$0xf] }
 0x505   : > { %6528 = vst [vmem:[#allocation4 + $0x8] sm:$0xf] %v6518_v18  ;;  %6529 = vst [vmem:[#allocation4 + $0x10] sm:$0xf] %v6519_v50  ;;  %7573 = vrot.lane.b32.xlu0 %v12069_v5, %s9840_s27  ;;  %9504 = vmatprep.subr.bf16.mxu1 %v9503_v4  ;;  %v5669_v38 = vld [vmem:[#allocation2 + $0x40] sm:$0xff]  ;;  %v5668_v4 = vld [vmem:[#allocation2 + $0x38] sm:$0xff] }
 0x506   : > { %v6516_v24 = vpop.permute.xlu1 %6515  ;;  %6189 = vmatprep.mubr.f32.mxu1 %v9845_v48  ;;  %vm13469_vm7 = vmmov %vm13468_vm9  ;;  %v5681_v50 = vld [vmem:[#allocation2 + $0xa0] sm:$0xf]  ;;  %v9521_v0 = vpack.c.bf16 %v5669_v38, %v12134_v35 }
 0x507   : > { %v6514_v43 = vpop.permute.xlu0 %6513 }
 0x508   : > { %v6520_v3 = vsel %vm13466_vm11, %v6512_v51, %v6514_v43  ;;  %v6521_v2 = vsel %vm13467_vm10, %v6514_v43, %v6516_v24  ;;  %9506 = vmatpush1.bf16.msra.mxu1 %v9505_v25  ;;  %7611 = vrot.lane.b32.xlu1 %v12255_v39, %s9841_s28  ;;  %vm13470_vm11 = vmmov %vm13469_vm7  ;;  %v5682_v51 = vld [vmem:[#allocation2 + $0xa8] sm:$0xf]  ;;  %v12355_v24 = vld [vmem:[%s13221_s1] sm:$0xff]  ;;  %v9523_v43 = vpack.c.bf16 %v5668_v4, %v12123_v6 }
 0x509   : > { %6530 = vst [vmem:[#allocation4 + $0x18] sm:$0xf] %v6520_v3  ;;  %6531 = vst [vmem:[#allocation4 + $0x20] sm:$0xf] %v6521_v2  ;;  %7609 = vrot.lane.b32.xlu0 %v12061_v11, %s9841_s28  ;;  %8958 = vmatprep.subr.msk.mxu1 %vm844_vm13, %v6034_v10  ;;  %v5679_v25 = vld [vmem:[#allocation2 + $0x90] sm:$0xff]  ;;  %v5674_v3 = vld [vmem:[#allocation2 + $0x68] sm:$0xff]  ;;  %v12371_v6 = vcombine.low %v12121_v59, %v12121_v59 }
 0x50a   : > { %v6544_v56 = vpop.permute.xlu1 %6543  ;;  %vm13471_vm10 = vmmov %vm13469_vm7  ;;  %v9525_v10 = vpack.c.bf16 %v5679_v25, %v5674_v3 }
 0x50b   : > { %v6542_v41 = vpop.permute.xlu0 %6541 }
 0x50c   : > { %v6553_v15 = vsel %vm13468_vm9, %v6542_v41, %v6544_v56  ;;  %8959 = vmatpush1.msk.msra.mxu1 %vm844_vm13, %v6033_v49  ;;  %7647 = vrot.lane.b32.xlu1 %v12245_v33, %s9842_s29  ;;  %vm13472_vm9 = vmmov %vm13469_vm7  ;;  %v5673_v41 = vld [vmem:[#allocation2 + $0x60] sm:$0xff] }
 0x50d   : > { %6563 = vst [vmem:[#allocation4] sm:$0xf0] %v6553_v15  ;;  %7645 = vrot.lane.b32.xlu0 %v12069_v5, %s9842_s29  ;;  %9507 = vmatprep.subr.bf16.mxu1 %v9839_v45 }
 0x50e   : > { %8960 = vmatmul.mubr.msk.f32.vlgmr.msra.gmra.mrb[12].mxu1 %vm840_vm15, %v12277_v12  ;;  %v6548_v31 = vpop.permute.xlu1 %6547 }
 0x50f   : > { %9509 = vmatpush3.bf16.msra.mxu1 %v9508_v9  ;;  %v6546_v34 = vpop.permute.xlu0 %6545  ;;  %9225 = vmatprep.mubr.msk.f32.mxu1 %vm9846_vm8, %v9845_v48 }
 0x510   : > { %v6554_v54 = vsel %vm13469_vm7, %v6544_v56, %v6546_v34  ;;  %v6555_v32 = vsel %vm13470_vm11, %v6546_v34, %v6548_v31  ;;  %7683 = vrot.lane.b32.xlu1 %v12255_v39, %s9843_s30  ;;  %9510 = vmatprep.subr.bf16.mxu1 %v9839_v45  ;;  %v5666_v39 = vld [vmem:[#allocation2 + $0x28] sm:$0xff]  ;;  %vm13473_vm7 = vcmask 769024  }
 0x511   : > { %6564 = vst [vmem:[#allocation4 + $0x8] sm:$0xf0] %v6554_v54  ;;  %6565 = vst [vmem:[#allocation4 + $0x10] sm:$0xf0] %v6555_v32  ;;  %7681 = vrot.lane.b32.xlu0 %v12061_v11, %s9843_s30  ;;  %v5677_v11 = vld [vmem:[#allocation2 + $0x80] sm:$0xff]  ;;  %v9515_v23 = vpack.c.bf16 %v5666_v39, %v12095_v14  ;;  %v5671_v14 = vld [vmem:[#allocation2 + $0x50] sm:$0xff] }
 0x512   : > { %v6552_v30 = vpop.permute.xlu1 %6551  ;;  %v9519_v21 = vpack.c.bf16 %v5676_v36, %v5671_v14  ;;  %vm13474_vm11 = vmmov %vm13473_vm7  ;;  %v5678_v56 = vld [vmem:[#allocation2 + $0x88] sm:$0xff]  ;;  %v5683_v54 = vld [vmem:[#allocation2 + $0xb0] sm:$0xf] }
 0x513   : > { %9512 = vmatpush3.bf16.msra.mxu1 %v9511_v26  ;;  %v6550_v27 = vpop.permute.xlu0 %6549  ;;  %v9527_v49 = vpack.c.bf16 %v5678_v56, %v5673_v41  ;;  %v12466_v41 = vld [vmem:[%s9885_s14 + $0x60] sm:$0xff] }
 0x514   : > { %v6556_v58 = vsel %vm13471_vm10, %v6548_v31, %v6550_v27  ;;  %v6557_v37 = vsel %vm13472_vm9, %v6550_v27, %v6552_v30  ;;  %7719 = vrot.lane.b32.xlu1 %v12245_v33, %s9844_s3  ;;  %9223 = vmatprep.subr.mxu1 %v9845_v48  ;;  %vm13475_vm10 = vmmov %vm13473_vm7  ;;  %v5680_v27 = vld [vmem:[#allocation2 + $0x98] sm:$0xff] }
 0x515   : > { %6566 = vst [vmem:[#allocation4 + $0x18] sm:$0xf0] %v6556_v58  ;;  %6567 = vst [vmem:[#allocation4 + $0x20] sm:$0xf0] %v6557_v37  ;;  %7717 = vrot.lane.b32.xlu0 %v12069_v5, %s9844_s3  ;;  %v9517_v5 = vpack.c.bf16 %v5677_v11, %v5672_v7  ;;  %v5685_v7 = vld [vmem:[#allocation2 + $0xc0] sm:$0xf] }
 0x516   : > { %v6580_v47 = vpop.permute.xlu1 %6579  ;;  %vm13476_vm9 = vmmov %vm13473_vm7 }
 0x517   : > { %9224 = vmatpush3.msk.msra.mxu1 %vm844_vm13, %v6035_v63  ;;  %v6578_v16 = vpop.permute.xlu0 %6577  ;;  %v12402_v63 = vcombine.low %v12093_v20, %v12093_v20 }
 0x518   : > { %v6589_v62 = vsel %vm13473_vm7, %v6578_v16, %v6580_v47  ;;  %9514 = vmatprep.subr.bf16.mxu1 %v9513_v29  ;;  %9226 = vmatmul.mubr.msk.f32.vlgmr.msra.gmra.mrb[14].mxu1 %vm840_vm15, %v12277_v12  ;;  %v6822_v16 = vld [vmem:[#allocation4 + $0x8] sm:$0xff] }
 0x519   : > { %6599 = vst [vmem:[#allocation4 + $0x28] sm:$0xf] %v6589_v62  ;;  %9516 = vmatpush1.bf16.msra.mxu1 %v9515_v23  ;;  %7469 = vrot.lane.b32.xlu1 %v12245_v33, %s9836_s24  ;;  %s13491_s24 = smov 87  }
 0x51a   : > { %7433 = vrot.lane.b32.xlu0 %v12329_v13, %s9835_s23  ;;  %9518 = vmatprep.subr.bf16.mxu1 %v9517_v5  ;;  %v6584_v40 = vpop.permute.xlu1 %6583  ;;  %v6821_v5 = vld [vmem:[#allocation4] sm:$0xff]  ;;  %s13489_s23 = smov 88  }
 0x51b   : > { %v6582_v60 = vpop.permute.xlu0 %6581  ;;  %6348 = vmatprep.mubr.f32.mxu1 %v9845_v48 }
 0x51c   : > { %v6590_v1 = vsel %vm13474_vm11, %v6580_v47, %v6582_v60  ;;  %v6591_v22 = vsel %vm13475_vm10, %v6582_v60, %v6584_v40  ;;  %vm13477_vm11 = vcmask 621568  }
 0x51d   : > { %6600 = vst [vmem:[#allocation4 + $0x30] sm:$0xf] %v6590_v1  ;;  %6601 = vst [vmem:[#allocation4 + $0x38] sm:$0xf] %v6591_v22  ;;  %9520 = vmatpush1.bf16.msra.mxu1 %v9519_v21  ;;  %7541 = vrot.lane.b32.xlu1 %v12245_v33, %s9838_s26 }
 0x51e   : > { %7505 = vrot.lane.b32.xlu0 %v12329_v13, %s9837_s25  ;;  %8963 = vmatprep.subr.msk.mxu1 %vm844_vm13, %v5682_v51  ;;  %v6588_v55 = vpop.permute.xlu1 %6587  ;;  %vm13478_vm10 = vmmov %vm13477_vm11  ;;  %s13500_s25 = smov 86  }
 0x51f   : > { %v6586_v46 = vpop.permute.xlu0 %6585 }
 0x520   : > { %v6592_v17 = vsel %vm13476_vm9, %v6584_v40, %v6586_v46  ;;  %v6593_v18 = vsel %vm13473_vm7, %v6586_v46, %v6588_v55  ;;  %vm13479_vm9 = vmmov %vm13478_vm10 }
 0x521   : > { %6602 = vst [vmem:[#allocation4 + $0x40] sm:$0xf] %v6592_v17  ;;  %6603 = vst [vmem:[#allocation4 + $0x48] sm:$0xf] %v6593_v18  ;;  %8964 = vmatpush1.msk.msra.mxu1 %vm844_vm13, %v5681_v50  ;;  %7613 = vrot.lane.b32.xlu1 %v12245_v33, %s9841_s28 }
 0x522   : > { %7577 = vrot.lane.b32.xlu0 %v12329_v13, %s9840_s27  ;;  %9522 = vmatprep.subr.bf16.mxu1 %v9521_v0  ;;  %v6616_v35 = vpop.permute.xlu1 %6615  ;;  %vm13480_vm7 = vmmov %vm13479_vm9 }
 0x523   : > { %8965 = vmatmul.mubr.msk.f32.vlgmr.msra.gmra.mrb[10].mxu1 %vm840_vm15, %v12355_v24  ;;  %v6614_v2 = vpop.permute.xlu0 %6613 }
 0x524   : > { %9524 = vmatpush1.bf16.msra.mxu1 %v9523_v43  ;;  %v6625_v8 = vsel %vm13477_vm11, %v6614_v2, %v6616_v35  ;;  %6419 = vmatprep.mubr.f32.mxu1 %v9845_v48  ;;  %vm13481_vm11 = vmmov %vm13480_vm7 }
 0x525   : > { %6635 = vst [vmem:[#allocation4 + $0x28] sm:$0xf0] %v6625_v8  ;;  %9526 = vmatprep.subr.bf16.mxu1 %v9525_v10  ;;  %7685 = vrot.lane.b32.xlu1 %v12245_v33, %s9843_s30  ;;  %v5670_v33 = vld [vmem:[#allocation2 + $0x48] sm:$0xff] }
 0x526   : > { %7649 = vrot.lane.b32.xlu0 %v12329_v13, %s9842_s29  ;;  %v6620_v15 = vpop.permute.xlu1 %6619  ;;  %v9530_v30 = vpack.c.bf16 %v5670_v33, %v12150_v53  ;;  %v5675_v53 = vld [vmem:[#allocation2 + $0x70] sm:$0xff] }
 0x527   : > { %v6618_v28 = vpop.permute.xlu0 %6617  ;;  %v9533_v37 = vpack.c.bf16 %v5680_v27, %v5675_v53 }
 0x528   : > { %9528 = vmatpush1.bf16.msra.mxu1 %v9527_v49  ;;  %v6626_v9 = vsel %vm13478_vm10, %v6616_v35, %v6618_v28  ;;  %v6627_v31 = vsel %vm13479_vm9, %v6618_v28, %v6620_v15  ;;  %vm13482_vm10 = vcmask 916480   ;;  %vm13483_vm9 = vcmask 908288  }
 0x529   : > { %6636 = vst [vmem:[#allocation4 + $0x30] sm:$0xf0] %v6626_v9  ;;  %6637 = vst [vmem:[#allocation4 + $0x38] sm:$0xf0] %v6627_v31  ;;  %8966 = vmatprep.subr.msk.mxu1 %vm844_vm13, %v5684_v57  ;;  %7113 = vrot.lane.b32.xlu1 %v12371_v6, %s9827_s15  ;;  %v12474_v31 = vcombine.low %v12466_v41, %v12466_v41 }
 0x52a   : > { %7111 = vrot.lane.b32.xlu0 %v12093_v20, %s9827_s15  ;;  %v6624_v34 = vpop.permute.xlu1 %6623 }
 0x52b   : > { %v6622_v32 = vpop.permute.xlu0 %6621 }
 0x52c   : > { %8967 = vmatpush1.msk.msra.mxu1 %vm844_vm13, %v5683_v54  ;;  %v6628_v44 = vsel %vm13480_vm7, %v6620_v15, %v6622_v32  ;;  %v6629_v26 = vsel %vm13481_vm11, %v6622_v32, %v6624_v34  ;;  %v6826_v23 = vld [vmem:[#allocation4 + $0x28] sm:$0xff]  ;;  %vm13484_vm7 = vcmask 900096   ;;  %vm13485_vm11 = vmmov %vm13482_vm10 }
 0x52d   : > { %6638 = vst [vmem:[#allocation4 + $0x40] sm:$0xf0] %v6628_v44  ;;  %6639 = vst [vmem:[#allocation4 + $0x48] sm:$0xf0] %v6629_v26  ;;  %9529 = vmatprep.subr.bf16.mxu1 %v9839_v45  ;;  %8968 = vmatmul.mubr.msk.f32.vlgmr.msra.gmra.mrb[12].mxu1 %vm840_vm15, %v12355_v24  ;;  %v9537_v40 = vpack.c.bf16 %v6826_v23, %v6821_v5 }
 0x52e   : > { %9531 = vmatpush3.bf16.msra.mxu1 %v9530_v30  ;;  %7149 = vrot.lane.b32.xlu1 %v12121_v59, %s9828_s16  ;;  %v7426_v42 = vpop.permute.xlu1 %7425 }
 0x52f   : > { %7147 = vrot.lane.b32.xlu0 %v12099_v52, %s9828_s16  ;;  %v12393_v58 = vpop.permute.xlu0 %6649  ;;  %9532 = vmatprep.subr.bf16.mxu1 %v9839_v45 }
 0x530   : > { %9238 = vmatprep.mubr.msk.f32.mxu1 %vm9846_vm8, %v9845_v48  ;;  %v6827_v11 = vld [vmem:[#allocation4 + $0x30] sm:$0xff] }
 0x531   : > { %v9535_v62 = vpack.c.bf16 %v6827_v11, %v6822_v16 }
 0x532   : > { %9534 = vmatpush3.bf16.msra.mxu1 %v9533_v37  ;;  %7185 = vrot.lane.b32.xlu1 %v12371_v6, %s9829_s17  ;;  %v7462_v39 = vpop.permute.xlu1 %7461 }
 0x533   : > { %7183 = vrot.lane.b32.xlu0 %v12093_v20, %s9829_s17  ;;  %v12406_v47 = vpop.permute.xlu0 %7427  ;;  %9236 = vmatprep.subr.mxu1 %v9845_v48 }
 0x534   : > { %v7436_v29 = vsel %vm13482_vm10, %v7426_v42, %v12406_v47  ;;  %vm13486_vm10 = vcmask 752640  }
 0x535   : > { %7446 = vst [vmem:[#allocation3 + $0x8] sm:$0xf] %v7436_v29 }
 0x536   : > { %9237 = vmatpush3.msk.msra.mxu1 %vm844_vm13, %v5685_v7  ;;  %7145 = vrot.lane.b32.xlu1 %v12093_v20, %s9828_s16  ;;  %v7498_v36 = vpop.permute.xlu1 %7497 }
 0x537   : > { %7109 = vrot.lane.b32.xlu0 %v12402_v63, %s9827_s15  ;;  %9536 = vmatprep.subr.bf16.mxu1 %v9535_v62  ;;  %v12416_v14 = vpop.permute.xlu0 %7463 }
 0x538   : > { %9239 = vmatmul.mubr.msk.f32.vlgmr.msra.gmra.mrb[14].mxu1 %vm840_vm15, %v12355_v24  ;;  %v7472_v60 = vsel %vm13483_vm9, %v7462_v39, %v12416_v14  ;;  %vm13487_vm9 = vmmov %vm13484_vm7 }
 0x539   : > { %9538 = vmatpush1.bf16.msra.mxu1 %v9537_v40  ;;  %7482 = vst [vmem:[#allocation3 + $0x8] sm:$0xf0] %v7472_v60  ;;  %6928 = vmatprep.mubr.f32.mxu1 %v9845_v48 }
 0x53a   : > { %7721 = vrot.lane.b32.xlu1 %v12329_v13, %s9844_s3  ;;  %v7534_v21 = vpop.permute.xlu1 %7533 }
 0x53b   : > { %7181 = vrot.lane.b32.xlu0 %v12402_v63, %s9829_s17  ;;  %v12427_v1 = vpop.permute.xlu0 %7499 }
 0x53c   : > { %v7508_v22 = vsel %vm13484_vm7, %v7498_v36, %v12427_v1  ;;  %vm13488_vm7 = vcmask 908288  }
 0x53d   : > { %7518 = vst [vmem:[#allocation3 + $0x30] sm:$0xf] %v7508_v22 }
 0x53e   : > { %7221 = vrot.lane.b32.xlu1 %v12121_v59, %s9830_s18  ;;  %v7424_v51 = vpop.permute.xlu1 %7423 }
 0x53f   : > { %7219 = vrot.lane.b32.xlu0 %v12099_v52, %s9830_s18  ;;  %v7435_v38 = vsel %vm13485_vm11, %v7424_v51, %v7426_v42  ;;  %v12436_v13 = vpop.permute.xlu0 %7535  ;;  %vm13490_vm11 = vmmov %vm13486_vm10 }
 0x540   : > { %7445 = vst [vmem:[#allocation3] sm:$0xf] %v7435_v38  ;;  %v7544_v55 = vsel %vm13486_vm10, %v7534_v21, %v12436_v13  ;;  %v7740_v25 = vld [vmem:[#allocation3 + $0x8] sm:$0xff]  ;;  %vm13492_vm10 = vcmask 744448  }
 0x541   : > { %7554 = vst [vmem:[#allocation3 + $0x30] sm:$0xf0] %v7544_v55 }
 0x542   : > { %7257 = vrot.lane.b32.xlu1 %v12371_v6, %s9831_s19  ;;  %v7496_v46 = vpop.permute.xlu1 %7495 }
 0x543   : > { %7255 = vrot.lane.b32.xlu0 %v12093_v20, %s9831_s19  ;;  %v7507_v4 = vsel %vm13487_vm9, %v7496_v46, %v7498_v36  ;;  %v7460_v17 = vpop.permute.xlu0 %7459  ;;  %vm13493_vm9 = vcmask 736256  }
 0x544   : > { %7517 = vst [vmem:[#allocation3 + $0x28] sm:$0xf] %v7507_v4  ;;  %v7471_v18 = vsel %vm13488_vm7, %v7460_v17, %v7462_v39  ;;  %vm13494_vm7 = vcmask 588800  }
 0x545   : > { %7481 = vst [vmem:[#allocation3] sm:$0xf0] %v7471_v18 }
 0x546   : > { %7293 = vrot.lane.b32.xlu1 %v12121_v59, %s13489_s23  ;;  %v7570_v50 = vpop.permute.xlu1 %7569 }
 0x547   : > { %7291 = vrot.lane.b32.xlu0 %v12099_v52, %s13489_s23  ;;  %v7532_v0 = vpop.permute.xlu0 %7531 }
 0x548   : > { %v7543_v24 = vsel %vm13490_vm11, %v7532_v0, %v7534_v21  ;;  %v7745_v43 = vld [vmem:[#allocation3 + $0x30] sm:$0xff]  ;;  %vm13495_vm11 = vmmov %vm13492_vm10 }
 0x549   : > { %7553 = vst [vmem:[#allocation3 + $0x28] sm:$0xf0] %v7543_v24  ;;  %v9557_v35 = vpack.c.bf16 %v7745_v43, %v7740_v25  ;;  %v12564_v43 = vcombine.high %v12466_v41, %v12466_v41 }
 0x54a   : > { %7329 = vrot.lane.b32.xlu1 %v12371_v6, %s13491_s24  ;;  %v7606_v3 = vpop.permute.xlu1 %7605 }
 0x54b   : > { %7327 = vrot.lane.b32.xlu0 %v12093_v20, %s13491_s24  ;;  %v12455_v2 = vpop.permute.xlu0 %7571  ;;  %9558 = vmatprep.subr.bf16.mxu0 %v9557_v35 }
 0x54c   : > { %v7580_v10 = vsel %vm13492_vm10, %v7570_v50, %v12455_v2  ;;  %v7739_v49 = vld [vmem:[#allocation3] sm:$0xff]  ;;  %vm13496_vm10 = vcmask 580608  }
 0x54d   : > { %7590 = vst [vmem:[#allocation3 + $0x58] sm:$0xf] %v7580_v10 }
 0x54e   : > { %7253 = vrot.lane.b32.xlu1 %v12402_v63, %s9831_s19  ;;  %v7642_v56 = vpop.permute.xlu1 %7641 }
 0x54f   : > { %7217 = vrot.lane.b32.xlu0 %v12093_v20, %s9830_s18  ;;  %v12463_v8 = vpop.permute.xlu0 %7607 }
 0x550   : > { %v7616_v6 = vsel %vm13493_vm9, %v7606_v3, %v12463_v8  ;;  %v7744_v15 = vld [vmem:[#allocation3 + $0x28] sm:$0xff]  ;;  %vm13497_vm9 = vmmov %vm13494_vm7 }
 0x551   : > { %7626 = vst [vmem:[#allocation3 + $0x58] sm:$0xf0] %v7616_v6  ;;  %v9559_v28 = vpack.c.bf16 %v7744_v15, %v7739_v49 }
 0x552   : > { %7325 = vrot.lane.b32.xlu1 %v12402_v63, %s13491_s24  ;;  %v7678_v9 = vpop.permute.xlu1 %7677 }
 0x553   : > { %7289 = vrot.lane.b32.xlu0 %v12093_v20, %s13489_s23  ;;  %v12478_v57 = vpop.permute.xlu0 %7643  ;;  %9560 = vmatpush1.bf16.msra.mxu0 %v9559_v28 }
 0x554   : > { %v7652_v33 = vsel %vm13494_vm7, %v7642_v56, %v12478_v57  ;;  %vm13498_vm7 = vcmask 736256  }
 0x555   : > { %7662 = vst [vmem:[#allocation3 + $0x80] sm:$0xf] %v7652_v33 }
 0x556   : > { %7117 = vrot.lane.b32.xlu1 %v12474_v31, %s9827_s15  ;;  %v7568_v34 = vpop.permute.xlu1 %7567 }
 0x557   : > { %7115 = vrot.lane.b32.xlu0 %v12121_v59, %s9827_s15  ;;  %v7579_v54 = vsel %vm13495_vm11, %v7568_v34, %v7570_v50  ;;  %v12487_v32 = vpop.permute.xlu0 %7679  ;;  %vm13499_vm11 = vcmask 916480  }
 0x558   : > { %7589 = vst [vmem:[#allocation3 + $0x50] sm:$0xf] %v7579_v54  ;;  %v7688_v44 = vsel %vm13496_vm10, %v7678_v9, %v12487_v32  ;;  %v7750_v63 = vld [vmem:[#allocation3 + $0x58] sm:$0xff] }
 0x559   : > { %7698 = vst [vmem:[#allocation3 + $0x80] sm:$0xf0] %v7688_v44 }
 0x55a   : > { %7153 = vrot.lane.b32.xlu1 %v12466_v41, %s9828_s16  ;;  %v7640_v26 = vpop.permute.xlu1 %7639 }
 0x55b   : > { %7151 = vrot.lane.b32.xlu0 %v12127_v61, %s9828_s16  ;;  %v7651_v30 = vsel %vm13497_vm9, %v7640_v26, %v7642_v56  ;;  %v7604_v27 = vpop.permute.xlu0 %7603  ;;  %vm13501_vm9 = vcmask 908288  }
 0x55c   : > { %7661 = vst [vmem:[#allocation3 + $0x78] sm:$0xf] %v7651_v30  ;;  %v7615_v42 = vsel %vm13498_vm7, %v7604_v27, %v7606_v3  ;;  %vm13502_vm7 = vmmov %vm13499_vm11 }
 0x55d   : > { %7625 = vst [vmem:[#allocation3 + $0x50] sm:$0xf0] %v7615_v42  ;;  %v12604_v42 = vld [vmem:[%s9885_s14 + $0x5c] sm:$0xff] }
 0x55e   : > { %7189 = vrot.lane.b32.xlu1 %v12474_v31, %s9829_s17  ;;  %v7430_v53 = vpop.permute.xlu1 %7429 }
 0x55f   : > { %7187 = vrot.lane.b32.xlu0 %v12121_v59, %s9829_s17  ;;  %v7437_v37 = vsel %vm13499_vm11, %v12406_v47, %v7430_v53  ;;  %v7676_v39 = vpop.permute.xlu0 %7675  ;;  %vm13503_vm11 = vcmask 900096  }
 0x560   : > { %7447 = vst [vmem:[#allocation3 + $0x10] sm:$0xf] %v7437_v37  ;;  %v7687_v11 = vsel %vm13496_vm10, %v7676_v39, %v7678_v9  ;;  %v7755_v29 = vld [vmem:[#allocation3 + $0x80] sm:$0xff]  ;;  %vm13504_vm10 = vmmov %vm13501_vm9  ;;  %v12616_v39 = vld [vmem:[%s9885_s14 + $0x54] sm:$0xff] }
 0x561   : > { %7697 = vst [vmem:[#allocation3 + $0x78] sm:$0xf0] %v7687_v11  ;;  %v9561_v16 = vpack.c.bf16 %v7755_v29, %v7750_v63 }
 0x562   : > { %7365 = vrot.lane.b32.xlu1 %v12121_v59, %s13500_s25  ;;  %v7466_v23 = vpop.permute.xlu1 %7465 }
 0x563   : > { %7363 = vrot.lane.b32.xlu0 %v12099_v52, %s13500_s25  ;;  %v7473_v7 = vsel %vm13501_vm9, %v12416_v14, %v7466_v23  ;;  %v12510_v62 = vpop.permute.xlu0 %7431  ;;  %9562 = vmatprep.subr.bf16.mxu0 %v9561_v16  ;;  %vm13505_vm9 = vcmask 752640  }
 0x564   : > { %7483 = vst [vmem:[#allocation3 + $0x10] sm:$0xf0] %v7473_v7  ;;  %v7438_v47 = vsel %vm13502_vm7, %v7430_v53, %v12510_v62  ;;  %v7749_v14 = vld [vmem:[#allocation3 + $0x50] sm:$0xff]  ;;  %vm13506_vm7 = vmmov %vm13503_vm11 }
 0x565   : > { %7448 = vst [vmem:[#allocation3 + $0x18] sm:$0xf] %v7438_v47 }
 0x566   : > { %7223 = vrot.lane.b32.xlu1 %v12127_v61, %s9830_s18  ;;  %v7502_v5 = vpop.permute.xlu1 %7501 }
 0x567   : > { %7361 = vrot.lane.b32.xlu0 %v12093_v20, %s13500_s25  ;;  %v7509_v52 = vsel %vm13503_vm11, %v12427_v1, %v7502_v5  ;;  %v12520_v36 = vpop.permute.xlu0 %7467  ;;  %vm13507_vm11 = vmmov %vm13505_vm9 }
 0x568   : > { %7519 = vst [vmem:[#allocation3 + $0x38] sm:$0xf] %v7509_v52  ;;  %v7474_v40 = vsel %vm13504_vm10, %v7466_v23, %v12520_v36  ;;  %v7754_v60 = vld [vmem:[#allocation3 + $0x78] sm:$0xff]  ;;  %vm13508_vm10 = vcmask 572416  }
 0x569   : > { %7484 = vst [vmem:[#allocation3 + $0x18] sm:$0xf0] %v7474_v40  ;;  %v9563_v21 = vpack.c.bf16 %v7754_v60, %v7749_v14 }
 0x56a   : > { %7259 = vrot.lane.b32.xlu1 %v12121_v59, %s9831_s19  ;;  %v7538_v22 = vpop.permute.xlu1 %7537 }
 0x56b   : > { %7225 = vrot.lane.b32.xlu0 %v12466_v41, %s9830_s18  ;;  %v7545_v20 = vsel %vm13505_vm9, %v12436_v13, %v7538_v22  ;;  %v12530_v1 = vpop.permute.xlu0 %7503  ;;  %9564 = vmatpush1.bf16.msra.mxu0 %v9563_v21  ;;  %vm13509_vm9 = vmmov %vm13508_vm10  ;;  %v7741_v9 = vld [vmem:[#allocation3 + $0x10] sm:$0xff] }
 0x56c   : > { %7555 = vst [vmem:[#allocation3 + $0x38] sm:$0xf0] %v7545_v20  ;;  %v7510_v51 = vsel %vm13506_vm7, %v7502_v5, %v12530_v1  ;;  %vm13510_vm7 = vcmask 744448  }
 0x56d   : > { %7520 = vst [vmem:[#allocation3 + $0x40] sm:$0xf] %v7510_v51 }
 0x56e   : > { %7295 = vrot.lane.b32.xlu1 %v12127_v61, %s13489_s23  ;;  %v7714_v38 = vpop.permute.xlu1 %7713 }
 0x56f   : > { %7261 = vrot.lane.b32.xlu0 %v12474_v31, %s9831_s19  ;;  %v12538_v55 = vpop.permute.xlu0 %7539 }
 0x570   : > { %v7546_v13 = vsel %vm13507_vm11, %v7538_v22, %v12538_v55  ;;  %vm13511_vm11 = vmmov %vm13510_vm7  ;;  %v7742_v6 = vld [vmem:[#allocation3 + $0x18] sm:$0xff] }
 0x571   : > { %7556 = vst [vmem:[#allocation3 + $0x40] sm:$0xf0] %v7546_v13  ;;  %v12654_v13 = vld [vmem:[%s9885_s14 + $0x68] sm:$0xff] }
 0x572   : > { %7331 = vrot.lane.b32.xlu1 %v12121_v59, %s13491_s24  ;;  %v7712_v46 = vpop.permute.xlu1 %7711 }
 0x573   : > { %7297 = vrot.lane.b32.xlu0 %v12466_v41, %s13489_s23  ;;  %v7723_v4 = vsel %vm13508_vm10, %v7712_v46, %v7714_v38  ;;  %v7716_v17 = vpop.permute.xlu0 %7715  ;;  %vm13512_vm10 = vcmask 736256   ;;  %v7746_v49 = vld [vmem:[#allocation3 + $0x38] sm:$0xff] }
 0x574   : > { %7733 = vst [vmem:[#allocation3 + $0xa0] sm:$0xf] %v7723_v4  ;;  %v7724_v18 = vsel %vm13509_vm9, %v7714_v38, %v7716_v17  ;;  %vm13513_vm9 = vmmov %vm13512_vm10  ;;  %v6682_v38 = vcombine.low %v12616_v39, %v12616_v39 }
 0x575   : > { %7734 = vst [vmem:[#allocation3 + $0xa8] sm:$0xf] %v7724_v18 }
 0x576   : > { %7367 = vrot.lane.b32.xlu1 %v12127_v61, %s13500_s25  ;;  %v12550_v50 = vpop.permute.xlu1 %7575 }
 0x577   : > { %7333 = vrot.lane.b32.xlu0 %v12474_v31, %s13491_s24  ;;  %v7574_v59 = vpop.permute.xlu0 %7573  ;;  %v9567_v31 = vpack.c.bf16 %v7746_v49, %v7741_v9 }
 0x578   : > { %v7581_v0 = vsel %vm13510_vm7, %v12455_v2, %v7574_v59  ;;  %v7582_v24 = vsel %vm13511_vm11, %v7574_v59, %v12550_v50  ;;  %v7747_v61 = vld [vmem:[#allocation3 + $0x40] sm:$0xff]  ;;  %vm13514_vm7 = vcmask 588800   ;;  %v12664_v59 = vcombine.high %v12654_v13, %v12654_v13 }
 0x579   : > { %7591 = vst [vmem:[#allocation3 + $0x60] sm:$0xf] %v7581_v0  ;;  %7592 = vst [vmem:[#allocation3 + $0x68] sm:$0xf] %v7582_v24  ;;  %v9565_v15 = vpack.c.bf16 %v7747_v61, %v7742_v6 }
 0x57a   : > { %7119 = vrot.lane.b32.xlu1 %v12466_v41, %s9827_s15  ;;  %v12560_v25 = vpop.permute.xlu1 %7611  ;;  %vm13515_vm11 = vmmov %vm13514_vm7 }
 0x57b   : > { %7369 = vrot.lane.b32.xlu0 %v12466_v41, %s13500_s25  ;;  %v7610_v35 = vpop.permute.xlu0 %7609  ;;  %v7759_v3 = vld [vmem:[#allocation3 + $0xa0] sm:$0xf] }
 0x57c   : > { %v7617_v2 = vsel %vm13512_vm10, %v12463_v8, %v7610_v35  ;;  %v7618_v10 = vsel %vm13513_vm9, %v7610_v35, %v12560_v25  ;;  %v7760_v56 = vld [vmem:[#allocation3 + $0xa8] sm:$0xf]  ;;  %vm13516_vm10 = vcmask 580608  }
 0x57d   : > { %7627 = vst [vmem:[#allocation3 + $0x60] sm:$0xf0] %v7617_v2  ;;  %7628 = vst [vmem:[#allocation3 + $0x68] sm:$0xf0] %v7618_v10  ;;  %8981 = vmatprep.subr.msk.mxu0 %vm844_vm13, %v7760_v56  ;;  %v12678_v35 = vld [vmem:[%s9885_s14 + $0x70] sm:$0xff] }
 0x57e   : > { %7191 = vrot.lane.b32.xlu1 %v12466_v41, %s9829_s17  ;;  %8982 = vmatpush1.msk.msra.mxu0 %vm844_vm13, %v7759_v3  ;;  %v12576_v28 = vpop.permute.xlu1 %7647  ;;  %vm13517_vm9 = vmmov %vm13516_vm10  ;;  %v12688_v49 = vcombine.low %v12678_v35, %v12678_v35 }
 0x57f   : > { %7155 = vrot.lane.b32.xlu0 %v12564_v43, %s9828_s16  ;;  %v7646_v8 = vpop.permute.xlu0 %7645  ;;  %9566 = vmatprep.subr.bf16.mxu0 %v9565_v15 }
 0x580   : > { %v7653_v33 = vsel %vm13514_vm7, %v12478_v57, %v7646_v8  ;;  %v7654_v34 = vsel %vm13515_vm11, %v7646_v8, %v12576_v28  ;;  %8983 = vmatmul.mubr.msk.f32.vlgmr.msra.gmra.mrb[10].mxu0 %vm840_vm15, %v12277_v12  ;;  %vm13518_vm7 = vcmask 572416  }
 0x581   : > { %7663 = vst [vmem:[#allocation3 + $0x88] sm:$0xf] %v7653_v33  ;;  %7664 = vst [vmem:[#allocation3 + $0x90] sm:$0xf] %v7654_v34  ;;  %9568 = vmatpush1.bf16.msra.mxu0 %v9567_v31  ;;  %7917 = vmatprep.mubr.f32.mxu0 %v9845_v48 }
 0x582   : > { %7263 = vrot.lane.b32.xlu1 %v12466_v41, %s9831_s19  ;;  %v12589_v54 = vpop.permute.xlu1 %7683  ;;  %vm13519_vm11 = vmmov %vm13518_vm7 }
 0x583   : > { %7227 = vrot.lane.b32.xlu0 %v12564_v43, %s9830_s18  ;;  %v7682_v57 = vpop.permute.xlu0 %7681 }
 0x584   : > { %v7689_v44 = vsel %vm13516_vm10, %v12487_v32, %v7682_v57  ;;  %v7690_v26 = vsel %vm13517_vm9, %v7682_v57, %v12589_v54  ;;  %v7752_v11 = vld [vmem:[#allocation3 + $0x68] sm:$0xff]  ;;  %vm13520_vm10 = vcmask 908288   ;;  %v7751_v23 = vld [vmem:[#allocation3 + $0x60] sm:$0xff]  ;;  %vm13521_vm9 = vcmask 916480  }
 0x585   : > { %7699 = vst [vmem:[#allocation3 + $0x88] sm:$0xf0] %v7689_v44  ;;  %7700 = vst [vmem:[#allocation3 + $0x90] sm:$0xf0] %v7690_v26  ;;  %v12709_v26 = vcombine.low %v12654_v13, %v12654_v13 }
 0x586   : > { %7335 = vrot.lane.b32.xlu1 %v12466_v41, %s13491_s24  ;;  %v12599_v30 = vpop.permute.xlu1 %7719  ;;  %v6683_v41 = vcombine.low %v12604_v42, %v12604_v42 }
 0x587   : > { %7299 = vrot.lane.b32.xlu0 %v12564_v43, %s13489_s23  ;;  %v7718_v27 = vpop.permute.xlu0 %7717 }
 0x588   : > { %v7725_v53 = vsel %vm13518_vm7, %v7716_v17, %v7718_v27  ;;  %v7726_v32 = vsel %vm13519_vm11, %v7718_v27, %v12599_v30  ;;  %vm13522_vm7 = vcmask 752640   ;;  %vm13523_vm11 = vcmask 900096  }
 0x589   : > { %7735 = vst [vmem:[#allocation3 + $0xb0] sm:$0xf] %v7725_v53  ;;  %7736 = vst [vmem:[#allocation3 + $0xb8] sm:$0xf] %v7726_v32 }
 0x58a   : > { %6653 = vrot.lane.b32.xlu1 %v12604_v42, %s13352_s8 }
 0x58b   : > { %6651 = vrot.lane.b32.xlu0 %v12043_v19, %s13352_s8  ;;  %v7470_v37 = vpop.permute.xlu1 %7469 }
 0x58c   : > { %v7475_v63 = vsel %vm13520_vm10, %v12520_v36, %v7470_v37  ;;  %v7434_v29 = vpop.permute.xlu0 %7433  ;;  %v7757_v16 = vld [vmem:[#allocation3 + $0x90] sm:$0xff]  ;;  %v7756_v7 = vld [vmem:[#allocation3 + $0x88] sm:$0xff]  ;;  %v12627_v36 = vcombine.high %v12616_v39, %v12616_v39  ;;  %vm13524_vm10 = vcmask 736256  }
 0x58d   : > { %7485 = vst [vmem:[#allocation3 + $0x20] sm:$0xf0] %v7475_v63  ;;  %v7439_v47 = vsel %vm13521_vm9, %v12510_v62, %v7434_v29  ;;  %v9569_v5 = vpack.c.bf16 %v7757_v16, %v7752_v11  ;;  %v9571_v52 = vpack.c.bf16 %v7756_v7, %v7751_v23  ;;  %vm13525_vm9 = vcmask 744448  }
 0x58e   : > { %7449 = vst [vmem:[#allocation3 + $0x20] sm:$0xf] %v7439_v47  ;;  %6689 = vrot.lane.b32.xlu1 %v6683_v41, %s13358_s6 }
 0x58f   : > { %6687 = vrot.lane.b32.xlu0 %v12616_v39, %s13358_s6  ;;  %v7542_v19 = vpop.permute.xlu1 %7541  ;;  %9570 = vmatprep.subr.bf16.mxu0 %v9569_v5 }
 0x590   : > { %v7547_v40 = vsel %vm13522_vm7, %v12538_v55, %v7542_v19  ;;  %v7506_v14 = vpop.permute.xlu0 %7505  ;;  %9572 = vmatpush1.bf16.msra.mxu0 %v9571_v52  ;;  %v7762_v62 = vld [vmem:[#allocation3 + $0xb8] sm:$0xf]  ;;  %v7761_v22 = vld [vmem:[#allocation3 + $0xb0] sm:$0xf]  ;;  %vm13526_vm7 = vcmask 580608   ;;  %v9818_v52 = vld [vmem:[%s13221_s1 + $0x8] sm:$0xff] }
 0x591   : > { %7557 = vst [vmem:[#allocation3 + $0x48] sm:$0xf0] %v7547_v40  ;;  %v7511_v60 = vsel %vm13523_vm11, %v12530_v1, %v7506_v14  ;;  %8984 = vmatprep.subr.msk.mxu0 %vm844_vm13, %v7762_v62  ;;  %vm13527_vm11 = vcmask 588800  }
 0x592   : > { %7521 = vst [vmem:[#allocation3 + $0x48] sm:$0xf] %v7511_v60  ;;  %6725 = vrot.lane.b32.xlu1 %v12604_v42, %s13277_s12 }
 0x593   : > { %6723 = vrot.lane.b32.xlu0 %v12627_v36, %s13277_s12  ;;  %v7614_v21 = vpop.permute.xlu1 %7613 }
 0x594   : > { %v7619_v20 = vsel %vm13524_vm10, %v12560_v25, %v7614_v21  ;;  %v7578_v51 = vpop.permute.xlu0 %7577  ;;  %8985 = vmatpush1.msk.msra.mxu0 %vm844_vm13, %v7761_v22  ;;  %vm13528_vm10 = vcmask 572416  }
 0x595   : > { %7629 = vst [vmem:[#allocation3 + $0x70] sm:$0xf0] %v7619_v20  ;;  %v7583_v1 = vsel %vm13525_vm9, %v12550_v50, %v7578_v51  ;;  %9573 = vmatprep.subr.bf16.mxu0 %v9839_v45  ;;  %8986 = vmatmul.mubr.msk.f32.vlgmr.msra.gmra.mrb[12].mxu0 %vm840_vm15, %v12277_v12  ;;  %v7743_v17 = vld [vmem:[#allocation3 + $0x20] sm:$0xff]  ;;  %vm13529_vm9 = vcmask 703488  }
 0x596   : > { %7593 = vst [vmem:[#allocation3 + $0x70] sm:$0xf] %v7583_v1  ;;  %6761 = vrot.lane.b32.xlu1 %v6683_v41, %s13282_s13  ;;  %9264 = vmatprep.mubr.msk.f32.mxu0 %vm9846_vm8, %v9845_v48 }
 0x597   : > { %6759 = vrot.lane.b32.xlu0 %v12616_v39, %s13282_s13  ;;  %v7686_v55 = vpop.permute.xlu1 %7685 }
 0x598   : > { %v7691_v46 = vsel %vm13526_vm7, %v12589_v54, %v7686_v55  ;;  %v7650_v4 = vpop.permute.xlu0 %7649  ;;  %vm13530_vm7 = vmmov %vm13529_vm9 }
 0x599   : > { %7701 = vst [vmem:[#allocation3 + $0x98] sm:$0xf0] %v7691_v46  ;;  %v7655_v12 = vsel %vm13527_vm11, %v12576_v28, %v7650_v4  ;;  %v7748_v18 = vld [vmem:[#allocation3 + $0x48] sm:$0xff]  ;;  %vm13531_vm11 = vmmov %vm13530_vm7 }
 0x59a   : > { %7665 = vst [vmem:[#allocation3 + $0x98] sm:$0xf] %v7655_v12  ;;  %6721 = vrot.lane.b32.xlu1 %v12616_v39, %s13277_s12  ;;  %v9574_v50 = vpack.c.bf16 %v7748_v18, %v7743_v17 }
 0x59b   : > { %6685 = vrot.lane.b32.xlu0 %v6682_v38, %s13358_s6  ;;  %v12667_v0 = vpop.permute.xlu1 %7113 }
 0x59c   : > { %v7112_v24 = vpop.permute.xlu0 %7111  ;;  %9575 = vmatpush3.bf16.msra.mxu0 %v9574_v50 }
 0x59d   : > { %v7122_v25 = vsel %vm179_vm0, %v7112_v24, %v12667_v0  ;;  %9576 = vmatprep.subr.bf16.mxu0 %v9839_v45  ;;  %v7753_v2 = vld [vmem:[#allocation3 + $0x70] sm:$0xff] }
 0x59e   : > { %7132 = vst [vmem:[#allocation2 + $0x8] sm:$0xf0] %v7122_v25  ;;  %8235 = vrot.lane.b32.xlu1 %v12664_v59, %s13416_s4 }
 0x59f   : > { %6757 = vrot.lane.b32.xlu0 %v6682_v38, %s13282_s13 }
 0x5a0   : > { %v12675_v61 = vpop.permute.xlu1 %7149 }
 0x5a1   : > { %v7148_v3 = vpop.permute.xlu0 %7147  ;;  %v7758_v10 = vld [vmem:[#allocation3 + $0x98] sm:$0xff] }
 0x5a2   : > { %v7158_v56 = vsel %vm216_vm1, %v7148_v3, %v12675_v61  ;;  %8271 = vrot.lane.b32.xlu1 %v12654_v13, %s13421_s5  ;;  %v9577_v6 = vpack.c.bf16 %v7758_v10, %v7753_v2 }
 0x5a3   : > { %7168 = vst [vmem:[#allocation2 + $0x30] sm:$0xf] %v7158_v56  ;;  %8237 = vrot.lane.b32.xlu0 %v12678_v35, %s13416_s4 }
 0x5a4   : > { %v12690_v15 = vpop.permute.xlu1 %7185  ;;  %9578 = vmatpush3.bf16.msra.mxu0 %v9577_v6 }
 0x5a5   : > { %v7184_v28 = vpop.permute.xlu0 %7183  ;;  %9262 = vmatprep.subr.mxu0 %v9845_v48 }
 0x5a6   : > { %v7194_v9 = vsel %vm253_vm2, %v7184_v28, %v12690_v15  ;;  %8307 = vrot.lane.b32.xlu1 %v12664_v59, %s13427_s22 }
 0x5a7   : > { %7204 = vst [vmem:[#allocation2 + $0x30] sm:$0xf0] %v7194_v9  ;;  %8273 = vrot.lane.b32.xlu0 %v12688_v49, %s13421_s5 }
 0x5a8   : > { %v7146_v8 = vpop.permute.xlu1 %7145 }
 0x5a9   : > { %v7157_v31 = vsel %vm216_vm1, %v7146_v8, %v7148_v3  ;;  %v7110_v33 = vpop.permute.xlu0 %7109 }
 0x5aa   : > { %7167 = vst [vmem:[#allocation2 + $0x28] sm:$0xf] %v7157_v31  ;;  %v7121_v34 = vsel %vm179_vm0, %v7110_v33, %v7112_v24  ;;  %8343 = vrot.lane.b32.xlu1 %v12654_v13, %s13346_s7 }
 0x5ab   : > { %7131 = vst [vmem:[#allocation2] sm:$0xf0] %v7121_v34  ;;  %8309 = vrot.lane.b32.xlu0 %v12678_v35, %s13427_s22  ;;  %v12806_v34 = vld [vmem:[%s9885_s14 + $0x64] sm:$0xff] }
 0x5ac   : > { %v7722_v54 = vpop.permute.xlu1 %7721 }
 0x5ad   : > { %v7727_v57 = vsel %vm13528_vm10, %v12599_v30, %v7722_v54  ;;  %v7182_v44 = vpop.permute.xlu0 %7181  ;;  %vm13532_vm10 = vmmov %vm13530_vm7 }
 0x5ae   : > { %7737 = vst [vmem:[#allocation3 + $0xc0] sm:$0xf] %v7727_v57  ;;  %v7193_v27 = vsel %vm253_vm2, %v7182_v44, %v7184_v28  ;;  %7371 = vrot.lane.b32.xlu1 %v12564_v43, %s13500_s25  ;;  %v7395_v41 = vld [vmem:[#allocation2 + $0x30] sm:$0xff]  ;;  %v7390_v43 = vld [vmem:[#allocation2 + $0x8] sm:$0xff] }
 0x5af   : > { %7203 = vst [vmem:[#allocation2 + $0x28] sm:$0xf0] %v7193_v27  ;;  %8345 = vrot.lane.b32.xlu0 %v12688_v49, %s13346_s7  ;;  %v9579_v29 = vpack.c.bf16 %v7395_v41, %v7390_v43 }
 0x5b0   : > { %v12716_v53 = vpop.permute.xlu1 %7221 }
 0x5b1   : > { %v7220_v32 = vpop.permute.xlu0 %7219 }
 0x5b2   : > { %v7230_v30 = vsel %vm290_vm3, %v7220_v32, %v12716_v53  ;;  %8269 = vrot.lane.b32.xlu1 %v12709_v26, %s13421_s5  ;;  %v7389_v23 = vld [vmem:[#allocation2] sm:$0xff] }
 0x5b3   : > { %7240 = vst [vmem:[#allocation2 + $0x58] sm:$0xf] %v7230_v30  ;;  %8233 = vrot.lane.b32.xlu0 %v12654_v13, %s13416_s4 }
 0x5b4   : > { %v12724_v37 = vpop.permute.xlu1 %7257 }
 0x5b5   : > { %v7256_v11 = vpop.permute.xlu0 %7255  ;;  %v7763_v63 = vld [vmem:[#allocation3 + $0xc0] sm:$0xf] }
 0x5b6   : > { %v7266_v16 = vsel %vm327_vm4, %v7256_v11, %v12724_v37  ;;  %8341 = vrot.lane.b32.xlu1 %v12709_v26, %s13346_s7  ;;  %9263 = vmatpush3.msk.msra.mxu0 %vm844_vm13, %v7763_v63  ;;  %v7394_v7 = vld [vmem:[#allocation2 + $0x28] sm:$0xff] }
 0x5b7   : > { %7276 = vst [vmem:[#allocation2 + $0x58] sm:$0xf0] %v7266_v16  ;;  %8305 = vrot.lane.b32.xlu0 %v12654_v13, %s13427_s22  ;;  %9580 = vmatprep.subr.bf16.mxu0 %v9579_v29  ;;  %v9581_v47 = vpack.c.bf16 %v7394_v7, %v7389_v23  ;;  %v12832_v23 = vld [vmem:[%s13221_s1] sm:$0xff]  ;;  %v12836_v7 = vcombine.high %v12678_v35, %v12678_v35 }
 0x5b8   : > { %v12733_v5 = vpop.permute.xlu1 %7293  ;;  %9265 = vmatmul.mubr.msk.f32.vlgmr.msra.gmra.mrb[14].mxu0 %vm840_vm15, %v9818_v52 }
 0x5b9   : > { %v7292_v19 = vpop.permute.xlu0 %7291  ;;  %9582 = vmatpush1.bf16.msra.mxu0 %v9581_v47  ;;  %8076 = vmatprep.mubr.f32.mxu0 %v9845_v48 }
 0x5ba   : > { %v7302_v40 = vsel %vm364_vm5, %v7292_v19, %v12733_v5  ;;  %6797 = vrot.lane.b32.xlu1 %v12604_v42, %s13288_s11 }
 0x5bb   : > { %7312 = vst [vmem:[#allocation2 + $0x80] sm:$0xf] %v7302_v40  ;;  %6795 = vrot.lane.b32.xlu0 %v12627_v36, %s13288_s11 }
 0x5bc   : > { %v12746_v14 = vpop.permute.xlu1 %7329 }
 0x5bd   : > { %v7328_v62 = vpop.permute.xlu0 %7327 }
 0x5be   : > { %v7338_v60 = vsel %vm401_vm6, %v7328_v62, %v12746_v14  ;;  %8379 = vrot.lane.b32.xlu1 %v12664_v59, %s13352_s8  ;;  %v7400_v55 = vld [vmem:[#allocation2 + $0x58] sm:$0xff] }
 0x5bf   : > { %7348 = vst [vmem:[#allocation2 + $0x80] sm:$0xf0] %v7338_v60  ;;  %6793 = vrot.lane.b32.xlu0 %v12616_v39, %s13288_s11 }
 0x5c0   : > { %v7254_v21 = vpop.permute.xlu1 %7253 }
 0x5c1   : > { %v7265_v22 = vsel %vm327_vm4, %v7254_v21, %v7256_v11  ;;  %v7218_v20 = vpop.permute.xlu0 %7217 }
 0x5c2   : > { %7275 = vst [vmem:[#allocation2 + $0x50] sm:$0xf0] %v7265_v22  ;;  %v7229_v36 = vsel %vm290_vm3, %v7218_v20, %v7220_v32  ;;  %8415 = vrot.lane.b32.xlu1 %v12654_v13, %s13358_s6  ;;  %v12854_v20 = vld [vmem:[%s9885_s14 + $0x78] sm:$0xff]  ;;  %s9684_s14 = smul.u32 200, %s13584_s10 }
 0x5c3   : > { %7239 = vst [vmem:[#allocation2 + $0x50] sm:$0xf] %v7229_v36  ;;  %8381 = vrot.lane.b32.xlu0 %v12678_v35, %s13352_s8 }
 0x5c4   : > { %v7326_v51 = vpop.permute.xlu1 %7325  ;;  %s12992_s27 = scalar_lea.vmem %s13222_s2, %s9684_s14 }
 0x5c5   : > { %v7337_v1 = vsel %vm401_vm6, %v7326_v51, %v7328_v62  ;;  %v7290_v38 = vpop.permute.xlu0 %7289 }
 0x5c6   : > { %7347 = vst [vmem:[#allocation2 + $0x78] sm:$0xf0] %v7337_v1  ;;  %v7301_v39 = vsel %vm364_vm5, %v7290_v38, %v7292_v19  ;;  %8451 = vrot.lane.b32.xlu1 %v12664_v59, %s13277_s12  ;;  %v7405_v46 = vld [vmem:[#allocation2 + $0x80] sm:$0xff]  ;;  %v12864_v1 = vcombine.low %v12854_v20, %v12854_v20 }
 0x5c7   : > { %7311 = vst [vmem:[#allocation2 + $0x78] sm:$0xf] %v7301_v39  ;;  %8417 = vrot.lane.b32.xlu0 %v12688_v49, %s13358_s6  ;;  %v9583_v4 = vpack.c.bf16 %v7405_v46, %v7400_v55 }
 0x5c8   : > { %v12766_v12 = vpop.permute.xlu1 %7117 }
 0x5c9   : > { %v7116_v17 = vpop.permute.xlu0 %7115  ;;  %9584 = vmatprep.subr.bf16.mxu0 %v9583_v4 }
 0x5ca   : > { %v7123_v18 = vsel %vm179_vm0, %v12667_v0, %v7116_v17  ;;  %v7124_v50 = vsel %vm179_vm0, %v7116_v17, %v12766_v12  ;;  %8487 = vrot.lane.b32.xlu1 %v12654_v13, %s13282_s13  ;;  %v7399_v2 = vld [vmem:[#allocation2 + $0x50] sm:$0xff] }
 0x5cb   : > { %7133 = vst [vmem:[#allocation2 + $0x10] sm:$0xf0] %v7123_v18  ;;  %7134 = vst [vmem:[#allocation2 + $0x18] sm:$0xf0] %v7124_v50  ;;  %8453 = vrot.lane.b32.xlu0 %v12678_v35, %s13277_s12 }
 0x5cc   : > { %v12776_v24 = vpop.permute.xlu1 %7153 }
 0x5cd   : > { %v7152_v25 = vpop.permute.xlu0 %7151 }
 0x5ce   : > { %v7159_v3 = vsel %vm216_vm1, %v12675_v61, %v7152_v25  ;;  %v7160_v0 = vsel %vm216_vm1, %v7152_v25, %v12776_v24  ;;  %8377 = vrot.lane.b32.xlu1 %v12654_v13, %s13352_s8  ;;  %v7404_v10 = vld [vmem:[#allocation2 + $0x78] sm:$0xff]  ;;  %v12790_v61 = vcombine.high %v12604_v42, %v12604_v42 }
 0x5cf   : > { %7169 = vst [vmem:[#allocation2 + $0x38] sm:$0xf] %v7159_v3  ;;  %7170 = vst [vmem:[#allocation2 + $0x40] sm:$0xf] %v7160_v0  ;;  %8489 = vrot.lane.b32.xlu0 %v12688_v49, %s13282_s13  ;;  %v9585_v56 = vpack.c.bf16 %v7404_v10, %v7399_v2 }
 0x5d0   : > { %v12786_v6 = vpop.permute.xlu1 %7189 }
 0x5d1   : > { %v7188_v28 = vpop.permute.xlu0 %7187  ;;  %9586 = vmatpush1.bf16.msra.mxu0 %v9585_v56 }
 0x5d2   : > { %v7195_v9 = vsel %vm253_vm2, %v12690_v15, %v7188_v28  ;;  %v7196_v8 = vsel %vm253_vm2, %v7188_v28, %v12786_v6  ;;  %8449 = vrot.lane.b32.xlu1 %v12654_v13, %s13277_s12  ;;  %v7392_v16 = vld [vmem:[#allocation2 + $0x18] sm:$0xff] }
 0x5d3   : > { %7205 = vst [vmem:[#allocation2 + $0x38] sm:$0xf0] %v7195_v9  ;;  %7206 = vst [vmem:[#allocation2 + $0x40] sm:$0xf0] %v7196_v8  ;;  %8413 = vrot.lane.b32.xlu0 %v12709_v26, %s13358_s6 }
 0x5d4   : > { %v7366_v49 = vpop.permute.xlu1 %7365 }
 0x5d5   : > { %v7364_v31 = vpop.permute.xlu0 %7363 }
 0x5d6   : > { %v7374_v33 = vsel %vm13529_vm9, %v7364_v31, %v7366_v49  ;;  %6655 = vrot.lane.b32.xlu1 %v12790_v61, %s13352_s8  ;;  %vm13540_vm9 = vcmask 777216  }
 0x5d7   : > { %7384 = vst [vmem:[#allocation2 + $0xa8] sm:$0xf] %v7374_v33  ;;  %8485 = vrot.lane.b32.xlu0 %v12709_v26, %s13282_s13  ;;  %v6684_v26 = vcombine.low %v12806_v34, %v12806_v34 }
 0x5d8   : > { %v7224_v15 = vpop.permute.xlu1 %7223 }
 0x5d9   : > { %v7231_v54 = vsel %vm290_vm3, %v12716_v53, %v7224_v15  ;;  %v7362_v57 = vpop.permute.xlu0 %7361 }
 0x5da   : > { %7241 = vst [vmem:[#allocation2 + $0x60] sm:$0xf] %v7231_v54  ;;  %v7373_v44 = vsel %vm13530_vm7, %v7362_v57, %v7364_v31  ;;  %6691 = vrot.lane.b32.xlu1 %v12604_v42, %s13358_s6  ;;  %v7397_v43 = vld [vmem:[#allocation2 + $0x40] sm:$0xff]  ;;  %v7396_v63 = vld [vmem:[#allocation2 + $0x38] sm:$0xff]  ;;  %vm13541_vm7 = vcmask 769024  }
 0x5db   : > { %7383 = vst [vmem:[#allocation2 + $0xa0] sm:$0xf] %v7373_v44  ;;  %6657 = vrot.lane.b32.xlu0 %v12806_v34, %s13352_s8  ;;  %v9587_v19 = vpack.c.bf16 %v7397_v43, %v7392_v16 }
 0x5dc   : > { %v7260_v27 = vpop.permute.xlu1 %7259 }
 0x5dd   : > { %v7267_v32 = vsel %vm327_vm4, %v12724_v37, %v7260_v27  ;;  %v12819_v30 = vpop.permute.xlu0 %7225 }
 0x5de   : > { %7277 = vst [vmem:[#allocation2 + $0x60] sm:$0xf0] %v7267_v32  ;;  %v7232_v53 = vsel %vm290_vm3, %v7224_v15, %v12819_v30  ;;  %6727 = vrot.lane.b32.xlu1 %v12790_v61, %s13277_s12  ;;  %v7410_v41 = vld [vmem:[#allocation2 + $0xa8] sm:$0xf] }
 0x5df   : > { %7242 = vst [vmem:[#allocation2 + $0x68] sm:$0xf] %v7232_v53  ;;  %6693 = vrot.lane.b32.xlu0 %v6684_v26, %s13358_s6  ;;  %8989 = vmatprep.subr.msk.mxu0 %vm844_vm13, %v7410_v41 }
 0x5e0   : > { %v7296_v11 = vpop.permute.xlu1 %7295 }
 0x5e1   : > { %v7303_v37 = vsel %vm364_vm5, %v12733_v5, %v7296_v11  ;;  %v7262_v29 = vpop.permute.xlu0 %7261  ;;  %v7391_v5 = vld [vmem:[#allocation2 + $0x10] sm:$0xff] }
 0x5e2   : > { %7313 = vst [vmem:[#allocation2 + $0x88] sm:$0xf] %v7303_v37  ;;  %v7268_v47 = vsel %vm327_vm4, %v7260_v27, %v7262_v29  ;;  %6763 = vrot.lane.b32.xlu1 %v12604_v42, %s13282_s13  ;;  %v7409_v52 = vld [vmem:[#allocation2 + $0xa0] sm:$0xf]  ;;  %v9589_v40 = vpack.c.bf16 %v7396_v63, %v7391_v5 }
 0x5e3   : > { %7278 = vst [vmem:[#allocation2 + $0x68] sm:$0xf0] %v7268_v47  ;;  %6729 = vrot.lane.b32.xlu0 %v12806_v34, %s13277_s12  ;;  %8990 = vmatpush1.msk.msra.mxu0 %vm844_vm13, %v7409_v52 }
 0x5e4   : > { %9588 = vmatprep.subr.bf16.mxu0 %v9587_v19  ;;  %v7332_v62 = vpop.permute.xlu1 %7331  ;;  %8991 = vmatmul.mubr.msk.f32.vlgmr.msra.gmra.mrb[10].mxu0 %vm840_vm15, %v12832_v23 }
 0x5e5   : > { %v7339_v60 = vsel %vm401_vm6, %v12746_v14, %v7332_v62  ;;  %v7298_v42 = vpop.permute.xlu0 %7297  ;;  %9590 = vmatpush1.bf16.msra.mxu0 %v9589_v40  ;;  %8147 = vmatprep.mubr.f32.mxu0 %v9845_v48  ;;  %v7401_v2 = vld [vmem:[#allocation2 + $0x60] sm:$0xff]  ;;  %v6648_v40 = vcombine.high %v12806_v34, %v12806_v34 }
 0x5e6   : > { %7349 = vst [vmem:[#allocation2 + $0x88] sm:$0xf0] %v7339_v60  ;;  %v7304_v21 = vsel %vm364_vm5, %v7296_v11, %v7298_v42  ;;  %8239 = vrot.lane.b32.xlu1 %v12836_v7, %s13416_s4 }
 0x5e7   : > { %7314 = vst [vmem:[#allocation2 + $0x90] sm:$0xf] %v7304_v21  ;;  %6765 = vrot.lane.b32.xlu0 %v6684_v26, %s13282_s13 }
 0x5e8   : > { %v7368_v22 = vpop.permute.xlu1 %7367 }
 0x5e9   : > { %v7375_v36 = vsel %vm13531_vm11, %v7366_v49, %v7368_v22  ;;  %v7334_v51 = vpop.permute.xlu0 %7333  ;;  %vm13542_vm11 = vmmov %vm13532_vm10 }
 0x5ea   : > { %7385 = vst [vmem:[#allocation2 + $0xb0] sm:$0xf] %v7375_v36  ;;  %v7340_v14 = vsel %vm401_vm6, %v7332_v62, %v7334_v51  ;;  %8275 = vrot.lane.b32.xlu1 %v12678_v35, %s13421_s5  ;;  %v7402_v25 = vld [vmem:[#allocation2 + $0x68] sm:$0xff] }
 0x5eb   : > { %7350 = vst [vmem:[#allocation2 + $0x90] sm:$0xf0] %v7340_v14  ;;  %8241 = vrot.lane.b32.xlu0 %v12854_v20, %s13416_s4 }
 0x5ec   : > { %v7120_v38 = vpop.permute.xlu1 %7119 }
 0x5ed   : > { %v7125_v39 = vsel %vm179_vm0, %v12766_v12, %v7120_v38  ;;  %v12868_v55 = vpop.permute.xlu0 %7369  ;;  %v7406_v50 = vld [vmem:[#allocation2 + $0x88] sm:$0xff]  ;;  %vm13533_vm0 = vcmask 613376  }
 0x5ee   : > { %7135 = vst [vmem:[#allocation2 + $0x20] sm:$0xf0] %v7125_v39  ;;  %v7376_v46 = vsel %vm13532_vm10, %v7368_v22, %v12868_v55  ;;  %8311 = vrot.lane.b32.xlu1 %v12836_v7, %s13427_s22  ;;  %v9593_v56 = vpack.c.bf16 %v7406_v50, %v7401_v2  ;;  %vm13543_vm10 = vcmask 621568  }
 0x5ef   : > { %7386 = vst [vmem:[#allocation2 + $0xb8] sm:$0xf] %v7376_v46  ;;  %8277 = vrot.lane.b32.xlu0 %v12864_v1, %s13421_s5 }
 0x5f0   : > { %v7192_v4 = vpop.permute.xlu1 %7191 }
 0x5f1   : > { %v7197_v17 = vsel %vm253_vm2, %v12786_v6, %v7192_v4  ;;  %v7156_v18 = vpop.permute.xlu0 %7155  ;;  %v7411_v33 = vld [vmem:[#allocation2 + $0xb0] sm:$0xf]  ;;  %vm13535_vm2 = vcmask 605184  }
 0x5f2   : > { %7207 = vst [vmem:[#allocation2 + $0x48] sm:$0xf0] %v7197_v17  ;;  %v7161_v12 = vsel %vm216_vm1, %v12776_v24, %v7156_v18  ;;  %8347 = vrot.lane.b32.xlu1 %v12678_v35, %s13346_s7  ;;  %v7407_v3 = vld [vmem:[#allocation2 + $0x90] sm:$0xff]  ;;  %vm13534_vm1 = vmmov %vm13533_vm0  ;;  %v8232_v17 = vcombine.high %v12854_v20, %v12854_v20 }
 0x5f3   : > { %7171 = vst [vmem:[#allocation2 + $0x48] sm:$0xf] %v7161_v12  ;;  %8313 = vrot.lane.b32.xlu0 %v12854_v20, %s13427_s22  ;;  %v9591_v0 = vpack.c.bf16 %v7407_v3, %v7402_v25 }
 0x5f4   : > { %v7264_v10 = vpop.permute.xlu1 %7263 }
 0x5f5   : > { %v7269_v6 = vsel %vm327_vm4, %v7262_v29, %v7264_v10  ;;  %v7228_v28 = vpop.permute.xlu0 %7227  ;;  %9592 = vmatprep.subr.bf16.mxu0 %v9591_v0  ;;  %v1746_v10 = vpop.f32.mrb[2].mxu0 }
 0x5f6   : > { %7279 = vst [vmem:[#allocation2 + $0x70] sm:$0xf0] %v7269_v6  ;;  %v7233_v24 = vsel %vm290_vm3, %v12819_v30, %v7228_v28  ;;  %9594 = vmatpush1.bf16.msra.mxu0 %v9593_v56  ;;  %8523 = vrot.lane.b32.xlu1 %v12664_v59, %s13288_s11  ;;  %v7412_v9 = vld [vmem:[#allocation2 + $0xb8] sm:$0xf]  ;;  %v7393_v59 = vld [vmem:[#allocation2 + $0x20] sm:$0xff]  ;;  %vm13536_vm3 = vcmask 457728  }
 0x5f7   : > { %7243 = vst [vmem:[#allocation2 + $0x70] sm:$0xf] %v7233_v24  ;;  %8349 = vrot.lane.b32.xlu0 %v12864_v1, %s13346_s7  ;;  %8992 = vmatprep.subr.msk.mxu0 %vm844_vm13, %v7412_v9  ;;  %vm13537_vm4 = vmmov %vm13536_vm3  ;;  %v1748_v28 = vpop.f32.mrb[3].mxu0 }
 0x5f8   : > { %v7336_v8 = vpop.permute.xlu1 %7335  ;;  %v1888_v24 = vpop.f32.mrb[0].mxu0 }
 0x5f9   : > { %v7341_v49 = vsel %vm401_vm6, %v7334_v51, %v7336_v8  ;;  %v7300_v31 = vpop.permute.xlu0 %7299  ;;  %vm13539_vm6 = vcmask 785408   ;;  %1901 = vst [vmem:[%s12992_s27 + $0x20] sm:$0xff] %v1888_v24  ;;  %v9136_v9 = vpop.f32.mrb[1].mxu0 }
 0x5fa   : > { %7351 = vst [vmem:[#allocation2 + $0x98] sm:$0xf0] %v7341_v49  ;;  %v7305_v15 = vsel %vm364_vm5, %v7298_v42, %v7300_v31  ;;  %8993 = vmatpush1.msk.msra.mxu0 %vm844_vm13, %v7411_v33  ;;  %8521 = vrot.lane.b32.xlu1 %v12654_v13, %s13288_s11  ;;  %v7398_v54 = vld [vmem:[#allocation2 + $0x48] sm:$0xff]  ;;  %vm13538_vm5 = vmmov %vm13535_vm2 }
 0x5fb   : > { %7315 = vst [vmem:[#allocation2 + $0x98] sm:$0xf] %v7305_v15  ;;  %8525 = vrot.lane.b32.xlu0 %v12678_v35, %s13288_s11  ;;  %9595 = vmatprep.subr.bf16.mxu0 %v9839_v45  ;;  %v9596_v57 = vpack.c.bf16 %v7398_v54, %v7393_v59 }
 0x5fc   : > { %v12900_v44 = vpop.permute.xlu1 %6653  ;;  %8994 = vmatmul.mubr.msk.f32.vlgmr.msra.gmra.mrb[12].mxu0 %vm840_vm15, %v12832_v23 }
 0x5fd   : > { %v6652_v26 = vpop.permute.xlu0 %6651  ;;  %9597 = vmatpush3.bf16.msra.mxu0 %v9596_v57  ;;  %9277 = vmatprep.mubr.msk.f32.mxu0 %vm9846_vm8, %v9845_v48 }
 0x5fe   : > { %v6661_v13 = vsel %vm13533_vm0, %v12393_v58, %v6652_v26  ;;  %v6662_v27 = vsel %vm13534_vm1, %v6652_v26, %v12900_v44  ;;  %6801 = vrot.lane.b32.xlu1 %v12806_v34, %s13288_s11  ;;  %9598 = vmatprep.subr.bf16.mxu0 %v9839_v45  ;;  %v7403_v58 = vld [vmem:[#allocation2 + $0x70] sm:$0xff]  ;;  %vm13544_vm0 = vmmov %vm13540_vm9 }
 0x5ff   : > { %6671 = vst [vmem:[#allocation4 + $0x50] sm:$0xf] %v6661_v13  ;;  %6672 = vst [vmem:[#allocation4 + $0x58] sm:$0xf] %v6662_v27  ;;  %6799 = vrot.lane.b32.xlu0 %v12790_v61, %s13288_s11 }
 0x600   : > { %v12915_v32 = vpop.permute.xlu1 %6689  ;;  %vm13545_vm1 = vmmov %vm13539_vm6 }
 0x601   : > { %v6688_v30 = vpop.permute.xlu0 %6687 }
 0x602   : > { %v6698_v53 = vsel %vm13535_vm2, %v6688_v30, %v12915_v32  ;;  %8385 = vrot.lane.b32.xlu1 %v12854_v20, %s13352_s8  ;;  %v7408_v41 = vld [vmem:[#allocation2 + $0x98] sm:$0xff]  ;;  %vm13546_vm2 = vmmov %vm13543_vm10 }
 0x603   : > { %6708 = vst [vmem:[#allocation4 + $0x58] sm:$0xf0] %v6698_v53  ;;  %8383 = vrot.lane.b32.xlu0 %v12836_v7, %s13352_s8  ;;  %v9599_v43 = vpack.c.bf16 %v7408_v41, %v7403_v58 }
 0x604   : > { %v12923_v11 = vpop.permute.xlu1 %6725 }
 0x605   : > { %v6724_v63 = vpop.permute.xlu0 %6723  ;;  %9600 = vmatpush3.bf16.msra.mxu0 %v9599_v43  ;;  %v926_v43 = vpop.f32.mrb[0].mxu1 }
 0x606   : > { %v6734_v61 = vsel %vm13536_vm3, %v6724_v63, %v12923_v11  ;;  %8421 = vrot.lane.b32.xlu1 %v12864_v1, %s13358_s6  ;;  %9275 = vmatprep.subr.mxu0 %v9845_v48  ;;  %vm13547_vm3 = vmmov %vm13541_vm7 }
 0x607   : > { %6744 = vst [vmem:[#allocation4 + $0x80] sm:$0xf] %v6734_v61  ;;  %8419 = vrot.lane.b32.xlu0 %v12678_v35, %s13358_s6 }
 0x608   : > { %v12932_v37 = vpop.permute.xlu1 %6761 }
 0x609   : > { %v6760_v29 = vpop.permute.xlu0 %6759 }
 0x60a   : > { %v6770_v16 = vsel %vm1582_vm12, %v6760_v29, %v12932_v37  ;;  %8457 = vrot.lane.b32.xlu1 %v12854_v20, %s13277_s12  ;;  %v6832_v21 = vld [vmem:[#allocation4 + $0x58] sm:$0xff] }
 0x60b   : > { %6780 = vst [vmem:[#allocation4 + $0x80] sm:$0xf0] %v6770_v16  ;;  %8455 = vrot.lane.b32.xlu0 %v12836_v7, %s13277_s12  ;;  %v928_v16 = vpop.f32.mrb[1].mxu1 }
 0x60c   : > { %v6722_v47 = vpop.permute.xlu1 %6721 }
 0x60d   : > { %v6733_v52 = vsel %vm13537_vm4, %v6722_v47, %v6724_v63  ;;  %v6686_v19 = vpop.permute.xlu0 %6685  ;;  %v5202_v63 = vpop.f32.mrb[4].mxu0  ;;  %vm13548_vm4 = vcmask 613376  }
 0x60e   : > { %6743 = vst [vmem:[#allocation4 + $0x78] sm:$0xf] %v6733_v52  ;;  %v6697_v5 = vsel %vm13538_vm5, %v6686_v19, %v6688_v30  ;;  %8493 = vrot.lane.b32.xlu1 %v12864_v1, %s13282_s13  ;;  %5353 = vst [vmem:[%s12992_s27 + $0x50] sm:$0xff] %v5202_v63  ;;  %v9624_v52 = vadd.f32 %v1748_v28, %v928_v16  ;;  %v1817_v19 = vpop.f32.mrb[2].mxu1 }
 0x60f   : > { %6707 = vst [vmem:[#allocation4 + $0x50] sm:$0xf0] %v6697_v5  ;;  %8491 = vrot.lane.b32.xlu0 %v12678_v35, %s13282_s13  ;;  %1899 = vst [vmem:[%s12992_s27 + $0x10] sm:$0xff] %v1817_v19 }
 0x610   : > { %v8236_v62 = vpop.permute.xlu1 %8235  ;;  %1898 = vst [vmem:[%s12992_s27 + $0x8] sm:$0xff] %v9624_v52 }
 0x611   : > { %v6758_v60 = vpop.permute.xlu0 %6757 }
 0x612   : > { %v6769_v42 = vsel %vm1582_vm12, %v6758_v60, %v6760_v29  ;;  %6695 = vrot.lane.b32.xlu1 %v12806_v34, %s13358_s6  ;;  %v6837_v22 = vld [vmem:[#allocation4 + $0x80] sm:$0xff]  ;;  %v9623_v29 = vadd.f32 %v1746_v10, %v926_v43 }
 0x613   : > { %6779 = vst [vmem:[#allocation4 + $0x78] sm:$0xf0] %v6769_v42  ;;  %6659 = vrot.lane.b32.xlu0 %v6648_v40, %s13352_s8  ;;  %v9539_v36 = vpack.c.bf16 %v6837_v22, %v6832_v21  ;;  %v6829_v22 = vld [vmem:[#allocation4 + $0x40] sm:$0xff] }
 0x614   : > { %v8272_v51 = vpop.permute.xlu1 %8271  ;;  %1897 = vst [vmem:[%s12992_s27] sm:$0xff] %v9623_v29 }
 0x615   : > { %v12952_v14 = vpop.permute.xlu0 %8237  ;;  %9540 = vmatprep.subr.bf16.mxu1 %v9539_v36 }
 0x616   : > { %v8246_v35 = vsel %vm13539_vm6, %v8236_v62, %v12952_v14  ;;  %6767 = vrot.lane.b32.xlu1 %v12806_v34, %s13282_s13  ;;  %v6831_v46 = vld [vmem:[#allocation4 + $0x50] sm:$0xff]  ;;  %vm13549_vm6 = vcmask 457728  }
 0x617   : > { %8256 = vst [vmem:[#allocation4 + $0x8] sm:$0xf] %v8246_v35  ;;  %6731 = vrot.lane.b32.xlu0 %v6648_v40, %s13277_s12 }
 0x618   : > { %v8308_v1 = vpop.permute.xlu1 %8307 }
 0x619   : > { %v12959_v38 = vpop.permute.xlu0 %8273 }
 0x61a   : > { %v8282_v39 = vsel %vm13540_vm9, %v8272_v51, %v12959_v38  ;;  %8529 = vrot.lane.b32.xlu1 %v12854_v20, %s13288_s11  ;;  %v6836_v4 = vld [vmem:[#allocation4 + $0x78] sm:$0xff]  ;;  %vm13550_vm9 = vmmov %vm13548_vm4 }
 0x61b   : > { %8292 = vst [vmem:[#allocation4 + $0x8] sm:$0xf0] %v8282_v39  ;;  %8527 = vrot.lane.b32.xlu0 %v12836_v7, %s13288_s11  ;;  %v9541_v34 = vpack.c.bf16 %v6836_v4, %v6831_v46  ;;  %v6824_v4 = vld [vmem:[#allocation4 + $0x18] sm:$0xff] }
 0x61c   : > { %v8344_v18 = vpop.permute.xlu1 %8343 }
 0x61d   : > { %v12969_v50 = vpop.permute.xlu0 %8309  ;;  %9542 = vmatpush1.bf16.msra.mxu1 %v9541_v34 }
 0x61e   : > { %v8318_v12 = vsel %vm13541_vm7, %v8308_v1, %v12969_v50  ;;  %8279 = vrot.lane.b32.xlu1 %v12854_v20, %s13421_s5  ;;  %vm13551_vm7 = vmmov %vm13549_vm6 }
 0x61f   : > { %8328 = vst [vmem:[#allocation4 + $0x30] sm:$0xf] %v8318_v12  ;;  %8243 = vrot.lane.b32.xlu0 %v8232_v17, %s13416_s4 }
 0x620   : > { %v7372_v25 = vpop.permute.xlu1 %7371 }
 0x621   : > { %v7377_v3 = vsel %vm13542_vm11, %v12868_v55, %v7372_v25  ;;  %v12978_v7 = vpop.permute.xlu0 %8345  ;;  %v9543_v25 = vpack.c.bf16 %v6829_v22, %v6824_v4  ;;  %vm13552_vm11 = vmmov %vm13538_vm5 }
 0x622   : > { %7387 = vst [vmem:[#allocation2 + $0xc0] sm:$0xf] %v7377_v3  ;;  %v8354_v0 = vsel %vm13543_vm10, %v8344_v18, %v12978_v7  ;;  %8351 = vrot.lane.b32.xlu1 %v12854_v20, %s13346_s7  ;;  %v8550_v59 = vld [vmem:[#allocation4 + $0x8] sm:$0xff]  ;;  %v6823_v3 = vld [vmem:[#allocation4 + $0x10] sm:$0xff]  ;;  %vm13553_vm10 = vmmov %vm13548_vm4 }
 0x623   : > { %8364 = vst [vmem:[#allocation4 + $0x30] sm:$0xf0] %v8354_v0  ;;  %8315 = vrot.lane.b32.xlu0 %v8232_v17, %s13427_s22 }
 0x624   : > { %v8270_v2 = vpop.permute.xlu1 %8269 }
 0x625   : > { %v8281_v56 = vsel %vm13544_vm0, %v8270_v2, %v8272_v51  ;;  %v8234_v6 = vpop.permute.xlu0 %8233  ;;  %vm13554_vm0 = vmmov %vm13538_vm5 }
 0x626   : > { %8291 = vst [vmem:[#allocation4] sm:$0xf0] %v8281_v56  ;;  %v8245_v55 = vsel %vm13545_vm1, %v8234_v6, %v8236_v62  ;;  %8387 = vrot.lane.b32.xlu1 %v8232_v17, %s13352_s8  ;;  %vm13555_vm1 = vmmov %vm13548_vm4 }
 0x627   : > { %8255 = vst [vmem:[#allocation4] sm:$0xf] %v8245_v55  ;;  %6803 = vrot.lane.b32.xlu0 %v6648_v40, %s13288_s11  ;;  %v1819_v40 = vpop.f32.mrb[3].mxu1 }
 0x628   : > { %v8342_v8 = vpop.permute.xlu1 %8341  ;;  %1900 = vst [vmem:[%s12992_s27 + $0x18] sm:$0xff] %v1819_v40  ;;  %v3474_v42 = vpop.f32.mrb[4].mxu1 }
 0x629   : > { %v8353_v49 = vsel %vm13546_vm2, %v8342_v8, %v8344_v18  ;;  %v8306_v31 = vpop.permute.xlu0 %8305  ;;  %v7413_v33 = vld [vmem:[#allocation2 + $0xc0] sm:$0xf]  ;;  %3625 = vst [vmem:[%s12992_s27 + $0x28] sm:$0xff] %v3474_v42  ;;  %v3476_v36 = vpop.f32.mrb[5].mxu1  ;;  %vm13556_vm2 = vmmov %vm13549_vm6 }
 0x62a   : > { %8363 = vst [vmem:[#allocation4 + $0x28] sm:$0xf0] %v8353_v49  ;;  %v8317_v15 = vsel %vm13547_vm3, %v8306_v31, %v8308_v1  ;;  %8459 = vrot.lane.b32.xlu1 %v8232_v17, %s13277_s12  ;;  %9276 = vmatpush3.msk.msra.mxu0 %vm844_vm13, %v7413_v33  ;;  %v8555_v54 = vld [vmem:[#allocation4 + $0x30] sm:$0xff]  ;;  %v6828_v1 = vld [vmem:[#allocation4 + $0x38] sm:$0xff]  ;;  %3626 = vst [vmem:[%s12992_s27 + $0x30] sm:$0xff] %v3476_v36  ;;  %v3545_v39 = vpop.f32.mrb[6].mxu1 }
 0x62b   : > { %8327 = vst [vmem:[#allocation4 + $0x28] sm:$0xf] %v8317_v15  ;;  %8423 = vrot.lane.b32.xlu0 %v12854_v20, %s13358_s6  ;;  %v9601_v57 = vpack.c.bf16 %v8555_v54, %v8550_v59  ;;  %9278 = vmatmul.mubr.msk.f32.vlgmr.msra.gmra.mrb[14].mxu0 %vm840_vm15, %v12832_v23  ;;  %3627 = vst [vmem:[%s12992_s27 + $0x38] sm:$0xff] %v3545_v39  ;;  %v3547_v34 = vpop.f32.mrb[7].mxu1  ;;  %v9545_v10 = vpack.c.bf16 %v6828_v1, %v6823_v3 }
 0x62c   : > { %v13004_v26 = vpop.permute.xlu1 %6797  ;;  %8656 = vmatprep.mubr.f32.mxu0 %v9845_v48  ;;  %3628 = vst [vmem:[%s12992_s27 + $0x40] sm:$0xff] %v3547_v34  ;;  %v3616_v0 = vpop.f32.mrb[8].mxu1  ;;  %vm13557_vm3 = vmmov %vm13554_vm0 }
 0x62d   : > { %v6796_v13 = vpop.permute.xlu0 %6795  ;;  %9602 = vmatprep.subr.bf16.mxu0 %v9601_v57  ;;  %3629 = vst [vmem:[%s12992_s27 + $0x48] sm:$0xff] %v3616_v0  ;;  %v9175_v56 = vpop.f32.mrb[9].mxu1 }
 0x62e   : > { %v6806_v27 = vsel %vm1619_vm14, %v6796_v13, %v13004_v26  ;;  %8531 = vrot.lane.b32.xlu1 %v8232_v17, %s13288_s11  ;;  %v8549_v58 = vld [vmem:[#allocation4] sm:$0xff] }
 0x62f   : > { %6816 = vst [vmem:[#allocation4 + $0xa8] sm:$0xf] %v6806_v27  ;;  %8495 = vrot.lane.b32.xlu0 %v12854_v20, %s13282_s13  ;;  %v5204_v20 = vpop.f32.mrb[5].mxu0  ;;  %v13038_v17 = vld [vmem:[%s13221_s1 + $0x10] sm:$0xff] }
 0x630   : > { %v13012_v30 = vpop.permute.xlu1 %8379  ;;  %5354 = vst [vmem:[%s12992_s27 + $0x58] sm:$0xff] %v5204_v20  ;;  %v5273_v21 = vpop.f32.mrb[6].mxu0 }
 0x631   : > { %v6794_v23 = vpop.permute.xlu0 %6793  ;;  %5355 = vst [vmem:[%s12992_s27 + $0x60] sm:$0xff] %v5273_v21  ;;  %v5275_v51 = vpop.f32.mrb[7].mxu0 }
 0x632   : > { %v6805_v53 = vsel %vm1619_vm14, %v6794_v23, %v6796_v13  ;;  %v8554_v41 = vld [vmem:[#allocation4 + $0x28] sm:$0xff]  ;;  %5356 = vst [vmem:[%s12992_s27 + $0x68] sm:$0xff] %v5275_v51  ;;  %v5344_v2 = vpop.f32.mrb[8].mxu0 }
 0x633   : > { %6815 = vst [vmem:[#allocation4 + $0xa0] sm:$0xf] %v6805_v53  ;;  %v9603_v61 = vpack.c.bf16 %v8554_v41, %v8549_v58  ;;  %5357 = vst [vmem:[%s12992_s27 + $0x70] sm:$0xff] %v5344_v2  ;;  %v9214_v6 = vpop.f32.mrb[9].mxu0 }
 0x634   : > { %v13016_v47 = vpop.permute.xlu1 %8415 }
 0x635   : > { %v13019_v5 = vpop.permute.xlu0 %8381  ;;  %9604 = vmatpush1.bf16.msra.mxu0 %v9603_v61 }
 0x636   : > { %v8390_v62 = vsel %vm13548_vm4, %v13012_v30, %v13019_v5  ;;  %v6842_v60 = vld [vmem:[#allocation4 + $0xa8] sm:$0xf]  ;;  %vm13558_vm4 = vmmov %vm13556_vm2 }
 0x637   : > { %8400 = vst [vmem:[#allocation4 + $0x58] sm:$0xf] %v8390_v62  ;;  %8972 = vmatprep.subr.msk.mxu1 %vm844_vm13, %v6842_v60 }
 0x638   : > { %v8452_v35 = vpop.permute.xlu1 %8451 }
 0x639   : > { %v13033_v46 = vpop.permute.xlu0 %8417 }
 0x63a   : > { %v8426_v18 = vsel %vm13538_vm5, %v13016_v47, %v13033_v46  ;;  %v6841_v12 = vld [vmem:[#allocation4 + $0xa0] sm:$0xf]  ;;  %vm13559_vm5 = vcmask 785408  }
 0x63b   : > { %8436 = vst [vmem:[#allocation4 + $0x58] sm:$0xf0] %v8426_v18  ;;  %8973 = vmatpush1.msk.msra.mxu1 %vm844_vm13, %v6841_v12 }
 0x63c   : > { %9544 = vmatprep.subr.bf16.mxu1 %v9543_v25  ;;  %v8488_v28 = vpop.permute.xlu1 %8487  ;;  %8974 = vmatmul.mubr.msk.f32.vlgmr.msra.gmra.mrb[10].mxu1 %vm840_vm15, %v13038_v17 }
 0x63d   : > { %v13050_v55 = vpop.permute.xlu0 %8453  ;;  %9546 = vmatpush1.bf16.msra.mxu1 %v9545_v10  ;;  %6999 = vmatprep.mubr.f32.mxu1 %v9845_v48 }
 0x63e   : > { %v8462_v24 = vsel %vm13549_vm6, %v8452_v35, %v13050_v55  ;;  %vm13560_vm6 = vcmask 777216  }
 0x63f   : > { %8472 = vst [vmem:[#allocation4 + $0x80] sm:$0xf] %v8462_v24 }
 0x640   : > { %v8378_v9 = vpop.permute.xlu1 %8377 }
 0x641   : > { %v8389_v8 = vsel %vm13550_vm9, %v8378_v9, %v13012_v30  ;;  %v13057_v49 = vpop.permute.xlu0 %8489  ;;  %vm13561_vm9 = vmmov %vm13559_vm5 }
 0x642   : > { %8399 = vst [vmem:[#allocation4 + $0x50] sm:$0xf] %v8389_v8  ;;  %v8498_v31 = vsel %vm1582_vm12, %v8488_v28, %v13057_v49  ;;  %v8560_v23 = vld [vmem:[#allocation4 + $0x58] sm:$0xff] }
 0x643   : > { %8508 = vst [vmem:[#allocation4 + $0x80] sm:$0xf0] %v8498_v31 }
 0x644   : > { %v8450_v33 = vpop.permute.xlu1 %8449 }
 0x645   : > { %v8461_v15 = vsel %vm13551_vm7, %v8450_v33, %v8452_v35  ;;  %v8414_v59 = vpop.permute.xlu0 %8413  ;;  %vm13562_vm7 = vcmask 769024  }
 0x646   : > { %8471 = vst [vmem:[#allocation4 + $0x78] sm:$0xf] %v8461_v15  ;;  %v8425_v54 = vsel %vm13552_vm11, %v8414_v59, %v13016_v47  ;;  %vm13563_vm11 = vmmov %vm13560_vm6 }
 0x647   : > { %8435 = vst [vmem:[#allocation4 + $0x50] sm:$0xf0] %v8425_v54 }
 0x648   : > { %v6656_v57 = vpop.permute.xlu1 %6655 }
 0x649   : > { %v6663_v13 = vsel %vm13553_vm10, %v12900_v44, %v6656_v57  ;;  %v8486_v27 = vpop.permute.xlu0 %8485  ;;  %vm13564_vm10 = vcmask 621568  }
 0x64a   : > { %6673 = vst [vmem:[#allocation4 + $0x60] sm:$0xf] %v6663_v13  ;;  %v8497_v30 = vsel %vm1582_vm12, %v8486_v27, %v8488_v28  ;;  %v8565_v53 = vld [vmem:[#allocation4 + $0x80] sm:$0xff] }
 0x64b   : > { %8507 = vst [vmem:[#allocation4 + $0x78] sm:$0xf0] %v8497_v30  ;;  %v9605_v58 = vpack.c.bf16 %v8565_v53, %v8560_v23 }
 0x64c   : > { %v6692_v41 = vpop.permute.xlu1 %6691 }
 0x64d   : > { %v6699_v43 = vsel %vm13554_vm0, %v12915_v32, %v6692_v41  ;;  %v13069_v63 = vpop.permute.xlu0 %6657  ;;  %9606 = vmatprep.subr.bf16.mxu0 %v9605_v58  ;;  %vm13565_vm0 = vmmov %vm13562_vm7 }
 0x64e   : > { %6709 = vst [vmem:[#allocation4 + $0x60] sm:$0xf0] %v6699_v43  ;;  %v6664_v61 = vsel %vm13555_vm1, %v6656_v57, %v13069_v63  ;;  %v8559_v47 = vld [vmem:[#allocation4 + $0x50] sm:$0xff]  ;;  %vm13566_vm1 = vmmov %vm13564_vm10 }
 0x64f   : > { %6674 = vst [vmem:[#allocation4 + $0x68] sm:$0xf] %v6664_v61 }
 0x650   : > { %v6728_v44 = vpop.permute.xlu1 %6727 }
 0x651   : > { %v6735_v29 = vsel %vm13556_vm2, %v12923_v11, %v6728_v44  ;;  %v13075_v16 = vpop.permute.xlu0 %6693  ;;  %vm13567_vm2 = vcmask 613376  }
 0x652   : > { %6745 = vst [vmem:[#allocation4 + $0x88] sm:$0xf] %v6735_v29  ;;  %v6700_v20 = vsel %vm13557_vm3, %v6692_v41, %v13075_v16  ;;  %v8564_v32 = vld [vmem:[#allocation4 + $0x78] sm:$0xff]  ;;  %vm13568_vm3 = vmmov %vm13567_vm2 }
 0x653   : > { %6710 = vst [vmem:[#allocation4 + $0x68] sm:$0xf0] %v6700_v20  ;;  %v9607_v52 = vpack.c.bf16 %v8564_v32, %v8559_v47 }
 0x654   : > { %v6764_v19 = vpop.permute.xlu1 %6763 }
 0x655   : > { %v6771_v40 = vsel %vm1582_vm12, %v12932_v37, %v6764_v19  ;;  %v13081_v62 = vpop.permute.xlu0 %6729  ;;  %9608 = vmatpush1.bf16.msra.mxu0 %v9607_v52  ;;  %v6833_v25 = vld [vmem:[#allocation4 + $0x60] sm:$0xff] }
 0x656   : > { %6781 = vst [vmem:[#allocation4 + $0x88] sm:$0xf0] %v6771_v40  ;;  %v6736_v11 = vsel %vm13558_vm4, %v6728_v44, %v13081_v62  ;;  %vm13569_vm4 = vcmask 605184  }
 0x657   : > { %6746 = vst [vmem:[#allocation4 + $0x90] sm:$0xf] %v6736_v11 }
 0x658   : > { %v8240_v60 = vpop.permute.xlu1 %8239 }
 0x659   : > { %v8247_v42 = vsel %vm13559_vm5, %v12952_v14, %v8240_v60  ;;  %v13087_v21 = vpop.permute.xlu0 %6765  ;;  %vm13570_vm5 = vmmov %vm13569_vm4 }
 0x65a   : > { %8257 = vst [vmem:[#allocation4 + $0x10] sm:$0xf] %v8247_v42  ;;  %v6772_v22 = vsel %vm1582_vm12, %v6764_v19, %v13087_v21  ;;  %v6834_v18 = vld [vmem:[#allocation4 + $0x68] sm:$0xff]  ;;  %v6825_v19 = vld [vmem:[#allocation4 + $0x20] sm:$0xff] }
 0x65b   : > { %6782 = vst [vmem:[#allocation4 + $0x90] sm:$0xf0] %v6772_v22 }
 0x65c   : > { %v8276_v37 = vpop.permute.xlu1 %8275 }
 0x65d   : > { %v8283_v36 = vsel %vm13560_vm6, %v12959_v38, %v8276_v37  ;;  %v13093_v51 = vpop.permute.xlu0 %8241  ;;  %v6838_v4 = vld [vmem:[#allocation4 + $0x88] sm:$0xff]  ;;  %vm13571_vm6 = vcmask 457728  }
 0x65e   : > { %8293 = vst [vmem:[#allocation4 + $0x10] sm:$0xf0] %v8283_v36  ;;  %v8248_v35 = vsel %vm13561_vm9, %v8240_v60, %v13093_v51  ;;  %v9549_v0 = vpack.c.bf16 %v6838_v4, %v6833_v25  ;;  %vm13572_vm9 = vmmov %vm13571_vm6 }
 0x65f   : > { %8258 = vst [vmem:[#allocation4 + $0x18] sm:$0xf] %v8248_v35 }
 0x660   : > { %v8312_v1 = vpop.permute.xlu1 %8311 }
 0x661   : > { %v8319_v14 = vsel %vm13562_vm7, %v12969_v50, %v8312_v1  ;;  %v13099_v39 = vpop.permute.xlu0 %8277  ;;  %vm13573_vm7 = vmmov %vm13569_vm4 }
 0x662   : > { %8329 = vst [vmem:[#allocation4 + $0x38] sm:$0xf] %v8319_v14  ;;  %v8284_v34 = vsel %vm13563_vm11, %v8276_v37, %v13099_v39  ;;  %v6839_v38 = vld [vmem:[#allocation4 + $0x90] sm:$0xff]  ;;  %vm13574_vm11 = vmmov %vm13567_vm2 }
 0x663   : > { %8294 = vst [vmem:[#allocation4 + $0x18] sm:$0xf0] %v8284_v34  ;;  %v9547_v12 = vpack.c.bf16 %v6839_v38, %v6834_v18 }
 0x664   : > { %v8348_v3 = vpop.permute.xlu1 %8347 }
 0x665   : > { %v8355_v2 = vsel %vm13564_vm10, %v12978_v7, %v8348_v3  ;;  %v13105_v10 = vpop.permute.xlu0 %8313  ;;  %9548 = vmatprep.subr.bf16.mxu1 %v9547_v12  ;;  %v8551_v43 = vld [vmem:[#allocation4 + $0x10] sm:$0xff]  ;;  %vm13575_vm10 = vmmov %vm13571_vm6 }
 0x666   : > { %8365 = vst [vmem:[#allocation4 + $0x38] sm:$0xf0] %v8355_v2  ;;  %v8320_v50 = vsel %vm13565_vm0, %v8312_v1, %v13105_v10  ;;  %9550 = vmatpush1.bf16.msra.mxu1 %v9549_v0  ;;  %vm13576_vm0 = vcmask 777216  }
 0x667   : > { %8330 = vst [vmem:[#allocation4 + $0x40] sm:$0xf] %v8320_v50 }
 0x668   : > { %v8524_v56 = vpop.permute.xlu1 %8523 }
 0x669   : > { %v13109_v6 = vpop.permute.xlu0 %8349 }
 0x66a   : > { %v8356_v28 = vsel %vm13566_vm1, %v8348_v3, %v13109_v6  ;;  %v8552_v41 = vld [vmem:[#allocation4 + $0x18] sm:$0xff]  ;;  %vm13577_vm1 = vcmask 785408  }
 0x66b   : > { %8366 = vst [vmem:[#allocation4 + $0x40] sm:$0xf0] %v8356_v28 }
 0x66c   : > { %v8522_v24 = vpop.permute.xlu1 %8521 }
 0x66d   : > { %v8533_v9 = vsel %vm1619_vm14, %v8522_v24, %v8524_v56  ;;  %v13114_v7 = vpop.permute.xlu0 %8525  ;;  %v8556_v30 = vld [vmem:[#allocation4 + $0x38] sm:$0xff] }
 0x66e   : > { %8543 = vst [vmem:[#allocation4 + $0xa0] sm:$0xf] %v8533_v9  ;;  %v8534_v8 = vsel %vm1619_vm14, %v8524_v56, %v13114_v7  ;;  %v9611_v44 = vpack.c.bf16 %v8556_v30, %v8551_v43 }
 0x66f   : > { %8544 = vst [vmem:[#allocation4 + $0xa8] sm:$0xf] %v8534_v8 }
 0x670   : > { %v13118_v31 = vpop.permute.xlu1 %6801 }
 0x671   : > { %v6800_v33 = vpop.permute.xlu0 %6799 }
 0x672   : > { %v6807_v15 = vsel %vm1619_vm14, %v13004_v26, %v6800_v33  ;;  %v6808_v59 = vsel %vm1619_vm14, %v6800_v33, %v13118_v31  ;;  %v8557_v57 = vld [vmem:[#allocation4 + $0x40] sm:$0xff] }
 0x673   : > { %6817 = vst [vmem:[#allocation4 + $0xb0] sm:$0xf] %v6807_v15  ;;  %6818 = vst [vmem:[#allocation4 + $0xb8] sm:$0xf] %v6808_v59  ;;  %v9609_v26 = vpack.c.bf16 %v8557_v57, %v8552_v41 }
 0x674   : > { %v13124_v54 = vpop.permute.xlu1 %8385 }
 0x675   : > { %v8384_v13 = vpop.permute.xlu0 %8383  ;;  %v8569_v27 = vld [vmem:[#allocation4 + $0xa0] sm:$0xf] }
 0x676   : > { %v8391_v23 = vsel %vm13567_vm2, %v13019_v5, %v8384_v13  ;;  %v8392_v53 = vsel %vm13568_vm3, %v8384_v13, %v13124_v54  ;;  %v8570_v58 = vld [vmem:[#allocation4 + $0xa8] sm:$0xf]  ;;  %vm13578_vm2 = vcmask 621568   ;;  %vm13579_vm3 = vcmask 769024  }
 0x677   : > { %8401 = vst [vmem:[#allocation4 + $0x60] sm:$0xf] %v8391_v23  ;;  %8402 = vst [vmem:[#allocation4 + $0x68] sm:$0xf] %v8392_v53  ;;  %8998 = vmatprep.subr.msk.mxu0 %vm844_vm13, %v8570_v58  ;;  %v6830_v5 = vld [vmem:[#allocation4 + $0x48] sm:$0xff] }
 0x678   : > { %8999 = vmatpush1.msk.msra.mxu0 %vm844_vm13, %v8569_v27  ;;  %v13132_v61 = vpop.permute.xlu1 %8421  ;;  %v9552_v11 = vpack.c.bf16 %v6830_v5, %v6825_v19 }
 0x679   : > { %v8420_v29 = vpop.permute.xlu0 %8419  ;;  %9000 = vmatmul.mubr.msk.f32.vlgmr.msra.gmra.mrb[10].mxu0 %vm840_vm15, %v13038_v17  ;;  %9610 = vmatprep.subr.bf16.mxu0 %v9609_v26 }
 0x67a   : > { %v8427_v20 = vsel %vm13569_vm4, %v13033_v46, %v8420_v29  ;;  %v8428_v47 = vsel %vm13570_vm5, %v8420_v29, %v13132_v61  ;;  %9612 = vmatpush1.bf16.msra.mxu0 %v9611_v44  ;;  %v6844_v32 = vld [vmem:[#allocation4 + $0xb8] sm:$0xf]  ;;  %v6843_v52 = vld [vmem:[#allocation4 + $0xb0] sm:$0xf]  ;;  %8727 = vmatprep.mubr.f32.mxu0 %v9845_v48  ;;  %vm13580_vm4 = vmmov %vm13574_vm11 }
 0x67b   : > { %8437 = vst [vmem:[#allocation4 + $0x60] sm:$0xf0] %v8427_v20  ;;  %8438 = vst [vmem:[#allocation4 + $0x68] sm:$0xf0] %v8428_v47  ;;  %8975 = vmatprep.subr.msk.mxu1 %vm844_vm13, %v6844_v32 }
 0x67c   : > { %8976 = vmatpush1.msk.msra.mxu1 %vm844_vm13, %v6843_v52  ;;  %v13143_v40 = vpop.permute.xlu1 %8457  ;;  %vm13581_vm5 = vmmov %vm13571_vm6 }
 0x67d   : > { %v8456_v60 = vpop.permute.xlu0 %8455  ;;  %8977 = vmatmul.mubr.msk.f32.vlgmr.msra.gmra.mrb[12].mxu1 %vm840_vm15, %v13038_v17  ;;  %9551 = vmatprep.subr.bf16.mxu1 %v9839_v45 }
 0x67e   : > { %v8463_v46 = vsel %vm13571_vm6, %v13050_v55, %v8456_v60  ;;  %v8464_v42 = vsel %vm13572_vm9, %v8456_v60, %v13143_v40  ;;  %9553 = vmatpush3.bf16.msra.mxu1 %v9552_v11  ;;  %9251 = vmatprep.mubr.msk.f32.mxu1 %vm9846_vm8, %v9845_v48  ;;  %vm13582_vm6 = vmmov %vm13573_vm7 }
 0x67f   : > { %8473 = vst [vmem:[#allocation4 + $0x88] sm:$0xf] %v8463_v46  ;;  %8474 = vst [vmem:[#allocation4 + $0x90] sm:$0xf] %v8464_v42  ;;  %9554 = vmatprep.subr.bf16.mxu1 %v9839_v45 }
 0x680   : > { %v13155_v22 = vpop.permute.xlu1 %8493 }
 0x681   : > { %v8492_v37 = vpop.permute.xlu0 %8491 }
 0x682   : > { %v8499_v36 = vsel %vm1582_vm12, %v13057_v49, %v8492_v37  ;;  %v8500_v55 = vsel %vm1582_vm12, %v8492_v37, %v13155_v22  ;;  %v8562_v38 = vld [vmem:[#allocation4 + $0x68] sm:$0xff]  ;;  %v8561_v3 = vld [vmem:[#allocation4 + $0x60] sm:$0xff] }
 0x683   : > { %8509 = vst [vmem:[#allocation4 + $0x88] sm:$0xf0] %v8499_v36  ;;  %8510 = vst [vmem:[#allocation4 + $0x90] sm:$0xf0] %v8500_v55 }
 0x684   : > { %v6696_v35 = vpop.permute.xlu1 %6695 }
 0x685   : > { %v6701_v1 = vsel %vm13573_vm7, %v13075_v16, %v6696_v35  ;;  %v6660_v14 = vpop.permute.xlu0 %6659 }
 0x686   : > { %6711 = vst [vmem:[#allocation4 + $0x70] sm:$0xf0] %v6701_v1  ;;  %v6665_v4 = vsel %vm13574_vm11, %v13069_v63, %v6660_v14 }
 0x687   : > { %6675 = vst [vmem:[#allocation4 + $0x70] sm:$0xf] %v6665_v4 }
 0x688   : > { %v6768_v34 = vpop.permute.xlu1 %6767 }
 0x689   : > { %v6773_v18 = vsel %vm1582_vm12, %v13087_v21, %v6768_v34  ;;  %v6732_v49 = vpop.permute.xlu0 %6731 }
 0x68a   : > { %6783 = vst [vmem:[#allocation4 + $0x98] sm:$0xf0] %v6773_v18  ;;  %v6737_v12 = vsel %vm13575_vm10, %v13081_v62, %v6732_v49  ;;  %v8567_v25 = vld [vmem:[#allocation4 + $0x90] sm:$0xff]  ;;  %v8566_v0 = vld [vmem:[#allocation4 + $0x88] sm:$0xff] }
 0x68b   : > { %6747 = vst [vmem:[#allocation4 + $0x98] sm:$0xf] %v6737_v12  ;;  %v9613_v16 = vpack.c.bf16 %v8567_v25, %v8562_v38  ;;  %v9615_v2 = vpack.c.bf16 %v8566_v0, %v8561_v3 }
 0x68c   : > { %v8530_v50 = vpop.permute.xlu1 %8529 }
 0x68d   : > { %v8528_v56 = vpop.permute.xlu0 %8527  ;;  %9614 = vmatprep.subr.bf16.mxu0 %v9613_v16 }
 0x68e   : > { %v8535_v63 = vsel %vm1619_vm14, %v13114_v7, %v8528_v56  ;;  %v8536_v21 = vsel %vm1619_vm14, %v8528_v56, %v8530_v50  ;;  %9616 = vmatpush1.bf16.msra.mxu0 %v9615_v2  ;;  %v6835_v8 = vld [vmem:[#allocation4 + $0x70] sm:$0xff] }
 0x68f   : > { %8545 = vst [vmem:[#allocation4 + $0xb0] sm:$0xf] %v8535_v63  ;;  %8546 = vst [vmem:[#allocation4 + $0xb8] sm:$0xf] %v8536_v21 }
 0x690   : > { %v8280_v28 = vpop.permute.xlu1 %8279 }
 0x691   : > { %v8285_v62 = vsel %vm13576_vm0, %v13099_v39, %v8280_v28  ;;  %v8244_v24 = vpop.permute.xlu0 %8243 }
 0x692   : > { %8295 = vst [vmem:[#allocation4 + $0x20] sm:$0xf0] %v8285_v62  ;;  %v8249_v9 = vsel %vm13577_vm1, %v13093_v51, %v8244_v24  ;;  %v6840_v33 = vld [vmem:[#allocation4 + $0x98] sm:$0xff] }
 0x693   : > { %8259 = vst [vmem:[#allocation4 + $0x20] sm:$0xf] %v8249_v9  ;;  %v9555_v15 = vpack.c.bf16 %v6840_v33, %v6835_v8 }
 0x694   : > { %v8352_v59 = vpop.permute.xlu1 %8351 }
 0x695   : > { %v8357_v7 = vsel %vm13578_vm2, %v13109_v6, %v8352_v59  ;;  %v8316_v57 = vpop.permute.xlu0 %8315  ;;  %9556 = vmatpush3.bf16.msra.mxu1 %v9555_v15 }
 0x696   : > { %8367 = vst [vmem:[#allocation4 + $0x48] sm:$0xf0] %v8357_v7  ;;  %v8321_v13 = vsel %vm13579_vm3, %v13105_v10, %v8316_v57  ;;  %v8572_v39 = vld [vmem:[#allocation4 + $0xb8] sm:$0xf]  ;;  %v8571_v27 = vld [vmem:[#allocation4 + $0xb0] sm:$0xf]  ;;  %9249 = vmatprep.subr.mxu1 %v9845_v48 }
 0x697   : > { %8331 = vst [vmem:[#allocation4 + $0x48] sm:$0xf] %v8321_v13  ;;  %9001 = vmatprep.subr.msk.mxu0 %vm844_vm13, %v8572_v39 }
 0x698   : > { %9002 = vmatpush1.msk.msra.mxu0 %vm844_vm13, %v8571_v27  ;;  %v8388_v51 = vpop.permute.xlu1 %8387 }
 0x699   : > { %v8393_v30 = vsel %vm13580_vm4, %v13124_v54, %v8388_v51  ;;  %v6804_v6 = vpop.permute.xlu0 %6803  ;;  %9003 = vmatmul.mubr.msk.f32.vlgmr.msra.gmra.mrb[12].mxu0 %vm840_vm15, %v13038_v17  ;;  %9617 = vmatprep.subr.bf16.mxu0 %v9839_v45 }
 0x69a   : > { %8403 = vst [vmem:[#allocation4 + $0x70] sm:$0xf] %v8393_v30  ;;  %v6809_v10 = vsel %vm1619_vm14, %v13118_v31, %v6804_v6  ;;  %9290 = vmatprep.mubr.msk.f32.mxu0 %vm9846_vm8, %v9845_v48  ;;  %v8553_v41 = vld [vmem:[#allocation4 + $0x20] sm:$0xff] }
 0x69b   : > { %6819 = vst [vmem:[#allocation4 + $0xc0] sm:$0xf] %v6809_v10 }
 0x69c   : > { %v8460_v23 = vpop.permute.xlu1 %8459 }
 0x69d   : > { %v8465_v53 = vsel %vm13581_vm5, %v13143_v40, %v8460_v23  ;;  %v8424_v58 = vpop.permute.xlu0 %8423 }
 0x69e   : > { %8475 = vst [vmem:[#allocation4 + $0x98] sm:$0xf] %v8465_v53  ;;  %v8429_v54 = vsel %vm13582_vm6, %v13132_v61, %v8424_v58  ;;  %v8558_v26 = vld [vmem:[#allocation4 + $0x48] sm:$0xff] }
 0x69f   : > { %8439 = vst [vmem:[#allocation4 + $0x70] sm:$0xf0] %v8429_v54  ;;  %v9618_v43 = vpack.c.bf16 %v8558_v26, %v8553_v41 }
 0x6a0   : > { %v8532_v44 = vpop.permute.xlu1 %8531 }
 0x6a1   : > { %v8537_v31 = vsel %vm1619_vm14, %v8530_v50, %v8532_v44  ;;  %v8496_v29 = vpop.permute.xlu0 %8495  ;;  %9619 = vmatpush3.bf16.msra.mxu0 %v9618_v43 }
 0x6a2   : > { %v8501_v5 = vsel %vm1582_vm12, %v13155_v22, %v8496_v29  ;;  %v6845_v20 = vld [vmem:[#allocation4 + $0xc0] sm:$0xf]  ;;  %9620 = vmatprep.subr.bf16.mxu0 %v9839_v45 }
 0x6a3   : > { %8511 = vst [vmem:[#allocation4 + $0x98] sm:$0xf0] %v8501_v5  ;;  %9250 = vmatpush3.msk.msra.mxu1 %vm844_vm13, %v6845_v20  ;;  %8547 = vst [vmem:[#allocation4 + $0xc0] sm:$0xf] %v8537_v31 }
 0x6a4   : > { %9252 = vmatmul.mubr.msk.f32.vlgmr.msra.gmra.mrb[14].mxu1 %vm840_vm15, %v13038_v17 }
 0x6a6   : > { %v8563_v61 = vld [vmem:[#allocation4 + $0x70] sm:$0xff] }
 0x6aa   : > { %v8568_v47 = vld [vmem:[#allocation4 + $0x98] sm:$0xff]  ;;  %v8573_v52 = vld [vmem:[#allocation4 + $0xc0] sm:$0xf] }
 0x6ab   : > { %v9621_v32 = vpack.c.bf16 %v8568_v47, %v8563_v61 }
 0x6ad   : > { %9622 = vmatpush3.bf16.msra.mxu0 %v9621_v32 }
 0x6ae   : > { %9288 = vmatprep.subr.mxu0 %v9845_v48 }
 0x6b1   : > { %9289 = vmatpush3.msk.msra.mxu0 %vm844_vm13, %v8573_v52 }
 0x6b2   : > { %9291 = vmatmul.mubr.msk.f32.vlgmr.msra.gmra.mrb[14].mxu0 %vm840_vm15, %v13038_v17 }
 0x70f   : > { %v6930_v45 = vpop.f32.mrb[10].mxu1 }
 0x710   : > { %7081 = vst [vmem:[%s12992_s27 + $0x78] sm:$0xff] %v6930_v45  ;;  %v6932_v19 = vpop.f32.mrb[11].mxu1 }
 0x711   : > { %7082 = vst [vmem:[%s12992_s27 + $0x80] sm:$0xff] %v6932_v19 }
 0x74c   : > { %v8658_v40 = vpop.f32.mrb[10].mxu0 }
 0x74d   : > { %8809 = vst [vmem:[%s12992_s27 + $0xa0] sm:$0xff] %v8658_v40  ;;  %v8660_v11 = vpop.f32.mrb[11].mxu0 }
 0x74e   : > { %8810 = vst [vmem:[%s12992_s27 + $0xa8] sm:$0xff] %v8660_v11 }
 0x750   : > { %v7001_v60 = vpop.f32.mrb[12].mxu1 }
 0x751   : > { %7083 = vst [vmem:[%s12992_s27 + $0x88] sm:$0xff] %v7001_v60  ;;  %v7003_v48 = vpop.f32.mrb[13].mxu1 }
 0x752   : > { %7084 = vst [vmem:[%s12992_s27 + $0x90] sm:$0xff] %v7003_v48 }
 0x76c   : > { %v8729_v46 = vpop.f32.mrb[12].mxu0 }
 0x76d   : > { %8811 = vst [vmem:[%s12992_s27 + $0xb0] sm:$0xff] %v8729_v46  ;;  %v8731_v42 = vpop.f32.mrb[13].mxu0 }
 0x76e   : > { %8812 = vst [vmem:[%s12992_s27 + $0xb8] sm:$0xff] %v8731_v42 }
 0x777   : > { %v7072_v17 = vpop.f32.mrb[14].mxu1 }
 0x778   : > { %7085 = vst [vmem:[%s12992_s27 + $0x98] sm:$0xff] %v7072_v17  ;;  %v9253_v22 = vpop.f32.mrb[15].mxu1 }
 0x785   : > { %v8800_v37 = vpop.f32.mrb[14].mxu0 }
 0x786   : > { %8813 = vst [vmem:[%s12992_s27 + $0xc0] sm:$0xff] %v8800_v37  ;;  %v9292_v36 = vpop.f32.mrb[15].mxu0 }
 0x787 PF: > { %s12_s9 = sadd.s32 1, %s9825_s9  }
 0x788   : > { %p9_p4 = scmp.ge.s32.totalorder %s12_s9, 4  }
 0x78a   :  { %11 = sbr.rel (!%p9_p4) target bundleno = 1 (0x1), region = 60 }

</bundles_post_ra>
